<compile_context>
chip_gen: v6e
topology: v6e:2x2x1
jax: 0.10.0
libtpu: 0.0.40
codegen_flags: <defaults>
</compile_context>

<pallas_src>
import math
import numpy as np
import jax
import jax.numpy as jnp
from jax.experimental import pallas as pl
from jax.experimental.pallas import tpu as pltpu

F32 = jnp.float32
BF16 = jnp.bfloat16
BN_SCALE = 1.0 / math.sqrt(1.0 + 1e-5)   # eval-mode BatchNorm with default stats
LEAKY_SLOPE = 0.01
MASK_SCALE = 1e8                         # adjacency-prior softmax mask scale
ADJ_PAD = 1e3                            # padded adj value (>> max real value 1.0)


def _leaky(x):
    return jnp.maximum(x, LEAKY_SLOPE * x)


def _round_up(v, m):
    return ((v + m - 1) // m) * m


# -----------------------------------------------------------------------------
# Fused GNN_nl kernel: 3 x (Wcompute metric + Gconv), EB episodes per grid step,
# evaluated entirely in VMEM.  Weights + selector constants stay grid-resident.
# -----------------------------------------------------------------------------
def _make_fused_kernel(n_blocks, hdims):
    H1, H2, H3, H4 = hdims

    def kernel(nodes_ref, adjm_ref, adjg_ref, rm_ref, tm_ref, em_ref, tsc_ref,
               tile_ref, bdm_ref, *rest):
        out_ref = rest[-1]
        wrefs = list(rest[:-1])
        cursor = [0]

        def take(k):
            s = cursor[0]
            cursor[0] = s + k
            return wrefs[s:s + k]

        x0 = nodes_ref[...]                  # (RN, F0) bf16, padded rows are 0
        adj_mask = adjm_ref[...]             # (RN, NP) f32, pre-scaled mask copy
        tile_i = tile_ref[...]               # (NP, RN) f32: eye(NP) tiled EB times
        bdm = bdm_ref[...]                   # (RN, RN) f32: block-diag & real-row mask
        rm = rm_ref[...]                     # (RP, RN) bf16: pair row -> node i selector
        tm = tm_ref[...]                     # (RP, RN) bf16: pair row -> node j selector
        em = em_ref[...]                     # (RN, RP) f32: pair row -> node-i row scatter
        tsc = tsc_ref[...]                   # (RP, NP) f32: pair row -> column j scatter

        # block-diagonal real adjacency for the Gconv, built once per grid step
        # (zero-padded copy: the softmax-mask ADJ_PAD value never enters here)
        adj_bd = jnp.dot(adjg_ref[...], tile_i, preferred_element_type=F32) * bdm

        def pair_abs(x_bf):                  # (RN, F) bf16 -> (RP, F) bf16
            d = jnp.abs(jnp.dot(rm, x_bf, preferred_element_type=F32)
                        - jnp.dot(tm, x_bf, preferred_element_type=F32))
            return d.astype(BF16)

        def wcompute(d_pieces):
            """Learned metric: pairwise MLP + adjacency mask + per-episode softmax."""
            w1s = take(len(d_pieces))
            w2, w3, w4, w5r, bias_slab = take(5)
            bias = bias_slab[...]
            h = bias[0:1, 0:H1]
            for d, w in zip(d_pieces, w1s):
                h = h + jnp.dot(d, w[...], preferred_element_type=F32)
            h = _leaky(h)
            h = _leaky(jnp.dot(h.astype(BF16), w2[...],
                               preferred_element_type=F32) + bias[1:2, 0:H2])
            h = _leaky(jnp.dot(h.astype(BF16), w3[...],
                               preferred_element_type=F32) + bias[2:3, 0:H3])
            h = _leaky(jnp.dot(h.astype(BF16), w4[...],
                               preferred_element_type=F32) + bias[3:4, 0:H4])
            # final nf -> 1 layer: VPU multiply + lane reduction (keeps MXU free);
            # its bias is dropped (constant per-row shift is softmax-invariant).
            g = jnp.sum(h * w5r[...], axis=-1, keepdims=True)        # (RP, 1)
            # scatter pair logits (row e*PP + i*NP + j) to [e*NP + i, j]
            s = jnp.dot(em, g * tsc, preferred_element_type=F32)     # (RN, NP)
            m = s - adj_mask
            m = m - jnp.max(m, axis=-1, keepdims=True)
            e = jnp.exp(m)
            w_soft = e * pl.reciprocal(jnp.sum(e, axis=-1, keepdims=True),
                                       approx=True)
            # expand to a block-diagonal (RN, RN) operator; padded rows zeroed
            return jnp.dot(w_soft, tile_i, preferred_element_type=F32) * bdm

        def gconv(w_bd, x_pieces, relu):
            """out = adj @ (x @ fw1) + W_soft @ (x @ fw2) + fb   (reassociated)."""
            n = len(x_pieces)
            fw1s = take(n)
            fw2s = take(n)
            (fbb,) = take(1)
            p1 = jnp.dot(x_pieces[0], fw1s[0][...], preferred_element_type=F32)
            p2 = jnp.dot(x_pieces[0], fw2s[0][...], preferred_element_type=F32)
            for xp, wa, wb in zip(x_pieces[1:], fw1s[1:], fw2s[1:]):
                p1 = p1 + jnp.dot(xp, wa[...], preferred_element_type=F32)
                p2 = p2 + jnp.dot(xp, wb[...], preferred_element_type=F32)
            o = (jnp.dot(adj_bd, p1, preferred_element_type=F32)
                 + jnp.dot(w_bd, p2, preferred_element_type=F32)
                 + fbb[...])
            return _leaky(o) if relu else o

        x_pieces = [x0]
        d_pieces = [pair_abs(x0)]
        for blk in range(n_blocks):
            w_bd = wcompute(d_pieces)
            last = blk == n_blocks - 1
            xn = gconv(w_bd, x_pieces, relu=not last)
            if last:
                out_ref[...] = xn            # (RN, 128) lane-dense full-tile store
            else:
                # padded node rows are exactly 0 (zero adj rows, masked W_soft
                # rows, row-masked bias) => safe to reuse for later blocks.
                xn_bf = xn.astype(BF16)
                x_pieces.append(xn_bf)
                d_pieces.append(pair_abs(xn_bf))

    return kernel


# -----------------------------------------------------------------------------
# Host-side parameter preparation: BN folding, 128-multiple padding of the
# Wcompute hidden dims, bf16 weight storage, per-block bias-slab packing, and
# splitting weights by feature segment (replaces in-model feature concat).
# -----------------------------------------------------------------------------
def _pad2(x, rows, cols):
    x = jnp.asarray(x, F32)
    r, c = x.shape
    if r == rows and c == cols:
        return x
    return jnp.zeros((rows, cols), F32).at[:r, :c].set(x)


def _split_rows(w, piece_sizes):
    out, off = [], 0
    for sz in piece_sizes:
        out.append(w[off:off + sz])
        off += sz
    assert off == w.shape[0]
    return out


def _prepare_wcompute(p, piece_sizes, hdims):
    w1, b1, w2, b2, w3, b3, w4, b4, w5, _b5 = p      # b5 dropped (softmax-invariant)
    H1, H2, H3, H4 = hdims
    HB = max(hdims)
    s = BN_SCALE
    w1p = _pad2(w1 * s, w1.shape[0], H1).astype(BF16)
    w2p = _pad2(w2 * s, H1, H2).astype(BF16)
    w3p = _pad2(w3 * s, H2, H3).astype(BF16)
    w4p = _pad2(w4 * s, H3, H4).astype(BF16)
    w5r = _pad2(w5.T, 1, H4)                          # f32 row, no BN on last layer
    bias = jnp.zeros((8, HB), F32)
    bias = bias.at[0, :w1.shape[1]].set(jnp.asarray(b1, F32).reshape(-1) * s)
    bias = bias.at[1, :w2.shape[1]].set(jnp.asarray(b2, F32).reshape(-1) * s)
    bias = bias.at[2, :w3.shape[1]].set(jnp.asarray(b3, F32).reshape(-1) * s)
    bias = bias.at[3, :w4.shape[1]].set(jnp.asarray(b4, F32).reshape(-1) * s)
    return _split_rows(w1p, piece_sizes) + [w2p, w3p, w4p, w5r, bias]


def _prepare_gconv(p, piece_sizes, use_bn, out_pad, row_mask):
    fw1, fw2, fb = p
    s = BN_SCALE if use_bn else 1.0
    out_w = fw1.shape[1]
    W = out_pad if out_pad is not None else out_w
    fw1p = _pad2(fw1 * s, fw1.shape[0], W).astype(BF16)
    fw2p = _pad2(fw2 * s, fw2.shape[0], W).astype(BF16)
    fbp = jnp.zeros((1, W), F32).at[0, :out_w].set(jnp.asarray(fb, F32).reshape(-1) * s)
    fb_bcast = row_mask[:, None] * fbp                # (RN, W): padded rows get no bias
    return _split_rows(fw1p, piece_sizes) + _split_rows(fw2p, piece_sizes) + [fb_bcast]


# -----------------------------------------------------------------------------
# GNN_nl forward (fused Pallas call) and AMGNN glue.
# -----------------------------------------------------------------------------
def gnn_nl_forward(params, nodes, adj):
    """nodes: (B, N, F0), adj: (B, N, N) -> query-node logits (B, n_way)."""
    B, N, F0 = nodes.shape
    NP = _round_up(max(N, 8), 8)
    PP = NP * NP
    n_way = params["g_last"][2].shape[-1]
    fnew = params["g0"][2].shape[-1]                  # nf // 2
    NWP = _round_up(n_way, 128)                       # lane-dense output width

    # Episode-batching factor: EB*PP pair rows per Wcompute matmul.
    # EB=8 -> 512 rows (fills MXU rows on v6e/v7x; >=128 needed on v5e); for
    # small B keep at least 2 grid steps so v7x's two TensorCores both get work.
    if B >= 16:
        EB = 8
    elif B >= 2:
        EB = min(8, max(1, B // 2))
    else:
        EB = 1
    B_pad = _round_up(B, EB)
    G = B_pad // EB
    RN = EB * NP                                      # node rows per grid step
    RP = EB * PP                                      # pair rows per grid step

    # ---- per-episode data, padded + regrouped to (G, RN, ...) ----------------
    nodes_p = jnp.zeros((B_pad, NP, F0), F32).at[:B, :N, :].set(nodes.astype(F32))
    nodes_in = nodes_p.reshape(G, RN, F0).astype(BF16)
    adj_f = adj.astype(F32)
    # mask copy (pre-scaled; padded entries hugely positive -> softmax weight 0)
    adj_mask = jnp.full((B_pad, NP, NP), ADJ_PAD, F32).at[:B, :N, :N].set(adj_f)
    adj_mask = (adj_mask * MASK_SCALE).reshape(G, RN, NP)
    # zero-padded copy used as the real Gconv adjacency (never sees ADJ_PAD)
    adj_g = jnp.zeros((B_pad, NP, NP), F32).at[:B, :N, :N].set(adj_f)
    adj_g = adj_g.reshape(G, RN, NP)

    # ---- constant selection / scatter matrices (host-built, grid-resident) ---
    r = np.arange(RP)
    e_id, rem = r // PP, r % PP
    i_id, j_id = rem // NP, rem % NP
    rm = np.zeros((RP, RN), np.float32); rm[r, e_id * NP + i_id] = 1.0
    tm = np.zeros((RP, RN), np.float32); tm[r, e_id * NP + j_id] = 1.0
    em = np.zeros((RN, RP), np.float32); em[e_id * NP + i_id, r] = 1.0
    tsc = np.zeros((RP, NP), np.float32); tsc[r, j_id] = 1.0
    tile_i = np.tile(np.eye(NP, dtype=np.float32), (1, EB))            # (NP, RN)
    row_real = (np.tile(np.arange(NP), EB) < N).astype(np.float32)     # (RN,)
    bdm = np.kron(np.eye(EB, dtype=np.float32), np.ones((NP, NP), np.float32))
    bdm = bdm * row_real[:, None]                                      # (RN, RN)
    consts = [jnp.asarray(rm, BF16), jnp.asarray(tm, BF16),
              jnp.asarray(em, F32), jnp.asarray(tsc, F32),
              jnp.asarray(tile_i, F32), jnp.asarray(bdm, F32)]
    row_mask = jnp.asarray(row_real, F32)

    # ---- weights: BN folded, hidden dims padded to 128-multiples, bf16 -------
    w1, _, w2, _, w3, _, w4, _, _, _ = params["wc0"]
    hdims = tuple(_round_up(w.shape[1], 128) for w in (w1, w2, w3, w4))
    piece_plan = [[F0], [F0, fnew], [F0, fnew, fnew]]
    flat = []
    for blk, (wck, gck) in enumerate((("wc0", "g0"), ("wc1", "g1"),
                                      ("wc_last", "g_last"))):
        last = blk == 2
        flat += _prepare_wcompute(params[wck], piece_plan[blk], hdims)
        flat += _prepare_gconv(params[gck], piece_plan[blk], use_bn=not last,
                               out_pad=NWP if last else None, row_mask=row_mask)

    in_specs = (
        [pl.BlockSpec((None, RN, F0), lambda g: (g, 0, 0)),
         pl.BlockSpec((None, RN, NP), lambda g: (g, 0, 0)),
         pl.BlockSpec((None, RN, NP), lambda g: (g, 0, 0))]
        + [pl.BlockSpec(c.shape, lambda g: (0, 0)) for c in consts]
        + [pl.BlockSpec(w.shape, lambda g: (0, 0)) for w in flat])

    out = pl.pallas_call(
        _make_fused_kernel(3, hdims),
        out_shape=jax.ShapeDtypeStruct((G, RN, NWP), F32),
        grid=(G,),
        in_specs=in_specs,
        out_specs=pl.BlockSpec((None, RN, NWP), lambda g: (g, 0, 0)),
        compiler_params=pltpu.CompilerParams(
            dimension_semantics=("parallel",),
            vmem_limit_bytes=32 * 1024 * 1024),
    )(nodes_in, adj_mask, adj_g, *consts, *flat)

    # query node (node 0) of each real episode, real class columns only
    return out.reshape(B_pad, NP, NWP)[:B, 0, :n_way]


def _build_nodes(z_c, z, zi_c, zi_s, labels_yi):
    zero_pad = jnp.zeros_like(labels_yi[0])
    labels = [zero_pad] + list(labels_yi)
    zs = [z] + list(zi_s)
    zc = [z_c] + list(zi_c)
    zs = [jnp.squeeze(zz) for zz in zs]
    feats = [jnp.concatenate([c, s], axis=1) for s, c in zip(zs, zc)]
    node_list = [jnp.concatenate([lab, f], axis=1) for f, lab in zip(feats, labels)]
    return jnp.stack(node_list, axis=1)       # (B, N, n_way + feature_num)


def amgnn_forward(params, z_c, z, zi_c, zi_s, labels_yi, adj):
    """JAX/Pallas equivalent of AMGNN.gnn_iclr_forward."""
    nodes = _build_nodes(z_c, z, zi_c, zi_s, labels_yi)
    adj2d = adj[..., 0]                       # (B, N, N)
    logits = gnn_nl_forward(params, nodes, adj2d)
    if logits.shape[-1] == 1:
        logits = jnp.squeeze(logits, axis=-1)
    outputs = jax.nn.sigmoid(logits)
    return outputs, logits


# -----------------------------------------------------------------------------
# Deterministic parameter construction (PyTorch-default-like uniform init).
# -----------------------------------------------------------------------------
def _init_linear(key, fan_in, fan_out):
    kw, kb = jax.random.split(key)
    bound = 1.0 / math.sqrt(fan_in)
    w = jax.random.uniform(kw, (fan_in, fan_out), F32, -bound, bound)
    b = jax.random.uniform(kb, (1, fan_out), F32, -bound, bound)
    return w, b


def init_wcompute_params(key, f_in, nf):
    dims = [(f_in, 2 * nf), (2 * nf, 2 * nf), (2 * nf, nf), (nf, nf), (nf, 1)]
    keys = jax.random.split(key, len(dims))
    params = []
    for k, (a, b) in zip(keys, dims):
        w, bias = _init_linear(k, a, b)
        params += [w, bias]
    return tuple(params)


def init_gconv_params(key, f_in, f_out):
    w, b = _init_linear(key, 2 * f_in, f_out)
    return (w[:f_in], w[f_in:], b)


def init_amgnn_params(key, num_inputs, nf, n_way):
    ks = jax.random.split(key, 6)
    p = {}
    p["wc0"] = init_wcompute_params(ks[0], num_inputs, nf)
    p["g0"] = init_gconv_params(ks[1], num_inputs, nf // 2)
    f1 = num_inputs + nf // 2
    p["wc1"] = init_wcompute_params(ks[2], f1, nf)
    p["g1"] = init_gconv_params(ks[3], f1, nf // 2)
    f2 = num_inputs + nf
    p["wc_last"] = init_wcompute_params(ks[4], f2, nf)
    p["g_last"] = init_gconv_params(ks[5], f2, n_way)
    return p


# -----------------------------------------------------------------------------
# Pure-JAX f32 reference of the same forward (for a loose numerical cross-check;
# the kernel uses bf16 weights/dots + approx reciprocal, hence the tolerance).
# -----------------------------------------------------------------------------
def _gnn_nl_reference(params, nodes, adj):
    def wc(x, p):
        w1, b1, w2, b2, w3, b3, w4, b4, w5, b5 = p
        d = jnp.abs(x[:, :, None, :] - x[:, None, :, :])           # (B,N,N,F)
        h = _leaky((d @ w1 + b1) * BN_SCALE)
        h = _leaky((h @ w2 + b2) * BN_SCALE)
        h = _leaky((h @ w3 + b3) * BN_SCALE)
        h = _leaky((h @ w4 + b4) * BN_SCALE)
        logit = (h @ w5 + b5)[..., 0]                               # (B,N,N)
        m = logit - adj * MASK_SCALE
        m = m - jnp.max(m, axis=-1, keepdims=True)
        e = jnp.exp(m)
        return e / jnp.sum(e, axis=-1, keepdims=True)

    def gc(w_soft, x, p, bn, relu):
        fw1, fw2, fb = p
        o = (jnp.einsum('bij,bjf->bif', adj, x) @ fw1
             + jnp.einsum('bij,bjf->bif', w_soft, x) @ fw2 + fb)
        if bn:
            o = o * BN_SCALE
        if relu:
            o = _leaky(o)
        return o

    x = nodes.astype(F32)
    for wck, gck in (("wc0", "g0"), ("wc1", "g1")):
        ws = wc(x, params[wck])
        xn = gc(ws, x, params[gck], True, True)
        x = jnp.concatenate([x, xn], axis=-1)
    ws = wc(x, params["wc_last"])
    out = gc(ws, x, params["g_last"], False, False)
    return out[:, 0, :]


if __name__ == "__main__":
    B = 4                       # args.batch_size (exercises EB=2, grid=2)
    n_way, n_shots = 2, 3       # args.train_N_way, args.train_N_shots
    num_support = n_way * n_shots
    N = num_support + 1         # query + supports
    c_dim, s_dim = 4, 12        # clinical features + image embedding
    emb = c_dim + s_dim         # args.feature_num
    num_inputs = emb + n_way    # GNN node feature size
    nf = 96

    root = jax.random.PRNGKey(0)
    kp, kin = jax.random.split(root)
    params = init_amgnn_params(kp, num_inputs, nf, n_way)

    ks = jax.random.split(kin, 3 + 2 * num_support)
    z_c = jax.random.normal(ks[0], (B, c_dim), F32)
    z = jax.random.normal(ks[1], (B, 1, s_dim), F32)
    zi_c = [jax.random.normal(ks[2 + t], (B, c_dim), F32) for t in range(num_support)]
    zi_s = [jax.random.normal(ks[2 + num_support + t], (B, 1, s_dim), F32)
            for t in range(num_support)]
    labels_yi = [jax.nn.one_hot(jnp.full((B,), t % n_way), n_way, dtype=F32)
                 for t in range(num_support)]
    # adjacency prior like AMGNN.compute_adj: symmetric, values 1/(1+k), k in [0,4]
    raw = jax.random.randint(ks[2 + 2 * num_support], (B, N, N), 0, 5).astype(F32)
    counts = jnp.minimum(raw, jnp.swapaxes(raw, 1, 2))
    adj = (1.0 / (1.0 + counts))[..., None]              # (B, N, N, 1)

    fwd = jax.jit(amgnn_forward)
    outputs, logits = fwd(params, z_c, z, zi_c, zi_s, labels_yi, adj)
    jax.block_until_ready((outputs, logits))

    assert outputs.shape == (B, n_way) and logits.shape == (B, n_way)
    assert bool(jnp.all(jnp.isfinite(outputs)))

    # loose cross-check against pure-JAX f32 reference (bf16 dots + approx
    # reciprocal + BN/padding folding introduce small numerical differences)
    nodes = _build_nodes(z_c, z, zi_c, zi_s, labels_yi)
    ref_logits = _gnn_nl_reference(params, nodes, adj[..., 0])
    assert bool(jnp.allclose(logits, ref_logits, rtol=1e-1, atol=1e-1)), (
        "pallas kernel disagrees with pure-JAX reference")

    print("KERNEL_OK")
</pallas_src>

<mosaic_0001>
module attributes {stable_mosaic.version = 11 : i64} {
  func.func @kernel(%arg0: i32, %arg1: memref<1x16x18xbf16, #tpu.memory_space<vmem>>, %arg2: memref<1x16x8xf32, #tpu.memory_space<vmem>>, %arg3: memref<1x16x8xf32, #tpu.memory_space<vmem>>, %arg4: memref<128x16xbf16, #tpu.memory_space<vmem>>, %arg5: memref<128x16xbf16, #tpu.memory_space<vmem>>, %arg6: memref<16x128xf32, #tpu.memory_space<vmem>>, %arg7: memref<128x8xf32, #tpu.memory_space<vmem>>, %arg8: memref<8x16xf32, #tpu.memory_space<vmem>>, %arg9: memref<16x16xf32, #tpu.memory_space<vmem>>, %arg10: memref<18x256xbf16, #tpu.memory_space<vmem>>, %arg11: memref<256x256xbf16, #tpu.memory_space<vmem>>, %arg12: memref<256x128xbf16, #tpu.memory_space<vmem>>, %arg13: memref<128x128xbf16, #tpu.memory_space<vmem>>, %arg14: memref<1x128xf32, #tpu.memory_space<vmem>>, %arg15: memref<8x256xf32, #tpu.memory_space<vmem>>, %arg16: memref<18x48xbf16, #tpu.memory_space<vmem>>, %arg17: memref<18x48xbf16, #tpu.memory_space<vmem>>, %arg18: memref<16x48xf32, #tpu.memory_space<vmem>>, %arg19: memref<18x256xbf16, #tpu.memory_space<vmem>>, %arg20: memref<48x256xbf16, #tpu.memory_space<vmem>>, %arg21: memref<256x256xbf16, #tpu.memory_space<vmem>>, %arg22: memref<256x128xbf16, #tpu.memory_space<vmem>>, %arg23: memref<128x128xbf16, #tpu.memory_space<vmem>>, %arg24: memref<1x128xf32, #tpu.memory_space<vmem>>, %arg25: memref<8x256xf32, #tpu.memory_space<vmem>>, %arg26: memref<18x48xbf16, #tpu.memory_space<vmem>>, %arg27: memref<48x48xbf16, #tpu.memory_space<vmem>>, %arg28: memref<18x48xbf16, #tpu.memory_space<vmem>>, %arg29: memref<48x48xbf16, #tpu.memory_space<vmem>>, %arg30: memref<16x48xf32, #tpu.memory_space<vmem>>, %arg31: memref<18x256xbf16, #tpu.memory_space<vmem>>, %arg32: memref<48x256xbf16, #tpu.memory_space<vmem>>, %arg33: memref<48x256xbf16, #tpu.memory_space<vmem>>, %arg34: memref<256x256xbf16, #tpu.memory_space<vmem>>, %arg35: memref<256x128xbf16, #tpu.memory_space<vmem>>, %arg36: memref<128x128xbf16, #tpu.memory_space<vmem>>, %arg37: memref<1x128xf32, #tpu.memory_space<vmem>>, %arg38: memref<8x256xf32, #tpu.memory_space<vmem>>, %arg39: memref<18x128xbf16, #tpu.memory_space<vmem>>, %arg40: memref<48x128xbf16, #tpu.memory_space<vmem>>, %arg41: memref<48x128xbf16, #tpu.memory_space<vmem>>, %arg42: memref<18x128xbf16, #tpu.memory_space<vmem>>, %arg43: memref<48x128xbf16, #tpu.memory_space<vmem>>, %arg44: memref<48x128xbf16, #tpu.memory_space<vmem>>, %arg45: memref<16x128xf32, #tpu.memory_space<vmem>>, %arg46: memref<1x16x128xf32, #tpu.memory_space<vmem>>) attributes {dimension_semantics = [#tpu.dimension_semantics<parallel>], iteration_bounds = array<i64: 2>, scalar_prefetch = 0 : i64, scratch_operands = 0 : i64, tpu.core_type = #tpu.core_type<tc>, window_params = [{transform_indices = @transform_0, window_bounds = array<i64: 1, 16, 18>}, {transform_indices = @transform_1, window_bounds = array<i64: 1, 16, 8>}, {transform_indices = @transform_2, window_bounds = array<i64: 1, 16, 8>}, {pipeline_mode = #tpu.pipeline_mode<synchronous>, transform_indices = @transform_3, window_bounds = array<i64: 128, 16>}, {pipeline_mode = #tpu.pipeline_mode<synchronous>, transform_indices = @transform_4, window_bounds = array<i64: 128, 16>}, {pipeline_mode = #tpu.pipeline_mode<synchronous>, transform_indices = @transform_5, window_bounds = array<i64: 16, 128>}, {pipeline_mode = #tpu.pipeline_mode<synchronous>, transform_indices = @transform_6, window_bounds = array<i64: 128, 8>}, {pipeline_mode = #tpu.pipeline_mode<synchronous>, transform_indices = @transform_7, window_bounds = array<i64: 8, 16>}, {pipeline_mode = #tpu.pipeline_mode<synchronous>, transform_indices = @transform_8, window_bounds = array<i64: 16, 16>}, {pipeline_mode = #tpu.pipeline_mode<synchronous>, transform_indices = @transform_9, window_bounds = array<i64: 18, 256>}, {pipeline_mode = #tpu.pipeline_mode<synchronous>, transform_indices = @transform_10, window_bounds = array<i64: 256, 256>}, {pipeline_mode = #tpu.pipeline_mode<synchronous>, transform_indices = @transform_11, window_bounds = array<i64: 256, 128>}, {pipeline_mode = #tpu.pipeline_mode<synchronous>, transform_indices = @transform_12, window_bounds = array<i64: 128, 128>}, {pipeline_mode = #tpu.pipeline_mode<synchronous>, transform_indices = @transform_13, window_bounds = array<i64: 1, 128>}, {pipeline_mode = #tpu.pipeline_mode<synchronous>, transform_indices = @transform_14, window_bounds = array<i64: 8, 256>}, {pipeline_mode = #tpu.pipeline_mode<synchronous>, transform_indices = @transform_15, window_bounds = array<i64: 18, 48>}, {pipeline_mode = #tpu.pipeline_mode<synchronous>, transform_indices = @transform_16, window_bounds = array<i64: 18, 48>}, {pipeline_mode = #tpu.pipeline_mode<synchronous>, transform_indices = @transform_17, window_bounds = array<i64: 16, 48>}, {pipeline_mode = #tpu.pipeline_mode<synchronous>, transform_indices = @transform_18, window_bounds = array<i64: 18, 256>}, {pipeline_mode = #tpu.pipeline_mode<synchronous>, transform_indices = @transform_19, window_bounds = array<i64: 48, 256>}, {pipeline_mode = #tpu.pipeline_mode<synchronous>, transform_indices = @transform_20, window_bounds = array<i64: 256, 256>}, {pipeline_mode = #tpu.pipeline_mode<synchronous>, transform_indices = @transform_21, window_bounds = array<i64: 256, 128>}, {pipeline_mode = #tpu.pipeline_mode<synchronous>, transform_indices = @transform_22, window_bounds = array<i64: 128, 128>}, {pipeline_mode = #tpu.pipeline_mode<synchronous>, transform_indices = @transform_23, window_bounds = array<i64: 1, 128>}, {pipeline_mode = #tpu.pipeline_mode<synchronous>, transform_indices = @transform_24, window_bounds = array<i64: 8, 256>}, {pipeline_mode = #tpu.pipeline_mode<synchronous>, transform_indices = @transform_25, window_bounds = array<i64: 18, 48>}, {pipeline_mode = #tpu.pipeline_mode<synchronous>, transform_indices = @transform_26, window_bounds = array<i64: 48, 48>}, {pipeline_mode = #tpu.pipeline_mode<synchronous>, transform_indices = @transform_27, window_bounds = array<i64: 18, 48>}, {pipeline_mode = #tpu.pipeline_mode<synchronous>, transform_indices = @transform_28, window_bounds = array<i64: 48, 48>}, {pipeline_mode = #tpu.pipeline_mode<synchronous>, transform_indices = @transform_29, window_bounds = array<i64: 16, 48>}, {pipeline_mode = #tpu.pipeline_mode<synchronous>, transform_indices = @transform_30, window_bounds = array<i64: 18, 256>}, {pipeline_mode = #tpu.pipeline_mode<synchronous>, transform_indices = @transform_31, window_bounds = array<i64: 48, 256>}, {pipeline_mode = #tpu.pipeline_mode<synchronous>, transform_indices = @transform_32, window_bounds = array<i64: 48, 256>}, {pipeline_mode = #tpu.pipeline_mode<synchronous>, transform_indices = @transform_33, window_bounds = array<i64: 256, 256>}, {pipeline_mode = #tpu.pipeline_mode<synchronous>, transform_indices = @transform_34, window_bounds = array<i64: 256, 128>}, {pipeline_mode = #tpu.pipeline_mode<synchronous>, transform_indices = @transform_35, window_bounds = array<i64: 128, 128>}, {pipeline_mode = #tpu.pipeline_mode<synchronous>, transform_indices = @transform_36, window_bounds = array<i64: 1, 128>}, {pipeline_mode = #tpu.pipeline_mode<synchronous>, transform_indices = @transform_37, window_bounds = array<i64: 8, 256>}, {pipeline_mode = #tpu.pipeline_mode<synchronous>, transform_indices = @transform_38, window_bounds = array<i64: 18, 128>}, {pipeline_mode = #tpu.pipeline_mode<synchronous>, transform_indices = @transform_39, window_bounds = array<i64: 48, 128>}, {pipeline_mode = #tpu.pipeline_mode<synchronous>, transform_indices = @transform_40, window_bounds = array<i64: 48, 128>}, {pipeline_mode = #tpu.pipeline_mode<synchronous>, transform_indices = @transform_41, window_bounds = array<i64: 18, 128>}, {pipeline_mode = #tpu.pipeline_mode<synchronous>, transform_indices = @transform_42, window_bounds = array<i64: 48, 128>}, {pipeline_mode = #tpu.pipeline_mode<synchronous>, transform_indices = @transform_43, window_bounds = array<i64: 48, 128>}, {pipeline_mode = #tpu.pipeline_mode<synchronous>, transform_indices = @transform_44, window_bounds = array<i64: 16, 128>}, {transform_indices = @transform_45, window_bounds = array<i64: 1, 16, 128>}]} {
    %c0 = arith.constant 0 : index
    %c0_0 = arith.constant 0 : index
    %c0_1 = arith.constant 0 : index
    %0 = vector.load %arg1[%c0, %c0_0, %c0_1] : memref<1x16x18xbf16, #tpu.memory_space<vmem>>, vector<1x16x18xbf16>
    %1 = vector.shape_cast %0 : vector<1x16x18xbf16> to vector<16x18xbf16>
    %c0_2 = arith.constant 0 : index
    %c0_3 = arith.constant 0 : index
    %c0_4 = arith.constant 0 : index
    %2 = vector.load %arg2[%c0_2, %c0_3, %c0_4] : memref<1x16x8xf32, #tpu.memory_space<vmem>>, vector<1x16x8xf32>
    %3 = vector.shape_cast %2 : vector<1x16x8xf32> to vector<16x8xf32>
    %c0_5 = arith.constant 0 : index
    %c0_6 = arith.constant 0 : index
    %4 = vector.load %arg8[%c0_5, %c0_6] : memref<8x16xf32, #tpu.memory_space<vmem>>, vector<8x16xf32>
    %c0_7 = arith.constant 0 : index
    %c0_8 = arith.constant 0 : index
    %5 = vector.load %arg9[%c0_7, %c0_8] : memref<16x16xf32, #tpu.memory_space<vmem>>, vector<16x16xf32>
    %c0_9 = arith.constant 0 : index
    %c0_10 = arith.constant 0 : index
    %6 = vector.load %arg4[%c0_9, %c0_10] : memref<128x16xbf16, #tpu.memory_space<vmem>>, vector<128x16xbf16>
    %c0_11 = arith.constant 0 : index
    %c0_12 = arith.constant 0 : index
    %7 = vector.load %arg5[%c0_11, %c0_12] : memref<128x16xbf16, #tpu.memory_space<vmem>>, vector<128x16xbf16>
    %c0_13 = arith.constant 0 : index
    %c0_14 = arith.constant 0 : index
    %8 = vector.load %arg6[%c0_13, %c0_14] : memref<16x128xf32, #tpu.memory_space<vmem>>, vector<16x128xf32>
    %c0_15 = arith.constant 0 : index
    %c0_16 = arith.constant 0 : index
    %9 = vector.load %arg7[%c0_15, %c0_16] : memref<128x8xf32, #tpu.memory_space<vmem>>, vector<128x8xf32>
    %c0_17 = arith.constant 0 : index
    %c0_18 = arith.constant 0 : index
    %c0_19 = arith.constant 0 : index
    %10 = vector.load %arg3[%c0_17, %c0_18, %c0_19] : memref<1x16x8xf32, #tpu.memory_space<vmem>>, vector<1x16x8xf32>
    %11 = vector.shape_cast %10 : vector<1x16x8xf32> to vector<16x8xf32>
    %cst = arith.constant dense<0.000000e+00> : vector<16x16xf32>
    %12 = tpu.matmul %11, %4, %cst {dimension_numbers = #tpu.dot_dimension_numbers<[1], [0], [0], [1], [0, 0, 1, 1], [], []>} : vector<16x8xf32>, vector<8x16xf32>, vector<16x16xf32> -> vector<16x16xf32>
    %13 = arith.mulf %12, %5 : vector<16x16xf32>
    %cst_20 = arith.constant dense<0.000000e+00> : vector<128x18xf32>
    %14 = tpu.matmul %6, %1, %cst_20 {dimension_numbers = #tpu.dot_dimension_numbers<[1], [0], [0], [1], [0, 0, 1, 1], [], []>} : vector<128x16xbf16>, vector<16x18xbf16>, vector<128x18xf32> -> vector<128x18xf32>
    %cst_21 = arith.constant dense<0.000000e+00> : vector<128x18xf32>
    %15 = tpu.matmul %7, %1, %cst_21 {dimension_numbers = #tpu.dot_dimension_numbers<[1], [0], [0], [1], [0, 0, 1, 1], [], []>} : vector<128x16xbf16>, vector<16x18xbf16>, vector<128x18xf32> -> vector<128x18xf32>
    %16 = arith.subf %14, %15 : vector<128x18xf32>
    %17 = math.absf %16 : vector<128x18xf32>
    %18 = arith.truncf %17 : vector<128x18xf32> to vector<128x18xbf16>
    %c0_22 = arith.constant 0 : index
    %c0_23 = arith.constant 0 : index
    %19 = vector.load %arg15[%c0_22, %c0_23] : memref<8x256xf32, #tpu.memory_space<vmem>>, vector<8x256xf32>
    %20 = vector.extract_strided_slice %19 {offsets = [0, 0], sizes = [1, 256], strides = [1, 1]} : vector<8x256xf32> to vector<1x256xf32>
    %c0_24 = arith.constant 0 : index
    %c0_25 = arith.constant 0 : index
    %21 = vector.load %arg10[%c0_24, %c0_25] : memref<18x256xbf16, #tpu.memory_space<vmem>>, vector<18x256xbf16>
    %cst_26 = arith.constant dense<0.000000e+00> : vector<128x256xf32>
    %22 = tpu.matmul %18, %21, %cst_26 {dimension_numbers = #tpu.dot_dimension_numbers<[1], [0], [0], [1], [0, 0, 1, 1], [], []>} : vector<128x18xbf16>, vector<18x256xbf16>, vector<128x256xf32> -> vector<128x256xf32>
    %23 = vector.broadcast %20 : vector<1x256xf32> to vector<128x256xf32>
    %24 = arith.addf %23, %22 : vector<128x256xf32>
    %cst_27 = arith.constant 0.00999999977 : f32
    %25 = vector.broadcast %cst_27 : f32 to vector<128x256xf32>
    %26 = arith.mulf %25, %24 : vector<128x256xf32>
    %27 = arith.maximumf %24, %26 : vector<128x256xf32>
    %28 = arith.truncf %27 : vector<128x256xf32> to vector<128x256xbf16>
    %c0_28 = arith.constant 0 : index
    %c0_29 = arith.constant 0 : index
    %29 = vector.load %arg11[%c0_28, %c0_29] : memref<256x256xbf16, #tpu.memory_space<vmem>>, vector<256x256xbf16>
    %cst_30 = arith.constant dense<0.000000e+00> : vector<128x256xf32>
    %30 = tpu.matmul %28, %29, %cst_30 {dimension_numbers = #tpu.dot_dimension_numbers<[1], [0], [0], [1], [0, 0, 1, 1], [], []>} : vector<128x256xbf16>, vector<256x256xbf16>, vector<128x256xf32> -> vector<128x256xf32>
    %31 = vector.extract_strided_slice %19 {offsets = [1, 0], sizes = [1, 256], strides = [1, 1]} : vector<8x256xf32> to vector<1x256xf32>
    %32 = vector.broadcast %31 : vector<1x256xf32> to vector<128x256xf32>
    %33 = arith.addf %30, %32 : vector<128x256xf32>
    %cst_31 = arith.constant 0.00999999977 : f32
    %34 = vector.broadcast %cst_31 : f32 to vector<128x256xf32>
    %35 = arith.mulf %34, %33 : vector<128x256xf32>
    %36 = arith.maximumf %33, %35 : vector<128x256xf32>
    %37 = arith.truncf %36 : vector<128x256xf32> to vector<128x256xbf16>
    %c0_32 = arith.constant 0 : index
    %c0_33 = arith.constant 0 : index
    %38 = vector.load %arg12[%c0_32, %c0_33] : memref<256x128xbf16, #tpu.memory_space<vmem>>, vector<256x128xbf16>
    %cst_34 = arith.constant dense<0.000000e+00> : vector<128x128xf32>
    %39 = tpu.matmul %37, %38, %cst_34 {dimension_numbers = #tpu.dot_dimension_numbers<[1], [0], [0], [1], [0, 0, 1, 1], [], []>} : vector<128x256xbf16>, vector<256x128xbf16>, vector<128x128xf32> -> vector<128x128xf32>
    %40 = vector.extract_strided_slice %19 {offsets = [2, 0], sizes = [1, 128], strides = [1, 1]} : vector<8x256xf32> to vector<1x128xf32>
    %41 = vector.broadcast %40 : vector<1x128xf32> to vector<128x128xf32>
    %42 = arith.addf %39, %41 : vector<128x128xf32>
    %cst_35 = arith.constant 0.00999999977 : f32
    %43 = vector.broadcast %cst_35 : f32 to vector<128x128xf32>
    %44 = arith.mulf %43, %42 : vector<128x128xf32>
    %45 = arith.maximumf %42, %44 : vector<128x128xf32>
    %46 = arith.truncf %45 : vector<128x128xf32> to vector<128x128xbf16>
    %c0_36 = arith.constant 0 : index
    %c0_37 = arith.constant 0 : index
    %47 = vector.load %arg13[%c0_36, %c0_37] : memref<128x128xbf16, #tpu.memory_space<vmem>>, vector<128x128xbf16>
    %cst_38 = arith.constant dense<0.000000e+00> : vector<128x128xf32>
    %48 = tpu.matmul %46, %47, %cst_38 {dimension_numbers = #tpu.dot_dimension_numbers<[1], [0], [0], [1], [0, 0, 1, 1], [], []>} : vector<128x128xbf16>, vector<128x128xbf16>, vector<128x128xf32> -> vector<128x128xf32>
    %49 = vector.extract_strided_slice %19 {offsets = [3, 0], sizes = [1, 128], strides = [1, 1]} : vector<8x256xf32> to vector<1x128xf32>
    %50 = vector.broadcast %49 : vector<1x128xf32> to vector<128x128xf32>
    %51 = arith.addf %48, %50 : vector<128x128xf32>
    %cst_39 = arith.constant 0.00999999977 : f32
    %52 = vector.broadcast %cst_39 : f32 to vector<128x128xf32>
    %53 = arith.mulf %52, %51 : vector<128x128xf32>
    %54 = arith.maximumf %51, %53 : vector<128x128xf32>
    %c0_40 = arith.constant 0 : index
    %c0_41 = arith.constant 0 : index
    %55 = vector.load %arg14[%c0_40, %c0_41] : memref<1x128xf32, #tpu.memory_space<vmem>>, vector<1x128xf32>
    %56 = vector.broadcast %55 : vector<1x128xf32> to vector<128x128xf32>
    %57 = arith.mulf %54, %56 : vector<128x128xf32>
    %cst_42 = arith.constant dense<0.000000e+00> : vector<128xf32>
    %58 = vector.multi_reduction <add>, %57, %cst_42 [1] : vector<128x128xf32> to vector<128xf32>
    %59 = vector.shape_cast %58 : vector<128xf32> to vector<128x1xf32>
    %60 = vector.broadcast %59 : vector<128x1xf32> to vector<128x8xf32>
    %61 = arith.mulf %60, %9 : vector<128x8xf32>
    %cst_43 = arith.constant dense<0.000000e+00> : vector<16x8xf32>
    %62 = tpu.matmul %8, %61, %cst_43 {dimension_numbers = #tpu.dot_dimension_numbers<[1], [0], [0], [1], [0, 0, 1, 1], [], []>} : vector<16x128xf32>, vector<128x8xf32>, vector<16x8xf32> -> vector<16x8xf32>
    %63 = arith.subf %62, %3 : vector<16x8xf32>
    %cst_44 = arith.constant dense<0xFF800000> : vector<16xf32>
    %64 = vector.multi_reduction <maximumf>, %63, %cst_44 [1] : vector<16x8xf32> to vector<16xf32>
    %65 = vector.shape_cast %64 : vector<16xf32> to vector<16x1xf32>
    %66 = vector.broadcast %65 : vector<16x1xf32> to vector<16x8xf32>
    %67 = arith.subf %63, %66 : vector<16x8xf32>
    %68 = math.exp %67 : vector<16x8xf32>
    %cst_45 = arith.constant dense<0.000000e+00> : vector<16xf32>
    %69 = vector.multi_reduction <add>, %68, %cst_45 [1] : vector<16x8xf32> to vector<16xf32>
    %70 = vector.shape_cast %69 : vector<16xf32> to vector<16x1xf32>
    %71 = tpu.reciprocal %70 {approx = true} : vector<16x1xf32> -> vector<16x1xf32>
    %72 = vector.broadcast %71 : vector<16x1xf32> to vector<16x8xf32>
    %73 = arith.mulf %68, %72 : vector<16x8xf32>
    %cst_46 = arith.constant dense<0.000000e+00> : vector<16x16xf32>
    %74 = tpu.matmul %73, %4, %cst_46 {dimension_numbers = #tpu.dot_dimension_numbers<[1], [0], [0], [1], [0, 0, 1, 1], [], []>} : vector<16x8xf32>, vector<8x16xf32>, vector<16x16xf32> -> vector<16x16xf32>
    %75 = arith.mulf %74, %5 : vector<16x16xf32>
    %c0_47 = arith.constant 0 : index
    %c0_48 = arith.constant 0 : index
    %76 = vector.load %arg16[%c0_47, %c0_48] : memref<18x48xbf16, #tpu.memory_space<vmem>>, vector<18x48xbf16>
    %cst_49 = arith.constant dense<0.000000e+00> : vector<16x48xf32>
    %77 = tpu.matmul %1, %76, %cst_49 {dimension_numbers = #tpu.dot_dimension_numbers<[1], [0], [0], [1], [0, 0, 1, 1], [], []>} : vector<16x18xbf16>, vector<18x48xbf16>, vector<16x48xf32> -> vector<16x48xf32>
    %c0_50 = arith.constant 0 : index
    %c0_51 = arith.constant 0 : index
    %78 = vector.load %arg17[%c0_50, %c0_51] : memref<18x48xbf16, #tpu.memory_space<vmem>>, vector<18x48xbf16>
    %cst_52 = arith.constant dense<0.000000e+00> : vector<16x48xf32>
    %79 = tpu.matmul %1, %78, %cst_52 {dimension_numbers = #tpu.dot_dimension_numbers<[1], [0], [0], [1], [0, 0, 1, 1], [], []>} : vector<16x18xbf16>, vector<18x48xbf16>, vector<16x48xf32> -> vector<16x48xf32>
    %cst_53 = arith.constant dense<0.000000e+00> : vector<16x48xf32>
    %80 = tpu.matmul %13, %77, %cst_53 {dimension_numbers = #tpu.dot_dimension_numbers<[1], [0], [0], [1], [0, 0, 1, 1], [], []>} : vector<16x16xf32>, vector<16x48xf32>, vector<16x48xf32> -> vector<16x48xf32>
    %cst_54 = arith.constant dense<0.000000e+00> : vector<16x48xf32>
    %81 = tpu.matmul %75, %79, %cst_54 {dimension_numbers = #tpu.dot_dimension_numbers<[1], [0], [0], [1], [0, 0, 1, 1], [], []>} : vector<16x16xf32>, vector<16x48xf32>, vector<16x48xf32> -> vector<16x48xf32>
    %82 = arith.addf %80, %81 : vector<16x48xf32>
    %c0_55 = arith.constant 0 : index
    %c0_56 = arith.constant 0 : index
    %83 = vector.load %arg18[%c0_55, %c0_56] : memref<16x48xf32, #tpu.memory_space<vmem>>, vector<16x48xf32>
    %84 = arith.addf %82, %83 : vector<16x48xf32>
    %cst_57 = arith.constant 0.00999999977 : f32
    %85 = vector.broadcast %cst_57 : f32 to vector<16x48xf32>
    %86 = arith.mulf %85, %84 : vector<16x48xf32>
    %87 = arith.maximumf %84, %86 : vector<16x48xf32>
    %88 = arith.truncf %87 : vector<16x48xf32> to vector<16x48xbf16>
    %cst_58 = arith.constant dense<0.000000e+00> : vector<128x48xf32>
    %89 = tpu.matmul %6, %88, %cst_58 {dimension_numbers = #tpu.dot_dimension_numbers<[1], [0], [0], [1], [0, 0, 1, 1], [], []>} : vector<128x16xbf16>, vector<16x48xbf16>, vector<128x48xf32> -> vector<128x48xf32>
    %cst_59 = arith.constant dense<0.000000e+00> : vector<128x48xf32>
    %90 = tpu.matmul %7, %88, %cst_59 {dimension_numbers = #tpu.dot_dimension_numbers<[1], [0], [0], [1], [0, 0, 1, 1], [], []>} : vector<128x16xbf16>, vector<16x48xbf16>, vector<128x48xf32> -> vector<128x48xf32>
    %91 = arith.subf %89, %90 : vector<128x48xf32>
    %92 = math.absf %91 : vector<128x48xf32>
    %93 = arith.truncf %92 : vector<128x48xf32> to vector<128x48xbf16>
    %c0_60 = arith.constant 0 : index
    %c0_61 = arith.constant 0 : index
    %94 = vector.load %arg25[%c0_60, %c0_61] : memref<8x256xf32, #tpu.memory_space<vmem>>, vector<8x256xf32>
    %95 = vector.extract_strided_slice %94 {offsets = [0, 0], sizes = [1, 256], strides = [1, 1]} : vector<8x256xf32> to vector<1x256xf32>
    %c0_62 = arith.constant 0 : index
    %c0_63 = arith.constant 0 : index
    %96 = vector.load %arg19[%c0_62, %c0_63] : memref<18x256xbf16, #tpu.memory_space<vmem>>, vector<18x256xbf16>
    %cst_64 = arith.constant dense<0.000000e+00> : vector<128x256xf32>
    %97 = tpu.matmul %18, %96, %cst_64 {dimension_numbers = #tpu.dot_dimension_numbers<[1], [0], [0], [1], [0, 0, 1, 1], [], []>} : vector<128x18xbf16>, vector<18x256xbf16>, vector<128x256xf32> -> vector<128x256xf32>
    %98 = vector.broadcast %95 : vector<1x256xf32> to vector<128x256xf32>
    %99 = arith.addf %98, %97 : vector<128x256xf32>
    %c0_65 = arith.constant 0 : index
    %c0_66 = arith.constant 0 : index
    %100 = vector.load %arg20[%c0_65, %c0_66] : memref<48x256xbf16, #tpu.memory_space<vmem>>, vector<48x256xbf16>
    %cst_67 = arith.constant dense<0.000000e+00> : vector<128x256xf32>
    %101 = tpu.matmul %93, %100, %cst_67 {dimension_numbers = #tpu.dot_dimension_numbers<[1], [0], [0], [1], [0, 0, 1, 1], [], []>} : vector<128x48xbf16>, vector<48x256xbf16>, vector<128x256xf32> -> vector<128x256xf32>
    %102 = arith.addf %99, %101 : vector<128x256xf32>
    %cst_68 = arith.constant 0.00999999977 : f32
    %103 = vector.broadcast %cst_68 : f32 to vector<128x256xf32>
    %104 = arith.mulf %103, %102 : vector<128x256xf32>
    %105 = arith.maximumf %102, %104 : vector<128x256xf32>
    %106 = arith.truncf %105 : vector<128x256xf32> to vector<128x256xbf16>
    %c0_69 = arith.constant 0 : index
    %c0_70 = arith.constant 0 : index
    %107 = vector.load %arg21[%c0_69, %c0_70] : memref<256x256xbf16, #tpu.memory_space<vmem>>, vector<256x256xbf16>
    %cst_71 = arith.constant dense<0.000000e+00> : vector<128x256xf32>
    %108 = tpu.matmul %106, %107, %cst_71 {dimension_numbers = #tpu.dot_dimension_numbers<[1], [0], [0], [1], [0, 0, 1, 1], [], []>} : vector<128x256xbf16>, vector<256x256xbf16>, vector<128x256xf32> -> vector<128x256xf32>
    %109 = vector.extract_strided_slice %94 {offsets = [1, 0], sizes = [1, 256], strides = [1, 1]} : vector<8x256xf32> to vector<1x256xf32>
    %110 = vector.broadcast %109 : vector<1x256xf32> to vector<128x256xf32>
    %111 = arith.addf %108, %110 : vector<128x256xf32>
    %cst_72 = arith.constant 0.00999999977 : f32
    %112 = vector.broadcast %cst_72 : f32 to vector<128x256xf32>
    %113 = arith.mulf %112, %111 : vector<128x256xf32>
    %114 = arith.maximumf %111, %113 : vector<128x256xf32>
    %115 = arith.truncf %114 : vector<128x256xf32> to vector<128x256xbf16>
    %c0_73 = arith.constant 0 : index
    %c0_74 = arith.constant 0 : index
    %116 = vector.load %arg22[%c0_73, %c0_74] : memref<256x128xbf16, #tpu.memory_space<vmem>>, vector<256x128xbf16>
    %cst_75 = arith.constant dense<0.000000e+00> : vector<128x128xf32>
    %117 = tpu.matmul %115, %116, %cst_75 {dimension_numbers = #tpu.dot_dimension_numbers<[1], [0], [0], [1], [0, 0, 1, 1], [], []>} : vector<128x256xbf16>, vector<256x128xbf16>, vector<128x128xf32> -> vector<128x128xf32>
    %118 = vector.extract_strided_slice %94 {offsets = [2, 0], sizes = [1, 128], strides = [1, 1]} : vector<8x256xf32> to vector<1x128xf32>
    %119 = vector.broadcast %118 : vector<1x128xf32> to vector<128x128xf32>
    %120 = arith.addf %117, %119 : vector<128x128xf32>
    %cst_76 = arith.constant 0.00999999977 : f32
    %121 = vector.broadcast %cst_76 : f32 to vector<128x128xf32>
    %122 = arith.mulf %121, %120 : vector<128x128xf32>
    %123 = arith.maximumf %120, %122 : vector<128x128xf32>
    %124 = arith.truncf %123 : vector<128x128xf32> to vector<128x128xbf16>
    %c0_77 = arith.constant 0 : index
    %c0_78 = arith.constant 0 : index
    %125 = vector.load %arg23[%c0_77, %c0_78] : memref<128x128xbf16, #tpu.memory_space<vmem>>, vector<128x128xbf16>
    %cst_79 = arith.constant dense<0.000000e+00> : vector<128x128xf32>
    %126 = tpu.matmul %124, %125, %cst_79 {dimension_numbers = #tpu.dot_dimension_numbers<[1], [0], [0], [1], [0, 0, 1, 1], [], []>} : vector<128x128xbf16>, vector<128x128xbf16>, vector<128x128xf32> -> vector<128x128xf32>
    %127 = vector.extract_strided_slice %94 {offsets = [3, 0], sizes = [1, 128], strides = [1, 1]} : vector<8x256xf32> to vector<1x128xf32>
    %128 = vector.broadcast %127 : vector<1x128xf32> to vector<128x128xf32>
    %129 = arith.addf %126, %128 : vector<128x128xf32>
    %cst_80 = arith.constant 0.00999999977 : f32
    %130 = vector.broadcast %cst_80 : f32 to vector<128x128xf32>
    %131 = arith.mulf %130, %129 : vector<128x128xf32>
    %132 = arith.maximumf %129, %131 : vector<128x128xf32>
    %c0_81 = arith.constant 0 : index
    %c0_82 = arith.constant 0 : index
    %133 = vector.load %arg24[%c0_81, %c0_82] : memref<1x128xf32, #tpu.memory_space<vmem>>, vector<1x128xf32>
    %134 = vector.broadcast %133 : vector<1x128xf32> to vector<128x128xf32>
    %135 = arith.mulf %132, %134 : vector<128x128xf32>
    %cst_83 = arith.constant dense<0.000000e+00> : vector<128xf32>
    %136 = vector.multi_reduction <add>, %135, %cst_83 [1] : vector<128x128xf32> to vector<128xf32>
    %137 = vector.shape_cast %136 : vector<128xf32> to vector<128x1xf32>
    %138 = vector.broadcast %137 : vector<128x1xf32> to vector<128x8xf32>
    %139 = arith.mulf %138, %9 : vector<128x8xf32>
    %cst_84 = arith.constant dense<0.000000e+00> : vector<16x8xf32>
    %140 = tpu.matmul %8, %139, %cst_84 {dimension_numbers = #tpu.dot_dimension_numbers<[1], [0], [0], [1], [0, 0, 1, 1], [], []>} : vector<16x128xf32>, vector<128x8xf32>, vector<16x8xf32> -> vector<16x8xf32>
    %141 = arith.subf %140, %3 : vector<16x8xf32>
    %cst_85 = arith.constant dense<0xFF800000> : vector<16xf32>
    %142 = vector.multi_reduction <maximumf>, %141, %cst_85 [1] : vector<16x8xf32> to vector<16xf32>
    %143 = vector.shape_cast %142 : vector<16xf32> to vector<16x1xf32>
    %144 = vector.broadcast %143 : vector<16x1xf32> to vector<16x8xf32>
    %145 = arith.subf %141, %144 : vector<16x8xf32>
    %146 = math.exp %145 : vector<16x8xf32>
    %cst_86 = arith.constant dense<0.000000e+00> : vector<16xf32>
    %147 = vector.multi_reduction <add>, %146, %cst_86 [1] : vector<16x8xf32> to vector<16xf32>
    %148 = vector.shape_cast %147 : vector<16xf32> to vector<16x1xf32>
    %149 = tpu.reciprocal %148 {approx = true} : vector<16x1xf32> -> vector<16x1xf32>
    %150 = vector.broadcast %149 : vector<16x1xf32> to vector<16x8xf32>
    %151 = arith.mulf %146, %150 : vector<16x8xf32>
    %cst_87 = arith.constant dense<0.000000e+00> : vector<16x16xf32>
    %152 = tpu.matmul %151, %4, %cst_87 {dimension_numbers = #tpu.dot_dimension_numbers<[1], [0], [0], [1], [0, 0, 1, 1], [], []>} : vector<16x8xf32>, vector<8x16xf32>, vector<16x16xf32> -> vector<16x16xf32>
    %153 = arith.mulf %152, %5 : vector<16x16xf32>
    %c0_88 = arith.constant 0 : index
    %c0_89 = arith.constant 0 : index
    %154 = vector.load %arg26[%c0_88, %c0_89] : memref<18x48xbf16, #tpu.memory_space<vmem>>, vector<18x48xbf16>
    %cst_90 = arith.constant dense<0.000000e+00> : vector<16x48xf32>
    %155 = tpu.matmul %1, %154, %cst_90 {dimension_numbers = #tpu.dot_dimension_numbers<[1], [0], [0], [1], [0, 0, 1, 1], [], []>} : vector<16x18xbf16>, vector<18x48xbf16>, vector<16x48xf32> -> vector<16x48xf32>
    %c0_91 = arith.constant 0 : index
    %c0_92 = arith.constant 0 : index
    %156 = vector.load %arg28[%c0_91, %c0_92] : memref<18x48xbf16, #tpu.memory_space<vmem>>, vector<18x48xbf16>
    %cst_93 = arith.constant dense<0.000000e+00> : vector<16x48xf32>
    %157 = tpu.matmul %1, %156, %cst_93 {dimension_numbers = #tpu.dot_dimension_numbers<[1], [0], [0], [1], [0, 0, 1, 1], [], []>} : vector<16x18xbf16>, vector<18x48xbf16>, vector<16x48xf32> -> vector<16x48xf32>
    %c0_94 = arith.constant 0 : index
    %c0_95 = arith.constant 0 : index
    %158 = vector.load %arg27[%c0_94, %c0_95] : memref<48x48xbf16, #tpu.memory_space<vmem>>, vector<48x48xbf16>
    %cst_96 = arith.constant dense<0.000000e+00> : vector<16x48xf32>
    %159 = tpu.matmul %88, %158, %cst_96 {dimension_numbers = #tpu.dot_dimension_numbers<[1], [0], [0], [1], [0, 0, 1, 1], [], []>} : vector<16x48xbf16>, vector<48x48xbf16>, vector<16x48xf32> -> vector<16x48xf32>
    %160 = arith.addf %155, %159 : vector<16x48xf32>
    %c0_97 = arith.constant 0 : index
    %c0_98 = arith.constant 0 : index
    %161 = vector.load %arg29[%c0_97, %c0_98] : memref<48x48xbf16, #tpu.memory_space<vmem>>, vector<48x48xbf16>
    %cst_99 = arith.constant dense<0.000000e+00> : vector<16x48xf32>
    %162 = tpu.matmul %88, %161, %cst_99 {dimension_numbers = #tpu.dot_dimension_numbers<[1], [0], [0], [1], [0, 0, 1, 1], [], []>} : vector<16x48xbf16>, vector<48x48xbf16>, vector<16x48xf32> -> vector<16x48xf32>
    %163 = arith.addf %157, %162 : vector<16x48xf32>
    %cst_100 = arith.constant dense<0.000000e+00> : vector<16x48xf32>
    %164 = tpu.matmul %13, %160, %cst_100 {dimension_numbers = #tpu.dot_dimension_numbers<[1], [0], [0], [1], [0, 0, 1, 1], [], []>} : vector<16x16xf32>, vector<16x48xf32>, vector<16x48xf32> -> vector<16x48xf32>
    %cst_101 = arith.constant dense<0.000000e+00> : vector<16x48xf32>
    %165 = tpu.matmul %153, %163, %cst_101 {dimension_numbers = #tpu.dot_dimension_numbers<[1], [0], [0], [1], [0, 0, 1, 1], [], []>} : vector<16x16xf32>, vector<16x48xf32>, vector<16x48xf32> -> vector<16x48xf32>
    %166 = arith.addf %164, %165 : vector<16x48xf32>
    %c0_102 = arith.constant 0 : index
    %c0_103 = arith.constant 0 : index
    %167 = vector.load %arg30[%c0_102, %c0_103] : memref<16x48xf32, #tpu.memory_space<vmem>>, vector<16x48xf32>
    %168 = arith.addf %166, %167 : vector<16x48xf32>
    %cst_104 = arith.constant 0.00999999977 : f32
    %169 = vector.broadcast %cst_104 : f32 to vector<16x48xf32>
    %170 = arith.mulf %169, %168 : vector<16x48xf32>
    %171 = arith.maximumf %168, %170 : vector<16x48xf32>
    %172 = arith.truncf %171 : vector<16x48xf32> to vector<16x48xbf16>
    %cst_105 = arith.constant dense<0.000000e+00> : vector<128x48xf32>
    %173 = tpu.matmul %6, %172, %cst_105 {dimension_numbers = #tpu.dot_dimension_numbers<[1], [0], [0], [1], [0, 0, 1, 1], [], []>} : vector<128x16xbf16>, vector<16x48xbf16>, vector<128x48xf32> -> vector<128x48xf32>
    %cst_106 = arith.constant dense<0.000000e+00> : vector<128x48xf32>
    %174 = tpu.matmul %7, %172, %cst_106 {dimension_numbers = #tpu.dot_dimension_numbers<[1], [0], [0], [1], [0, 0, 1, 1], [], []>} : vector<128x16xbf16>, vector<16x48xbf16>, vector<128x48xf32> -> vector<128x48xf32>
    %175 = arith.subf %173, %174 : vector<128x48xf32>
    %176 = math.absf %175 : vector<128x48xf32>
    %177 = arith.truncf %176 : vector<128x48xf32> to vector<128x48xbf16>
    %c0_107 = arith.constant 0 : index
    %c0_108 = arith.constant 0 : index
    %178 = vector.load %arg38[%c0_107, %c0_108] : memref<8x256xf32, #tpu.memory_space<vmem>>, vector<8x256xf32>
    %179 = vector.extract_strided_slice %178 {offsets = [0, 0], sizes = [1, 256], strides = [1, 1]} : vector<8x256xf32> to vector<1x256xf32>
    %c0_109 = arith.constant 0 : index
    %c0_110 = arith.constant 0 : index
    %180 = vector.load %arg31[%c0_109, %c0_110] : memref<18x256xbf16, #tpu.memory_space<vmem>>, vector<18x256xbf16>
    %cst_111 = arith.constant dense<0.000000e+00> : vector<128x256xf32>
    %181 = tpu.matmul %18, %180, %cst_111 {dimension_numbers = #tpu.dot_dimension_numbers<[1], [0], [0], [1], [0, 0, 1, 1], [], []>} : vector<128x18xbf16>, vector<18x256xbf16>, vector<128x256xf32> -> vector<128x256xf32>
    %182 = vector.broadcast %179 : vector<1x256xf32> to vector<128x256xf32>
    %183 = arith.addf %182, %181 : vector<128x256xf32>
    %c0_112 = arith.constant 0 : index
    %c0_113 = arith.constant 0 : index
    %184 = vector.load %arg32[%c0_112, %c0_113] : memref<48x256xbf16, #tpu.memory_space<vmem>>, vector<48x256xbf16>
    %cst_114 = arith.constant dense<0.000000e+00> : vector<128x256xf32>
    %185 = tpu.matmul %93, %184, %cst_114 {dimension_numbers = #tpu.dot_dimension_numbers<[1], [0], [0], [1], [0, 0, 1, 1], [], []>} : vector<128x48xbf16>, vector<48x256xbf16>, vector<128x256xf32> -> vector<128x256xf32>
    %186 = arith.addf %183, %185 : vector<128x256xf32>
    %c0_115 = arith.constant 0 : index
    %c0_116 = arith.constant 0 : index
    %187 = vector.load %arg33[%c0_115, %c0_116] : memref<48x256xbf16, #tpu.memory_space<vmem>>, vector<48x256xbf16>
    %cst_117 = arith.constant dense<0.000000e+00> : vector<128x256xf32>
    %188 = tpu.matmul %177, %187, %cst_117 {dimension_numbers = #tpu.dot_dimension_numbers<[1], [0], [0], [1], [0, 0, 1, 1], [], []>} : vector<128x48xbf16>, vector<48x256xbf16>, vector<128x256xf32> -> vector<128x256xf32>
    %189 = arith.addf %186, %188 : vector<128x256xf32>
    %cst_118 = arith.constant 0.00999999977 : f32
    %190 = vector.broadcast %cst_118 : f32 to vector<128x256xf32>
    %191 = arith.mulf %190, %189 : vector<128x256xf32>
    %192 = arith.maximumf %189, %191 : vector<128x256xf32>
    %193 = arith.truncf %192 : vector<128x256xf32> to vector<128x256xbf16>
    %c0_119 = arith.constant 0 : index
    %c0_120 = arith.constant 0 : index
    %194 = vector.load %arg34[%c0_119, %c0_120] : memref<256x256xbf16, #tpu.memory_space<vmem>>, vector<256x256xbf16>
    %cst_121 = arith.constant dense<0.000000e+00> : vector<128x256xf32>
    %195 = tpu.matmul %193, %194, %cst_121 {dimension_numbers = #tpu.dot_dimension_numbers<[1], [0], [0], [1], [0, 0, 1, 1], [], []>} : vector<128x256xbf16>, vector<256x256xbf16>, vector<128x256xf32> -> vector<128x256xf32>
    %196 = vector.extract_strided_slice %178 {offsets = [1, 0], sizes = [1, 256], strides = [1, 1]} : vector<8x256xf32> to vector<1x256xf32>
    %197 = vector.broadcast %196 : vector<1x256xf32> to vector<128x256xf32>
    %198 = arith.addf %195, %197 : vector<128x256xf32>
    %cst_122 = arith.constant 0.00999999977 : f32
    %199 = vector.broadcast %cst_122 : f32 to vector<128x256xf32>
    %200 = arith.mulf %199, %198 : vector<128x256xf32>
    %201 = arith.maximumf %198, %200 : vector<128x256xf32>
    %202 = arith.truncf %201 : vector<128x256xf32> to vector<128x256xbf16>
    %c0_123 = arith.constant 0 : index
    %c0_124 = arith.constant 0 : index
    %203 = vector.load %arg35[%c0_123, %c0_124] : memref<256x128xbf16, #tpu.memory_space<vmem>>, vector<256x128xbf16>
    %cst_125 = arith.constant dense<0.000000e+00> : vector<128x128xf32>
    %204 = tpu.matmul %202, %203, %cst_125 {dimension_numbers = #tpu.dot_dimension_numbers<[1], [0], [0], [1], [0, 0, 1, 1], [], []>} : vector<128x256xbf16>, vector<256x128xbf16>, vector<128x128xf32> -> vector<128x128xf32>
    %205 = vector.extract_strided_slice %178 {offsets = [2, 0], sizes = [1, 128], strides = [1, 1]} : vector<8x256xf32> to vector<1x128xf32>
    %206 = vector.broadcast %205 : vector<1x128xf32> to vector<128x128xf32>
    %207 = arith.addf %204, %206 : vector<128x128xf32>
    %cst_126 = arith.constant 0.00999999977 : f32
    %208 = vector.broadcast %cst_126 : f32 to vector<128x128xf32>
    %209 = arith.mulf %208, %207 : vector<128x128xf32>
    %210 = arith.maximumf %207, %209 : vector<128x128xf32>
    %211 = arith.truncf %210 : vector<128x128xf32> to vector<128x128xbf16>
    %c0_127 = arith.constant 0 : index
    %c0_128 = arith.constant 0 : index
    %212 = vector.load %arg36[%c0_127, %c0_128] : memref<128x128xbf16, #tpu.memory_space<vmem>>, vector<128x128xbf16>
    %cst_129 = arith.constant dense<0.000000e+00> : vector<128x128xf32>
    %213 = tpu.matmul %211, %212, %cst_129 {dimension_numbers = #tpu.dot_dimension_numbers<[1], [0], [0], [1], [0, 0, 1, 1], [], []>} : vector<128x128xbf16>, vector<128x128xbf16>, vector<128x128xf32> -> vector<128x128xf32>
    %214 = vector.extract_strided_slice %178 {offsets = [3, 0], sizes = [1, 128], strides = [1, 1]} : vector<8x256xf32> to vector<1x128xf32>
    %215 = vector.broadcast %214 : vector<1x128xf32> to vector<128x128xf32>
    %216 = arith.addf %213, %215 : vector<128x128xf32>
    %cst_130 = arith.constant 0.00999999977 : f32
    %217 = vector.broadcast %cst_130 : f32 to vector<128x128xf32>
    %218 = arith.mulf %217, %216 : vector<128x128xf32>
    %219 = arith.maximumf %216, %218 : vector<128x128xf32>
    %c0_131 = arith.constant 0 : index
    %c0_132 = arith.constant 0 : index
    %220 = vector.load %arg37[%c0_131, %c0_132] : memref<1x128xf32, #tpu.memory_space<vmem>>, vector<1x128xf32>
    %221 = vector.broadcast %220 : vector<1x128xf32> to vector<128x128xf32>
    %222 = arith.mulf %219, %221 : vector<128x128xf32>
    %cst_133 = arith.constant dense<0.000000e+00> : vector<128xf32>
    %223 = vector.multi_reduction <add>, %222, %cst_133 [1] : vector<128x128xf32> to vector<128xf32>
    %224 = vector.shape_cast %223 : vector<128xf32> to vector<128x1xf32>
    %225 = vector.broadcast %224 : vector<128x1xf32> to vector<128x8xf32>
    %226 = arith.mulf %225, %9 : vector<128x8xf32>
    %cst_134 = arith.constant dense<0.000000e+00> : vector<16x8xf32>
    %227 = tpu.matmul %8, %226, %cst_134 {dimension_numbers = #tpu.dot_dimension_numbers<[1], [0], [0], [1], [0, 0, 1, 1], [], []>} : vector<16x128xf32>, vector<128x8xf32>, vector<16x8xf32> -> vector<16x8xf32>
    %228 = arith.subf %227, %3 : vector<16x8xf32>
    %cst_135 = arith.constant dense<0xFF800000> : vector<16xf32>
    %229 = vector.multi_reduction <maximumf>, %228, %cst_135 [1] : vector<16x8xf32> to vector<16xf32>
    %230 = vector.shape_cast %229 : vector<16xf32> to vector<16x1xf32>
    %231 = vector.broadcast %230 : vector<16x1xf32> to vector<16x8xf32>
    %232 = arith.subf %228, %231 : vector<16x8xf32>
    %233 = math.exp %232 : vector<16x8xf32>
    %cst_136 = arith.constant dense<0.000000e+00> : vector<16xf32>
    %234 = vector.multi_reduction <add>, %233, %cst_136 [1] : vector<16x8xf32> to vector<16xf32>
    %235 = vector.shape_cast %234 : vector<16xf32> to vector<16x1xf32>
    %236 = tpu.reciprocal %235 {approx = true} : vector<16x1xf32> -> vector<16x1xf32>
    %237 = vector.broadcast %236 : vector<16x1xf32> to vector<16x8xf32>
    %238 = arith.mulf %233, %237 : vector<16x8xf32>
    %cst_137 = arith.constant dense<0.000000e+00> : vector<16x16xf32>
    %239 = tpu.matmul %238, %4, %cst_137 {dimension_numbers = #tpu.dot_dimension_numbers<[1], [0], [0], [1], [0, 0, 1, 1], [], []>} : vector<16x8xf32>, vector<8x16xf32>, vector<16x16xf32> -> vector<16x16xf32>
    %240 = arith.mulf %239, %5 : vector<16x16xf32>
    %c0_138 = arith.constant 0 : index
    %c0_139 = arith.constant 0 : index
    %241 = vector.load %arg39[%c0_138, %c0_139] : memref<18x128xbf16, #tpu.memory_space<vmem>>, vector<18x128xbf16>
    %cst_140 = arith.constant dense<0.000000e+00> : vector<16x128xf32>
    %242 = tpu.matmul %1, %241, %cst_140 {dimension_numbers = #tpu.dot_dimension_numbers<[1], [0], [0], [1], [0, 0, 1, 1], [], []>} : vector<16x18xbf16>, vector<18x128xbf16>, vector<16x128xf32> -> vector<16x128xf32>
    %c0_141 = arith.constant 0 : index
    %c0_142 = arith.constant 0 : index
    %243 = vector.load %arg42[%c0_141, %c0_142] : memref<18x128xbf16, #tpu.memory_space<vmem>>, vector<18x128xbf16>
    %cst_143 = arith.constant dense<0.000000e+00> : vector<16x128xf32>
    %244 = tpu.matmul %1, %243, %cst_143 {dimension_numbers = #tpu.dot_dimension_numbers<[1], [0], [0], [1], [0, 0, 1, 1], [], []>} : vector<16x18xbf16>, vector<18x128xbf16>, vector<16x128xf32> -> vector<16x128xf32>
    %c0_144 = arith.constant 0 : index
    %c0_145 = arith.constant 0 : index
    %245 = vector.load %arg40[%c0_144, %c0_145] : memref<48x128xbf16, #tpu.memory_space<vmem>>, vector<48x128xbf16>
    %cst_146 = arith.constant dense<0.000000e+00> : vector<16x128xf32>
    %246 = tpu.matmul %88, %245, %cst_146 {dimension_numbers = #tpu.dot_dimension_numbers<[1], [0], [0], [1], [0, 0, 1, 1], [], []>} : vector<16x48xbf16>, vector<48x128xbf16>, vector<16x128xf32> -> vector<16x128xf32>
    %247 = arith.addf %242, %246 : vector<16x128xf32>
    %c0_147 = arith.constant 0 : index
    %c0_148 = arith.constant 0 : index
    %248 = vector.load %arg43[%c0_147, %c0_148] : memref<48x128xbf16, #tpu.memory_space<vmem>>, vector<48x128xbf16>
    %cst_149 = arith.constant dense<0.000000e+00> : vector<16x128xf32>
    %249 = tpu.matmul %88, %248, %cst_149 {dimension_numbers = #tpu.dot_dimension_numbers<[1], [0], [0], [1], [0, 0, 1, 1], [], []>} : vector<16x48xbf16>, vector<48x128xbf16>, vector<16x128xf32> -> vector<16x128xf32>
    %250 = arith.addf %244, %249 : vector<16x128xf32>
    %c0_150 = arith.constant 0 : index
    %c0_151 = arith.constant 0 : index
    %251 = vector.load %arg41[%c0_150, %c0_151] : memref<48x128xbf16, #tpu.memory_space<vmem>>, vector<48x128xbf16>
    %cst_152 = arith.constant dense<0.000000e+00> : vector<16x128xf32>
    %252 = tpu.matmul %172, %251, %cst_152 {dimension_numbers = #tpu.dot_dimension_numbers<[1], [0], [0], [1], [0, 0, 1, 1], [], []>} : vector<16x48xbf16>, vector<48x128xbf16>, vector<16x128xf32> -> vector<16x128xf32>
    %253 = arith.addf %247, %252 : vector<16x128xf32>
    %c0_153 = arith.constant 0 : index
    %c0_154 = arith.constant 0 : index
    %254 = vector.load %arg44[%c0_153, %c0_154] : memref<48x128xbf16, #tpu.memory_space<vmem>>, vector<48x128xbf16>
    %cst_155 = arith.constant dense<0.000000e+00> : vector<16x128xf32>
    %255 = tpu.matmul %172, %254, %cst_155 {dimension_numbers = #tpu.dot_dimension_numbers<[1], [0], [0], [1], [0, 0, 1, 1], [], []>} : vector<16x48xbf16>, vector<48x128xbf16>, vector<16x128xf32> -> vector<16x128xf32>
    %256 = arith.addf %250, %255 : vector<16x128xf32>
    %cst_156 = arith.constant dense<0.000000e+00> : vector<16x128xf32>
    %257 = tpu.matmul %13, %253, %cst_156 {dimension_numbers = #tpu.dot_dimension_numbers<[1], [0], [0], [1], [0, 0, 1, 1], [], []>} : vector<16x16xf32>, vector<16x128xf32>, vector<16x128xf32> -> vector<16x128xf32>
    %cst_157 = arith.constant dense<0.000000e+00> : vector<16x128xf32>
    %258 = tpu.matmul %240, %256, %cst_157 {dimension_numbers = #tpu.dot_dimension_numbers<[1], [0], [0], [1], [0, 0, 1, 1], [], []>} : vector<16x16xf32>, vector<16x128xf32>, vector<16x128xf32> -> vector<16x128xf32>
    %259 = arith.addf %257, %258 : vector<16x128xf32>
    %c0_158 = arith.constant 0 : index
    %c0_159 = arith.constant 0 : index
    %260 = vector.load %arg45[%c0_158, %c0_159] : memref<16x128xf32, #tpu.memory_space<vmem>>, vector<16x128xf32>
    %261 = arith.addf %259, %260 : vector<16x128xf32>
    %c0_160 = arith.constant 0 : index
    %c0_161 = arith.constant 0 : index
    %c0_162 = arith.constant 0 : index
    %262 = vector.load %arg46[%c0_160, %c0_161, %c0_162] : memref<1x16x128xf32, #tpu.memory_space<vmem>>, vector<1x16x128xf32>
    %263 = vector.shape_cast %262 : vector<1x16x128xf32> to vector<16x128xf32>
    %264 = vector.shape_cast %261 : vector<16x128xf32> to vector<1x16x128xf32>
    tpu.vector_store %arg46[%c0_160, %c0_161, %c0_162], %264 {strides = array<i32>} : memref<1x16x128xf32, #tpu.memory_space<vmem>>, vector<1x16x128xf32>,
    return
  }
  func.func @transform_0(%arg0: i32) -> (i32, i32, i32) {
    %c0_i32 = arith.constant 0 : i32
    %c0_i32_0 = arith.constant 0 : i32
    %c0_i32_1 = arith.constant 0 : i32
    return %arg0, %c0_i32, %c0_i32_0 : i32, i32, i32
  }
  func.func @transform_1(%arg0: i32) -> (i32, i32, i32) {
    %c0_i32 = arith.constant 0 : i32
    %c0_i32_0 = arith.constant 0 : i32
    %c0_i32_1 = arith.constant 0 : i32
    return %arg0, %c0_i32, %c0_i32_0 : i32, i32, i32
  }
  func.func @transform_2(%arg0: i32) -> (i32, i32, i32) {
    %c0_i32 = arith.constant 0 : i32
    %c0_i32_0 = arith.constant 0 : i32
    %c0_i32_1 = arith.constant 0 : i32
    return %arg0, %c0_i32, %c0_i32_0 : i32, i32, i32
  }
  func.func @transform_3(%arg0: i32) -> (i32, i32) {
    %c0_i32 = arith.constant 0 : i32
    %c0_i32_0 = arith.constant 0 : i32
    %c0_i32_1 = arith.constant 0 : i32
    return %c0_i32, %c0_i32_0 : i32, i32
  }
  func.func @transform_4(%arg0: i32) -> (i32, i32) {
    %c0_i32 = arith.constant 0 : i32
    %c0_i32_0 = arith.constant 0 : i32
    %c0_i32_1 = arith.constant 0 : i32
    return %c0_i32, %c0_i32_0 : i32, i32
  }
  func.func @transform_5(%arg0: i32) -> (i32, i32) {
    %c0_i32 = arith.constant 0 : i32
    %c0_i32_0 = arith.constant 0 : i32
    %c0_i32_1 = arith.constant 0 : i32
    return %c0_i32, %c0_i32_0 : i32, i32
  }
  func.func @transform_6(%arg0: i32) -> (i32, i32) {
    %c0_i32 = arith.constant 0 : i32
    %c0_i32_0 = arith.constant 0 : i32
    %c0_i32_1 = arith.constant 0 : i32
    return %c0_i32, %c0_i32_0 : i32, i32
  }
  func.func @transform_7(%arg0: i32) -> (i32, i32) {
    %c0_i32 = arith.constant 0 : i32
    %c0_i32_0 = arith.constant 0 : i32
    %c0_i32_1 = arith.constant 0 : i32
    return %c0_i32, %c0_i32_0 : i32, i32
  }
  func.func @transform_8(%arg0: i32) -> (i32, i32) {
    %c0_i32 = arith.constant 0 : i32
    %c0_i32_0 = arith.constant 0 : i32
    %c0_i32_1 = arith.constant 0 : i32
    return %c0_i32, %c0_i32_0 : i32, i32
  }
  func.func @transform_9(%arg0: i32) -> (i32, i32) {
    %c0_i32 = arith.constant 0 : i32
    %c0_i32_0 = arith.constant 0 : i32
    %c0_i32_1 = arith.constant 0 : i32
    return %c0_i32, %c0_i32_0 : i32, i32
  }
  func.func @transform_10(%arg0: i32) -> (i32, i32) {
    %c0_i32 = arith.constant 0 : i32
    %c0_i32_0 = arith.constant 0 : i32
    %c0_i32_1 = arith.constant 0 : i32
    return %c0_i32, %c0_i32_0 : i32, i32
  }
  func.func @transform_11(%arg0: i32) -> (i32, i32) {
    %c0_i32 = arith.constant 0 : i32
    %c0_i32_0 = arith.constant 0 : i32
    %c0_i32_1 = arith.constant 0 : i32
    return %c0_i32, %c0_i32_0 : i32, i32
  }
  func.func @transform_12(%arg0: i32) -> (i32, i32) {
    %c0_i32 = arith.constant 0 : i32
    %c0_i32_0 = arith.constant 0 : i32
    %c0_i32_1 = arith.constant 0 : i32
    return %c0_i32, %c0_i32_0 : i32, i32
  }
  func.func @transform_13(%arg0: i32) -> (i32, i32) {
    %c0_i32 = arith.constant 0 : i32
    %c0_i32_0 = arith.constant 0 : i32
    %c0_i32_1 = arith.constant 0 : i32
    return %c0_i32, %c0_i32_0 : i32, i32
  }
  func.func @transform_14(%arg0: i32) -> (i32, i32) {
    %c0_i32 = arith.constant 0 : i32
    %c0_i32_0 = arith.constant 0 : i32
    %c0_i32_1 = arith.constant 0 : i32
    return %c0_i32, %c0_i32_0 : i32, i32
  }
  func.func @transform_15(%arg0: i32) -> (i32, i32) {
    %c0_i32 = arith.constant 0 : i32
    %c0_i32_0 = arith.constant 0 : i32
    %c0_i32_1 = arith.constant 0 : i32
    return %c0_i32, %c0_i32_0 : i32, i32
  }
  func.func @transform_16(%arg0: i32) -> (i32, i32) {
    %c0_i32 = arith.constant 0 : i32
    %c0_i32_0 = arith.constant 0 : i32
    %c0_i32_1 = arith.constant 0 : i32
    return %c0_i32, %c0_i32_0 : i32, i32
  }
  func.func @transform_17(%arg0: i32) -> (i32, i32) {
    %c0_i32 = arith.constant 0 : i32
    %c0_i32_0 = arith.constant 0 : i32
    %c0_i32_1 = arith.constant 0 : i32
    return %c0_i32, %c0_i32_0 : i32, i32
  }
  func.func @transform_18(%arg0: i32) -> (i32, i32) {
    %c0_i32 = arith.constant 0 : i32
    %c0_i32_0 = arith.constant 0 : i32
    %c0_i32_1 = arith.constant 0 : i32
    return %c0_i32, %c0_i32_0 : i32, i32
  }
  func.func @transform_19(%arg0: i32) -> (i32, i32) {
    %c0_i32 = arith.constant 0 : i32
    %c0_i32_0 = arith.constant 0 : i32
    %c0_i32_1 = arith.constant 0 : i32
    return %c0_i32, %c0_i32_0 : i32, i32
  }
  func.func @transform_20(%arg0: i32) -> (i32, i32) {
    %c0_i32 = arith.constant 0 : i32
    %c0_i32_0 = arith.constant 0 : i32
    %c0_i32_1 = arith.constant 0 : i32
    return %c0_i32, %c0_i32_0 : i32, i32
  }
  func.func @transform_21(%arg0: i32) -> (i32, i32) {
    %c0_i32 = arith.constant 0 : i32
    %c0_i32_0 = arith.constant 0 : i32
    %c0_i32_1 = arith.constant 0 : i32
    return %c0_i32, %c0_i32_0 : i32, i32
  }
  func.func @transform_22(%arg0: i32) -> (i32, i32) {
    %c0_i32 = arith.constant 0 : i32
    %c0_i32_0 = arith.constant 0 : i32
    %c0_i32_1 = arith.constant 0 : i32
    return %c0_i32, %c0_i32_0 : i32, i32
  }
  func.func @transform_23(%arg0: i32) -> (i32, i32) {
    %c0_i32 = arith.constant 0 : i32
    %c0_i32_0 = arith.constant 0 : i32
    %c0_i32_1 = arith.constant 0 : i32
    return %c0_i32, %c0_i32_0 : i32, i32
  }
  func.func @transform_24(%arg0: i32) -> (i32, i32) {
    %c0_i32 = arith.constant 0 : i32
    %c0_i32_0 = arith.constant 0 : i32
    %c0_i32_1 = arith.constant 0 : i32
    return %c0_i32, %c0_i32_0 : i32, i32
  }
  func.func @transform_25(%arg0: i32) -> (i32, i32) {
    %c0_i32 = arith.constant 0 : i32
    %c0_i32_0 = arith.constant 0 : i32
    %c0_i32_1 = arith.constant 0 : i32
    return %c0_i32, %c0_i32_0 : i32, i32
  }
  func.func @transform_26(%arg0: i32) -> (i32, i32) {
    %c0_i32 = arith.constant 0 : i32
    %c0_i32_0 = arith.constant 0 : i32
    %c0_i32_1 = arith.constant 0 : i32
    return %c0_i32, %c0_i32_0 : i32, i32
  }
  func.func @transform_27(%arg0: i32) -> (i32, i32) {
    %c0_i32 = arith.constant 0 : i32
    %c0_i32_0 = arith.constant 0 : i32
    %c0_i32_1 = arith.constant 0 : i32
    return %c0_i32, %c0_i32_0 : i32, i32
  }
  func.func @transform_28(%arg0: i32) -> (i32, i32) {
    %c0_i32 = arith.constant 0 : i32
    %c0_i32_0 = arith.constant 0 : i32
    %c0_i32_1 = arith.constant 0 : i32
    return %c0_i32, %c0_i32_0 : i32, i32
  }
  func.func @transform_29(%arg0: i32) -> (i32, i32) {
    %c0_i32 = arith.constant 0 : i32
    %c0_i32_0 = arith.constant 0 : i32
    %c0_i32_1 = arith.constant 0 : i32
    return %c0_i32, %c0_i32_0 : i32, i32
  }
  func.func @transform_30(%arg0: i32) -> (i32, i32) {
    %c0_i32 = arith.constant 0 : i32
    %c0_i32_0 = arith.constant 0 : i32
    %c0_i32_1 = arith.constant 0 : i32
    return %c0_i32, %c0_i32_0 : i32, i32
  }
  func.func @transform_31(%arg0: i32) -> (i32, i32) {
    %c0_i32 = arith.constant 0 : i32
    %c0_i32_0 = arith.constant 0 : i32
    %c0_i32_1 = arith.constant 0 : i32
    return %c0_i32, %c0_i32_0 : i32, i32
  }
  func.func @transform_32(%arg0: i32) -> (i32, i32) {
    %c0_i32 = arith.constant 0 : i32
    %c0_i32_0 = arith.constant 0 : i32
    %c0_i32_1 = arith.constant 0 : i32
    return %c0_i32, %c0_i32_0 : i32, i32
  }
  func.func @transform_33(%arg0: i32) -> (i32, i32) {
    %c0_i32 = arith.constant 0 : i32
    %c0_i32_0 = arith.constant 0 : i32
    %c0_i32_1 = arith.constant 0 : i32
    return %c0_i32, %c0_i32_0 : i32, i32
  }
  func.func @transform_34(%arg0: i32) -> (i32, i32) {
    %c0_i32 = arith.constant 0 : i32
    %c0_i32_0 = arith.constant 0 : i32
    %c0_i32_1 = arith.constant 0 : i32
    return %c0_i32, %c0_i32_0 : i32, i32
  }
  func.func @transform_35(%arg0: i32) -> (i32, i32) {
    %c0_i32 = arith.constant 0 : i32
    %c0_i32_0 = arith.constant 0 : i32
    %c0_i32_1 = arith.constant 0 : i32
    return %c0_i32, %c0_i32_0 : i32, i32
  }
  func.func @transform_36(%arg0: i32) -> (i32, i32) {
    %c0_i32 = arith.constant 0 : i32
    %c0_i32_0 = arith.constant 0 : i32
    %c0_i32_1 = arith.constant 0 : i32
    return %c0_i32, %c0_i32_0 : i32, i32
  }
  func.func @transform_37(%arg0: i32) -> (i32, i32) {
    %c0_i32 = arith.constant 0 : i32
    %c0_i32_0 = arith.constant 0 : i32
    %c0_i32_1 = arith.constant 0 : i32
    return %c0_i32, %c0_i32_0 : i32, i32
  }
  func.func @transform_38(%arg0: i32) -> (i32, i32) {
    %c0_i32 = arith.constant 0 : i32
    %c0_i32_0 = arith.constant 0 : i32
    %c0_i32_1 = arith.constant 0 : i32
    return %c0_i32, %c0_i32_0 : i32, i32
  }
  func.func @transform_39(%arg0: i32) -> (i32, i32) {
    %c0_i32 = arith.constant 0 : i32
    %c0_i32_0 = arith.constant 0 : i32
    %c0_i32_1 = arith.constant 0 : i32
    return %c0_i32, %c0_i32_0 : i32, i32
  }
  func.func @transform_40(%arg0: i32) -> (i32, i32) {
    %c0_i32 = arith.constant 0 : i32
    %c0_i32_0 = arith.constant 0 : i32
    %c0_i32_1 = arith.constant 0 : i32
    return %c0_i32, %c0_i32_0 : i32, i32
  }
  func.func @transform_41(%arg0: i32) -> (i32, i32) {
    %c0_i32 = arith.constant 0 : i32
    %c0_i32_0 = arith.constant 0 : i32
    %c0_i32_1 = arith.constant 0 : i32
    return %c0_i32, %c0_i32_0 : i32, i32
  }
  func.func @transform_42(%arg0: i32) -> (i32, i32) {
    %c0_i32 = arith.constant 0 : i32
    %c0_i32_0 = arith.constant 0 : i32
    %c0_i32_1 = arith.constant 0 : i32
    return %c0_i32, %c0_i32_0 : i32, i32
  }
  func.func @transform_43(%arg0: i32) -> (i32, i32) {
    %c0_i32 = arith.constant 0 : i32
    %c0_i32_0 = arith.constant 0 : i32
    %c0_i32_1 = arith.constant 0 : i32
    return %c0_i32, %c0_i32_0 : i32, i32
  }
  func.func @transform_44(%arg0: i32) -> (i32, i32) {
    %c0_i32 = arith.constant 0 : i32
    %c0_i32_0 = arith.constant 0 : i32
    %c0_i32_1 = arith.constant 0 : i32
    return %c0_i32, %c0_i32_0 : i32, i32
  }
  func.func @transform_45(%arg0: i32) -> (i32, i32, i32) {
    %c0_i32 = arith.constant 0 : i32
    %c0_i32_0 = arith.constant 0 : i32
    %c0_i32_1 = arith.constant 0 : i32
    return %arg0, %c0_i32, %c0_i32_0 : i32, i32, i32
  }
}

</mosaic_0001>

<bundles_post_ra>
// kernel: amgnn_forward.1
= control target key start
LH: loop header
LB: loop body
LE: loop exit
PB: predicated region body
PF: predicated region fallthrough
CT: control target
= control target key end

     0   :  { %s10244_s6 = smov 1   ;;  %s10245_s10 = smov 2   ;;  %s11929_s0 = inlined_call_operand.smem [shape: u32[46], index: -1, kind: input, shape index: {}] }
   0x1   :  { %s10300_s5 = sld [smem:[%s11929_s0]]   ;;  %s10246_s14 = smov 3  }
   0x2   :  { %s10305_s9 = sld [smem:[%s11929_s0 + %s10244_s6]]   ;;  %s10247_s18 = smov 4  }
   0x3   :  { %s10310_s13 = sld [smem:[%s11929_s0 + %s10245_s10]]   ;;  %s10248_s22 = smov 5  }
   0x4   :  { %s10315_s17 = sld [smem:[%s11929_s0 + %s10246_s14]]   ;;  %s10249_s26 = smov 6  }
   0x5   :  { %s10320_s21 = sld [smem:[%s11929_s0 + %s10247_s18]]   ;;  %s10250_s30 = smov 7  }
   0x6   :  { %s10325_s25 = sld [smem:[%s11929_s0 + %s10248_s22]]   ;;  %s10251_s4 = smov 8  }
   0x7   :  { %s10330_s29 = sld [smem:[%s11929_s0 + %s10249_s26]]   ;;  %s10252_s10 = smov 9  }
   0x8   :  { %11994 = sst [smem:[#allocation2_spill]] %s10305_s9  ;;  %s10253_s15 = smov 10  }
   0x9   :  { %s10335_s3 = sld [smem:[%s11929_s0 + %s10250_s30]]   ;;  %s10254_s20 = smov 11  }
   0xa   :  { %s10340_s8 = sld [smem:[%s11929_s0 + %s10251_s4]]   ;;  %s10255_s26 = smov 12  }
   0xb   :  { %s10345_s14 = sld [smem:[%s11929_s0 + %s10252_s10]]   ;;  %s10256_s1 = smov 13  }
   0xc   :  { %s10350_s19 = sld [smem:[%s11929_s0 + %s10253_s15]]   ;;  %s10257_s7 = smov 14  }
   0xd   :  { %s10355_s24 = sld [smem:[%s11929_s0 + %s10254_s20]]   ;;  %s10258_s15 = smov 15  }
   0xe   :  { %s10360_s30 = sld [smem:[%s11929_s0 + %s10255_s26]]   ;;  %s10259_s22 = smov 16  }
   0xf   :  { %s10365_s6 = sld [smem:[%s11929_s0 + %s10256_s1]]   ;;  %s10260_s28 = smov 17  }
  0x10   :  { %11995 = sst [smem:[#allocation3_spill]] %s10340_s8 }
  0x11   :  { %s10370_s12 = sld [smem:[%s11929_s0 + %s10257_s7]]   ;;  %s10261_s7 = smov 18  }
  0x12   :  { %s10375_s20 = sld [smem:[%s11929_s0 + %s10258_s15]]   ;;  %s10262_s15 = smov 19  }
  0x13   :  { %s10380_s27 = sld [smem:[%s11929_s0 + %s10259_s22]]   ;;  %s10263_s22 = smov 20  }
  0x14   :  { %s10385_s4 = sld [smem:[%s11929_s0 + %s10260_s28]]   ;;  %s10264_s28 = smov 21  }
  0x15   :  { %s10390_s8 = sld [smem:[%s11929_s0 + %s10261_s7]]   ;;  %s10265_s7 = smov 22  }
  0x16   :  { %s10395_s9 = sld [smem:[%s11929_s0 + %s10262_s15]]   ;;  %s10266_s15 = smov 23  }
  0x19   :  { %11996 = sst [smem:[#allocation4_spill]] %s10380_s27 }
  0x1a   :  { %11997 = sst [smem:[#allocation5_spill]] %s10385_s4 }
  0x1b   :  { %11998 = sst [smem:[#allocation6_spill]] %s10390_s8 }
  0x1c   :  { %11999 = sst [smem:[#allocation7_spill]] %s10395_s9 }
  0x1d   :  { %s10400_s27 = sld [smem:[%s11929_s0 + %s10263_s22]]   ;;  %s10267_s22 = smov 24  }
  0x1e   :  { %s10405_s4 = sld [smem:[%s11929_s0 + %s10264_s28]]   ;;  %s10268_s28 = smov 25  }
  0x1f   :  { %s10410_s8 = sld [smem:[%s11929_s0 + %s10265_s7]]   ;;  %s10269_s7 = smov 26  }
  0x20   :  { %s10415_s9 = sld [smem:[%s11929_s0 + %s10266_s15]]   ;;  %s10270_s15 = smov 27  }
  0x23   :  { %12000 = sst [smem:[#allocation8_spill]] %s10400_s27 }
  0x24   :  { %12001 = sst [smem:[#allocation9_spill]] %s10405_s4 }
  0x25   :  { %12002 = sst [smem:[#allocation10_spill]] %s10410_s8 }
  0x26   :  { %12003 = sst [smem:[#allocation11_spill]] %s10415_s9 }
  0x27   :  { %s10420_s27 = sld [smem:[%s11929_s0 + %s10267_s22]]   ;;  %s10271_s22 = smov 28  }
  0x28   :  { %s10425_s4 = sld [smem:[%s11929_s0 + %s10268_s28]]   ;;  %s10272_s28 = smov 29  }
  0x29   :  { %s10430_s8 = sld [smem:[%s11929_s0 + %s10269_s7]]   ;;  %s10273_s7 = smov 30  }
  0x2a   :  { %s10435_s9 = sld [smem:[%s11929_s0 + %s10270_s15]]   ;;  %s10274_s15 = smov 31  }
  0x2d   :  { %12004 = sst [smem:[#allocation12_spill]] %s10420_s27 }
  0x2e   :  { %12005 = sst [smem:[#allocation13_spill]] %s10425_s4 }
  0x2f   :  { %12006 = sst [smem:[#allocation14_spill]] %s10430_s8 }
  0x30   :  { %12007 = sst [smem:[#allocation15_spill]] %s10435_s9 }
  0x31   :  { %s10440_s27 = sld [smem:[%s11929_s0 + %s10271_s22]]   ;;  %s10275_s22 = smov 32  }
  0x32   :  { %s10445_s4 = sld [smem:[%s11929_s0 + %s10272_s28]]   ;;  %s10276_s28 = smov 33  }
  0x33   :  { %s10450_s8 = sld [smem:[%s11929_s0 + %s10273_s7]]   ;;  %s10277_s7 = smov 34  }
  0x34   :  { %s10455_s9 = sld [smem:[%s11929_s0 + %s10274_s15]]   ;;  %s10278_s15 = smov 35  }
  0x37   :  { %12008 = sst [smem:[#allocation16_spill]] %s10440_s27 }
  0x38   :  { %12009 = sst [smem:[#allocation17_spill]] %s10445_s4 }
  0x39   :  { %12010 = sst [smem:[#allocation18_spill]] %s10450_s8 }
  0x3a   :  { %12011 = sst [smem:[#allocation19_spill]] %s10455_s9 }
  0x3b   :  { %s10460_s27 = sld [smem:[%s11929_s0 + %s10275_s22]]   ;;  %s10279_s22 = smov 36  }
  0x3c   :  { %s10465_s4 = sld [smem:[%s11929_s0 + %s10276_s28]]   ;;  %s10280_s28 = smov 37  }
  0x3d   :  { %s10470_s8 = sld [smem:[%s11929_s0 + %s10277_s7]]   ;;  %s10281_s7 = smov 38  }
  0x3e   :  { %s10475_s9 = sld [smem:[%s11929_s0 + %s10278_s15]]   ;;  %s10282_s15 = smov 39  }
  0x41   :  { %12012 = sst [smem:[#allocation20_spill]] %s10460_s27 }
  0x42   :  { %12013 = sst [smem:[#allocation21_spill]] %s10465_s4 }
  0x43   :  { %12014 = sst [smem:[#allocation22_spill]] %s10470_s8 }
  0x44   :  { %12015 = sst [smem:[#allocation23_spill]] %s10475_s9 }
  0x45   :  { %s10480_s27 = sld [smem:[%s11929_s0 + %s10279_s22]]   ;;  %s10283_s22 = smov 40  }
  0x46   :  { %s10485_s4 = sld [smem:[%s11929_s0 + %s10280_s28]]   ;;  %s10284_s28 = smov 41  }
  0x47   :  { %s10490_s8 = sld [smem:[%s11929_s0 + %s10281_s7]]   ;;  %s10285_s7 = smov 42  }
  0x48   :  { %s10495_s9 = sld [smem:[%s11929_s0 + %s10282_s15]]   ;;  %s10286_s15 = smov 43  }
  0x4b   :  { %12016 = sst [smem:[#allocation24_spill]] %s10480_s27 }
  0x4c   :  { %12017 = sst [smem:[#allocation25_spill]] %s10485_s4 }
  0x4d   :  { %12018 = sst [smem:[#allocation26_spill]] %s10490_s8 }
  0x4e   :  { %12019 = sst [smem:[#allocation27_spill]] %s10495_s9 }
  0x4f   :  { %s10500_s27 = sld [smem:[%s11929_s0 + %s10283_s22]]   ;;  %s10287_s22 = smov 44  }
  0x50   :  { %s10505_s4 = sld [smem:[%s11929_s0 + %s10284_s28]]   ;;  %s10288_s28 = smov 45  }
  0x51   :  { %s10510_s8 = sld [smem:[%s11929_s0 + %s10285_s7]]   ;;  %s10527_s7 = smov 0  }
  0x52   :  { %s10515_s9 = sld [smem:[%s11929_s0 + %s10286_s15]]  }
  0x55   :  { %12020 = sst [smem:[#allocation28_spill]] %s10500_s27 }
  0x56   :  { %12021 = sst [smem:[#allocation29_spill]] %s10505_s4 }
  0x57   :  { %s10520_s27 = sld [smem:[%s11929_s0 + %s10287_s22]]  }
  0x58   :  { %s10525_s4 = sld [smem:[%s11929_s0 + %s10288_s28]]  }
  0x59 LB: > { %s8464_s10 = sadd.s32 4294967295, %s10242_s7   ;;  %p8468_p0 = scmp.ge.s32.totalorder %s10242_s7, 1  ;;  %s10242_s7 = sphi %s10527_s7, %s101_s7  }
  0x5a   : > { %p1253_p1 = scmp.lt.s32.totalorder %s10242_s7, 3 }
  0x5c   : > { %p1254_p2 = pnand %p8468_p0, %p1253_p1 }
  0x5e   : > { %1257 = sbr.rel (%p1254_p2) target bundleno = 6733 (0x1a4d), region = 200 }
  0x63   : > { %v1396_v0 = vld [vmem:[%s10335_s3] sm:$0xff]  ;;  %p1371_p3 = scmp.lt.s32.totalorder %s8464_s10, 1  ;;  %vm1581_vm0 = vcmask 130048   ;;  %vm1451_vm1 = vcmask 64512   ;;  %v9826_v6 = vld [vmem:[%s10315_s17 + $0x8] sm:$0xff]   ;;  %v9828_v8 = vld [vmem:[%s10315_s17 + $0x10] sm:$0xff]  }
  0x64   : > { %v9824_v1 = vld [vmem:[%s10315_s17] sm:$0xff]   ;;  %9288 = vmatprep.subr.mxu0 %v1396_v0  ;;  %v9827_v7 = vld [vmem:[%s10320_s21 + $0x8] sm:$0xff]   ;;  %v9829_v9 = vld [vmem:[%s10320_s21 + $0x10] sm:$0xff]   ;;  %vm1949_vm2 = vcmask 1040384   ;;  %v11955_v26 = vmov 0   ;;  %vm1924_vm3 = vcmask 146432  }
  0x65   : > { %9289 = vmatpush3.msra.mxu0 %v1396_v0  ;;  %s12090_s10 = smov (!%p1371_p3, %s8464_s10), 1  ;;  %9295 = vmatprep.mubr.msk.bf16.mxu1 %vm1581_vm0, %v9824_v1  ;;  %v9825_v2 = vld [vmem:[%s10320_s21] sm:$0xff]   ;;  %v9830_v10 = vld [vmem:[%s10315_s17 + $0x18] sm:$0xff]   ;;  %v9834_v14 = vld [vmem:[%s10315_s17 + $0x28] sm:$0xff]   ;;  %s12028_s18 = sld [smem:[#allocation2_spill]]  ;;  %vm10291_vm4 = vmmov 0  }
  0x66   : > { %s8858_s0 = sshll.u32 %s12090_s10, 3  ;;  %s10538_s11 = sshll.u32 %s12090_s10, 4  ;;  %v9831_v11 = vld [vmem:[%s10320_s21 + $0x18] sm:$0xff]   ;;  %v9832_v12 = vld [vmem:[%s10315_s17 + $0x20] sm:$0xff]   ;;  %v9835_v15 = vld [vmem:[%s10320_s21 + $0x28] sm:$0xff]   ;;  %vm4036_vm5 = vcmask 392192  }
  0x67   : > { %s10541_s15 = scalar_lea.vmem %s10300_s5, %s8858_s0  ;;  %s1385_s16 = scalar_lea.vmem %s10310_s13, %s10538_s11  ;;  %v9833_v13 = vld [vmem:[%s10320_s21 + $0x20] sm:$0xff]   ;;  %v9836_v16 = vld [vmem:[%s10315_s17 + $0x30] sm:$0xff]   ;;  %v9838_v18 = vld [vmem:[%s10315_s17 + $0x38] sm:$0xff]  }
  0x68   : > { %v1449_v3 = vld [vmem:[%s1385_s16] sm:$0xff]  ;;  %v1450_v4 = vld [vmem:[%s1385_s16 + $0x8] sm:$0xff]  ;;  %v9837_v17 = vld [vmem:[%s10320_s21 + $0x30] sm:$0xff]   ;;  %s12029_s23 = sld [smem:[#allocation4_spill]] }
  0x69   : > { %9290 = vmatprep.mubr.msk.f32.mxu0 %vm1451_vm1, %v1449_v3  ;;  %v9823_v5 = vld [vmem:[%s10541_s15] sm:$0xff]   ;;  %v9839_v19 = vld [vmem:[%s10320_s21 + $0x38] sm:$0xff]   ;;  %v1908_v20 = vld [vmem:[%s10345_s14 + $0x10] sm:$0x11]  ;;  %s12030_s26 = sld [smem:[#allocation3_spill]] }
  0x6a   : > { %9291 = vmatmul.mubr.msk.f32.vlgmr.msra.gmra.mxu0 %vm1451_vm1, %v1450_v4  ;;  %9293 = vmatprep.subr.bf16.mxu1 %v9823_v5  ;;  %v8515_v21 = vcombine.high %v1908_v20, %v1908_v20  ;;  %v8514_v22 = vcombine.low %v1908_v20, %v1908_v20  ;;  %v9844_v24 = vld [vmem:[%s10345_s14 + $0x4] ss:$8 sps:$4 sm:$0xff]   ;;  %v9842_v25 = vld [vmem:[%s10345_s14] ss:$8 sps:$4 sm:$0xff]   ;;  %v9845_v27 = vld [vmem:[%s10350_s19 + $0x70] ss:$8 sps:$4 sm:$0xff]  }
  0x6b   : > { %9311 = vmatprep.subr.bf16.mxu0 %v9823_v5  ;;  %9294 = vmatpush3.bf16.msra.mxu1 %v9823_v5  ;;  %v9847_v28 = vld [vmem:[%s10350_s19 + $0x74] ss:$8 sps:$4 sm:$0xff]   ;;  %v9850_v29 = vld [vmem:[%s10350_s19 + $0x64] ss:$8 sps:$4 sm:$0xff]   ;;  %v9848_v30 = vld [vmem:[%s10350_s19 + $0x60] ss:$8 sps:$4 sm:$0xff]   ;;  %s10864_s22 = scalar_lea.vmem %s12028_s18, %s10538_s11 }
  0x6c   : > { %9312 = vmatpush3.bf16.msra.mxu0 %v9823_v5  ;;  %9313 = vmatprep.mubr.msk.bf16.mxu0 %vm1581_vm0, %v9825_v2  ;;  %v1951_v23 = vsel %vm1949_vm2, %v8514_v22, 0  ;;  %v9853_v31 = vld [vmem:[%s10350_s19 + $0x54] ss:$8 sps:$4 sm:$0xff]   ;;  %v9851_v32 = vld [vmem:[%s10350_s19 + $0x50] ss:$8 sps:$4 sm:$0xff]   ;;  %s12033_s28 = sld [smem:[#allocation5_spill]] }
  0x6d   : > { %8516 = vmatprep.subr.msk.bf16.mxu1 %vm1949_vm2, %v8515_v21  ;;  %2389 = vmatprep.subr.bf16.mxu0 %v9847_v28  ;;  %v9856_v33 = vld [vmem:[%s10350_s19 + $0x44] ss:$8 sps:$4 sm:$0xff]   ;;  %v9854_v34 = vld [vmem:[%s10350_s19 + $0x40] ss:$8 sps:$4 sm:$0xff]   ;;  %v9859_v35 = vld [vmem:[%s10350_s19 + $0x34] ss:$8 sps:$4 sm:$0xff]  }
  0x6e   : > { %9296 = vmatmul.mubr.msk.bf16.vlgmr.msra.gmra.mxu1 %vm1581_vm0, %v9826_v6  ;;  %v9857_v36 = vld [vmem:[%s10350_s19 + $0x30] ss:$8 sps:$4 sm:$0xff]   ;;  %v9862_v37 = vld [vmem:[%s10350_s19 + $0x24] ss:$8 sps:$4 sm:$0xff]   ;;  %v9860_v38 = vld [vmem:[%s10350_s19 + $0x20] ss:$8 sps:$4 sm:$0xff]  }
  0x6f   : > { %9314 = vmatmul.mubr.msk.bf16.vlgmr.msra.gmra.mxu0 %vm1581_vm0, %v9827_v7  ;;  %9299 = vmatprep.mubr.msk.bf16.mxu1 %vm1581_vm0, %v9828_v8  ;;  %v9865_v39 = vld [vmem:[%s10350_s19 + $0x14] ss:$8 sps:$4 sm:$0xff]   ;;  %v9863_v40 = vld [vmem:[%s10350_s19 + $0x10] ss:$8 sps:$4 sm:$0xff]   ;;  %v9868_v41 = vld [vmem:[%s10350_s19 + $0x4] ss:$8 sps:$4 sm:$0xff]  }
  0x70   : > { %9317 = vmatprep.mubr.msk.bf16.mxu0 %vm1581_vm0, %v9829_v9  ;;  %1969 = vmatpush1.bf16.msra.mxu1 %v1951_v23  ;;  %v9866_v42 = vld [vmem:[%s10350_s19] ss:$8 sps:$4 sm:$0xff]   ;;  %v9871_v43 = vld [vmem:[%s10350_s19 + $0xf4] ss:$8 sps:$4 sm:$0xff]   ;;  %v9869_v44 = vld [vmem:[%s10350_s19 + $0xf0] ss:$8 sps:$4 sm:$0xff]  }
  0x71   : > { %1970 = vmatprep.subr.bf16.mxu1 %v9844_v24  ;;  %2390 = vmatpush1.bf16.msra.mxu0 %v9845_v27  ;;  %v9874_v45 = vld [vmem:[%s10350_s19 + $0xe4] ss:$8 sps:$4 sm:$0xff]   ;;  %v9872_v46 = vld [vmem:[%s10350_s19 + $0xe0] ss:$8 sps:$4 sm:$0xff]   ;;  %v9877_v47 = vld [vmem:[%s10350_s19 + $0xd4] ss:$8 sps:$4 sm:$0xff]  }
  0x72   : > { %2391 = vmatprep.subr.bf16.mxu0 %v9850_v29  ;;  %v9875_v48 = vld [vmem:[%s10350_s19 + $0xd0] ss:$8 sps:$4 sm:$0xff]   ;;  %v9880_v49 = vld [vmem:[%s10350_s19 + $0xc4] ss:$8 sps:$4 sm:$0xff]   ;;  %v9878_v50 = vld [vmem:[%s10350_s19 + $0xc0] ss:$8 sps:$4 sm:$0xff]  }
  0x73   : > { %s12034_s1 = sld [smem:[#allocation6_spill]] }
  0x74   : > { %1971 = vmatpush1.bf16.msra.mxu1 %v9842_v25  ;;  %s12036_s2 = sld [smem:[#allocation7_spill]] }
  0x75   : > { %2392 = vmatpush1.bf16.msra.mxu0 %v9848_v30  ;;  %s12037_s10 = sld [smem:[#allocation8_spill]] }
  0x76   : > { %9300 = vmatmul.mubr.msk.bf16.gmra.mxu1 %vm1581_vm0, %v9830_v10  ;;  %2393 = vmatprep.subr.bf16.mxu0 %v9853_v31  ;;  %s12040_s0 = sld [smem:[#allocation9_spill]] }
  0x77   : > { %9318 = vmatmul.mubr.msk.bf16.gmra.mxu0 %vm1581_vm0, %v9831_v11  ;;  %9303 = vmatprep.mubr.msk.bf16.mxu1 %vm1581_vm0, %v9832_v12  ;;  %s12041_s16 = sld [smem:[#allocation12_spill]] }
  0x78   : > { %9321 = vmatprep.mubr.msk.bf16.mxu0 %vm1581_vm0, %v9833_v13  ;;  %s12042_s18 = sld [smem:[#allocation10_spill]] }
  0x79   : > { %2394 = vmatpush1.bf16.msra.mxu0 %v9851_v32 }
  0x7a   : > { %2395 = vmatprep.subr.bf16.mxu0 %v9856_v33 }
  0x7d   : > { %2396 = vmatpush1.bf16.msra.mxu0 %v9854_v34 }
  0x7e   : > { %9304 = vmatmul.mubr.msk.bf16.gmra.mxu1 %vm1581_vm0, %v9834_v14  ;;  %2397 = vmatprep.subr.bf16.mxu0 %v9859_v35 }
  0x7f   : > { %9322 = vmatmul.mubr.msk.bf16.gmra.mxu0 %vm1581_vm0, %v9835_v15  ;;  %9307 = vmatprep.mubr.msk.bf16.mxu1 %vm1581_vm0, %v9836_v16 }
  0x80   : > { %9325 = vmatprep.mubr.msk.bf16.mxu0 %vm1581_vm0, %v9837_v17 }
  0x81   : > { %2398 = vmatpush1.bf16.msra.mxu0 %v9857_v36 }
  0x82   : > { %2399 = vmatprep.subr.bf16.mxu0 %v9862_v37 }
  0x85   : > { %2400 = vmatpush1.bf16.msra.mxu0 %v9860_v38 }
  0x86   : > { %9308 = vmatmul.mubr.msk.bf16.gmra.mxu1 %vm1581_vm0, %v9838_v18  ;;  %2401 = vmatprep.subr.bf16.mxu0 %v9865_v39 }
  0x87   : > { %9326 = vmatmul.mubr.msk.bf16.gmra.mxu0 %vm1581_vm0, %v9839_v19  ;;  %1988 = vmatprep.mubr.bf16.mxu1 %v11955_v26 }
  0x89   : > { %2402 = vmatpush1.bf16.msra.mxu0 %v9863_v40 }
  0x8a   : > { %2403 = vmatprep.subr.bf16.mxu0 %v9868_v41 }
  0x8d   : > { %2404 = vmatpush1.bf16.msra.mxu0 %v9866_v42 }
  0x8e   : > { %2405 = vmatprep.subr.bf16.mxu0 %v9871_v43 }
  0x91   : > { %2406 = vmatpush2.bf16.msra.mxu0 %v9869_v44 }
  0x92   : > { %2407 = vmatprep.subr.bf16.mxu0 %v9874_v45 }
  0x95   : > { %2408 = vmatpush2.bf16.msra.mxu0 %v9872_v46 }
  0x96   : > { %2409 = vmatprep.subr.bf16.mxu0 %v9877_v47 }
  0x99   : > { %2410 = vmatpush2.bf16.msra.mxu0 %v9875_v48 }
  0x9a   : > { %2411 = vmatprep.subr.bf16.mxu0 %v9880_v49 }
  0x9d   : > { %2412 = vmatpush2.bf16.msra.mxu0 %v9878_v50 }
 0x12a   : > { %v10608_v51 = vpop.f32.mrf.mxu0 }
 0x12c   : > { %v10610_v52 = vpop.f32.mrf.mxu0 }
 0x12e   : > { %v9297_v53 = vpop.f32.mrf.mxu1 }
 0x12f   : > { %v9315_v54 = vpop.f32.mrf.mxu0 }
 0x130   : > { %v1640_v55 = vpop.f32.mrf.mxu1  ;;  %v1866_v9 = vsub.f32 %v9297_v53, %v9315_v54 }
 0x131   : > { %v1801_v56 = vpop.f32.mrf.mxu0 }
 0x132   : > { %v9298_v57 = vpop.f32.mrf.mxu1  ;;  %v1864_v59 = vsub.f32 %v1640_v55, %v1801_v56  ;;  %v1882_v13 = vand.u32 2147483647, %v1866_v9  ;;  %v9893_v9 = vld [vmem:[%s10355_s24 + $0x78] sm:$0xff]  }
 0x133   : > { %v9316_v58 = vpop.f32.mrf.mxu0  ;;  %8883 = vmatprep.subr.bf16.mxu1 %v9893_v9 }
 0x134   : > { %v1643_v60 = vpop.f32.mrf.mxu1  ;;  %v1880_v1 = vand.u32 2147483647, %v1864_v59  ;;  %v1867_v5 = vsub.f32 %v9298_v57, %v9316_v58 }
 0x135   : > { %v1804_v61 = vpop.f32.mrf.mxu0 }
 0x136   : > { %v1865_v62 = vsub.f32 %v1643_v60, %v1804_v61  ;;  %v9301_v63 = vpop.f32.mrf.mxu1  ;;  %v1883_v10 = vand.u32 2147483647, %v1867_v5  ;;  %v9887_v5 = vld [vmem:[%s10350_s19 + $0x90] ss:$8 sps:$4 sm:$0xff]  }
 0x137   : > { %v9319_v0 = vpop.f32.mrf.mxu0 }
 0x138   : > { %v1881_v2 = vand.u32 2147483647, %v1865_v62  ;;  %v1656_v3 = vpop.f32.mrf.mxu1  ;;  %v10617_v14 = vpack.c.bf16 %v1883_v10, %v1882_v13  ;;  %v1870_v23 = vsub.f32 %v9301_v63, %v9319_v0  ;;  %v9883_v0 = vld [vmem:[%s10350_s19 + $0xb4] ss:$8 sps:$4 sm:$0xff]   ;;  %v9897_v13 = vld [vmem:[%s10355_s24 + $0x68] sm:$0xff]  }
 0x139   : > { %v1817_v4 = vpop.f32.mrf.mxu0  ;;  %2413 = vmatprep.subr.bf16.mxu0 %v9883_v0  ;;  %v9894_v10 = vld [vmem:[%s10355_s24 + $0x38] sm:$0xff]  }
 0x13a   : > { %v10612_v6 = vpack.c.bf16 %v1881_v2, %v1880_v1  ;;  %v9302_v7 = vpop.f32.mrf.mxu1  ;;  %v1868_v15 = vsub.f32 %v1656_v3, %v1817_v4  ;;  %v1886_v29 = vand.u32 2147483647, %v1870_v23  ;;  %v9881_v1 = vld [vmem:[%s10350_s19 + $0xb0] ss:$8 sps:$4 sm:$0xff]   ;;  %v9886_v2 = vld [vmem:[%s10350_s19 + $0xa4] ss:$8 sps:$4 sm:$0xff]  }
 0x13b   : > { %v9320_v8 = vpop.f32.mrf.mxu0  ;;  %2414 = vmatpush2.bf16.msra.mxu0 %v9881_v1  ;;  %v9884_v3 = vld [vmem:[%s10350_s19 + $0xa0] ss:$8 sps:$4 sm:$0xff]   ;;  %v9889_v4 = vld [vmem:[%s10350_s19 + $0x94] ss:$8 sps:$4 sm:$0xff]  }
 0x13c   : > { %8517 = vmatmul.mubr.msk.bf16.vlgmr.msra.gmra.mxu1 %vm1924_vm3, %v10612_v6  ;;  %v1659_v11 = vpop.f32.mrf.mxu1  ;;  %v1884_v19 = vand.u32 2147483647, %v1868_v15  ;;  %v1871_v24 = vsub.f32 %v9302_v7, %v9320_v8  ;;  %2415 = vmatprep.subr.bf16.mxu0 %v9886_v2  ;;  %v9892_v7 = vld [vmem:[%s10350_s19 + $0x84] ss:$8 sps:$4 sm:$0xff]   ;;  %v9890_v8 = vld [vmem:[%s10350_s19 + $0x80] ss:$8 sps:$4 sm:$0xff]  }
 0x13d   : > { %1998 = vmatprep.mubr.bf16.mxu1 %v11955_v26  ;;  %v1820_v12 = vpop.f32.mrf.mxu0  ;;  %8884 = vmatpush3.bf16.msra.mxu1 %v9894_v10  ;;  %v9898_v15 = vld [vmem:[%s10355_s24 + $0x28] sm:$0xff]  }
 0x13e   : > { %v1869_v16 = vsub.f32 %v1659_v11, %v1820_v12  ;;  %v9305_v17 = vpop.f32.mrf.mxu1  ;;  %v1887_v30 = vand.u32 2147483647, %v1871_v24  ;;  %v9895_v11 = vld [vmem:[%s10355_s24 + $0x70] sm:$0xff]  }
 0x13f   : > { %v9323_v18 = vpop.f32.mrf.mxu0  ;;  %2416 = vmatpush2.bf16.msra.mxu0 %v9884_v3  ;;  %v9896_v12 = vld [vmem:[%s10355_s24 + $0x30] sm:$0xff]   ;;  %8885 = vmatprep.subr.bf16.mxu1 %v9895_v11 }
 0x140   : > { %v1885_v20 = vand.u32 2147483647, %v1869_v16  ;;  %v1672_v21 = vpop.f32.mrf.mxu1  ;;  %v10627_v33 = vpack.c.bf16 %v1887_v30, %v1886_v29  ;;  %v1874_v42 = vsub.f32 %v9305_v17, %v9323_v18  ;;  %2417 = vmatprep.subr.bf16.mxu0 %v9889_v4  ;;  %v9899_v16 = vld [vmem:[%s10355_s24 + $0x60] sm:$0xff]   ;;  %v2069_v18 = vlaneseq }
 0x141   : > { %v1833_v22 = vpop.f32.mrf.mxu0  ;;  %8886 = vmatpush3.bf16.msra.mxu1 %v9896_v12  ;;  %v9900_v17 = vld [vmem:[%s10355_s24 + $0x20] sm:$0xff]  }
 0x142   : > { %v10622_v25 = vpack.c.bf16 %v1885_v20, %v1884_v19  ;;  %v9306_v27 = vpop.f32.mrf.mxu1  ;;  %v1872_v34 = vsub.f32 %v1672_v21, %v1833_v22  ;;  %v1890_v47 = vand.u32 2147483647, %v1874_v42  ;;  %8887 = vmatprep.subr.bf16.mxu1 %v9897_v13  ;;  %v10667_v19 = vshrl.u32 %v2069_v18, 7  ;;  %v10673_v21 = vld [vmem:[%s10370_s12 + $0x8] sm:$0xff]  ;;  %v10676_v22 = vld [vmem:[%s10370_s12] sm:$0xff] }
 0x143   : > { %v9324_v28 = vpop.f32.mrf.mxu0  ;;  %2418 = vmatpush2.bf16.msra.mxu0 %v9887_v5 }
 0x144   : > { %8518 = vmatmul.mubr.msk.bf16.gmra.mxu1 %vm1924_vm3, %v10617_v14  ;;  %v1675_v31 = vpop.f32.mrf.mxu1  ;;  %v1888_v38 = vand.u32 2147483647, %v1872_v34  ;;  %v1875_v43 = vsub.f32 %v9306_v27, %v9324_v28  ;;  %2419 = vmatprep.subr.bf16.mxu0 %v9892_v7  ;;  %v10670_v20 = vsub.s32 0, %v10667_v19 }
 0x145   : > { %2008 = vmatprep.mubr.bf16.mxu1 %v11955_v26  ;;  %v1836_v32 = vpop.f32.mrf.mxu0  ;;  %8888 = vmatpush3.bf16.msra.mxu1 %v9898_v15 }
 0x146   : > { %v1873_v35 = vsub.f32 %v1675_v31, %v1836_v32  ;;  %v9309_v36 = vpop.f32.mrf.mxu1  ;;  %v1891_v48 = vand.u32 2147483647, %v1875_v43  ;;  %8889 = vmatprep.subr.bf16.mxu1 %v9899_v16  ;;  %12024 = vst [vmem:[#allocation32_spill] sm:$0xff] %v10670_v20  ;;  %v10680_v23 = vrot.slane %v10673_v21, %v10670_v20  ;;  %v10684_v27 = vrot.slane %v10676_v22, %v10670_v20 }
 0x147   : > { %v9327_v37 = vpop.f32.mrf.mxu0  ;;  %2420 = vmatpush2.bf16.msra.mxu0 %v9890_v8 }
 0x148   : > { %v1889_v39 = vand.u32 2147483647, %v1873_v35  ;;  %v1688_v40 = vpop.f32.mrf.mxu1  ;;  %v10637_v53 = vpack.c.bf16 %v1891_v48, %v1890_v47  ;;  %v1878_v58 = vsub.f32 %v9309_v36, %v9327_v37 }
 0x149   : > { %v1849_v41 = vpop.f32.mrf.mxu0  ;;  %8890 = vmatpush3.bf16.msra.mxu1 %v9900_v17 }
 0x14a   : > { %v10632_v44 = vpack.c.bf16 %v1889_v39, %v1888_v38  ;;  %v9310_v45 = vpop.f32.mrf.mxu1  ;;  %v1876_v54 = vsub.f32 %v1688_v40, %v1849_v41  ;;  %v1894_v61 = vand.u32 2147483647, %v1878_v58 }
 0x14b   : > { %v9328_v46 = vpop.f32.mrf.mxu0 }
 0x14c   : > { %8519 = vmatmul.mubr.msk.bf16.gmra.mxu1 %vm1924_vm3, %v10622_v25  ;;  %v1691_v49 = vpop.f32.mrf.mxu1  ;;  %v1892_v56 = vand.u32 2147483647, %v1876_v54  ;;  %v1879_v59 = vsub.f32 %v9310_v45, %v9328_v46 }
 0x14d   : > { %2018 = vmatprep.mubr.bf16.mxu1 %v11955_v26  ;;  %v1852_v50 = vpop.f32.mrf.mxu0 }
 0x14e   : > { %v1877_v55 = vsub.f32 %v1691_v49, %v1852_v50  ;;  %v1895_v62 = vand.u32 2147483647, %v1879_v59 }
 0x150   : > { %v1893_v57 = vand.u32 2147483647, %v1877_v55  ;;  %v10647_v63 = vpack.c.bf16 %v1895_v62, %v1894_v61 }
 0x152   : > { %v10642_v60 = vpack.c.bf16 %v1893_v57, %v1892_v56  ;;  %12023 = vst [vmem:[#allocation31_spill] sm:$0xff] %v10647_v63 }
 0x154   : > { %8520 = vmatmul.mubr.msk.bf16.gmra.mxu1 %vm1924_vm3, %v10627_v33  ;;  %12022 = vst [vmem:[#allocation30_spill] sm:$0xff] %v10642_v60 }
 0x155   : > { %2028 = vmatprep.mubr.bf16.mxu1 %v11955_v26 }
 0x15c   : > { %8521 = vmatmul.mubr.msk.bf16.gmra.mxu1 %vm1924_vm3, %v10632_v44 }
 0x15d   : > { %2038 = vmatprep.mubr.bf16.mxu1 %v11955_v26 }
 0x164   : > { %8522 = vmatmul.mubr.msk.bf16.gmra.mxu1 %vm1924_vm3, %v10637_v53 }
 0x165   : > { %2048 = vmatprep.mubr.bf16.mxu1 %v11955_v26 }
 0x16c   : > { %8523 = vmatmul.mubr.msk.bf16.gmra.mxu1 %vm1924_vm3, %v10642_v60 }
 0x16d   : > { %2058 = vmatprep.mubr.bf16.mxu1 %v11955_v26 }
 0x174   : > { %8524 = vmatmul.mubr.msk.bf16.gmra.mxu1 %vm1924_vm3, %v10647_v63 }
 0x1fc   : > { %v1990_v24 = vpop.f32.mrf.mxu1 }
 0x1fd   : > { %v2077_v30 = vadd.f32 %v10684_v27, %v1990_v24 }
 0x1fe   : > { %v1992_v28 = vpop.f32.mrf.mxu1 }
 0x1ff   : > { %v2078_v29 = vadd.f32 %v10680_v23, %v1992_v28  ;;  %v2109_v38 = vmul.f32 0.01, %v2077_v30 }
 0x200   : > { %v1994_v31 = vpop.f32.mrf.mxu1 }
 0x201   : > { %v2079_v32 = vadd.f32 %v10684_v27, %v1994_v31  ;;  %v2110_v35 = vmul.f32 0.01, %v2078_v29  ;;  %v2141_v47 = vmax.f32 %v2077_v30, %v2109_v38 }
 0x202   : > { %v1996_v34 = vpop.f32.mrf.mxu1 }
 0x203   : > { %v2111_v36 = vmul.f32 0.01, %v2079_v32  ;;  %v2080_v37 = vadd.f32 %v10680_v23, %v1996_v34  ;;  %v2142_v43 = vmax.f32 %v2078_v29, %v2110_v35 }
 0x204   : > { %v2000_v39 = vpop.f32.mrf.mxu1 }
 0x205   : > { %v2112_v40 = vmul.f32 0.01, %v2080_v37  ;;  %v2143_v41 = vmax.f32 %v2079_v32, %v2111_v36  ;;  %v2081_v48 = vadd.f32 %v10684_v27, %v2000_v39 }
 0x206   : > { %v2002_v42 = vpop.f32.mrf.mxu1 }
 0x207   : > { %v2144_v45 = vmax.f32 %v2080_v37, %v2112_v40  ;;  %v2082_v46 = vadd.f32 %v10680_v23, %v2002_v42  ;;  %v2173_v55 = vpack.c.bf16 %v2143_v41, %v2141_v47  ;;  %v2113_v61 = vmul.f32 0.01, %v2081_v48 }
 0x208   : > { %v2004_v49 = vpop.f32.mrf.mxu1 }
 0x209   : > { %v2083_v50 = vadd.f32 %v10684_v27, %v2004_v49  ;;  %v2174_v54 = vpack.c.bf16 %v2144_v45, %v2142_v43  ;;  %v2114_v57 = vmul.f32 0.01, %v2082_v46  ;;  %v2145_v7 = vmax.f32 %v2081_v48, %v2113_v61 }
 0x20a   : > { %v2006_v56 = vpop.f32.mrf.mxu1 }
 0x20b   : > { %v2115_v58 = vmul.f32 0.01, %v2083_v50  ;;  %v2084_v59 = vadd.f32 %v10680_v23, %v2006_v56  ;;  %2421 = vmatprep.mubr.bf16.mxu0 %v2174_v54  ;;  %v2146_v3 = vmax.f32 %v2082_v46, %v2114_v57 }
 0x20c   : > { %v2010_v62 = vpop.f32.mrf.mxu1  ;;  %2422 = vmatmul.mubr.bf16.vlgmr.msra.gmra.mxu0 %v2173_v55 }
 0x20d   : > { %v2116_v0 = vmul.f32 0.01, %v2084_v59  ;;  %v2147_v1 = vmax.f32 %v2083_v50, %v2115_v58  ;;  %v2085_v8 = vadd.f32 %v10684_v27, %v2010_v62 }
 0x20e   : > { %v2012_v2 = vpop.f32.mrf.mxu1 }
 0x20f   : > { %v2148_v4 = vmax.f32 %v2084_v59, %v2116_v0  ;;  %v2086_v5 = vadd.f32 %v10680_v23, %v2012_v2  ;;  %v2175_v13 = vpack.c.bf16 %v2147_v1, %v2145_v7  ;;  %v2117_v18 = vmul.f32 0.01, %v2085_v8 }
 0x210   : > { %v2014_v9 = vpop.f32.mrf.mxu1 }
 0x211   : > { %v2087_v10 = vadd.f32 %v10684_v27, %v2014_v9  ;;  %v2176_v11 = vpack.c.bf16 %v2148_v4, %v2146_v3  ;;  %v2118_v15 = vmul.f32 0.01, %v2086_v5  ;;  %v2149_v35 = vmax.f32 %v2085_v8, %v2117_v18 }
 0x212   : > { %v2016_v12 = vpop.f32.mrf.mxu1 }
 0x213   : > { %v2119_v16 = vmul.f32 0.01, %v2087_v10  ;;  %v2088_v17 = vadd.f32 %v10680_v23, %v2016_v12  ;;  %2431 = vmatprep.mubr.bf16.mxu0 %v2176_v11  ;;  %v2150_v31 = vmax.f32 %v2086_v5, %v2118_v15 }
 0x214   : > { %v2020_v24 = vpop.f32.mrf.mxu1  ;;  %2432 = vmatmul.mubr.bf16.gmra.mxu0 %v2175_v13 }
 0x215   : > { %v2120_v28 = vmul.f32 0.01, %v2088_v17  ;;  %v2151_v29 = vmax.f32 %v2087_v10, %v2119_v16  ;;  %v2089_v36 = vadd.f32 %v10684_v27, %v2020_v24 }
 0x216   : > { %v2022_v30 = vpop.f32.mrf.mxu1 }
 0x217   : > { %v2152_v32 = vmax.f32 %v2088_v17, %v2120_v28  ;;  %v2090_v34 = vadd.f32 %v10680_v23, %v2022_v30  ;;  %v2177_v41 = vpack.c.bf16 %v2151_v29, %v2149_v35  ;;  %v2121_v46 = vmul.f32 0.01, %v2089_v36 }
 0x218   : > { %v2024_v37 = vpop.f32.mrf.mxu1 }
 0x219   : > { %v2091_v38 = vadd.f32 %v10684_v27, %v2024_v37  ;;  %v2178_v39 = vpack.c.bf16 %v2152_v32, %v2150_v31  ;;  %v2122_v42 = vmul.f32 0.01, %v2090_v34  ;;  %v2153_v57 = vmax.f32 %v2089_v36, %v2121_v46 }
 0x21a   : > { %v2026_v40 = vpop.f32.mrf.mxu1 }
 0x21b   : > { %v2123_v43 = vmul.f32 0.01, %v2091_v38  ;;  %v2092_v45 = vadd.f32 %v10680_v23, %v2026_v40  ;;  %2441 = vmatprep.mubr.bf16.mxu0 %v2178_v39  ;;  %v2154_v54 = vmax.f32 %v2090_v34, %v2122_v42 }
 0x21c   : > { %v2030_v47 = vpop.f32.mrf.mxu1  ;;  %2442 = vmatmul.mubr.bf16.gmra.mxu0 %v2177_v41 }
 0x21d   : > { %v2124_v48 = vmul.f32 0.01, %v2092_v45  ;;  %v2155_v49 = vmax.f32 %v2091_v38, %v2123_v43  ;;  %v2093_v58 = vadd.f32 %v10684_v27, %v2030_v47 }
 0x21e   : > { %v2032_v50 = vpop.f32.mrf.mxu1 }
 0x21f   : > { %v2156_v55 = vmax.f32 %v2092_v45, %v2124_v48  ;;  %v2094_v56 = vadd.f32 %v10680_v23, %v2032_v50  ;;  %v2179_v1 = vpack.c.bf16 %v2155_v49, %v2153_v57  ;;  %v2125_v5 = vmul.f32 0.01, %v2093_v58 }
 0x220   : > { %v2034_v59 = vpop.f32.mrf.mxu1 }
 0x221   : > { %v2095_v61 = vadd.f32 %v10684_v27, %v2034_v59  ;;  %v2180_v62 = vpack.c.bf16 %v2156_v55, %v2154_v54  ;;  %v2126_v2 = vmul.f32 0.01, %v2094_v56  ;;  %v2157_v15 = vmax.f32 %v2093_v58, %v2125_v5 }
 0x222   : > { %v2036_v0 = vpop.f32.mrf.mxu1 }
 0x223   : > { %v2127_v3 = vmul.f32 0.01, %v2095_v61  ;;  %v2096_v4 = vadd.f32 %v10680_v23, %v2036_v0  ;;  %2451 = vmatprep.mubr.bf16.mxu0 %v2180_v62  ;;  %v2158_v11 = vmax.f32 %v2094_v56, %v2126_v2 }
 0x224   : > { %v2040_v7 = vpop.f32.mrf.mxu1  ;;  %2452 = vmatmul.mubr.bf16.gmra.mxu0 %v2179_v1 }
 0x225   : > { %v2128_v8 = vmul.f32 0.01, %v2096_v4  ;;  %v2159_v9 = vmax.f32 %v2095_v61, %v2127_v3  ;;  %v2097_v16 = vadd.f32 %v10684_v27, %v2040_v7 }
 0x226   : > { %v2042_v10 = vpop.f32.mrf.mxu1 }
 0x227   : > { %v2160_v12 = vmax.f32 %v2096_v4, %v2128_v8  ;;  %v2098_v13 = vadd.f32 %v10680_v23, %v2042_v10  ;;  %v2181_v29 = vpack.c.bf16 %v2159_v9, %v2157_v15  ;;  %v2129_v34 = vmul.f32 0.01, %v2097_v16 }
 0x228   : > { %v2044_v17 = vpop.f32.mrf.mxu1 }
 0x229   : > { %v2099_v18 = vadd.f32 %v10684_v27, %v2044_v17  ;;  %v2182_v24 = vpack.c.bf16 %v2160_v12, %v2158_v11  ;;  %v2130_v30 = vmul.f32 0.01, %v2098_v13  ;;  %v2161_v42 = vmax.f32 %v2097_v16, %v2129_v34  ;;  %v9906_v34 = vld [vmem:[%s10355_s24 + $0x8] sm:$0xff]  }
 0x22a   : > { %v2046_v28 = vpop.f32.mrf.mxu1 }
 0x22b   : > { %v2131_v31 = vmul.f32 0.01, %v2099_v18  ;;  %v2100_v32 = vadd.f32 %v10680_v23, %v2046_v28  ;;  %2461 = vmatprep.mubr.bf16.mxu0 %v2182_v24  ;;  %v2162_v39 = vmax.f32 %v2098_v13, %v2130_v30  ;;  %v9903_v30 = vld [vmem:[%s10355_s24 + $0x50] sm:$0xff]  }
 0x22c   : > { %v2050_v35 = vpop.f32.mrf.mxu1  ;;  %2462 = vmatmul.mubr.bf16.gmra.mxu0 %v2181_v29  ;;  %v9901_v29 = vld [vmem:[%s10355_s24 + $0x58] sm:$0xff]  }
 0x22d   : > { %v2132_v36 = vmul.f32 0.01, %v2100_v32  ;;  %v2163_v37 = vmax.f32 %v2099_v18, %v2131_v31  ;;  %v2101_v43 = vadd.f32 %v10684_v27, %v2050_v35  ;;  %8891 = vmatprep.subr.bf16.mxu1 %v9901_v29  ;;  %v9904_v31 = vld [vmem:[%s10355_s24 + $0x10] sm:$0xff]   ;;  %v9907_v35 = vld [vmem:[%s10355_s24 + $0x40] sm:$0xff]  }
 0x22e   : > { %v2052_v38 = vpop.f32.mrf.mxu1 }
 0x22f   : > { %v2164_v40 = vmax.f32 %v2100_v32, %v2132_v36  ;;  %v2102_v41 = vadd.f32 %v10680_v23, %v2052_v38  ;;  %v2183_v49 = vpack.c.bf16 %v2163_v37, %v2161_v42  ;;  %v2133_v56 = vmul.f32 0.01, %v2101_v43  ;;  %v9905_v32 = vld [vmem:[%s10355_s24 + $0x48] sm:$0xff]   ;;  %v9908_v36 = vld [vmem:[%s10355_s24] sm:$0xff]   ;;  %v9909_v37 = vld [vmem:[%s10360_s30 + $0x38] sm:$0xff]  }
 0x230   : > { %v2054_v45 = vpop.f32.mrf.mxu1  ;;  %v9910_v38 = vld [vmem:[%s10360_s30 + $0x30] sm:$0xff]   ;;  %9329 = vmatprep.subr.bf16.mxu0 %v9909_v37 }
 0x231   : > { %v2103_v46 = vadd.f32 %v10684_v27, %v2054_v45  ;;  %v2184_v47 = vpack.c.bf16 %v2164_v40, %v2162_v39  ;;  %v2134_v50 = vmul.f32 0.01, %v2102_v41  ;;  %v2165_v2 = vmax.f32 %v2101_v43, %v2133_v56  ;;  %9330 = vmatpush3.bf16.msra.mxu0 %v9909_v37 }
 0x232   : > { %v2056_v48 = vpop.f32.mrf.mxu1  ;;  %9331 = vmatprep.subr.bf16.mxu0 %v9910_v38  ;;  %v10729_v39 = vsub.s32 1, %v10667_v19 }
 0x233   : > { %v2135_v54 = vmul.f32 0.01, %v2103_v46  ;;  %v2104_v55 = vadd.f32 %v10680_v23, %v2056_v48  ;;  %2471 = vmatprep.mubr.bf16.mxu0 %v2184_v47  ;;  %v2166_v62 = vmax.f32 %v2102_v41, %v2134_v50 }
 0x234   : > { %v2060_v57 = vpop.f32.mrf.mxu1  ;;  %2472 = vmatmul.mubr.bf16.gmra.mxu0 %v2183_v49  ;;  %12025 = vst [vmem:[#allocation33_spill] sm:$0xff] %v10729_v39  ;;  %v10733_v40 = vrot.slane %v10673_v21, %v10729_v39  ;;  %v10737_v41 = vrot.slane %v10676_v22, %v10729_v39 }
 0x235   : > { %v2136_v58 = vmul.f32 0.01, %v2104_v55  ;;  %v2167_v59 = vmax.f32 %v2103_v46, %v2135_v54  ;;  %v2105_v3 = vadd.f32 %v10684_v27, %v2060_v57  ;;  %9332 = vmatpush3.bf16.msra.mxu0 %v9910_v38 }
 0x236   : > { %v2062_v61 = vpop.f32.mrf.mxu1 }
 0x237   : > { %v2168_v0 = vmax.f32 %v2104_v55, %v2136_v58  ;;  %v2106_v1 = vadd.f32 %v10680_v23, %v2062_v61  ;;  %v2185_v9 = vpack.c.bf16 %v2167_v59, %v2165_v2  ;;  %v2137_v13 = vmul.f32 0.01, %v2105_v3 }
 0x238   : > { %v2064_v4 = vpop.f32.mrf.mxu1 }
 0x239   : > { %v2107_v5 = vadd.f32 %v10684_v27, %v2064_v4  ;;  %v2186_v7 = vpack.c.bf16 %v2168_v0, %v2166_v62  ;;  %v2138_v10 = vmul.f32 0.01, %v2106_v1  ;;  %v2169_v18 = vmax.f32 %v2105_v3, %v2137_v13 }
 0x23a   : > { %v2066_v8 = vpop.f32.mrf.mxu1 }
 0x23b   : > { %v2139_v11 = vmul.f32 0.01, %v2107_v5  ;;  %v2108_v12 = vadd.f32 %v10680_v23, %v2066_v8  ;;  %2481 = vmatprep.mubr.bf16.mxu0 %v2186_v7  ;;  %v2170_v17 = vmax.f32 %v2106_v1, %v2138_v10  ;;  %v9902_v23 = vld [vmem:[%s10355_s24 + $0x18] sm:$0xff]  }
 0x23c   : > { %2482 = vmatmul.mubr.bf16.gmra.mxu0 %v2185_v9  ;;  %8892 = vmatpush3.bf16.msra.mxu1 %v9902_v23 }
 0x23d   : > { %v2140_v15 = vmul.f32 0.01, %v2108_v12  ;;  %v2171_v16 = vmax.f32 %v2107_v5, %v2139_v11  ;;  %8893 = vmatprep.subr.bf16.mxu1 %v9903_v30 }
 0x23f   : > { %v2172_v27 = vmax.f32 %v2108_v12, %v2140_v15  ;;  %v2187_v28 = vpack.c.bf16 %v2171_v16, %v2169_v18 }
 0x240   : > { %8894 = vmatpush3.bf16.msra.mxu1 %v9904_v31 }
 0x241   : > { %v2188_v24 = vpack.c.bf16 %v2172_v27, %v2170_v17  ;;  %8895 = vmatprep.subr.bf16.mxu1 %v9905_v32 }
 0x243   : > { %2491 = vmatprep.mubr.bf16.mxu0 %v2188_v24 }
 0x244   : > { %2492 = vmatmul.mubr.bf16.gmra.mxu0 %v2187_v28  ;;  %8896 = vmatpush3.bf16.msra.mxu1 %v9906_v34 }
 0x245   : > { %8897 = vmatprep.subr.bf16.mxu1 %v9907_v35 }
 0x248   : > { %8898 = vmatpush3.bf16.msra.mxu1 %v9908_v36 }
 0x2cc   : > { %v2423_v42 = vpop.f32.mrf.mxu0 }
 0x2cd   : > { %v2424_v46 = vadd.f32 %v2423_v42, %v10737_v41 }
 0x2ce   : > { %v2425_v43 = vpop.f32.mrf.mxu0 }
 0x2cf   : > { %v2426_v45 = vadd.f32 %v2425_v43, %v10733_v40  ;;  %v2502_v21 = vmul.f32 0.01, %v2424_v46 }
 0x2d0   : > { %v2427_v47 = vpop.f32.mrf.mxu0 }
 0x2d1   : > { %v2428_v48 = vadd.f32 %v2427_v47, %v10737_v41  ;;  %v2503_v50 = vmul.f32 0.01, %v2426_v45  ;;  %v2534_v1 = vmax.f32 %v2424_v46, %v2502_v21 }
 0x2d2   : > { %v2429_v49 = vpop.f32.mrf.mxu0 }
 0x2d3   : > { %v2504_v54 = vmul.f32 0.01, %v2428_v48  ;;  %v2430_v55 = vadd.f32 %v2429_v49, %v10733_v40  ;;  %v2535_v61 = vmax.f32 %v2426_v45, %v2503_v50 }
 0x2d4   : > { %v2433_v56 = vpop.f32.mrf.mxu0 }
 0x2d5   : > { %v2505_v57 = vmul.f32 0.01, %v2430_v55  ;;  %v2536_v58 = vmax.f32 %v2428_v48, %v2504_v54  ;;  %v2434_v2 = vadd.f32 %v2433_v56, %v10737_v41 }
 0x2d6   : > { %v2435_v59 = vpop.f32.mrf.mxu0 }
 0x2d7   : > { %v2537_v62 = vmax.f32 %v2430_v55, %v2505_v57  ;;  %v2436_v0 = vadd.f32 %v2435_v59, %v10733_v40  ;;  %v2566_v7 = vpack.c.bf16 %v2536_v58, %v2534_v1  ;;  %v2506_v12 = vmul.f32 0.01, %v2434_v2 }
 0x2d8   : > { %v2437_v3 = vpop.f32.mrf.mxu0 }
 0x2d9   : > { %v2438_v4 = vadd.f32 %v2437_v3, %v10737_v41  ;;  %v2567_v5 = vpack.c.bf16 %v2537_v62, %v2535_v61  ;;  %v2507_v9 = vmul.f32 0.01, %v2436_v0  ;;  %v2538_v28 = vmax.f32 %v2434_v2, %v2506_v12 }
 0x2da   : > { %v2439_v8 = vpop.f32.mrf.mxu0 }
 0x2db   : > { %v2508_v10 = vmul.f32 0.01, %v2438_v4  ;;  %v2440_v11 = vadd.f32 %v2439_v8, %v10733_v40  ;;  %2746 = vmatprep.mubr.bf16.mxu1 %v2567_v5  ;;  %v2539_v27 = vmax.f32 %v2436_v0, %v2507_v9 }
 0x2dc   : > { %v2443_v13 = vpop.f32.mrf.mxu0  ;;  %2747 = vmatmul.mubr.bf16.vlgmr.msra.gmra.mxu1 %v2566_v7 }
 0x2dd   : > { %v2509_v15 = vmul.f32 0.01, %v2440_v11  ;;  %v2540_v16 = vmax.f32 %v2438_v4, %v2508_v10  ;;  %v2444_v29 = vadd.f32 %v2443_v13, %v10737_v41 }
 0x2de   : > { %v2445_v17 = vpop.f32.mrf.mxu0 }
 0x2df   : > { %v2541_v18 = vmax.f32 %v2440_v11, %v2509_v15  ;;  %v2446_v24 = vadd.f32 %v2445_v17, %v10733_v40  ;;  %v2568_v34 = vpack.c.bf16 %v2540_v16, %v2538_v28  ;;  %v2510_v38 = vmul.f32 0.01, %v2444_v29 }
 0x2e0   : > { %v2447_v23 = vpop.f32.mrf.mxu0 }
 0x2e1   : > { %v2448_v30 = vadd.f32 %v2447_v23, %v10737_v41  ;;  %v2569_v31 = vpack.c.bf16 %v2541_v18, %v2539_v27  ;;  %v2511_v35 = vmul.f32 0.01, %v2446_v24  ;;  %v2542_v50 = vmax.f32 %v2444_v29, %v2510_v38 }
 0x2e2   : > { %v2449_v32 = vpop.f32.mrf.mxu0 }
 0x2e3   : > { %v2512_v36 = vmul.f32 0.01, %v2448_v30  ;;  %v2450_v37 = vadd.f32 %v2449_v32, %v10733_v40  ;;  %2754 = vmatprep.mubr.bf16.mxu1 %v2569_v31  ;;  %v2543_v47 = vmax.f32 %v2446_v24, %v2511_v35 }
 0x2e4   : > { %v2453_v42 = vpop.f32.mrf.mxu0  ;;  %2755 = vmatmul.mubr.bf16.gmra.mxu1 %v2568_v34 }
 0x2e5   : > { %v2513_v43 = vmul.f32 0.01, %v2450_v37  ;;  %v2544_v45 = vmax.f32 %v2448_v30, %v2512_v36  ;;  %v2454_v54 = vadd.f32 %v2453_v42, %v10737_v41 }
 0x2e6   : > { %v2455_v46 = vpop.f32.mrf.mxu0 }
 0x2e7   : > { %v2545_v48 = vmax.f32 %v2450_v37, %v2513_v43  ;;  %v2456_v49 = vadd.f32 %v2455_v46, %v10733_v40  ;;  %v2570_v58 = vpack.c.bf16 %v2544_v45, %v2542_v50  ;;  %v2514_v0 = vmul.f32 0.01, %v2454_v54 }
 0x2e8   : > { %v2457_v55 = vpop.f32.mrf.mxu0 }
 0x2e9   : > { %v2458_v21 = vadd.f32 %v2457_v55, %v10737_v41  ;;  %v2571_v56 = vpack.c.bf16 %v2545_v48, %v2543_v47  ;;  %v2515_v59 = vmul.f32 0.01, %v2456_v49  ;;  %v2546_v9 = vmax.f32 %v2454_v54, %v2514_v0 }
 0x2ea   : > { %v2459_v57 = vpop.f32.mrf.mxu0 }
 0x2eb   : > { %v2516_v61 = vmul.f32 0.01, %v2458_v21  ;;  %v2460_v62 = vadd.f32 %v2459_v57, %v10733_v40  ;;  %2762 = vmatprep.mubr.bf16.mxu1 %v2571_v56  ;;  %v2547_v5 = vmax.f32 %v2456_v49, %v2515_v59 }
 0x2ec   : > { %v2463_v1 = vpop.f32.mrf.mxu0  ;;  %2763 = vmatmul.mubr.bf16.gmra.mxu1 %v2570_v58 }
 0x2ed   : > { %v2517_v2 = vmul.f32 0.01, %v2460_v62  ;;  %v2548_v3 = vmax.f32 %v2458_v21, %v2516_v61  ;;  %v2464_v10 = vadd.f32 %v2463_v1, %v10737_v41 }
 0x2ee   : > { %v2465_v4 = vpop.f32.mrf.mxu0 }
 0x2ef   : > { %v2549_v7 = vmax.f32 %v2460_v62, %v2517_v2  ;;  %v2466_v8 = vadd.f32 %v2465_v4, %v10733_v40  ;;  %v2572_v16 = vpack.c.bf16 %v2548_v3, %v2546_v9  ;;  %v2518_v24 = vmul.f32 0.01, %v2464_v10 }
 0x2f0   : > { %v2467_v11 = vpop.f32.mrf.mxu0 }
 0x2f1   : > { %v2468_v12 = vadd.f32 %v2467_v11, %v10737_v41  ;;  %v2573_v13 = vpack.c.bf16 %v2549_v7, %v2547_v5  ;;  %v2519_v17 = vmul.f32 0.01, %v2466_v8  ;;  %v2550_v35 = vmax.f32 %v2464_v10, %v2518_v24 }
 0x2f2   : > { %v2469_v15 = vpop.f32.mrf.mxu0 }
 0x2f3   : > { %v2520_v27 = vmul.f32 0.01, %v2468_v12  ;;  %v2470_v18 = vadd.f32 %v2469_v15, %v10733_v40  ;;  %2770 = vmatprep.mubr.bf16.mxu1 %v2573_v13  ;;  %v2551_v31 = vmax.f32 %v2466_v8, %v2519_v17 }
 0x2f4   : > { %v2473_v28 = vpop.f32.mrf.mxu0  ;;  %2771 = vmatmul.mubr.bf16.gmra.mxu1 %v2572_v16 }
 0x2f5   : > { %v2521_v29 = vmul.f32 0.01, %v2470_v18  ;;  %v2552_v23 = vmax.f32 %v2468_v12, %v2520_v27  ;;  %v2474_v36 = vadd.f32 %v2473_v28, %v10737_v41 }
 0x2f6   : > { %v2475_v30 = vpop.f32.mrf.mxu0 }
 0x2f7   : > { %v2553_v32 = vmax.f32 %v2470_v18, %v2521_v29  ;;  %v2476_v34 = vadd.f32 %v2475_v30, %v10733_v40  ;;  %v2574_v45 = vpack.c.bf16 %v2552_v23, %v2550_v35  ;;  %v2522_v49 = vmul.f32 0.01, %v2474_v36 }
 0x2f8   : > { %v2477_v37 = vpop.f32.mrf.mxu0 }
 0x2f9   : > { %v2478_v38 = vadd.f32 %v2477_v37, %v10737_v41  ;;  %v2575_v42 = vpack.c.bf16 %v2553_v32, %v2551_v31  ;;  %v2523_v46 = vmul.f32 0.01, %v2476_v34  ;;  %v2554_v59 = vmax.f32 %v2474_v36, %v2522_v49  ;;  %v9916_v49 = vld [vmem:[%s10360_s30] sm:$0xff]  }
 0x2fa   : > { %v2479_v43 = vpop.f32.mrf.mxu0 }
 0x2fb   : > { %v2524_v47 = vmul.f32 0.01, %v2478_v38  ;;  %v2480_v48 = vadd.f32 %v2479_v43, %v10733_v40  ;;  %2778 = vmatprep.mubr.bf16.mxu1 %v2575_v42  ;;  %v2555_v56 = vmax.f32 %v2476_v34, %v2523_v46  ;;  %v9913_v46 = vld [vmem:[%s10360_s30 + $0x18] sm:$0xff]  }
 0x2fc   : > { %v2483_v50 = vpop.f32.mrf.mxu0  ;;  %2779 = vmatmul.mubr.bf16.gmra.mxu1 %v2574_v45  ;;  %v9911_v45 = vld [vmem:[%s10360_s30 + $0x28] sm:$0xff]  }
 0x2fd   : > { %v2525_v54 = vmul.f32 0.01, %v2480_v48  ;;  %v2556_v55 = vmax.f32 %v2478_v38, %v2524_v47  ;;  %v2484_v61 = vadd.f32 %v2483_v50, %v10737_v41  ;;  %9333 = vmatprep.subr.bf16.mxu0 %v9911_v45  ;;  %v9914_v47 = vld [vmem:[%s10360_s30 + $0x10] sm:$0xff]   ;;  %v10152_v50 = vld [vmem:[%s10335_s3] sm:$0xff] }
 0x2fe   : > { %v2485_v21 = vpop.f32.mrf.mxu0  ;;  %9334 = vmatpush3.bf16.msra.mxu0 %v9911_v45 }
 0x2ff   : > { %v2557_v57 = vmax.f32 %v2480_v48, %v2525_v54  ;;  %v2486_v58 = vadd.f32 %v2485_v21, %v10733_v40  ;;  %v2576_v3 = vpack.c.bf16 %v2556_v55, %v2554_v59  ;;  %v2526_v8 = vmul.f32 0.01, %v2484_v61  ;;  %v9915_v48 = vld [vmem:[%s10360_s30 + $0x8] sm:$0xff]  }
 0x300   : > { %v2487_v62 = vpop.f32.mrf.mxu0  ;;  %v10779_v54 = vsub.s32 2, %v10667_v19 }
 0x301   : > { %v2488_v0 = vadd.f32 %v2487_v62, %v10737_v41  ;;  %v2577_v1 = vpack.c.bf16 %v2557_v57, %v2555_v56  ;;  %v2527_v4 = vmul.f32 0.01, %v2486_v58  ;;  %v2558_v17 = vmax.f32 %v2484_v61, %v2526_v8 }
 0x302   : > { %v2489_v2 = vpop.f32.mrf.mxu0  ;;  %12026 = vst [vmem:[#allocation34_spill] sm:$0xff] %v10779_v54  ;;  %v10783_v21 = vrot.slane %v10676_v22, %v10779_v54 }
 0x303   : > { %v2528_v5 = vmul.f32 0.01, %v2488_v0  ;;  %v2490_v7 = vadd.f32 %v2489_v2, %v10733_v40  ;;  %2786 = vmatprep.mubr.bf16.mxu1 %v2577_v1  ;;  %v2559_v13 = vmax.f32 %v2486_v58, %v2527_v4 }
 0x304   : > { %v2493_v9 = vpop.f32.mrf.mxu0  ;;  %2787 = vmatmul.mubr.bf16.gmra.mxu1 %v2576_v3 }
 0x305   : > { %v2529_v10 = vmul.f32 0.01, %v2490_v7  ;;  %v2560_v11 = vmax.f32 %v2488_v0, %v2528_v5  ;;  %v2494_v27 = vadd.f32 %v2493_v9, %v10737_v41 }
 0x306   : > { %v2495_v12 = vpop.f32.mrf.mxu0 }
 0x307   : > { %v2561_v15 = vmax.f32 %v2490_v7, %v2529_v10  ;;  %v2496_v16 = vadd.f32 %v2495_v12, %v10733_v40  ;;  %v2578_v23 = vpack.c.bf16 %v2560_v11, %v2558_v17  ;;  %v2530_v34 = vmul.f32 0.01, %v2494_v27 }
 0x308   : > { %v2497_v18 = vpop.f32.mrf.mxu0 }
 0x309   : > { %v2498_v24 = vadd.f32 %v2497_v18, %v10737_v41  ;;  %v2579_v28 = vpack.c.bf16 %v2561_v15, %v2559_v13  ;;  %v2531_v30 = vmul.f32 0.01, %v2496_v16  ;;  %v2562_v42 = vmax.f32 %v2494_v27, %v2530_v34 }
 0x30a   : > { %v2499_v29 = vpop.f32.mrf.mxu0 }
 0x30b   : > { %v2532_v31 = vmul.f32 0.01, %v2498_v24  ;;  %v2500_v32 = vadd.f32 %v2499_v29, %v10733_v40  ;;  %2794 = vmatprep.mubr.bf16.mxu1 %v2579_v28  ;;  %v2563_v37 = vmax.f32 %v2496_v16, %v2531_v30  ;;  %v9912_v40 = vld [vmem:[%s10360_s30 + $0x20] sm:$0xff]  }
 0x30c   : > { %2795 = vmatmul.mubr.bf16.gmra.mxu1 %v2578_v23  ;;  %9335 = vmatprep.subr.bf16.mxu0 %v9912_v40 }
 0x30d   : > { %v2533_v35 = vmul.f32 0.01, %v2500_v32  ;;  %v2564_v36 = vmax.f32 %v2498_v24, %v2532_v31  ;;  %9336 = vmatpush3.bf16.msra.mxu0 %v9912_v40 }
 0x30e   : > { %9337 = vmatprep.subr.bf16.mxu0 %v9913_v46 }
 0x30f   : > { %v2565_v38 = vmax.f32 %v2500_v32, %v2533_v35  ;;  %v2580_v43 = vpack.c.bf16 %v2564_v36, %v2562_v42 }
 0x311   : > { %v2581_v41 = vpack.c.bf16 %v2565_v38, %v2563_v37  ;;  %9338 = vmatpush3.bf16.msra.mxu0 %v9913_v46 }
 0x312   : > { %9339 = vmatprep.subr.bf16.mxu0 %v9914_v47 }
 0x313   : > { %2802 = vmatprep.mubr.bf16.mxu1 %v2581_v41 }
 0x314   : > { %2803 = vmatmul.mubr.bf16.gmra.mxu1 %v2580_v43 }
 0x315   : > { %9340 = vmatpush3.bf16.msra.mxu0 %v9914_v47 }
 0x316   : > { %9341 = vmatprep.subr.bf16.mxu0 %v9915_v48 }
 0x319   : > { %9342 = vmatpush3.bf16.msra.mxu0 %v9915_v48 }
 0x31a   : > { %9343 = vmatprep.subr.bf16.mxu0 %v9916_v49 }
 0x31d   : > { %9344 = vmatpush3.bf16.msra.mxu0 %v9916_v49 }
 0x31e   : > { %9396 = vmatprep.subr.mxu0 %v10152_v50 }
 0x39c   : > { %v8899_v55 = vpop.f32.mrf.mxu1 }
 0x39e   : > { %v8900_v56 = vpop.f32.mrf.mxu1 }
 0x39f   : > { %v8901_v57 = vadd.f32 %v8900_v56, %v8899_v55 }
 0x3a0   : > { %v8902_v58 = vpop.f32.mrf.mxu1 }
 0x3a1   : > { %v2749_v59 = vadd.f32 %v8901_v57, %v10783_v21 }
 0x3a2   : > { %v8903_v61 = vpop.f32.mrf.mxu1 }
 0x3a3   : > { %v8904_v62 = vadd.f32 %v8903_v61, %v8902_v58  ;;  %v2811_v1 = vmul.f32 0.01, %v2749_v59 }
 0x3a4   : > { %v8905_v0 = vpop.f32.mrf.mxu1 }
 0x3a5   : > { %v2752_v2 = vadd.f32 %v8904_v62, %v10783_v21  ;;  %v2827_v8 = vmax.f32 %v2749_v59, %v2811_v1 }
 0x3a6   : > { %v8906_v3 = vpop.f32.mrf.mxu1 }
 0x3a7   : > { %v2812_v4 = vmul.f32 0.01, %v2752_v2  ;;  %v8907_v5 = vadd.f32 %v8906_v3, %v8905_v0 }
 0x3a8   : > { %v8908_v7 = vpop.f32.mrf.mxu1 }
 0x3a9   : > { %v2828_v9 = vmax.f32 %v2752_v2, %v2812_v4  ;;  %v2757_v10 = vadd.f32 %v8907_v5, %v10783_v21 }
 0x3aa   : > { %v8909_v11 = vpop.f32.mrf.mxu1 }
 0x3ab   : > { %v8910_v12 = vadd.f32 %v8909_v11, %v8908_v7  ;;  %v2843_v13 = vpack.c.bf16 %v2828_v9, %v2827_v8  ;;  %v2813_v16 = vmul.f32 0.01, %v2757_v10 }
 0x3ac   : > { %v8911_v15 = vpop.f32.mrf.mxu1 }
 0x3ad   : > { %v2760_v17 = vadd.f32 %v8910_v12, %v10783_v21  ;;  %9345 = vmatprep.mubr.bf16.mxu0 %v2843_v13  ;;  %v2829_v29 = vmax.f32 %v2757_v10, %v2813_v16 }
 0x3ae   : > { %v8912_v27 = vpop.f32.mrf.mxu1 }
 0x3af   : > { %v2814_v18 = vmul.f32 0.01, %v2760_v17  ;;  %v8913_v24 = vadd.f32 %v8912_v27, %v8911_v15 }
 0x3b0   : > { %v8914_v28 = vpop.f32.mrf.mxu1 }
 0x3b1   : > { %v2830_v23 = vmax.f32 %v2760_v17, %v2814_v18  ;;  %v2765_v30 = vadd.f32 %v8913_v24, %v10783_v21 }
 0x3b2   : > { %v8915_v31 = vpop.f32.mrf.mxu1 }
 0x3b3   : > { %v2844_v32 = vpack.c.bf16 %v2830_v23, %v2829_v29  ;;  %v8916_v34 = vadd.f32 %v8915_v31, %v8914_v28  ;;  %v2815_v36 = vmul.f32 0.01, %v2765_v30 }
 0x3b4   : > { %v8917_v35 = vpop.f32.mrf.mxu1 }
 0x3b5   : > { %v2768_v37 = vadd.f32 %v8916_v34, %v10783_v21  ;;  %9346 = vmatmul.mubr.bf16.vlgmr.msra.gmra.mxu0 %v2844_v32  ;;  %v2831_v45 = vmax.f32 %v2765_v30, %v2815_v36 }
 0x3b6   : > { %v8918_v38 = vpop.f32.mrf.mxu1  ;;  %9397 = vmatpush3.msra.mxu0 %v10152_v50 }
 0x3b7   : > { %v2816_v42 = vmul.f32 0.01, %v2768_v37  ;;  %v8919_v41 = vadd.f32 %v8918_v38, %v8917_v35 }
 0x3b8   : > { %v8920_v43 = vpop.f32.mrf.mxu1 }
 0x3b9   : > { %v2832_v40 = vmax.f32 %v2768_v37, %v2816_v42  ;;  %v2773_v46 = vadd.f32 %v8919_v41, %v10783_v21 }
 0x3ba   : > { %v8921_v47 = vpop.f32.mrf.mxu1 }
 0x3bb   : > { %v8922_v48 = vadd.f32 %v8921_v47, %v8920_v43  ;;  %v2845_v49 = vpack.c.bf16 %v2832_v40, %v2831_v45  ;;  %v2817_v56 = vmul.f32 0.01, %v2773_v46 }
 0x3bc   : > { %v8923_v55 = vpop.f32.mrf.mxu1 }
 0x3bd   : > { %v2776_v57 = vadd.f32 %v8922_v48, %v10783_v21  ;;  %9349 = vmatprep.mubr.bf16.mxu0 %v2845_v49  ;;  %v2833_v50 = vmax.f32 %v2773_v46, %v2817_v56 }
 0x3be   : > { %v8924_v58 = vpop.f32.mrf.mxu1 }
 0x3bf   : > { %v2818_v59 = vmul.f32 0.01, %v2776_v57  ;;  %v8925_v61 = vadd.f32 %v8924_v58, %v8923_v55 }
 0x3c0   : > { %v8926_v62 = vpop.f32.mrf.mxu1 }
 0x3c1   : > { %v2834_v0 = vmax.f32 %v2776_v57, %v2818_v59  ;;  %v2781_v1 = vadd.f32 %v8925_v61, %v10783_v21 }
 0x3c2   : > { %v8927_v2 = vpop.f32.mrf.mxu1 }
 0x3c3   : > { %v8928_v3 = vadd.f32 %v8927_v2, %v8926_v62  ;;  %v2846_v4 = vpack.c.bf16 %v2834_v0, %v2833_v50  ;;  %v2819_v7 = vmul.f32 0.01, %v2781_v1 }
 0x3c4   : > { %v8929_v5 = vpop.f32.mrf.mxu1 }
 0x3c5   : > { %v2784_v8 = vadd.f32 %v8928_v3, %v10783_v21  ;;  %9350 = vmatmul.mubr.bf16.gmra.mxu0 %v2846_v4  ;;  %v2835_v13 = vmax.f32 %v2781_v1, %v2819_v7 }
 0x3c6   : > { %v8930_v9 = vpop.f32.mrf.mxu1 }
 0x3c7   : > { %v2820_v10 = vmul.f32 0.01, %v2784_v8  ;;  %v8931_v11 = vadd.f32 %v8930_v9, %v8929_v5 }
 0x3c8   : > { %v8932_v12 = vpop.f32.mrf.mxu1 }
 0x3c9   : > { %v2836_v15 = vmax.f32 %v2784_v8, %v2820_v10  ;;  %v2789_v16 = vadd.f32 %v8931_v11, %v10783_v21 }
 0x3ca   : > { %v8933_v17 = vpop.f32.mrf.mxu1 }
 0x3cb   : > { %v8934_v27 = vadd.f32 %v8933_v17, %v8932_v12  ;;  %v2847_v18 = vpack.c.bf16 %v2836_v15, %v2835_v13  ;;  %v2821_v28 = vmul.f32 0.01, %v2789_v16  ;;  %v10808_v15 = vsub.s32 3, %v10667_v19 }
 0x3cc   : > { %v8935_v24 = vpop.f32.mrf.mxu1 }
 0x3cd   : > { %v2792_v29 = vadd.f32 %v8934_v27, %v10783_v21  ;;  %9353 = vmatprep.mubr.bf16.mxu0 %v2847_v18  ;;  %v2837_v34 = vmax.f32 %v2789_v16, %v2821_v28  ;;  %12027 = vst [vmem:[#allocation35_spill] sm:$0xff] %v10808_v15  ;;  %v2870_v27 = vrot.slane %v10676_v22, %v10808_v15 }
 0x3ce   : > { %v8936_v23 = vpop.f32.mrf.mxu1 }
 0x3cf   : > { %v2822_v30 = vmul.f32 0.01, %v2792_v29  ;;  %v8937_v31 = vadd.f32 %v8936_v23, %v8935_v24 }
 0x3d0   : > { %v8938_v32 = vpop.f32.mrf.mxu1 }
 0x3d1   : > { %v2838_v35 = vmax.f32 %v2792_v29, %v2822_v30  ;;  %v2797_v36 = vadd.f32 %v8937_v31, %v10783_v21 }
 0x3d2   : > { %v8939_v37 = vpop.f32.mrf.mxu1 }
 0x3d3   : > { %v8940_v38 = vadd.f32 %v8939_v37, %v8938_v32  ;;  %v2848_v42 = vpack.c.bf16 %v2838_v35, %v2837_v34  ;;  %v2823_v43 = vmul.f32 0.01, %v2797_v36 }
 0x3d4   : > { %v8941_v41 = vpop.f32.mrf.mxu1 }
 0x3d5   : > { %v2800_v45 = vadd.f32 %v8940_v38, %v10783_v21  ;;  %9354 = vmatmul.mubr.bf16.gmra.mxu0 %v2848_v42  ;;  %v2839_v49 = vmax.f32 %v2797_v36, %v2823_v43 }
 0x3d6   : > { %v8942_v40 = vpop.f32.mrf.mxu1 }
 0x3d7   : > { %v2824_v46 = vmul.f32 0.01, %v2800_v45  ;;  %v8943_v47 = vadd.f32 %v8942_v40, %v8941_v41  ;;  %v10813_v41 = vld [vmem:[%s10365_s6] ss:$0 sm:$0xff] }
 0x3d8   : > { %v8944_v48 = vpop.f32.mrf.mxu1 }
 0x3d9   : > { %v2840_v55 = vmax.f32 %v2800_v45, %v2824_v46  ;;  %v2805_v56 = vadd.f32 %v8943_v47, %v10783_v21 }
 0x3da   : > { %v8945_v57 = vpop.f32.mrf.mxu1 }
 0x3db   : > { %v8946_v58 = vadd.f32 %v8945_v57, %v8944_v48  ;;  %v2849_v59 = vpack.c.bf16 %v2840_v55, %v2839_v49  ;;  %v2825_v61 = vmul.f32 0.01, %v2805_v56 }
 0x3dd   : > { %v2808_v62 = vadd.f32 %v8946_v58, %v10783_v21  ;;  %9357 = vmatprep.mubr.bf16.mxu0 %v2849_v59  ;;  %v2841_v0 = vmax.f32 %v2805_v56, %v2825_v61 }
 0x3df   : > { %v2826_v50 = vmul.f32 0.01, %v2808_v62 }
 0x3e1   : > { %v2842_v1 = vmax.f32 %v2808_v62, %v2826_v50 }
 0x3e3   : > { %v2850_v2 = vpack.c.bf16 %v2842_v1, %v2841_v0 }
 0x3e5   : > { %9358 = vmatmul.mubr.bf16.gmra.mxu0 %v2850_v2 }
 0x475   : > { %v10801_v3 = vpop.f32.mrf.mxu0 }
 0x477   : > { %v10803_v4 = vpop.f32.mrf.mxu0 }
 0x479   : > { %v9348_v5 = vpop.f32.mrf.mxu0 }
 0x47b   : > { %v10805_v7 = vpop.f32.mrf.mxu0 }
 0x485   : > { %v9351_v8 = vpop.f32.mrf.mxu0 }
 0x486   : > { %v2978_v59 = vadd.f32 %v9351_v8, %v2870_v27 }
 0x487   : > { %v2969_v9 = vpop.f32.mrf.mxu0 }
 0x489   : > { %v9352_v10 = vpop.f32.mrf.mxu0 }
 0x48a   : > { %v2981_v55 = vadd.f32 %v9352_v10, %v2870_v27 }
 0x48b   : > { %v2972_v11 = vpop.f32.mrf.mxu0 }
 0x48c   : > { %v3023_v0 = vmul.f32 0.01, %v2981_v55  ;;  %v2973_v1 = vadd.f32 %v2972_v11, %v2870_v27 }
 0x48e   : > { %v3021_v8 = vmul.f32 0.01, %v2973_v1 }
 0x495   : > { %v9355_v12 = vpop.f32.mrf.mxu0 }
 0x496   : > { %v2994_v36 = vadd.f32 %v9355_v12, %v2870_v27 }
 0x497   : > { %v2985_v13 = vpop.f32.mrf.mxu0 }
 0x498   : > { %v3026_v46 = vmul.f32 0.01, %v2994_v36  ;;  %v2986_v47 = vadd.f32 %v2985_v13, %v2870_v27  ;;  %v3022_v13 = vmul.f32 0.01, %v2978_v59 }
 0x499   : > { %v9356_v21 = vpop.f32.mrf.mxu0 }
 0x49a   : > { %v2997_v30 = vadd.f32 %v9356_v21, %v2870_v27  ;;  %v3042_v61 = vmax.f32 %v2994_v36, %v3026_v46  ;;  %v3024_v62 = vmul.f32 0.01, %v2986_v47  ;;  %v2970_v21 = vadd.f32 %v2969_v9, %v2870_v27  ;;  %v1431_v46 = vld [vmem:[%s10325_s25] sm:$0xff] }
 0x49b   : > { %v2988_v16 = vpop.f32.mrf.mxu0  ;;  %v2957_v9 = vadd.f32 %v10805_v7, %v2870_v27  ;;  %9393 = vmatprep.mubr.f32.mxu1 %v1431_v46  ;;  %v1432_v46 = vld [vmem:[%s10325_s25 + $0x8] sm:$0xff] }
 0x49c   : > { %v3027_v42 = vmul.f32 0.01, %v2997_v30  ;;  %v2989_v43 = vadd.f32 %v2988_v16, %v2870_v27  ;;  %v3065_v10 = vmul.f32 %v10813_v41, %v3042_v61  ;;  %v3040_v16 = vmax.f32 %v2986_v47, %v3024_v62  ;;  %v1448_v47 = vld [vmem:[%s10330_s29 + $0x78] sm:$0xff]  ;;  %v1445_v61 = vld [vmem:[%s10330_s29 + $0x60] sm:$0xff] }
 0x49d   : > { %v3020_v11 = vmul.f32 0.01, %v2970_v21 }
 0x49e   : > { %v3043_v56 = vmax.f32 %v2997_v30, %v3027_v42  ;;  %v3025_v57 = vmul.f32 0.01, %v2989_v43 }
 0x4a0   : > { %v3041_v2 = vmax.f32 %v2989_v43, %v3025_v57  ;;  %v3066_v12 = vmul.f32 %v10813_v41, %v3043_v56  ;;  %v1447_v56 = vld [vmem:[%s10330_s29 + $0x70] sm:$0xff]  ;;  %v1446_v57 = vld [vmem:[%s10330_s29 + $0x68] sm:$0xff] }
 0x4a5   : > { %v9359_v17 = vpop.f32.mrf.mxu0 }
 0x4a6   : > { %v3010_v24 = vadd.f32 %v9359_v17, %v2870_v27  ;;  %v2965_v17 = vadd.f32 %v9348_v5, %v2870_v27 }
 0x4a7   : > { %v3001_v18 = vpop.f32.mrf.mxu0 }
 0x4a8   : > { %v3002_v29 = vadd.f32 %v3001_v18, %v2870_v27  ;;  %v3030_v32 = vmul.f32 0.01, %v3010_v24  ;;  %v3039_v18 = vmax.f32 %v2981_v55, %v3023_v0  ;;  %v3019_v30 = vmul.f32 0.01, %v2965_v17 }
 0x4a9   : > { %v9360_v28 = vpop.f32.mrf.mxu0 }
 0x4aa   : > { %v3013_v23 = vadd.f32 %v9360_v28, %v2870_v27  ;;  %v3028_v37 = vmul.f32 0.01, %v3002_v29  ;;  %v3046_v22 = vmax.f32 %v3010_v24, %v3030_v32  ;;  %v3064_v24 = vmul.f32 %v10813_v41, %v3041_v2  ;;  %v1443_v2 = vld [vmem:[%s10330_s29 + $0x50] sm:$0xff] }
 0x4ab   : > { %v3004_v31 = vpop.f32.mrf.mxu0  ;;  %v2962_v28 = vadd.f32 %v10801_v3, %v2870_v27  ;;  %v3037_v32 = vmax.f32 %v2973_v1, %v3021_v8  ;;  %v3035_v3 = vmax.f32 %v2965_v17, %v3019_v30  ;;  %v1441_v17 = vld [vmem:[%s10330_s29 + $0x40] sm:$0xff] }
 0x4ac   : > { %v3031_v34 = vmul.f32 0.01, %v3013_v23  ;;  %v3005_v35 = vadd.f32 %v3004_v31, %v2870_v27  ;;  %v3044_v49 = vmax.f32 %v3002_v29, %v3028_v37  ;;  %v3069_v58 = vmul.f32 %v10813_v41, %v3046_v22 }
 0x4ad   : > { %v3038_v29 = vmax.f32 %v2978_v59, %v3022_v13  ;;  %v3062_v31 = vmul.f32 %v10813_v41, %v3039_v18  ;;  %v3018_v5 = vmul.f32 0.01, %v2962_v28  ;;  %v3017_v37 = vmul.f32 0.01, %v2957_v9 }
 0x4ae   : > { %v3029_v19 = vmul.f32 0.01, %v3005_v35  ;;  %v3047_v38 = vmax.f32 %v3013_v23, %v3031_v34  ;;  %v3067_v50 = vmul.f32 %v10813_v41, %v3044_v49  ;;  %v3063_v23 = vmul.f32 %v10813_v41, %v3040_v16 }
 0x4af   : > { %v2954_v34 = vadd.f32 %v10803_v4, %v2870_v27  ;;  %v3061_v36 = vmul.f32 %v10813_v41, %v3038_v29  ;;  %v3058_v43 = vmul.f32 %v10813_v41, %v3035_v3  ;;  %v3033_v4 = vmax.f32 %v2957_v9, %v3017_v37  ;;  %v1438_v9 = vld [vmem:[%s10330_s29 + $0x28] sm:$0xff] }
 0x4b0   : > { %v3070_v45 = vmul.f32 %v10813_v41, %v3047_v38  ;;  %v3045_v40 = vmax.f32 %v3005_v35, %v3029_v19  ;;  %v3036_v35 = vmax.f32 %v2970_v21, %v3020_v11  ;;  %v3060_v19 = vmul.f32 %v10813_v41, %v3037_v32  ;;  %v1442_v21 = vld [vmem:[%s10330_s29 + $0x48] sm:$0xff]  ;;  %v1439_v11 = vld [vmem:[%s10330_s29 + $0x30] sm:$0xff] }
 0x4b1   : > { %v3034_v38 = vmax.f32 %v2962_v28, %v3018_v5  ;;  %v3016_v42 = vmul.f32 0.01, %v2954_v34  ;;  %v1437_v5 = vld [vmem:[%s10330_s29 + $0x20] sm:$0xff] }
 0x4b2   : > { %3101 = vadd.xlane.f32.xlu0 %v3070_v45  ;;  %v3068_v48 = vmul.f32 %v10813_v41, %v3045_v40  ;;  %v3059_v7 = vmul.f32 %v10813_v41, %v3036_v35  ;;  %v3056_v45 = vmul.f32 %v10813_v41, %v3033_v4 }
 0x4b3   : > { %v3032_v27 = vmax.f32 %v2954_v34, %v3016_v42  ;;  %v3057_v22 = vmul.f32 %v10813_v41, %v3034_v38 }
 0x4b4   : > { %3097 = vadd.xlane.f32.xlu1 %v3068_v48 }
 0x4b5   : > { %v3055_v40 = vmul.f32 %v10813_v41, %v3032_v27  ;;  %v1444_v41 = vld [vmem:[%s10330_s29 + $0x58] sm:$0xff]  ;;  %v1433_v27 = vld [vmem:[%s10330_s29] sm:$0xff] }
 0x4b6   : > { %3099 = vadd.xlane.f32.xlu0 %v3069_v58 }
 0x4b8   : > { %3095 = vadd.xlane.f32.xlu1 %v3067_v50 }
 0x4ba   : > { %3093 = vadd.xlane.f32.xlu0 %v3066_v12 }
 0x4bc   : > { %3091 = vadd.xlane.f32.xlu1 %v3065_v10 }
 0x4be   : > { %3089 = vadd.xlane.f32.xlu0 %v3064_v24  ;;  %v1440_v24 = vld [vmem:[%s10330_s29 + $0x38] sm:$0xff] }
 0x4c0   : > { %3087 = vadd.xlane.f32.xlu1 %v3063_v23 }
 0x4c2   : > { %3085 = vadd.xlane.f32.xlu0 %v3062_v31 }
 0x4c4   : > { %3083 = vadd.xlane.f32.xlu1 %v3061_v36  ;;  %v1436_v36 = vld [vmem:[%s10330_s29 + $0x18] sm:$0xff] }
 0x4c6   : > { %3081 = vadd.xlane.f32.xlu0 %v3060_v19  ;;  %v1435_v19 = vld [vmem:[%s10330_s29 + $0x10] sm:$0xff] }
 0x4c8   : > { %3079 = vadd.xlane.f32.xlu1 %v3059_v7  ;;  %v1434_v7 = vld [vmem:[%s10330_s29 + $0x8] sm:$0xff] }
 0x4ca   : > { %3077 = vadd.xlane.f32.xlu0 %v3058_v43 }
 0x4cc   : > { %3075 = vadd.xlane.f32.xlu1 %v3057_v22 }
 0x4ce   : > { %3073 = vadd.xlane.f32.xlu0 %v3056_v45 }
 0x4d0   : > { %3071 = vadd.xlane.f32.xlu1 %v3055_v40 }
 0x53b   : > { %v3102_v48 = vpop.xlane.xlu0 %3101 }
 0x53c   : > { %v3118_v49 = vmul.f32 %v3102_v48, %v1448_v47  ;;  %v9917_v47 = vld [vmem:[%s10375_s20 + $0x8] ss:$0 sps:$4 sm:$0x11]   ;;  %v11957_v48 = vmov 0.0  }
 0x53d   : > { %v3098_v55 = vpop.xlane.xlu1 %3097  ;;  %9409 = vmatprep.subr.bf16.mxu0 %v11957_v48 }
 0x53e   : > { %9361 = vmatprep.subr.mxu1 %v3118_v49  ;;  %v3116_v50 = vmul.f32 %v3098_v55, %v1446_v57  ;;  %v9918_v55 = vld [vmem:[%s10375_s20] sm:$0xff]   ;;  %v1395_v57 = vld [vmem:[%s10864_s22 + $0x8] sm:$0xff] }
 0x53f   : > { %9362 = vmatpush3.msra.mxu1 %v3118_v49  ;;  %v3100_v58 = vpop.xlane.xlu0 %3099  ;;  %v3317_v49 = vsel %vm1949_vm2, %v9917_v47, 0 }
 0x540   : > { %v3117_v59 = vmul.f32 %v3100_v58, %v1447_v56  ;;  %v10153_v56 = vld [vmem:[%s10541_s15] sm:$0xff]  }
 0x541   : > { %v3096_v62 = vpop.xlane.xlu1 %3095 }
 0x542   : > { %9363 = vmatprep.subr.mxu1 %v3117_v59  ;;  %v3115_v1 = vmul.f32 %v3096_v62, %v1445_v61 }
 0x543   : > { %9364 = vmatpush3.msra.mxu1 %v3117_v59  ;;  %v3094_v0 = vpop.xlane.xlu0 %3093  ;;  %v1394_v59 = vld [vmem:[%s10864_s22] sm:$0xff] }
 0x544   : > { %9365 = vmatprep.subr.mxu1 %v3116_v50  ;;  %v3114_v13 = vmul.f32 %v3094_v0, %v1444_v41 }
 0x545   : > { %9366 = vmatpush3.msra.mxu1 %v3116_v50  ;;  %v3092_v12 = vpop.xlane.xlu1 %3091 }
 0x546   : > { %9367 = vmatprep.subr.mxu1 %v3115_v1  ;;  %v3113_v16 = vmul.f32 %v3092_v12, %v1443_v2 }
 0x547   : > { %v3090_v10 = vpop.xlane.xlu0 %3089  ;;  %9368 = vmatpush3.msra.mxu1 %v3115_v1 }
 0x548   : > { %9369 = vmatprep.subr.mxu1 %v3114_v13  ;;  %v3112_v8 = vmul.f32 %v3090_v10, %v1442_v21 }
 0x549   : > { %9370 = vmatpush3.msra.mxu1 %v3114_v13  ;;  %v3088_v18 = vpop.xlane.xlu1 %3087 }
 0x54a   : > { %9371 = vmatprep.subr.mxu1 %v3113_v16  ;;  %v3111_v29 = vmul.f32 %v3088_v18, %v1441_v17 }
 0x54b   : > { %v3086_v28 = vpop.xlane.xlu0 %3085  ;;  %9372 = vmatpush3.msra.mxu1 %v3113_v16 }
 0x54c   : > { %9373 = vmatprep.subr.mxu1 %v3112_v8  ;;  %v3110_v30 = vmul.f32 %v3086_v28, %v1440_v24 }
 0x54d   : > { %9374 = vmatpush3.msra.mxu1 %v3112_v8  ;;  %v3084_v23 = vpop.xlane.xlu1 %3083 }
 0x54e   : > { %9375 = vmatprep.subr.mxu1 %v3111_v29  ;;  %v3109_v32 = vmul.f32 %v3084_v23, %v1439_v11 }
 0x54f   : > { %v3082_v31 = vpop.xlane.xlu0 %3081  ;;  %9376 = vmatpush3.msra.mxu1 %v3111_v29 }
 0x550   : > { %9377 = vmatprep.subr.mxu1 %v3110_v30  ;;  %v3108_v35 = vmul.f32 %v3082_v31, %v1438_v9  ;;  %v9919_v9 = vld [vmem:[%s12029_s23 + $0x8] ss:$0 sps:$4 sm:$0x11]  }
 0x551   : > { %9378 = vmatpush3.msra.mxu1 %v3110_v30  ;;  %v3080_v34 = vpop.xlane.xlu1 %3079 }
 0x552   : > { %9379 = vmatprep.subr.mxu1 %v3109_v32  ;;  %v3107_v37 = vmul.f32 %v3080_v34, %v1437_v5 }
 0x553   : > { %v3078_v3 = vpop.xlane.xlu0 %3077  ;;  %9380 = vmatpush3.msra.mxu1 %v3109_v32 }
 0x554   : > { %9381 = vmatprep.subr.mxu1 %v3108_v35  ;;  %v3106_v42 = vmul.f32 %v3078_v3, %v1436_v36  ;;  %v9920_v36 = vld [vmem:[%s12029_s23] sm:$0xff]  }
 0x555   : > { %9382 = vmatpush3.msra.mxu1 %v3108_v35  ;;  %v3076_v38 = vpop.xlane.xlu1 %3075  ;;  %v3373_v35 = vsel %vm1949_vm2, %v9919_v9, 0  ;;  %v1397_v3 = vld [vmem:[%s12030_s26] sm:$0xff]  ;;  %v10164_v9 = vld [vmem:[%s10315_s17 + $0x28] sm:$0xff]  }
 0x556   : > { %9383 = vmatprep.subr.mxu1 %v3107_v37  ;;  %v3105_v4 = vmul.f32 %v3076_v38, %v1435_v19  ;;  %v1398_v19 = vld [vmem:[%s12030_s26 + $0x8] sm:$0xff] }
 0x557   : > { %v3074_v43 = vpop.xlane.xlu0 %3073  ;;  %9384 = vmatpush3.msra.mxu1 %v3107_v37  ;;  %v10882_v37 = vmul.f32 %v10610_v52, %v1397_v3  ;;  %v10889_v38 = vmul.f32 %v10608_v51, %v1398_v19 }
 0x558   : > { %9385 = vmatprep.subr.mxu1 %v3106_v42  ;;  %v3104_v45 = vmul.f32 %v3074_v43, %v1434_v7 }
 0x559   : > { %9386 = vmatpush3.msra.mxu1 %v3106_v42  ;;  %v3072_v22 = vpop.xlane.xlu1 %3071  ;;  %12031 = vst [vmem:[#allocation36_spill] sm:$0xff] %v10882_v37  ;;  %12032 = vst [vmem:[#allocation37_spill] sm:$0xff] %v10889_v38  ;;  %v10154_v42 = vld [vmem:[%s10320_s21] sm:$0xff]  }
 0x55a   : > { %9387 = vmatprep.subr.mxu1 %v3105_v4  ;;  %v3103_v40 = vmul.f32 %v3072_v22, %v1433_v27 }
 0x55b   : > { %9388 = vmatpush3.msra.mxu1 %v3105_v4 }
 0x55c   : > { %9389 = vmatprep.subr.mxu1 %v3104_v45 }
 0x55d   : > { %9390 = vmatpush3.msra.mxu1 %v3104_v45 }
 0x55e   : > { %9391 = vmatprep.subr.mxu1 %v3103_v40 }
 0x55f   : > { %9392 = vmatpush3.msra.mxu1 %v3103_v40  ;;  %v10155_v40 = vld [vmem:[%s10315_s17] sm:$0xff]  }
 0x560   : > { %9394 = vmatmul.mubr.f32.vlgmr.msra.gmra.mxu1 %v1432_v46  ;;  %9401 = vmatprep.subr.bf16.mxu1 %v11957_v48 }
 0x561   : > { %9405 = vmatprep.mubr.msk.bf16.mxu1 %vm10291_vm4, %v11957_v48  ;;  %9402 = vmatpush3.bf16.msra.mxu1 %v3317_v49  ;;  %v3579_v49 = vld [vmem:[%s12033_s28 + $0x8] sm:$0xff] }
 0x562   : > { %9403 = vmatprep.subr.bf16.mxu1 %v11957_v48 }
 0x565   : > { %9404 = vmatpush3.bf16.msra.mxu1 %v9918_v55 }
 0x568   : > { %9406 = vmatmul.mubr.msk.bf16.vlgmr.msra.gmra.mxu1 %vm1924_vm3, %v10153_v56 }
 0x620   : > { %v9395_v58 = vpop.f32.mrf.mxu1 }
 0x621   : > { %v3195_v61 = vsub.f32 %v9395_v58, %v1395_v57  ;;  %v3578_v58 = vld [vmem:[%s12033_s28] sm:$0xff] }
 0x622   : > { %v3185_v62 = vpop.f32.mrf.mxu1 }
 0x623   : > { %v3194_v50 = vsub.f32 %v3185_v62, %v1394_v59  ;;  %v3199_v41 = vsel %vm1451_vm1, %v3195_v61, -inf }
 0x624   : > { %3200 = vmax.xlane.f32.xlu1 %v3199_v41 }
 0x625   : > { %v3196_v0 = vsel %vm1451_vm1, %v3194_v50, -inf }
 0x626   : > { %3197 = vmax.xlane.f32.xlu0 %v3196_v0  ;;  %v3825_v0 = vld [vmem:[%s12034_s1 + $0x10] sm:$0x11] }
 0x628   : > { %v3353_v24 = vpop.f32.mrf.mxu1 }
 0x62a   : > { %v9407_v28 = vpop.f32.mrf.mxu1 }
 0x62b   : > { %v9923_v28 = vld [vmem:[%s12034_s1] ss:$8 sps:$4 sm:$0xff]  }
 0x62c   : > { %v3356_v29 = vpop.f32.mrf.mxu1 }
 0x62e   : > { %v9408_v11 = vpop.f32.mrf.mxu1 }
 0x62f   : > { %v10161_v11 = vld [vmem:[%s10320_s21 + $0x18] sm:$0xff]  }
 0x6ad   : > { %v3201_v1 = vpop.xlane.xlu1 %3200 }
 0x6ae   : > { %v3203_v2 = vsub.f32 %v3195_v61, %v3201_v1 }
 0x6af   : > { %v3198_v12 = vpop.xlane.xlu0 %3197 }
 0x6b0   : > { %v3206_v13 = vmul.f32 1.442695, %v3203_v2  ;;  %v3202_v21 = vsub.f32 %v3194_v50, %v3198_v12 }
 0x6b2   : > { %10128 = vpow2.f32 %v3206_v13  ;;  %v3204_v10 = vmul.f32 1.442695, %v3202_v21  ;;  %v8613_v13 = vcombine.high %v3825_v0, %v3825_v0  ;;  %v8612_v21 = vcombine.low %v3825_v0, %v3825_v0 }
 0x6b4   : > { %10130 = vpow2.f32 %v3204_v10  ;;  %v3842_v10 = vsel %vm1949_vm2, %v8612_v21, 0  ;;  %v9962_v21 = vld [vmem:[%s12037_s10 + $0xe0] ss:$8 sps:$4 sm:$0xff]  }
 0x6bf   : > { %v10129_v16 = vpop.eup %10128 }
 0x6c0   : > { %v3211_v17 = vsel %vm1451_vm1, %v10129_v16, 0.0 }
 0x6c1   : > { %v10131_v18 = vpop.eup %10130  ;;  %3212 = vadd.xlane.f32.xlu1 %v3211_v17  ;;  %v10156_v17 = vld [vmem:[%s10315_s17 + $0x8] sm:$0xff]  }
 0x6c2   : > { %v3208_v8 = vsel %vm1451_vm1, %v10131_v18, 0.0 }
 0x6c3   : > { %3209 = vadd.xlane.f32.xlu0 %v3208_v8  ;;  %v10158_v8 = vld [vmem:[%s10315_s17 + $0x10] sm:$0xff]  }
 0x74a   : > { %v3213_v23 = vpop.xlane.xlu1 %3212 }
 0x74b   : > { %10132 = vrcp.f32 %v3213_v23  ;;  %v10162_v23 = vld [vmem:[%s10315_s17 + $0x20] sm:$0xff]  }
 0x74c   : > { %v3210_v30 = vpop.xlane.xlu0 %3209 }
 0x74d   : > { %10134 = vrcp.f32 %v3210_v30  ;;  %v10163_v30 = vld [vmem:[%s10320_s21 + $0x20] sm:$0xff]  }
 0x758   : > { %v10133_v31 = vpop.eup %10132 }
 0x759   : > { %v3217_v34 = vmul.f32 %v10133_v31, %v10129_v16  ;;  %v9925_v16 = vld [vmem:[%s12034_s1 + $0x4] ss:$8 sps:$4 sm:$0xff]   ;;  %s12047_s1 = sld [smem:[#allocation13_spill]] }
 0x75a   : > { %v10135_v32 = vpop.eup %10134  ;;  %v10165_v31 = vld [vmem:[%s10320_s21 + $0x28] sm:$0xff]  }
 0x75b   : > { %v3216_v5 = vmul.f32 %v10135_v32, %v10131_v18  ;;  %v10157_v18 = vld [vmem:[%s10320_s21 + $0x8] sm:$0xff]   ;;  %v10166_v32 = vld [vmem:[%s10315_s17 + $0x30] sm:$0xff]  }
 0x75d   : > { %9398 = vmatprep.mubr.msk.f32.mxu0 %vm1451_vm1, %v3216_v5  ;;  %v10167_v5 = vld [vmem:[%s10320_s21 + $0x30] sm:$0xff]  }
 0x75e   : > { %9399 = vmatmul.mubr.msk.f32.vlgmr.msra.gmra.mxu0 %vm1451_vm1, %v3217_v34  ;;  %v10168_v34 = vld [vmem:[%s10315_s17 + $0x38] sm:$0xff]  }
 0x75f   : > { %9410 = vmatpush3.bf16.msra.mxu0 %v3373_v35  ;;  %9413 = vmatprep.mubr.msk.bf16.mxu0 %vm10291_vm4, %v11957_v48  ;;  %v10169_v35 = vld [vmem:[%s10320_s21 + $0x38] sm:$0xff]  }
 0x760   : > { %9411 = vmatprep.subr.bf16.mxu0 %v11957_v48 }
 0x763   : > { %9412 = vmatpush3.bf16.msra.mxu0 %v9920_v36  ;;  %v9928_v36 = vld [vmem:[%s12036_s2 + $0x24] ss:$8 sps:$4 sm:$0xff]  }
 0x764   : > { %9424 = vmatprep.subr.mxu0 %v3356_v29 }
 0x766   : > { %9414 = vmatmul.mubr.msk.bf16.vlgmr.msra.gmra.mxu0 %vm1924_vm3, %v10153_v56 }
 0x767   : > { %9428 = vmatprep.mubr.msk.f32.mxu0 %vm1581_vm0, %v10882_v37  ;;  %9425 = vmatpush3.msra.mxu0 %v3356_v29  ;;  %v10160_v29 = vld [vmem:[%s10315_s17 + $0x18] sm:$0xff]  }
 0x768   : > { %9426 = vmatprep.subr.mxu0 %v3353_v24 }
 0x769   : > { %9427 = vmatpush3.msra.mxu0 %v3353_v24  ;;  %v10159_v24 = vld [vmem:[%s10320_s21 + $0x10] sm:$0xff]  }
 0x76e   : > { %9429 = vmatmul.mubr.msk.f32.vlgmr.msra.gmra.mxu0 %vm1581_vm0, %v10889_v38 }
 0x76f   : > { %9451 = vmatprep.mubr.msk.bf16.mxu0 %vm1581_vm0, %v10154_v42  ;;  %v9929_v42 = vld [vmem:[%s12036_s2 + $0x10] ss:$8 sps:$4 sm:$0xff]  }
 0x81e   : > { %v9400_v52 = vpop.f32.mrf.mxu0 }
 0x81f   : > { %v3300_v45 = vmul.f32 %v9400_v52, %v1398_v19  ;;  %v9931_v19 = vld [vmem:[%s12036_s2 + $0x14] ss:$8 sps:$4 sm:$0xff]   ;;  %v9934_v52 = vld [vmem:[%s12036_s2 + $0x4] ss:$8 sps:$4 sm:$0xff]  }
 0x820   : > { %v3290_v7 = vpop.f32.mrf.mxu0 }
 0x821   : > { %v3299_v43 = vmul.f32 %v3290_v7, %v1397_v3  ;;  %v9926_v3 = vld [vmem:[%s12036_s2 + $0x20] ss:$8 sps:$4 sm:$0xff]  }
 0x822   : > { %v9932_v7 = vld [vmem:[%s12036_s2] ss:$8 sps:$4 sm:$0xff]   ;;  %s12048_s2 = sld [smem:[#allocation15_spill]] }
 0x823   : > { %9421 = vmatprep.mubr.msk.f32.mxu1 %vm1581_vm0, %v3299_v43  ;;  %v9935_v43 = vld [vmem:[%s12037_s10 + $0x70] ss:$8 sps:$4 sm:$0xff]  }
 0x826   : > { %v3409_v4 = vpop.f32.mrf.mxu0 }
 0x828   : > { %v9415_v27 = vpop.f32.mrf.mxu0 }
 0x829   : > { %v9940_v27 = vld [vmem:[%s12037_s10 + $0x64] ss:$8 sps:$4 sm:$0xff]  }
 0x82a   : > { %v3412_v22 = vpop.f32.mrf.mxu0 }
 0x82b   : > { %9417 = vmatprep.subr.mxu1 %v3412_v22 }
 0x82c   : > { %v9416_v51 = vpop.f32.mrf.mxu0  ;;  %9418 = vmatpush3.msra.mxu1 %v3412_v22  ;;  %v9938_v22 = vld [vmem:[%s12037_s10 + $0x60] ss:$8 sps:$4 sm:$0xff]  }
 0x82d   : > { %9419 = vmatprep.subr.mxu1 %v3409_v4  ;;  %v9943_v51 = vld [vmem:[%s12037_s10 + $0x54] ss:$8 sps:$4 sm:$0xff]  }
 0x82e   : > { %9420 = vmatpush3.msra.mxu1 %v3409_v4  ;;  %v9430_v46 = vpop.f32.mrf.mxu0  ;;  %v9937_v4 = vld [vmem:[%s12037_s10 + $0x74] ss:$8 sps:$4 sm:$0xff]  }
 0x82f   : > { %9422 = vmatmul.mubr.msk.f32.vlgmr.msra.gmra.mxu1 %vm1581_vm0, %v3300_v45  ;;  %v9941_v45 = vld [vmem:[%s12037_s10 + $0x50] ss:$8 sps:$4 sm:$0xff]  }
 0x830   : > { %9433 = vmatprep.mubr.msk.bf16.mxu1 %vm1581_vm0, %v10155_v40  ;;  %v3569_v56 = vpop.f32.mrf.mxu0  ;;  %v9946_v40 = vld [vmem:[%s12037_s10 + $0x44] ss:$8 sps:$4 sm:$0xff]  }
 0x8ef   : > { %v9423_v47 = vpop.f32.mrf.mxu1 }
 0x8f0   : > { %v3575_v55 = vadd.f32 %v9430_v46, %v9423_v47  ;;  %v9944_v46 = vld [vmem:[%s12037_s10 + $0x40] ss:$8 sps:$4 sm:$0xff]   ;;  %v9949_v47 = vld [vmem:[%s12037_s10 + $0x34] ss:$8 sps:$4 sm:$0xff]  }
 0x8f1   : > { %v3488_v57 = vpop.f32.mrf.mxu1 }
 0x8f2   : > { %v3581_v59 = vadd.f32 %v3579_v49, %v3575_v55  ;;  %v3570_v61 = vadd.f32 %v3569_v56, %v3488_v57  ;;  %v9947_v49 = vld [vmem:[%s12037_s10 + $0x30] ss:$8 sps:$4 sm:$0xff]   ;;  %v9952_v55 = vld [vmem:[%s12037_s10 + $0x24] ss:$8 sps:$4 sm:$0xff]   ;;  %v9950_v56 = vld [vmem:[%s12037_s10 + $0x20] ss:$8 sps:$4 sm:$0xff]  }
 0x8f3   : > { %v9955_v57 = vld [vmem:[%s12037_s10 + $0x14] ss:$8 sps:$4 sm:$0xff]  }
 0x8f4   : > { %v3583_v62 = vmul.f32 0.01, %v3581_v59  ;;  %v3580_v50 = vadd.f32 %v3578_v58, %v3570_v61  ;;  %v9953_v58 = vld [vmem:[%s12037_s10 + $0x10] ss:$8 sps:$4 sm:$0xff]   ;;  %v9956_v61 = vld [vmem:[%s12037_s10] ss:$8 sps:$4 sm:$0xff]  }
 0x8f6   : > { %v3582_v41 = vmul.f32 0.01, %v3580_v50  ;;  %v3585_v1 = vmax.f32 %v3581_v59, %v3583_v62  ;;  %v9958_v59 = vld [vmem:[%s12037_s10 + $0x4] ss:$8 sps:$4 sm:$0xff]   ;;  %v9961_v62 = vld [vmem:[%s12037_s10 + $0xf4] ss:$8 sps:$4 sm:$0xff]  }
 0x8f8   : > { %v3584_v2 = vmax.f32 %v3580_v50, %v3582_v41  ;;  %v9959_v50 = vld [vmem:[%s12037_s10 + $0xf0] ss:$8 sps:$4 sm:$0xff]   ;;  %v9964_v41 = vld [vmem:[%s12037_s10 + $0xe4] ss:$8 sps:$4 sm:$0xff]  }
 0x8fa   : > { %v10902_v12 = vpack.c.bf16 %v3585_v1, %v3584_v2 }
 0x8fc   : > { %12035 = vst [vmem:[#allocation38_spill] sm:$0xff] %v10902_v12  ;;  %9431 = vmatprep.subr.bf16.mxu1 %v10902_v12  ;;  %9449 = vmatprep.subr.bf16.mxu0 %v10902_v12 }
 0x8fd   : > { %9432 = vmatpush3.bf16.msra.mxu1 %v10902_v12  ;;  %9450 = vmatpush3.bf16.msra.mxu0 %v10902_v12 }
 0x8fe   : > { %8614 = vmatprep.subr.msk.bf16.mxu1 %vm1949_vm2, %v8613_v13  ;;  %4071 = vmatprep.subr.bf16.mxu0 %v9928_v36 }
 0x900   : > { %9434 = vmatmul.mubr.msk.bf16.vlgmr.msra.gmra.mxu1 %vm1581_vm0, %v10156_v17  ;;  %9452 = vmatmul.mubr.msk.bf16.vlgmr.msra.gmra.mxu0 %vm1581_vm0, %v10157_v18 }
 0x901   : > { %9437 = vmatprep.mubr.msk.bf16.mxu1 %vm1581_vm0, %v10158_v8  ;;  %9455 = vmatprep.mubr.msk.bf16.mxu0 %vm1581_vm0, %v10159_v24 }
 0x902   : > { %3860 = vmatpush1.bf16.msra.mxu1 %v3842_v10  ;;  %4072 = vmatpush1.bf16.msra.mxu0 %v9926_v3  ;;  %v9967_v10 = vld [vmem:[%s12037_s10 + $0xd4] ss:$8 sps:$4 sm:$0xff]  }
 0x903   : > { %3861 = vmatprep.subr.bf16.mxu1 %v9925_v16  ;;  %4073 = vmatprep.subr.bf16.mxu0 %v9931_v19 }
 0x906   : > { %3862 = vmatpush1.bf16.msra.mxu1 %v9923_v28  ;;  %4074 = vmatpush1.bf16.msra.mxu0 %v9929_v42  ;;  %v9965_v28 = vld [vmem:[%s12037_s10 + $0xd0] ss:$8 sps:$4 sm:$0xff]  }
 0x907   : > { %4075 = vmatprep.subr.bf16.mxu0 %v9934_v52  ;;  %4486 = vmatprep.subr.bf16.mxu1 %v9937_v4 }
 0x908   : > { %9438 = vmatmul.mubr.msk.bf16.gmra.mxu1 %vm1581_vm0, %v10160_v29  ;;  %9456 = vmatmul.mubr.msk.bf16.gmra.mxu0 %vm1581_vm0, %v10161_v11  ;;  %v9970_v11 = vld [vmem:[%s12037_s10 + $0xc4] ss:$8 sps:$4 sm:$0xff]  }
 0x909   : > { %9441 = vmatprep.mubr.msk.bf16.mxu1 %vm1581_vm0, %v10162_v23  ;;  %9459 = vmatprep.mubr.msk.bf16.mxu0 %vm1581_vm0, %v10163_v30 }
 0x90a   : > { %4076 = vmatpush1.bf16.msra.mxu0 %v9932_v7 }
 0x910   : > { %9442 = vmatmul.mubr.msk.bf16.gmra.mxu1 %vm1581_vm0, %v10164_v9  ;;  %9460 = vmatmul.mubr.msk.bf16.gmra.mxu0 %vm1581_vm0, %v10165_v31 }
 0x911   : > { %9445 = vmatprep.mubr.msk.bf16.mxu1 %vm1581_vm0, %v10166_v32  ;;  %9463 = vmatprep.mubr.msk.bf16.mxu0 %vm1581_vm0, %v10167_v5 }
 0x918   : > { %9446 = vmatmul.mubr.msk.bf16.gmra.mxu1 %vm1581_vm0, %v10168_v34  ;;  %9464 = vmatmul.mubr.msk.bf16.gmra.mxu0 %vm1581_vm0, %v10169_v35  ;;  %v9968_v34 = vld [vmem:[%s12037_s10 + $0xc0] ss:$8 sps:$4 sm:$0xff]  }
 0x919   : > { %3879 = vmatprep.mubr.bf16.mxu1 %v11955_v26  ;;  %4093 = vmatprep.mubr.bf16.mxu0 %v11955_v26 }
 0x920   : > { %8615 = vmatmul.mubr.msk.bf16.vlgmr.msra.gmra.mxu1 %vm1924_vm3, %v10612_v6 }
 0x921   : > { %3889 = vmatprep.mubr.bf16.mxu1 %v11955_v26  ;;  %4487 = vmatpush1.bf16.msra.mxu1 %v9935_v43 }
 0x922   : > { %4488 = vmatprep.subr.bf16.mxu1 %v9940_v27 }
 0x925   : > { %4489 = vmatpush1.bf16.msra.mxu1 %v9938_v22 }
 0x926   : > { %4490 = vmatprep.subr.bf16.mxu1 %v9943_v51 }
 0x928   : > { %8616 = vmatmul.mubr.msk.bf16.gmra.mxu1 %vm1924_vm3, %v10617_v14 }
 0x929   : > { %3899 = vmatprep.mubr.bf16.mxu1 %v11955_v26  ;;  %4491 = vmatpush1.bf16.msra.mxu1 %v9941_v45 }
 0x92a   : > { %4492 = vmatprep.subr.bf16.mxu1 %v9946_v40 }
 0x92d   : > { %4493 = vmatpush1.bf16.msra.mxu1 %v9944_v46 }
 0x92e   : > { %4494 = vmatprep.subr.bf16.mxu1 %v9949_v47 }
 0x930   : > { %8617 = vmatmul.mubr.msk.bf16.gmra.mxu1 %vm1924_vm3, %v10622_v25 }
 0x931   : > { %3909 = vmatprep.mubr.bf16.mxu1 %v11955_v26  ;;  %4495 = vmatpush1.bf16.msra.mxu1 %v9947_v49 }
 0x932   : > { %4496 = vmatprep.subr.bf16.mxu1 %v9952_v55 }
 0x935   : > { %4497 = vmatpush1.bf16.msra.mxu1 %v9950_v56 }
 0x936   : > { %4498 = vmatprep.subr.bf16.mxu1 %v9955_v57 }
 0x938   : > { %8618 = vmatmul.mubr.msk.bf16.gmra.mxu1 %vm1924_vm3, %v10627_v33 }
 0x939   : > { %3919 = vmatprep.mubr.bf16.mxu1 %v11955_v26  ;;  %4499 = vmatpush1.bf16.msra.mxu1 %v9953_v58 }
 0x93a   : > { %4500 = vmatprep.subr.bf16.mxu1 %v9958_v59 }
 0x93d   : > { %4501 = vmatpush1.bf16.msra.mxu1 %v9956_v61 }
 0x93e   : > { %4502 = vmatprep.subr.bf16.mxu1 %v9961_v62 }
 0x940   : > { %8619 = vmatmul.mubr.msk.bf16.gmra.mxu1 %vm1924_vm3, %v10632_v44 }
 0x941   : > { %3929 = vmatprep.mubr.bf16.mxu1 %v11955_v26  ;;  %4503 = vmatpush2.bf16.msra.mxu1 %v9959_v50 }
 0x942   : > { %4504 = vmatprep.subr.bf16.mxu1 %v9964_v41 }
 0x945   : > { %4505 = vmatpush2.bf16.msra.mxu1 %v9962_v21 }
 0x946   : > { %4506 = vmatprep.subr.bf16.mxu1 %v9967_v10 }
 0x948   : > { %8620 = vmatmul.mubr.msk.bf16.gmra.mxu1 %vm1924_vm3, %v10637_v53 }
 0x949   : > { %3939 = vmatprep.mubr.bf16.mxu1 %v11955_v26  ;;  %4507 = vmatpush2.bf16.msra.mxu1 %v9965_v28 }
 0x94a   : > { %4508 = vmatprep.subr.bf16.mxu1 %v9970_v11 }
 0x94d   : > { %4509 = vmatpush2.bf16.msra.mxu1 %v9968_v34 }
 0x950   : > { %8621 = vmatmul.mubr.msk.bf16.gmra.mxu1 %vm1924_vm3, %v10642_v60 }
 0x951   : > { %3949 = vmatprep.mubr.bf16.mxu1 %v11955_v26 }
 0x958   : > { %8622 = vmatmul.mubr.msk.bf16.gmra.mxu1 %vm1924_vm3, %v10647_v63 }
 0x9c0   : > { %v9435_v0 = vpop.f32.mrf.mxu1  ;;  %v9453_v1 = vpop.f32.mrf.mxu0 }
 0x9c1   : > { %v3783_v19 = vsub.f32 %v9435_v0, %v9453_v1 }
 0x9c2   : > { %v3621_v2 = vpop.f32.mrf.mxu1  ;;  %v3718_v13 = vpop.f32.mrf.mxu0 }
 0x9c3   : > { %v3781_v18 = vsub.f32 %v3621_v2, %v3718_v13  ;;  %v3799_v43 = vand.u32 2147483647, %v3783_v19 }
 0x9c4   : > { %v9436_v16 = vpop.f32.mrf.mxu1  ;;  %v9454_v17 = vpop.f32.mrf.mxu0 }
 0x9c5   : > { %v3797_v9 = vand.u32 2147483647, %v3781_v18  ;;  %v3784_v35 = vsub.f32 %v9436_v16, %v9454_v17 }
 0x9c6   : > { %v3624_v8 = vpop.f32.mrf.mxu1  ;;  %v3721_v24 = vpop.f32.mrf.mxu0 }
 0x9c7   : > { %v3782_v29 = vsub.f32 %v3624_v8, %v3721_v24  ;;  %v3800_v52 = vand.u32 2147483647, %v3784_v35 }
 0x9c8   : > { %v9439_v23 = vpop.f32.mrf.mxu1  ;;  %v9457_v30 = vpop.f32.mrf.mxu0 }
 0x9c9   : > { %v3798_v31 = vand.u32 2147483647, %v3782_v29  ;;  %v11000_v27 = vpack.c.bf16 %v3800_v52, %v3799_v43  ;;  %v3787_v56 = vsub.f32 %v9439_v23, %v9457_v30 }
 0x9ca   : > { %v3637_v32 = vpop.f32.mrf.mxu1  ;;  %v3734_v5 = vpop.f32.mrf.mxu0 }
 0x9cb   : > { %v10995_v36 = vpack.c.bf16 %v3798_v31, %v3797_v9  ;;  %v3785_v22 = vsub.f32 %v3637_v32, %v3734_v5  ;;  %v3803_v62 = vand.u32 2147483647, %v3787_v56  ;;  %v9980_v56 = vld [vmem:[%s12037_s10 + $0x80] ss:$8 sps:$4 sm:$0xff]  }
 0x9cc   : > { %v9458_v3 = vpop.f32.mrf.mxu0  ;;  %v9440_v42 = vpop.f32.mrf.mxu1 }
 0x9cd   : > { %8629 = vmatmul.mubr.msk.bf16.vlgmr.msra.gmra.mxu0 %vm4036_vm5, %v10995_v36  ;;  %v3801_v46 = vand.u32 2147483647, %v3785_v22  ;;  %v3788_v57 = vsub.f32 %v9440_v42, %v9458_v3 }
 0x9ce   : > { %4103 = vmatprep.mubr.bf16.mxu0 %v11955_v26  ;;  %v3737_v7 = vpop.f32.mrf.mxu0  ;;  %v3640_v4 = vpop.f32.mrf.mxu1 }
 0x9cf   : > { %v3786_v51 = vsub.f32 %v3640_v4, %v3737_v7  ;;  %v3804_v50 = vand.u32 2147483647, %v3788_v57 }
 0x9d0   : > { %v9461_v45 = vpop.f32.mrf.mxu0  ;;  %v9443_v40 = vpop.f32.mrf.mxu1 }
 0x9d1   : > { %v3802_v47 = vand.u32 2147483647, %v3786_v51  ;;  %v11010_v1 = vpack.c.bf16 %v3804_v50, %v3803_v62  ;;  %v3791_v24 = vsub.f32 %v9443_v40, %v9461_v45  ;;  %v9973_v51 = vld [vmem:[%s12037_s10 + $0xb4] ss:$8 sps:$4 sm:$0xff]   ;;  %v9971_v45 = vld [vmem:[%s12037_s10 + $0xb0] ss:$8 sps:$4 sm:$0xff]  }
 0x9d2   : > { %v3750_v49 = vpop.f32.mrf.mxu0  ;;  %v3653_v55 = vpop.f32.mrf.mxu1  ;;  %4510 = vmatprep.subr.bf16.mxu1 %v9973_v51  ;;  %v9976_v40 = vld [vmem:[%s12037_s10 + $0xa4] ss:$8 sps:$4 sm:$0xff]   ;;  %v9983_v62 = vld [vmem:[%s12040_s0 + $0x78] sm:$0xff]  }
 0x9d3   : > { %v11005_v58 = vpack.c.bf16 %v3802_v47, %v3801_v46  ;;  %v3789_v2 = vsub.f32 %v3653_v55, %v3750_v49  ;;  %v3807_v30 = vand.u32 2147483647, %v3791_v24  ;;  %4511 = vmatpush2.bf16.msra.mxu1 %v9971_v45  ;;  %v9974_v46 = vld [vmem:[%s12037_s10 + $0xa0] ss:$8 sps:$4 sm:$0xff]   ;;  %v9979_v47 = vld [vmem:[%s12037_s10 + $0x94] ss:$8 sps:$4 sm:$0xff]   ;;  %9016 = vmatprep.subr.bf16.mxu0 %v9983_v62 }
 0x9d4   : > { %v9462_v59 = vpop.f32.mrf.mxu0  ;;  %v9444_v61 = vpop.f32.mrf.mxu1  ;;  %4512 = vmatprep.subr.bf16.mxu1 %v9976_v40  ;;  %v9977_v49 = vld [vmem:[%s12037_s10 + $0x90] ss:$8 sps:$4 sm:$0xff]   ;;  %v9982_v55 = vld [vmem:[%s12037_s10 + $0x84] ss:$8 sps:$4 sm:$0xff]  }
 0x9d5   : > { %8630 = vmatmul.mubr.msk.bf16.gmra.mxu0 %vm4036_vm5, %v11000_v27  ;;  %v3805_v16 = vand.u32 2147483647, %v3789_v2  ;;  %v3792_v28 = vsub.f32 %v9444_v61, %v9462_v59  ;;  %v9984_v50 = vld [vmem:[%s12040_s0 + $0x38] sm:$0xff]   ;;  %v9986_v2 = vld [vmem:[%s12040_s0 + $0x30] sm:$0xff]  }
 0x9d6   : > { %4113 = vmatprep.mubr.bf16.mxu0 %v11955_v26  ;;  %v3753_v41 = vpop.f32.mrf.mxu0  ;;  %v3656_v0 = vpop.f32.mrf.mxu1  ;;  %9017 = vmatpush3.bf16.msra.mxu0 %v9984_v50 }
 0x9d7   : > { %v3790_v13 = vsub.f32 %v3656_v0, %v3753_v41  ;;  %v3808_v9 = vand.u32 2147483647, %v3792_v28  ;;  %4513 = vmatpush2.bf16.msra.mxu1 %v9974_v46  ;;  %v9985_v41 = vld [vmem:[%s12040_s0 + $0x70] sm:$0xff]  }
 0x9d8   : > { %v9465_v21 = vpop.f32.mrf.mxu0  ;;  %v9447_v10 = vpop.f32.mrf.mxu1  ;;  %4514 = vmatprep.subr.bf16.mxu1 %v9979_v47  ;;  %9018 = vmatprep.subr.bf16.mxu0 %v9985_v41 }
 0x9d9   : > { %v3806_v17 = vand.u32 2147483647, %v3790_v13  ;;  %v11020_v5 = vpack.c.bf16 %v3808_v9, %v3807_v30  ;;  %v3795_v42 = vsub.f32 %v9447_v10, %v9465_v21  ;;  %v9987_v13 = vld [vmem:[%s12040_s0 + $0x68] sm:$0xff]  }
 0x9da   : > { %v3766_v18 = vpop.f32.mrf.mxu0  ;;  %v3669_v8 = vpop.f32.mrf.mxu1  ;;  %9019 = vmatpush3.bf16.msra.mxu0 %v9986_v2  ;;  %v9988_v10 = vld [vmem:[%s12040_s0 + $0x28] sm:$0xff]  }
 0x9db   : > { %v11015_v29 = vpack.c.bf16 %v3806_v17, %v3805_v16  ;;  %v3793_v34 = vsub.f32 %v3669_v8, %v3766_v18  ;;  %v3811_v43 = vand.u32 2147483647, %v3795_v42  ;;  %4515 = vmatpush2.bf16.msra.mxu1 %v9977_v49  ;;  %9020 = vmatprep.subr.bf16.mxu0 %v9987_v13  ;;  %v9989_v16 = vld [vmem:[%s12040_s0 + $0x60] sm:$0xff]  }
 0x9dc   : > { %v9466_v11 = vpop.f32.mrf.mxu0  ;;  %v9448_v23 = vpop.f32.mrf.mxu1  ;;  %4516 = vmatprep.subr.bf16.mxu1 %v9982_v55  ;;  %v9990_v18 = vld [vmem:[%s12040_s0 + $0x20] sm:$0xff]  }
 0x9dd   : > { %8631 = vmatmul.mubr.msk.bf16.gmra.mxu0 %vm4036_vm5, %v11005_v58  ;;  %v3809_v3 = vand.u32 2147483647, %v3793_v34  ;;  %v3796_v52 = vsub.f32 %v9448_v23, %v9466_v11  ;;  %v11059_v34 = vld [vmem:[%s12041_s16 + $0x8] sm:$0xff] }
 0x9de   : > { %4123 = vmatprep.mubr.bf16.mxu0 %v11955_v26  ;;  %v3769_v31 = vpop.f32.mrf.mxu0  ;;  %v3672_v32 = vpop.f32.mrf.mxu1  ;;  %9021 = vmatpush3.bf16.msra.mxu0 %v9988_v10 }
 0x9df   : > { %v3794_v35 = vsub.f32 %v3672_v32, %v3769_v31  ;;  %v3812_v4 = vand.u32 2147483647, %v3796_v52  ;;  %4517 = vmatpush2.bf16.msra.mxu1 %v9980_v56  ;;  %9022 = vmatprep.subr.bf16.mxu0 %v9989_v16 }
 0x9e0   : > { %v3881_v57 = vpop.f32.mrf.mxu1 }
 0x9e1   : > { %v3810_v19 = vand.u32 2147483647, %v3794_v35  ;;  %v11030_v22 = vpack.c.bf16 %v3812_v4, %v3811_v43 }
 0x9e2   : > { %v3883_v59 = vpop.f32.mrf.mxu1  ;;  %9023 = vmatpush3.bf16.msra.mxu0 %v9990_v18 }
 0x9e3   : > { %v11025_v7 = vpack.c.bf16 %v3810_v19, %v3809_v3  ;;  %12039 = vst [vmem:[#allocation40_spill] sm:$0xff] %v11030_v22  ;;  %v11064_v3 = vld [vmem:[%s12041_s16] sm:$0xff]  ;;  %v11068_v19 = vrot.slane %v11059_v34, %v10670_v20 }
 0x9e4   : > { %v3885_v61 = vpop.f32.mrf.mxu1  ;;  %v11072_v42 = vrot.slane %v11064_v3, %v10670_v20 }
 0x9e5   : > { %8632 = vmatmul.mubr.msk.bf16.gmra.mxu0 %vm4036_vm5, %v11010_v1  ;;  %12038 = vst [vmem:[#allocation39_spill] sm:$0xff] %v11025_v7  ;;  %v3969_v4 = vadd.f32 %v11068_v19, %v3883_v59 }
 0x9e6   : > { %4133 = vmatprep.mubr.bf16.mxu0 %v11955_v26  ;;  %v3887_v0 = vpop.f32.mrf.mxu1  ;;  %v3968_v51 = vadd.f32 %v11072_v42, %v3881_v57  ;;  %v3970_v46 = vadd.f32 %v11072_v42, %v3885_v61 }
 0x9e7   : > { %v3971_v56 = vadd.f32 %v11068_v19, %v3887_v0 }
 0x9e8   : > { %v3891_v21 = vpop.f32.mrf.mxu1 }
 0x9ea   : > { %v3893_v17 = vpop.f32.mrf.mxu1 }
 0x9eb   : > { %v3973_v57 = vadd.f32 %v11068_v19, %v3893_v17 }
 0x9ec   : > { %v3895_v8 = vpop.f32.mrf.mxu1 }
 0x9ed   : > { %8633 = vmatmul.mubr.msk.bf16.gmra.mxu0 %vm4036_vm5, %v11015_v29  ;;  %v3974_v0 = vadd.f32 %v11072_v42, %v3895_v8 }
 0x9ee   : > { %4143 = vmatprep.mubr.bf16.mxu0 %v11955_v26  ;;  %v3897_v24 = vpop.f32.mrf.mxu1 }
 0x9f0   : > { %v3901_v28 = vpop.f32.mrf.mxu1 }
 0x9f2   : > { %v3903_v11 = vpop.f32.mrf.mxu1 }
 0x9f4   : > { %v3905_v23 = vpop.f32.mrf.mxu1 }
 0x9f5   : > { %8634 = vmatmul.mubr.msk.bf16.gmra.mxu0 %vm4036_vm5, %v11020_v5 }
 0x9f6   : > { %4153 = vmatprep.mubr.bf16.mxu0 %v11955_v26  ;;  %v11050_v30 = vpop.f32.mrf.mxu1 }
 0x9f8   : > { %v11052_v9 = vpop.f32.mrf.mxu1 }
 0x9fa   : > { %v11054_v31 = vpop.f32.mrf.mxu1 }
 0x9fc   : > { %v11056_v32 = vpop.f32.mrf.mxu1 }
 0x9fd   : > { %8635 = vmatmul.mubr.msk.bf16.gmra.mxu0 %vm4036_vm5, %v11025_v7 }
 0x9fe   : > { %4163 = vmatprep.mubr.bf16.mxu0 %v11955_v26  ;;  %v11061_v35 = vpop.f32.mrf.mxu1  ;;  %v3972_v26 = vadd.f32 %v11072_v42, %v3891_v21 }
 0xa00   : > { %v11074_v52 = vpop.f32.mrf.mxu1 }
 0xa02   : > { %v11078_v45 = vpop.f32.mrf.mxu1 }
 0xa04   : > { %v11082_v50 = vpop.f32.mrf.mxu1 }
 0xa05   : > { %8636 = vmatmul.mubr.msk.bf16.gmra.mxu0 %vm4036_vm5, %v11030_v22 }
 0xa06   : > { %v11086_v61 = vpop.f32.mrf.mxu1 }
 0xa08   : > { %v11090_v17 = vpop.f32.mrf.mxu1 }
 0xa8d   : > { %v4095_v43 = vpop.f32.mrf.mxu0 }
 0xa8e   : > { %v4174_v49 = vadd.f32 %v4095_v43, %v3968_v51 }
 0xa8f   : > { %v4097_v40 = vpop.f32.mrf.mxu0 }
 0xa90   : > { %v4175_v47 = vadd.f32 %v4097_v40, %v3969_v4  ;;  %v4206_v59 = vmul.f32 0.01, %v4174_v49 }
 0xa91   : > { %v4099_v55 = vpop.f32.mrf.mxu0 }
 0xa92   : > { %v4176_v62 = vadd.f32 %v4099_v55, %v3970_v46  ;;  %v4207_v2 = vmul.f32 0.01, %v4175_v47  ;;  %v4238_v55 = vmax.f32 %v4174_v49, %v4206_v59 }
 0xa93   : > { %v4101_v41 = vpop.f32.mrf.mxu0 }
 0xa94   : > { %v4208_v13 = vmul.f32 0.01, %v4176_v62  ;;  %v4177_v10 = vadd.f32 %v4101_v41, %v3971_v56  ;;  %v4239_v51 = vmax.f32 %v4175_v47, %v4207_v2  ;;  %v3975_v56 = vadd.f32 %v11068_v19, %v3897_v24  ;;  %v11094_v2 = vpop.f32.mrf.mxu1 }
 0xa95   : > { %v4105_v16 = vpop.f32.mrf.mxu0  ;;  %v3977_v47 = vadd.f32 %v11068_v19, %v3903_v11 }
 0xa96   : > { %v4209_v18 = vmul.f32 0.01, %v4177_v10  ;;  %v4240_v43 = vmax.f32 %v4176_v62, %v4208_v13  ;;  %v4178_v48 = vadd.f32 %v4105_v16, %v3972_v26  ;;  %v3976_v26 = vadd.f32 %v11072_v42, %v3901_v28 }
 0xa97   : > { %v4107_v4 = vpop.f32.mrf.mxu0 }
 0xa98   : > { %v4241_v40 = vmax.f32 %v4177_v10, %v4209_v18  ;;  %v4179_v46 = vadd.f32 %v4107_v4, %v3973_v57  ;;  %v4270_v63 = vpack.c.bf16 %v4240_v43, %v4238_v55  ;;  %v4210_v13 = vmul.f32 0.01, %v4178_v48 }
 0xa99   : > { %v4109_v20 = vpop.f32.mrf.mxu0  ;;  %v3978_v10 = vadd.f32 %v11072_v42, %v3905_v23 }
 0xa9a   : > { %v4180_v41 = vadd.f32 %v4109_v20, %v3974_v0  ;;  %v4271_v22 = vpack.c.bf16 %v4241_v40, %v4239_v51  ;;  %v4211_v7 = vmul.f32 0.01, %v4179_v46  ;;  %v4242_v18 = vmax.f32 %v4178_v48, %v4210_v13  ;;  %v11099_v0 = vpop.f32.mrf.mxu1 }
 0xa9b   : > { %v4111_v21 = vpop.f32.mrf.mxu0  ;;  %v3981_v48 = vadd.f32 %v11068_v19, %v11054_v31 }
 0xa9c   : > { %v4212_v60 = vmul.f32 0.01, %v4180_v41  ;;  %v4181_v62 = vadd.f32 %v4111_v21, %v3975_v56  ;;  %4518 = vmatprep.mubr.bf16.mxu1 %v4271_v22  ;;  %v4243_v59 = vmax.f32 %v4179_v46, %v4211_v7  ;;  %v3937_v56 = vpop.f32.mrf.mxu1 }
 0xa9d   : > { %v4115_v8 = vpop.f32.mrf.mxu0  ;;  %4519 = vmatmul.mubr.bf16.vlgmr.msra.gmra.mxu1 %v4270_v63  ;;  %v3979_v63 = vadd.f32 %v11068_v19, %v11050_v30  ;;  %v3980_v30 = vadd.f32 %v11072_v42, %v11052_v9 }
 0xa9e   : > { %v4213_v49 = vmul.f32 0.01, %v4181_v62  ;;  %v4244_v20 = vmax.f32 %v4180_v41, %v4212_v60  ;;  %v4182_v43 = vadd.f32 %v4115_v8, %v3976_v26 }
 0xa9f   : > { %v4117_v24 = vpop.f32.mrf.mxu0 }
 0xaa0   : > { %v4245_v16 = vmax.f32 %v4181_v62, %v4213_v49  ;;  %v4183_v57 = vadd.f32 %v4117_v24, %v3977_v47  ;;  %v4272_v28 = vpack.c.bf16 %v4244_v20, %v4242_v18  ;;  %v4214_v23 = vmul.f32 0.01, %v4182_v43 }
 0xaa1   : > { %v4119_v22 = vpop.f32.mrf.mxu0  ;;  %v3982_v62 = vadd.f32 %v11072_v42, %v11056_v32  ;;  %v3983_v24 = vadd.f32 %v11068_v19, %v11061_v35  ;;  %v3984_v35 = vadd.f32 %v11072_v42, %v11074_v52 }
 0xaa2   : > { %v4184_v4 = vadd.f32 %v4119_v22, %v3978_v10  ;;  %v4273_v11 = vpack.c.bf16 %v4245_v16, %v4243_v59  ;;  %v4215_v40 = vmul.f32 0.01, %v4183_v57  ;;  %v4246_v49 = vmax.f32 %v4182_v43, %v4214_v23  ;;  %v11109_v59 = vpop.f32.mrf.mxu1 }
 0xaa3   : > { %v4121_v51 = vpop.f32.mrf.mxu0  ;;  %v3985_v43 = vadd.f32 %v11068_v19, %v11078_v45 }
 0xaa4   : > { %v4216_v60 = vmul.f32 0.01, %v4184_v4  ;;  %v4185_v55 = vadd.f32 %v4121_v51, %v3979_v63  ;;  %4528 = vmatprep.mubr.bf16.mxu1 %v4273_v11  ;;  %v4247_v13 = vmax.f32 %v4183_v57, %v4215_v40  ;;  %v3943_v11 = vpop.f32.mrf.mxu1  ;;  %v3986_v40 = vadd.f32 %v11072_v42, %v11082_v50 }
 0xaa5   : > { %v4125_v7 = vpop.f32.mrf.mxu0  ;;  %4529 = vmatmul.mubr.bf16.gmra.mxu1 %v4272_v28 }
 0xaa6   : > { %v4217_v46 = vmul.f32 0.01, %v4185_v55  ;;  %v4248_v41 = vmax.f32 %v4184_v4, %v4216_v60  ;;  %v4186_v26 = vadd.f32 %v4125_v7, %v3980_v30  ;;  %v3987_v30 = vadd.f32 %v11068_v19, %v11086_v61 }
 0xaa7   : > { %v4127_v21 = vpop.f32.mrf.mxu0 }
 0xaa8   : > { %v4249_v8 = vmax.f32 %v4185_v55, %v4217_v46  ;;  %v4187_v47 = vadd.f32 %v4127_v21, %v3981_v48  ;;  %v4274_v9 = vpack.c.bf16 %v4248_v41, %v4246_v49  ;;  %v4218_v32 = vmul.f32 0.01, %v4186_v26  ;;  %v3945_v21 = vpop.f32.mrf.mxu1 }
 0xaa9   : > { %v4129_v20 = vpop.f32.mrf.mxu0 }
 0xaaa   : > { %v4188_v31 = vadd.f32 %v4129_v20, %v3982_v62  ;;  %v4275_v10 = vpack.c.bf16 %v4249_v8, %v4247_v13  ;;  %v4219_v18 = vmul.f32 0.01, %v4187_v47  ;;  %v4250_v7 = vmax.f32 %v4186_v26, %v4218_v32  ;;  %v3947_v61 = vpop.f32.mrf.mxu1 }
 0xaab   : > { %v4131_v16 = vpop.f32.mrf.mxu0 }
 0xaac   : > { %v4220_v22 = vmul.f32 0.01, %v4188_v31  ;;  %v4189_v63 = vadd.f32 %v4131_v16, %v3983_v24  ;;  %4538 = vmatprep.mubr.bf16.mxu1 %v4275_v10  ;;  %v4251_v60 = vmax.f32 %v4187_v47, %v4219_v18  ;;  %v3989_v47 = vadd.f32 %v11068_v19, %v11094_v2 }
 0xaad   : > { %v4135_v57 = vpop.f32.mrf.mxu0  ;;  %4539 = vmatmul.mubr.bf16.gmra.mxu1 %v4274_v9  ;;  %v3988_v24 = vadd.f32 %v11072_v42, %v11090_v17  ;;  %v3990_v9 = vadd.f32 %v11072_v42, %v11099_v0  ;;  %v3993_v0 = vadd.f32 %v11068_v19, %v3943_v11 }
 0xaae   : > { %v4221_v4 = vmul.f32 0.01, %v4189_v63  ;;  %v4252_v28 = vmax.f32 %v4188_v31, %v4220_v22  ;;  %v4190_v48 = vadd.f32 %v4135_v57, %v3984_v35  ;;  %v3951_v35 = vpop.f32.mrf.mxu1 }
 0xaaf   : > { %v4137_v51 = vpop.f32.mrf.mxu0 }
 0xab0   : > { %v4253_v55 = vmax.f32 %v4189_v63, %v4221_v4  ;;  %v4191_v23 = vadd.f32 %v4137_v51, %v3985_v43  ;;  %v4276_v62 = vpack.c.bf16 %v4252_v28, %v4250_v7  ;;  %v4222_v20 = vmul.f32 0.01, %v4190_v48 }
 0xab1   : > { %v4139_v46 = vpop.f32.mrf.mxu0  ;;  %v3991_v43 = vadd.f32 %v11068_v19, %v3937_v56 }
 0xab2   : > { %v4192_v45 = vadd.f32 %v4139_v46, %v3986_v40  ;;  %v4277_v41 = vpack.c.bf16 %v4253_v55, %v4251_v60  ;;  %v4223_v13 = vmul.f32 0.01, %v4191_v23  ;;  %v4254_v63 = vmax.f32 %v4190_v48, %v4222_v20  ;;  %v3953_v46 = vpop.f32.mrf.mxu1 }
 0xab3   : > { %v4141_v52 = vpop.f32.mrf.mxu0  ;;  %v3992_v48 = vadd.f32 %v11072_v42, %v11109_v59  ;;  %v3995_v20 = vadd.f32 %v11068_v19, %v3947_v61 }
 0xab4   : > { %v4224_v8 = vmul.f32 0.01, %v4192_v45  ;;  %v4193_v49 = vadd.f32 %v4141_v52, %v3987_v30  ;;  %4548 = vmatprep.mubr.bf16.mxu1 %v4277_v41  ;;  %v4255_v16 = vmax.f32 %v4191_v23, %v4223_v13  ;;  %v3955_v11 = vpop.f32.mrf.mxu1 }
 0xab5   : > { %v4145_v50 = vpop.f32.mrf.mxu0  ;;  %4549 = vmatmul.mubr.bf16.gmra.mxu1 %v4276_v62 }
 0xab6   : > { %v4225_v26 = vmul.f32 0.01, %v4193_v49  ;;  %v4256_v31 = vmax.f32 %v4192_v45, %v4224_v8  ;;  %v4194_v32 = vadd.f32 %v4145_v50, %v3988_v24  ;;  %v3994_v45 = vadd.f32 %v11072_v42, %v3945_v21 }
 0xab7   : > { %v4147_v10 = vpop.f32.mrf.mxu0  ;;  %v3997_v21 = vadd.f32 %v11068_v19, %v3953_v46 }
 0xab8   : > { %v4257_v18 = vmax.f32 %v4193_v49, %v4225_v26  ;;  %v4195_v22 = vadd.f32 %v4147_v10, %v3989_v47  ;;  %v4278_v28 = vpack.c.bf16 %v4256_v31, %v4254_v63  ;;  %v4226_v55 = vmul.f32 0.01, %v4194_v32  ;;  %v3957_v63 = vpop.f32.mrf.mxu1 }
 0xab9   : > { %v4149_v57 = vpop.f32.mrf.mxu0 }
 0xaba   : > { %v4196_v4 = vadd.f32 %v4149_v57, %v3990_v9  ;;  %v4279_v2 = vpack.c.bf16 %v4257_v18, %v4255_v16  ;;  %v4227_v17 = vmul.f32 0.01, %v4195_v22  ;;  %v4258_v13 = vmax.f32 %v4194_v32, %v4226_v55 }
 0xabb   : > { %v4151_v51 = vpop.f32.mrf.mxu0  ;;  %v3998_v57 = vadd.f32 %v11072_v42, %v3955_v11  ;;  %v9998_v11 = vld [vmem:[%s12040_s0] sm:$0xff]  }
 0xabc   : > { %v4228_v40 = vmul.f32 0.01, %v4196_v4  ;;  %v4197_v60 = vadd.f32 %v4151_v51, %v3991_v43  ;;  %4558 = vmatprep.mubr.bf16.mxu1 %v4279_v2  ;;  %v4259_v41 = vmax.f32 %v4195_v22, %v4227_v17  ;;  %v3996_v22 = vadd.f32 %v11072_v42, %v3951_v35 }
 0xabd   : > { %v4155_v7 = vpop.f32.mrf.mxu0  ;;  %4559 = vmatmul.mubr.bf16.gmra.mxu1 %v4278_v28 }
 0xabe   : > { %v4229_v23 = vmul.f32 0.01, %v4197_v60  ;;  %v4260_v56 = vmax.f32 %v4196_v4, %v4228_v40  ;;  %v4198_v8 = vadd.f32 %v4155_v7, %v3992_v48  ;;  %v3999_v40 = vadd.f32 %v11068_v19, %v3957_v63 }
 0xabf   : > { %v4157_v30 = vpop.f32.mrf.mxu0 }
 0xac0   : > { %v4261_v62 = vmax.f32 %v4197_v60, %v4229_v23  ;;  %v4199_v52 = vadd.f32 %v4157_v30, %v3993_v0  ;;  %v4280_v26 = vpack.c.bf16 %v4260_v56, %v4258_v13  ;;  %v4230_v9 = vmul.f32 0.01, %v4198_v8  ;;  %v9992_v13 = vld [vmem:[%s12040_s0 + $0x18] sm:$0xff]  }
 0xac1   : > { %v4159_v49 = vpop.f32.mrf.mxu0 }
 0xac2   : > { %v4200_v50 = vadd.f32 %v4159_v49, %v3994_v45  ;;  %v4281_v47 = vpack.c.bf16 %v4261_v62, %v4259_v41  ;;  %v4231_v31 = vmul.f32 0.01, %v4199_v52  ;;  %v4262_v28 = vmax.f32 %v4198_v8, %v4230_v9  ;;  %v9993_v8 = vld [vmem:[%s12040_s0 + $0x50] sm:$0xff]  }
 0xac3   : > { %v4161_v24 = vpop.f32.mrf.mxu0  ;;  %v9994_v49 = vld [vmem:[%s12040_s0 + $0x10] sm:$0xff]  }
 0xac4   : > { %v4232_v59 = vmul.f32 0.01, %v4200_v50  ;;  %v4201_v10 = vadd.f32 %v4161_v24, %v3995_v20  ;;  %4568 = vmatprep.mubr.bf16.mxu1 %v4281_v47  ;;  %v4263_v43 = vmax.f32 %v4199_v52, %v4231_v31  ;;  %v9991_v52 = vld [vmem:[%s12040_s0 + $0x58] sm:$0xff]   ;;  %v9995_v20 = vld [vmem:[%s12040_s0 + $0x48] sm:$0xff]   ;;  %v9997_v47 = vld [vmem:[%s12040_s0 + $0x40] sm:$0xff]   ;;  %v11147_v31 = vrot.slane %v11059_v34, %v10729_v39 }
 0xac5   : > { %v4165_v16 = vpop.f32.mrf.mxu0  ;;  %4569 = vmatmul.mubr.bf16.gmra.mxu1 %v4280_v26  ;;  %9024 = vmatprep.subr.bf16.mxu0 %v9991_v52  ;;  %v9999_v26 = vld [vmem:[%s12042_s18 + $0x38] sm:$0xff]   ;;  %v10000_v24 = vld [vmem:[%s12042_s18 + $0x30] sm:$0xff]  }
 0xac6   : > { %v4233_v18 = vmul.f32 0.01, %v4201_v10  ;;  %v4264_v32 = vmax.f32 %v4200_v50, %v4232_v59  ;;  %v4202_v51 = vadd.f32 %v4165_v16, %v3996_v22  ;;  %9025 = vmatpush3.bf16.msra.mxu0 %v9992_v13  ;;  %v9996_v50 = vld [vmem:[%s12040_s0 + $0x8] sm:$0xff]   ;;  %9467 = vmatprep.subr.bf16.mxu1 %v9999_v26  ;;  %v11151_v59 = vrot.slane %v11064_v3, %v10729_v39  ;;  %s12044_s0 = sld [smem:[#allocation16_spill]] }
 0xac7   : > { %v4167_v61 = vpop.f32.mrf.mxu0  ;;  %9026 = vmatprep.subr.bf16.mxu0 %v9993_v8  ;;  %9468 = vmatpush3.bf16.msra.mxu1 %v9999_v26 }
 0xac8   : > { %v4265_v4 = vmax.f32 %v4201_v10, %v4233_v18  ;;  %v4203_v2 = vadd.f32 %v4167_v61, %v3997_v21  ;;  %v4282_v7 = vpack.c.bf16 %v4264_v32, %v4262_v28  ;;  %v4234_v42 = vmul.f32 0.01, %v4202_v51  ;;  %9469 = vmatprep.subr.bf16.mxu1 %v10000_v24 }
 0xac9   : > { %v4169_v17 = vpop.f32.mrf.mxu0 }
 0xaca   : > { %v4204_v60 = vadd.f32 %v4169_v17, %v3998_v57  ;;  %v4283_v55 = vpack.c.bf16 %v4265_v4, %v4263_v43  ;;  %v4235_v23 = vmul.f32 0.01, %v4203_v2  ;;  %v4266_v45 = vmax.f32 %v4202_v51, %v4234_v42  ;;  %9027 = vmatpush3.bf16.msra.mxu0 %v9994_v49 }
 0xacb   : > { %v4171_v0 = vpop.f32.mrf.mxu0  ;;  %9028 = vmatprep.subr.bf16.mxu0 %v9995_v20  ;;  %9470 = vmatpush3.bf16.msra.mxu1 %v10000_v24 }
 0xacc   : > { %v4236_v35 = vmul.f32 0.01, %v4204_v60  ;;  %v4205_v48 = vadd.f32 %v4171_v0, %v3999_v40  ;;  %4578 = vmatprep.mubr.bf16.mxu1 %v4283_v55  ;;  %v4267_v30 = vmax.f32 %v4203_v2, %v4235_v23 }
 0xacd   : > { %4579 = vmatmul.mubr.bf16.gmra.mxu1 %v4282_v7 }
 0xace   : > { %v4237_v46 = vmul.f32 0.01, %v4205_v48  ;;  %v4268_v56 = vmax.f32 %v4204_v60, %v4236_v35  ;;  %9029 = vmatpush3.bf16.msra.mxu0 %v9996_v50 }
 0xacf   : > { %9030 = vmatprep.subr.bf16.mxu0 %v9997_v47 }
 0xad0   : > { %v4269_v19 = vmax.f32 %v4205_v48, %v4237_v46  ;;  %v4284_v62 = vpack.c.bf16 %v4268_v56, %v4266_v45 }
 0xad2   : > { %v4285_v41 = vpack.c.bf16 %v4269_v19, %v4267_v30  ;;  %9031 = vmatpush3.bf16.msra.mxu0 %v9998_v11 }
 0xad4   : > { %4588 = vmatprep.mubr.bf16.mxu1 %v4285_v41 }
 0xad5   : > { %4589 = vmatmul.mubr.bf16.gmra.mxu1 %v4284_v62 }
 0xb5d   : > { %v4520_v10 = vpop.f32.mrf.mxu1 }
 0xb5e   : > { %v4521_v21 = vadd.f32 %v4520_v10, %v11151_v59 }
 0xb5f   : > { %v4522_v9 = vpop.f32.mrf.mxu1 }
 0xb60   : > { %v4523_v16 = vadd.f32 %v4522_v9, %v11147_v31  ;;  %v4599_v34 = vmul.f32 0.01, %v4521_v21 }
 0xb61   : > { %v4524_v18 = vpop.f32.mrf.mxu1 }
 0xb62   : > { %v4525_v22 = vadd.f32 %v4524_v18, %v11151_v59  ;;  %v4600_v32 = vmul.f32 0.01, %v4523_v16  ;;  %v4631_v60 = vmax.f32 %v4521_v21, %v4599_v34 }
 0xb63   : > { %v4526_v63 = vpop.f32.mrf.mxu1 }
 0xb64   : > { %v4601_v61 = vmul.f32 0.01, %v4525_v22  ;;  %v4527_v57 = vadd.f32 %v4526_v63, %v11147_v31  ;;  %v4632_v51 = vmax.f32 %v4523_v16, %v4600_v32 }
 0xb65   : > { %v4530_v43 = vpop.f32.mrf.mxu1 }
 0xb66   : > { %v4602_v4 = vmul.f32 0.01, %v4527_v57  ;;  %v4633_v2 = vmax.f32 %v4525_v22, %v4601_v61  ;;  %v4531_v55 = vadd.f32 %v4530_v43, %v11151_v59 }
 0xb67   : > { %v4532_v28 = vpop.f32.mrf.mxu1 }
 0xb68   : > { %v4634_v17 = vmax.f32 %v4527_v57, %v4602_v4  ;;  %v4533_v40 = vadd.f32 %v4532_v28, %v11147_v31  ;;  %v4663_v35 = vpack.c.bf16 %v4633_v2, %v4631_v60  ;;  %v4603_v30 = vmul.f32 0.01, %v4531_v55 }
 0xb69   : > { %v4534_v7 = vpop.f32.mrf.mxu1 }
 0xb6a   : > { %v4535_v0 = vadd.f32 %v4534_v7, %v11151_v59  ;;  %v4664_v23 = vpack.c.bf16 %v4634_v17, %v4632_v51  ;;  %v4604_v42 = vmul.f32 0.01, %v4533_v40  ;;  %v4635_v49 = vmax.f32 %v4531_v55, %v4603_v30 }
 0xb6b   : > { %v4536_v48 = vpop.f32.mrf.mxu1 }
 0xb6c   : > { %v4605_v46 = vmul.f32 0.01, %v4535_v0  ;;  %v4537_v56 = vadd.f32 %v4536_v48, %v11147_v31  ;;  %4843 = vmatprep.mubr.bf16.mxu0 %v4664_v23  ;;  %v4636_v52 = vmax.f32 %v4533_v40, %v4604_v42 }
 0xb6d   : > { %v4540_v19 = vpop.f32.mrf.mxu1  ;;  %4844 = vmatmul.mubr.bf16.vlgmr.msra.gmra.mxu0 %v4663_v35 }
 0xb6e   : > { %v4606_v45 = vmul.f32 0.01, %v4537_v56  ;;  %v4637_v41 = vmax.f32 %v4535_v0, %v4605_v46  ;;  %v4541_v20 = vadd.f32 %v4540_v19, %v11151_v59 }
 0xb6f   : > { %v4542_v62 = vpop.f32.mrf.mxu1 }
 0xb70   : > { %v4638_v13 = vmax.f32 %v4537_v56, %v4606_v45  ;;  %v4543_v8 = vadd.f32 %v4542_v62, %v11147_v31  ;;  %v4665_v26 = vpack.c.bf16 %v4637_v41, %v4635_v49  ;;  %v4607_v21 = vmul.f32 0.01, %v4541_v20 }
 0xb71   : > { %v4544_v50 = vpop.f32.mrf.mxu1 }
 0xb72   : > { %v4545_v47 = vadd.f32 %v4544_v50, %v11151_v59  ;;  %v4666_v11 = vpack.c.bf16 %v4638_v13, %v4636_v52  ;;  %v4608_v10 = vmul.f32 0.01, %v4543_v8  ;;  %v4639_v43 = vmax.f32 %v4541_v20, %v4607_v21 }
 0xb73   : > { %v4546_v24 = vpop.f32.mrf.mxu1 }
 0xb74   : > { %v4609_v9 = vmul.f32 0.01, %v4545_v47  ;;  %v4547_v16 = vadd.f32 %v4546_v24, %v11147_v31  ;;  %4851 = vmatprep.mubr.bf16.mxu0 %v4666_v11  ;;  %v4640_v61 = vmax.f32 %v4543_v8, %v4608_v10 }
 0xb75   : > { %v4550_v18 = vpop.f32.mrf.mxu1  ;;  %4852 = vmatmul.mubr.bf16.gmra.mxu0 %v4665_v26 }
 0xb76   : > { %v4610_v22 = vmul.f32 0.01, %v4547_v16  ;;  %v4641_v63 = vmax.f32 %v4545_v47, %v4609_v9  ;;  %v4551_v4 = vadd.f32 %v4550_v18, %v11151_v59 }
 0xb77   : > { %v4552_v32 = vpop.f32.mrf.mxu1 }
 0xb78   : > { %v4642_v57 = vmax.f32 %v4547_v16, %v4610_v22  ;;  %v4553_v34 = vadd.f32 %v4552_v32, %v11147_v31  ;;  %v4667_v17 = vpack.c.bf16 %v4641_v63, %v4639_v43  ;;  %v4611_v0 = vmul.f32 0.01, %v4551_v4 }
 0xb79   : > { %v4554_v2 = vpop.f32.mrf.mxu1 }
 0xb7a   : > { %v4555_v28 = vadd.f32 %v4554_v2, %v11151_v59  ;;  %v4668_v51 = vpack.c.bf16 %v4642_v57, %v4640_v61  ;;  %v4612_v60 = vmul.f32 0.01, %v4553_v34  ;;  %v4643_v19 = vmax.f32 %v4551_v4, %v4611_v0 }
 0xb7b   : > { %v4556_v40 = vpop.f32.mrf.mxu1 }
 0xb7c   : > { %v4613_v55 = vmul.f32 0.01, %v4555_v28  ;;  %v4557_v7 = vadd.f32 %v4556_v40, %v11147_v31  ;;  %4859 = vmatprep.mubr.bf16.mxu0 %v4668_v51  ;;  %v4644_v46 = vmax.f32 %v4553_v34, %v4612_v60 }
 0xb7d   : > { %v4560_v23 = vpop.f32.mrf.mxu1  ;;  %4860 = vmatmul.mubr.bf16.gmra.mxu0 %v4667_v17 }
 0xb7e   : > { %v4614_v35 = vmul.f32 0.01, %v4557_v7  ;;  %v4645_v48 = vmax.f32 %v4555_v28, %v4613_v55  ;;  %v4561_v45 = vadd.f32 %v4560_v23, %v11151_v59 }
 0xb7f   : > { %v4562_v42 = vpop.f32.mrf.mxu1 }
 0xb80   : > { %v4646_v56 = vmax.f32 %v4557_v7, %v4614_v35  ;;  %v4563_v30 = vadd.f32 %v4562_v42, %v11147_v31  ;;  %v4669_v13 = vpack.c.bf16 %v4645_v48, %v4643_v19  ;;  %v4615_v47 = vmul.f32 0.01, %v4561_v45 }
 0xb81   : > { %v4564_v41 = vpop.f32.mrf.mxu1 }
 0xb82   : > { %v4565_v62 = vadd.f32 %v4564_v41, %v11151_v59  ;;  %v4670_v52 = vpack.c.bf16 %v4646_v56, %v4644_v46  ;;  %v4616_v49 = vmul.f32 0.01, %v4563_v30  ;;  %v4647_v18 = vmax.f32 %v4561_v45, %v4615_v47 }
 0xb83   : > { %v4566_v8 = vpop.f32.mrf.mxu1 }
 0xb84   : > { %v4617_v20 = vmul.f32 0.01, %v4565_v62  ;;  %v4567_v50 = vadd.f32 %v4566_v8, %v11147_v31  ;;  %4867 = vmatprep.mubr.bf16.mxu0 %v4670_v52  ;;  %v4648_v9 = vmax.f32 %v4563_v30, %v4616_v49 }
 0xb85   : > { %v4570_v11 = vpop.f32.mrf.mxu1  ;;  %4868 = vmatmul.mubr.bf16.gmra.mxu0 %v4669_v13 }
 0xb86   : > { %v4618_v26 = vmul.f32 0.01, %v4567_v50  ;;  %v4649_v24 = vmax.f32 %v4565_v62, %v4617_v20  ;;  %v4571_v22 = vadd.f32 %v4570_v11, %v11151_v59 }
 0xb87   : > { %v4572_v10 = vpop.f32.mrf.mxu1 }
 0xb88   : > { %v4650_v16 = vmax.f32 %v4567_v50, %v4618_v26  ;;  %v4573_v21 = vadd.f32 %v4572_v10, %v11147_v31  ;;  %v4671_v57 = vpack.c.bf16 %v4649_v24, %v4647_v18  ;;  %v4619_v28 = vmul.f32 0.01, %v4571_v22 }
 0xb89   : > { %v4574_v63 = vpop.f32.mrf.mxu1 }
 0xb8a   : > { %v4575_v32 = vadd.f32 %v4574_v63, %v11151_v59  ;;  %v4672_v61 = vpack.c.bf16 %v4650_v16, %v4648_v9  ;;  %v4620_v43 = vmul.f32 0.01, %v4573_v21  ;;  %v4651_v23 = vmax.f32 %v4571_v22, %v4619_v28  ;;  %v10170_v28 = vld [vmem:[%s10325_s25] sm:$0xff] }
 0xb8b   : > { %v4576_v34 = vpop.f32.mrf.mxu1 }
 0xb8c   : > { %v4621_v4 = vmul.f32 0.01, %v4575_v32  ;;  %v4577_v2 = vadd.f32 %v4576_v34, %v11147_v31  ;;  %4875 = vmatprep.mubr.bf16.mxu0 %v4672_v61  ;;  %v4652_v55 = vmax.f32 %v4573_v21, %v4620_v43 }
 0xb8d   : > { %v4580_v51 = vpop.f32.mrf.mxu1  ;;  %4876 = vmatmul.mubr.bf16.gmra.mxu0 %v4671_v57 }
 0xb8e   : > { %v4622_v17 = vmul.f32 0.01, %v4577_v2  ;;  %v4653_v40 = vmax.f32 %v4575_v32, %v4621_v4  ;;  %v4581_v35 = vadd.f32 %v4580_v51, %v11151_v59  ;;  %v10002_v51 = vld [vmem:[%s12042_s18 + $0x20] sm:$0xff]  }
 0xb8f   : > { %v4582_v60 = vpop.f32.mrf.mxu1 }
 0xb90   : > { %v4654_v7 = vmax.f32 %v4577_v2, %v4622_v17  ;;  %v4583_v0 = vadd.f32 %v4582_v60, %v11147_v31  ;;  %v4673_v56 = vpack.c.bf16 %v4653_v40, %v4651_v23  ;;  %v4623_v62 = vmul.f32 0.01, %v4581_v35  ;;  %v10003_v17 = vld [vmem:[%s12042_s18 + $0x18] sm:$0xff]   ;;  %v10004_v40 = vld [vmem:[%s12042_s18 + $0x10] sm:$0xff]   ;;  %v10005_v60 = vld [vmem:[%s12042_s18 + $0x8] sm:$0xff]  }
 0xb91   : > { %v4584_v48 = vpop.f32.mrf.mxu1  ;;  %v11195_v23 = vrot.slane %v11064_v3, %v10779_v54 }
 0xb92   : > { %v4585_v42 = vadd.f32 %v4584_v48, %v11151_v59  ;;  %v4674_v46 = vpack.c.bf16 %v4654_v7, %v4652_v55  ;;  %v4624_v19 = vmul.f32 0.01, %v4583_v0  ;;  %v4655_v11 = vmax.f32 %v4581_v35, %v4623_v62  ;;  %v10006_v55 = vld [vmem:[%s12042_s18] sm:$0xff]  }
 0xb93   : > { %v4586_v30 = vpop.f32.mrf.mxu1  ;;  %v12043_v7 = vmov 0.0  }
 0xb94   : > { %v4625_v45 = vmul.f32 0.01, %v4585_v42  ;;  %v4587_v41 = vadd.f32 %v4586_v30, %v11147_v31  ;;  %4883 = vmatprep.mubr.bf16.mxu0 %v4674_v46  ;;  %v4656_v20 = vmax.f32 %v4583_v0, %v4624_v19 }
 0xb95   : > { %v4590_v52 = vpop.f32.mrf.mxu1  ;;  %4884 = vmatmul.mubr.bf16.gmra.mxu0 %v4673_v56 }
 0xb96   : > { %v4626_v13 = vmul.f32 0.01, %v4587_v41  ;;  %v4657_v8 = vmax.f32 %v4585_v42, %v4625_v45  ;;  %v4591_v26 = vadd.f32 %v4590_v52, %v11151_v59 }
 0xb97   : > { %v4592_v49 = vpop.f32.mrf.mxu1 }
 0xb98   : > { %v4658_v50 = vmax.f32 %v4587_v41, %v4626_v13  ;;  %v4593_v47 = vadd.f32 %v4592_v49, %v11147_v31  ;;  %v4675_v16 = vpack.c.bf16 %v4657_v8, %v4655_v11  ;;  %v4627_v32 = vmul.f32 0.01, %v4591_v26 }
 0xb99   : > { %v4594_v24 = vpop.f32.mrf.mxu1 }
 0xb9a   : > { %v4595_v10 = vadd.f32 %v4594_v24, %v11151_v59  ;;  %v4676_v9 = vpack.c.bf16 %v4658_v50, %v4656_v20  ;;  %v4628_v18 = vmul.f32 0.01, %v4593_v47  ;;  %v4659_v4 = vmax.f32 %v4591_v26, %v4627_v32 }
 0xb9b   : > { %v4596_v21 = vpop.f32.mrf.mxu1 }
 0xb9c   : > { %v4629_v22 = vmul.f32 0.01, %v4595_v10  ;;  %v4597_v63 = vadd.f32 %v4596_v21, %v11147_v31  ;;  %4891 = vmatprep.mubr.bf16.mxu0 %v4676_v9  ;;  %v4660_v34 = vmax.f32 %v4593_v47, %v4628_v18  ;;  %v10001_v31 = vld [vmem:[%s12042_s18 + $0x28] sm:$0xff]  }
 0xb9d   : > { %4892 = vmatmul.mubr.bf16.gmra.mxu0 %v4675_v16  ;;  %9471 = vmatprep.subr.bf16.mxu1 %v10001_v31 }
 0xb9e   : > { %v4630_v61 = vmul.f32 0.01, %v4597_v63  ;;  %v4661_v57 = vmax.f32 %v4595_v10, %v4629_v22  ;;  %9472 = vmatpush3.bf16.msra.mxu1 %v10001_v31  ;;  %v10008_v31 = vld [vmem:[%s12044_s0 + $0x8] sm:$0xff]  }
 0xb9f   : > { %9473 = vmatprep.subr.bf16.mxu1 %v10002_v51 }
 0xba0   : > { %v4662_v43 = vmax.f32 %v4597_v63, %v4630_v61  ;;  %v4677_v2 = vpack.c.bf16 %v4661_v57, %v4659_v4  ;;  %v10007_v57 = vld [vmem:[%s12044_s0 + $0x10] sm:$0xff]  }
 0xba2   : > { %v4678_v59 = vpack.c.bf16 %v4662_v43, %v4660_v34  ;;  %9474 = vmatpush3.bf16.msra.mxu1 %v10002_v51 }
 0xba3   : > { %9475 = vmatprep.subr.bf16.mxu1 %v10003_v17 }
 0xba4   : > { %4899 = vmatprep.mubr.bf16.mxu0 %v4678_v59 }
 0xba5   : > { %4900 = vmatmul.mubr.bf16.gmra.mxu0 %v4677_v2 }
 0xba6   : > { %9531 = vmatprep.mubr.f32.mxu0 %v10170_v28  ;;  %9476 = vmatpush3.bf16.msra.mxu1 %v10003_v17 }
 0xba7   : > { %9477 = vmatprep.subr.bf16.mxu1 %v10004_v40 }
 0xbaa   : > { %9478 = vmatpush3.bf16.msra.mxu1 %v10004_v40 }
 0xbab   : > { %9479 = vmatprep.subr.bf16.mxu1 %v10005_v60 }
 0xbae   : > { %9480 = vmatpush3.bf16.msra.mxu1 %v10005_v60 }
 0xbaf   : > { %9481 = vmatprep.subr.bf16.mxu1 %v10006_v55 }
 0xbb2   : > { %9482 = vmatpush3.bf16.msra.mxu1 %v10006_v55 }
 0xbb3   : > { %9557 = vmatprep.subr.bf16.mxu1 %v12043_v7 }
 0xc2d   : > { %v9032_v0 = vpop.f32.mrf.mxu0 }
 0xc2f   : > { %v9033_v35 = vpop.f32.mrf.mxu0 }
 0xc30   : > { %v9034_v48 = vadd.f32 %v9033_v35, %v9032_v0 }
 0xc31   : > { %v9035_v42 = vpop.f32.mrf.mxu0 }
 0xc32   : > { %v4846_v46 = vadd.f32 %v9034_v48, %v11195_v23  ;;  %v10009_v48 = vld [vmem:[%s12044_s0] sm:$0xff]   ;;  %s12045_s0 = sld [smem:[#allocation11_spill]] }
 0xc33   : > { %v9036_v56 = vpop.f32.mrf.mxu0 }
 0xc34   : > { %v9037_v30 = vadd.f32 %v9036_v56, %v9035_v42  ;;  %v4908_v45 = vmul.f32 0.01, %v4846_v46 }
 0xc35   : > { %v9038_v19 = vpop.f32.mrf.mxu0 }
 0xc36   : > { %v4849_v41 = vadd.f32 %v9037_v30, %v11195_v23  ;;  %v4924_v49 = vmax.f32 %v4846_v46, %v4908_v45 }
 0xc37   : > { %v9039_v62 = vpop.f32.mrf.mxu0 }
 0xc38   : > { %v4909_v52 = vmul.f32 0.01, %v4849_v41  ;;  %v9040_v13 = vadd.f32 %v9039_v62, %v9038_v19 }
 0xc39   : > { %v9041_v8 = vpop.f32.mrf.mxu0 }
 0xc3a   : > { %v4925_v20 = vmax.f32 %v4849_v41, %v4909_v52  ;;  %v4854_v3 = vadd.f32 %v9040_v13, %v11195_v23 }
 0xc3b   : > { %v9042_v50 = vpop.f32.mrf.mxu0 }
 0xc3c   : > { %v9043_v47 = vadd.f32 %v9042_v50, %v9041_v8  ;;  %v4940_v11 = vpack.c.bf16 %v4925_v20, %v4924_v49  ;;  %v4910_v24 = vmul.f32 0.01, %v4854_v3 }
 0xc3d   : > { %v9044_v26 = vpop.f32.mrf.mxu0 }
 0xc3e   : > { %v4857_v10 = vadd.f32 %v9043_v47, %v11195_v23  ;;  %9483 = vmatprep.mubr.bf16.mxu1 %v4940_v11  ;;  %v4926_v22 = vmax.f32 %v4854_v3, %v4910_v24 }
 0xc3f   : > { %v9045_v9 = vpop.f32.mrf.mxu0 }
 0xc40   : > { %v4911_v16 = vmul.f32 0.01, %v4857_v10  ;;  %v9046_v21 = vadd.f32 %v9045_v9, %v9044_v26 }
 0xc41   : > { %v9047_v18 = vpop.f32.mrf.mxu0 }
 0xc42   : > { %v4927_v63 = vmax.f32 %v4857_v10, %v4911_v16  ;;  %v4862_v32 = vadd.f32 %v9046_v21, %v11195_v23 }
 0xc43   : > { %v9048_v61 = vpop.f32.mrf.mxu0 }
 0xc44   : > { %v4941_v34 = vpack.c.bf16 %v4927_v63, %v4926_v22  ;;  %v9049_v43 = vadd.f32 %v9048_v61, %v9047_v18  ;;  %v4912_v59 = vmul.f32 0.01, %v4862_v32 }
 0xc45   : > { %v9050_v4 = vpop.f32.mrf.mxu0 }
 0xc46   : > { %v4865_v2 = vadd.f32 %v9049_v43, %v11195_v23  ;;  %9484 = vmatmul.mubr.bf16.vlgmr.msra.gmra.mxu1 %v4941_v34  ;;  %v4928_v60 = vmax.f32 %v4862_v32, %v4912_v59 }
 0xc47   : > { %v9051_v28 = vpop.f32.mrf.mxu0  ;;  %9558 = vmatpush3.bf16.msra.mxu1 %v10007_v57 }
 0xc48   : > { %v4913_v51 = vmul.f32 0.01, %v4865_v2  ;;  %v9052_v17 = vadd.f32 %v9051_v28, %v9050_v4  ;;  %9559 = vmatprep.subr.bf16.mxu1 %v12043_v7 }
 0xc49   : > { %v9053_v40 = vpop.f32.mrf.mxu0 }
 0xc4a   : > { %v4929_v55 = vmax.f32 %v4865_v2, %v4913_v51  ;;  %v4870_v0 = vadd.f32 %v9052_v17, %v11195_v23 }
 0xc4b   : > { %v9054_v35 = vpop.f32.mrf.mxu0  ;;  %9560 = vmatpush3.bf16.msra.mxu1 %v10008_v31 }
 0xc4c   : > { %v9055_v42 = vadd.f32 %v9054_v35, %v9053_v40  ;;  %v4942_v46 = vpack.c.bf16 %v4929_v55, %v4928_v60  ;;  %9561 = vmatprep.subr.bf16.mxu1 %v12043_v7  ;;  %v4914_v30 = vmul.f32 0.01, %v4870_v0 }
 0xc4d   : > { %v9056_v56 = vpop.f32.mrf.mxu0 }
 0xc4e   : > { %v4873_v19 = vadd.f32 %v9055_v42, %v11195_v23  ;;  %9487 = vmatprep.mubr.bf16.mxu1 %v4942_v46  ;;  %v4930_v13 = vmax.f32 %v4870_v0, %v4914_v30 }
 0xc4f   : > { %v9057_v45 = vpop.f32.mrf.mxu0  ;;  %9562 = vmatpush3.bf16.msra.mxu1 %v10009_v48 }
 0xc50   : > { %v4915_v41 = vmul.f32 0.01, %v4873_v19  ;;  %v9058_v62 = vadd.f32 %v9057_v45, %v9056_v56 }
 0xc51   : > { %v9059_v52 = vpop.f32.mrf.mxu0 }
 0xc52   : > { %v4931_v8 = vmax.f32 %v4873_v19, %v4915_v41  ;;  %v4878_v49 = vadd.f32 %v9058_v62, %v11195_v23 }
 0xc53   : > { %v9060_v20 = vpop.f32.mrf.mxu0 }
 0xc54   : > { %v4943_v3 = vpack.c.bf16 %v4931_v8, %v4930_v13  ;;  %v9061_v50 = vadd.f32 %v9060_v20, %v9059_v52  ;;  %v4916_v11 = vmul.f32 0.01, %v4878_v49 }
 0xc55   : > { %v9062_v47 = vpop.f32.mrf.mxu0 }
 0xc56   : > { %v4881_v26 = vadd.f32 %v9061_v50, %v11195_v23  ;;  %9488 = vmatmul.mubr.bf16.gmra.mxu1 %v4943_v3  ;;  %v4932_v21 = vmax.f32 %v4878_v49, %v4916_v11 }
 0xc57   : > { %v9063_v24 = vpop.f32.mrf.mxu0 }
 0xc58   : > { %v4917_v10 = vmul.f32 0.01, %v4881_v26  ;;  %v9064_v9 = vadd.f32 %v9063_v24, %v9062_v47 }
 0xc59   : > { %v9065_v16 = vpop.f32.mrf.mxu0 }
 0xc5a   : > { %v4933_v18 = vmax.f32 %v4881_v26, %v4917_v10  ;;  %v4886_v22 = vadd.f32 %v9064_v9, %v11195_v23 }
 0xc5b   : > { %v9066_v63 = vpop.f32.mrf.mxu0 }
 0xc5c   : > { %v9067_v32 = vadd.f32 %v9066_v63, %v9065_v16  ;;  %v4944_v61 = vpack.c.bf16 %v4933_v18, %v4932_v21  ;;  %v4918_v34 = vmul.f32 0.01, %v4886_v22 }
 0xc5d   : > { %v9068_v57 = vpop.f32.mrf.mxu0 }
 0xc5e   : > { %v4889_v43 = vadd.f32 %v9067_v32, %v11195_v23  ;;  %9491 = vmatprep.mubr.bf16.mxu1 %v4944_v61  ;;  %v4934_v31 = vmax.f32 %v4886_v22, %v4918_v34  ;;  %v10171_v61 = vld [vmem:[%s12041_s16] sm:$0xff] }
 0xc5f   : > { %v9069_v4 = vpop.f32.mrf.mxu0 }
 0xc60   : > { %v4919_v59 = vmul.f32 0.01, %v4889_v43  ;;  %v9070_v2 = vadd.f32 %v9069_v4, %v9068_v57  ;;  %v11230_v57 = vrot.slane %v10171_v61, %v10808_v15 }
 0xc61   : > { %v9071_v28 = vpop.f32.mrf.mxu0 }
 0xc62   : > { %v4935_v51 = vmax.f32 %v4889_v43, %v4919_v59  ;;  %v4894_v17 = vadd.f32 %v9070_v2, %v11195_v23 }
 0xc63   : > { %v9072_v40 = vpop.f32.mrf.mxu0 }
 0xc64   : > { %v4945_v60 = vpack.c.bf16 %v4935_v51, %v4934_v31  ;;  %v9073_v55 = vadd.f32 %v9072_v40, %v9071_v28  ;;  %v4920_v35 = vmul.f32 0.01, %v4894_v17 }
 0xc65   : > { %v9074_v0 = vpop.f32.mrf.mxu0 }
 0xc66   : > { %v4897_v48 = vadd.f32 %v9073_v55, %v11195_v23  ;;  %9492 = vmatmul.mubr.bf16.gmra.mxu1 %v4945_v60  ;;  %v4936_v19 = vmax.f32 %v4894_v17, %v4920_v35 }
 0xc67   : > { %v9075_v42 = vpop.f32.mrf.mxu0 }
 0xc68   : > { %v4921_v46 = vmul.f32 0.01, %v4897_v48  ;;  %v9076_v56 = vadd.f32 %v9075_v42, %v9074_v0 }
 0xc69   : > { %v9077_v30 = vpop.f32.mrf.mxu0 }
 0xc6a   : > { %v4937_v45 = vmax.f32 %v4897_v48, %v4921_v46  ;;  %v4902_v41 = vadd.f32 %v9076_v56, %v11195_v23  ;;  %v11239_v48 = vld [vmem:[%s12045_s0] ss:$0 sm:$0xff]  ;;  %s12046_s0 = sld [smem:[#allocation14_spill]] }
 0xc6b   : > { %v9078_v62 = vpop.f32.mrf.mxu0 }
 0xc6c   : > { %v9079_v52 = vadd.f32 %v9078_v62, %v9077_v30  ;;  %v4946_v13 = vpack.c.bf16 %v4937_v45, %v4936_v19  ;;  %v4922_v8 = vmul.f32 0.01, %v4902_v41 }
 0xc6e   : > { %v4905_v49 = vadd.f32 %v9079_v52, %v11195_v23  ;;  %9495 = vmatprep.mubr.bf16.mxu1 %v4946_v13  ;;  %v4938_v3 = vmax.f32 %v4902_v41, %v4922_v8 }
 0xc70   : > { %v4923_v20 = vmul.f32 0.01, %v4905_v49 }
 0xc72   : > { %v4939_v50 = vmax.f32 %v4905_v49, %v4923_v20 }
 0xc74   : > { %v4947_v47 = vpack.c.bf16 %v4939_v50, %v4938_v3 }
 0xc76   : > { %9496 = vmatmul.mubr.bf16.gmra.mxu1 %v4947_v47 }
 0xc77   : > { %9563 = vmatprep.mubr.msk.bf16.mxu1 %vm10291_vm4, %v12043_v7 }
 0xc7e   : > { %9564 = vmatmul.mubr.msk.bf16.vlgmr.msra.gmra.mxu1 %vm4036_vm5, %v10902_v12 }
 0xd06   : > { %v9485_v11 = vpop.f32.mrf.mxu1 }
 0xd08   : > { %v11222_v26 = vpop.f32.mrf.mxu1 }
 0xd0a   : > { %v11224_v24 = vpop.f32.mrf.mxu1 }
 0xd0c   : > { %v11226_v10 = vpop.f32.mrf.mxu1 }
 0xd16   : > { %v9489_v23 = vpop.f32.mrf.mxu1 }
 0xd17   : > { %v5075_v62 = vadd.f32 %v9489_v23, %v11230_v57 }
 0xd18   : > { %v5066_v9 = vpop.f32.mrf.mxu1 }
 0xd1a   : > { %v9490_v16 = vpop.f32.mrf.mxu1 }
 0xd1b   : > { %v5078_v23 = vadd.f32 %v9490_v16, %v11230_v57 }
 0xd1c   : > { %v5069_v21 = vpop.f32.mrf.mxu1 }
 0xd26   : > { %v9493_v18 = vpop.f32.mrf.mxu1 }
 0xd27   : > { %v5091_v4 = vadd.f32 %v9493_v18, %v11230_v57 }
 0xd28   : > { %v5082_v22 = vpop.f32.mrf.mxu1 }
 0xd29   : > { %v5123_v60 = vmul.f32 0.01, %v5091_v4  ;;  %v5083_v55 = vadd.f32 %v5082_v22, %v11230_v57  ;;  %v5119_v22 = vmul.f32 0.01, %v5075_v62 }
 0xd2a   : > { %v9494_v63 = vpop.f32.mrf.mxu1 }
 0xd2b   : > { %v5094_v0 = vadd.f32 %v9494_v63, %v11230_v57  ;;  %v5139_v52 = vmax.f32 %v5091_v4, %v5123_v60  ;;  %v5121_v13 = vmul.f32 0.01, %v5083_v55  ;;  %v5067_v63 = vadd.f32 %v5066_v9, %v11230_v57 }
 0xd2c   : > { %v5085_v32 = vpop.f32.mrf.mxu1 }
 0xd2d   : > { %v5124_v8 = vmul.f32 0.01, %v5094_v0  ;;  %v5086_v20 = vadd.f32 %v5085_v32, %v11230_v57 }
 0xd2f   : > { %v5122_v4 = vmul.f32 0.01, %v5086_v20 }
 0xd31   : > { %v5138_v9 = vmax.f32 %v5086_v20, %v5122_v4 }
 0xd36   : > { %v9497_v34 = vpop.f32.mrf.mxu1 }
 0xd37   : > { %v5107_v43 = vadd.f32 %v9497_v34, %v11230_v57  ;;  %v5162_v34 = vmul.f32 %v11239_v48, %v5139_v52 }
 0xd38   : > { %v5098_v59 = vpop.f32.mrf.mxu1 }
 0xd39   : > { %v5127_v2 = vmul.f32 0.01, %v5107_v43  ;;  %v5099_v28 = vadd.f32 %v5098_v59, %v11230_v57  ;;  %v5137_v59 = vmax.f32 %v5083_v55, %v5121_v13  ;;  %v5051_v55 = vadd.f32 %v11222_v26, %v11230_v57 }
 0xd3a   : > { %v9498_v31 = vpop.f32.mrf.mxu1 }
 0xd3b   : > { %v5143_v51 = vmax.f32 %v5107_v43, %v5127_v2  ;;  %v5125_v17 = vmul.f32 0.01, %v5099_v28  ;;  %v5110_v40 = vadd.f32 %v9498_v31, %v11230_v57  ;;  %v5140_v43 = vmax.f32 %v5094_v0, %v5124_v8 }
 0xd3c   : > { %v5101_v35 = vpop.f32.mrf.mxu1  ;;  %v5059_v2 = vadd.f32 %v9485_v11, %v11230_v57  ;;  %v5117_v31 = vmul.f32 0.01, %v5067_v63  ;;  %v5062_v0 = vadd.f32 %v11224_v24, %v11230_v57 }
 0xd3d   : > { %v5128_v42 = vmul.f32 0.01, %v5110_v40  ;;  %v5102_v46 = vadd.f32 %v5101_v35, %v11230_v57  ;;  %v5166_v56 = vmul.f32 %v11239_v48, %v5143_v51  ;;  %v5141_v30 = vmax.f32 %v5099_v28, %v5125_v17 }
 0xd3e   : > { %v11243_v19 = vpop.f32.mrf.mxu1  ;;  %v5135_v28 = vmax.f32 %v5075_v62, %v5119_v22  ;;  %v5120_v51 = vmul.f32 0.01, %v5078_v23  ;;  %v5070_v17 = vadd.f32 %v5069_v21, %v11230_v57  ;;  %v5163_v16 = vmul.f32 %v11239_v48, %v5140_v43 }
 0xd3f   : > { %v5144_v45 = vmax.f32 %v5110_v40, %v5128_v42  ;;  %v5126_v41 = vmul.f32 0.01, %v5102_v46  ;;  %5196 = vadd.xlane.f32.xlu1 %v5166_v56  ;;  %v5164_v47 = vmul.f32 %v11239_v48, %v5141_v30  ;;  %v5160_v40 = vmul.f32 %v11239_v48, %v5137_v59  ;;  %v10174_v59 = vld [vmem:[%s10330_s29 + $0x68] sm:$0xff] }
 0xd40   : > { %v9565_v49 = vpop.f32.mrf.mxu1  ;;  %v5115_v60 = vmul.f32 0.01, %v5059_v2  ;;  %v5158_v11 = vmul.f32 %v11239_v48, %v5135_v28  ;;  %v5136_v35 = vmax.f32 %v5078_v23, %v5120_v51  ;;  %v5118_v42 = vmul.f32 0.01, %v5070_v17  ;;  %v10172_v23 = vld [vmem:[%s10330_s29 + $0x78] sm:$0xff] }
 0xd41   : > { %v5142_v3 = vmax.f32 %v5102_v46, %v5126_v41  ;;  %v5167_v50 = vmul.f32 %v11239_v48, %v5144_v45  ;;  %v5161_v21 = vmul.f32 %v11239_v48, %v5138_v9  ;;  %v5133_v46 = vmax.f32 %v5067_v63, %v5117_v31 }
 0xd42   : > { %v11249_v18 = vpop.f32.mrf.mxu1  ;;  %v5131_v56 = vmax.f32 %v5059_v2, %v5115_v60  ;;  %v5113_v30 = vmul.f32 0.01, %v5051_v55  ;;  %v5116_v45 = vmul.f32 0.01, %v5062_v0  ;;  %v5054_v41 = vadd.f32 %v11226_v10, %v11230_v57 }
 0xd43   : > { %5198 = vadd.xlane.f32.xlu0 %v5167_v50  ;;  %5192 = vadd.xlane.f32.xlu1 %v5164_v47  ;;  %v5165_v32 = vmul.f32 %v11239_v48, %v5142_v3  ;;  %v5134_v62 = vmax.f32 %v5070_v17, %v5118_v42  ;;  %v5159_v26 = vmul.f32 %v11239_v48, %v5136_v35  ;;  %v10176_v17 = vld [vmem:[%s10330_s29 + $0x58] sm:$0xff]  ;;  %v10179_v35 = vld [vmem:[%s10330_s29 + $0x40] sm:$0xff] }
 0xd44   : > { %v9566_v61 = vpop.f32.mrf.mxu1  ;;  %v5156_v24 = vmul.f32 %v11239_v48, %v5133_v46  ;;  %v5154_v52 = vmul.f32 %v11239_v48, %v5131_v56  ;;  %v5132_v13 = vmax.f32 %v5062_v0, %v5116_v45  ;;  %v5114_v8 = vmul.f32 0.01, %v5054_v41  ;;  %v10178_v0 = vld [vmem:[%s10330_s29 + $0x48] sm:$0xff]  ;;  %v10180_v56 = vld [vmem:[%s10330_s29 + $0x38] sm:$0xff]  ;;  %v10181_v45 = vld [vmem:[%s10330_s29 + $0x30] sm:$0xff] }
 0xd45   : > { %v5157_v49 = vmul.f32 %v11239_v48, %v5134_v62  ;;  %v5129_v20 = vmax.f32 %v5051_v55, %v5113_v30 }
 0xd46   : > { %v5130_v3 = vmax.f32 %v5054_v41, %v5114_v8  ;;  %v5155_v10 = vmul.f32 %v11239_v48, %v5132_v13  ;;  %v10183_v13 = vld [vmem:[%s10330_s29 + $0x20] sm:$0xff] }
 0xd47   : > { %5194 = vadd.xlane.f32.xlu0 %v5165_v32  ;;  %5188 = vadd.xlane.f32.xlu1 %v5162_v34  ;;  %v5152_v57 = vmul.f32 %v11239_v48, %v5129_v20  ;;  %v10173_v34 = vld [vmem:[%s10330_s29 + $0x70] sm:$0xff]  ;;  %v10184_v20 = vld [vmem:[%s10330_s29 + $0x18] sm:$0xff] }
 0xd48   : > { %v5153_v50 = vmul.f32 %v11239_v48, %v5130_v3  ;;  %v10175_v48 = vld [vmem:[%s10330_s29 + $0x60] sm:$0xff] }
 0xd4b   : > { %5190 = vadd.xlane.f32.xlu0 %v5163_v16  ;;  %5184 = vadd.xlane.f32.xlu1 %v5160_v40  ;;  %v10177_v16 = vld [vmem:[%s10330_s29 + $0x50] sm:$0xff] }
 0xd4f   : > { %5186 = vadd.xlane.f32.xlu0 %v5161_v21  ;;  %5180 = vadd.xlane.f32.xlu1 %v5158_v11 }
 0xd53   : > { %5182 = vadd.xlane.f32.xlu0 %v5159_v26  ;;  %5176 = vadd.xlane.f32.xlu1 %v5156_v24  ;;  %v10182_v26 = vld [vmem:[%s10330_s29 + $0x28] sm:$0xff] }
 0xd57   : > { %5178 = vadd.xlane.f32.xlu0 %v5157_v49  ;;  %5172 = vadd.xlane.f32.xlu1 %v5154_v52 }
 0xd5b   : > { %5174 = vadd.xlane.f32.xlu0 %v5155_v10  ;;  %5168 = vadd.xlane.f32.xlu1 %v5152_v57  ;;  %v10185_v10 = vld [vmem:[%s10330_s29 + $0x10] sm:$0xff] }
 0xd5f   : > { %5170 = vadd.xlane.f32.xlu0 %v5153_v50 }
 0xdc8   : > { %v5197_v47 = vpop.xlane.xlu1 %5196 }
 0xdc9   : > { %v5214_v43 = vmul.f32 %v10173_v34, %v5197_v47  ;;  %v10188_v34 = vld [vmem:[%s10325_s25 + $0x8] sm:$0xff] }
 0xdcc   : > { %v5199_v22 = vpop.xlane.xlu0 %5198  ;;  %v5193_v63 = vpop.xlane.xlu1 %5192 }
 0xdcd   : > { %v5215_v61 = vmul.f32 %v10172_v23, %v5199_v22  ;;  %v5212_v28 = vmul.f32 %v10175_v48, %v5193_v63  ;;  %v10186_v22 = vld [vmem:[%s10330_s29 + $0x8] sm:$0xff]  ;;  %v10187_v23 = vld [vmem:[%s10330_s29] sm:$0xff] }
 0xdce   : > { %v10191_v48 = vld [vmem:[%s10864_s22] sm:$0xff] }
 0xdcf   : > { %9499 = vmatprep.subr.mxu0 %v5215_v61 }
 0xdd0   : > { %9500 = vmatpush3.msra.mxu0 %v5215_v61  ;;  %v5195_v4 = vpop.xlane.xlu0 %5194  ;;  %v5189_v32 = vpop.xlane.xlu1 %5188 }
 0xdd1   : > { %v5213_v2 = vmul.f32 %v10174_v59, %v5195_v4  ;;  %9501 = vmatprep.subr.mxu0 %v5214_v43  ;;  %v5210_v40 = vmul.f32 %v10177_v16, %v5189_v32  ;;  %v10190_v32 = vld [vmem:[%s10864_s22 + $0x8] sm:$0xff] }
 0xdd2   : > { %9502 = vmatpush3.msra.mxu0 %v5214_v43  ;;  %v10189_v43 = vld [vmem:[%s10335_s3] sm:$0xff] }
 0xdd3   : > { %9503 = vmatprep.subr.mxu0 %v5213_v2 }
 0xdd4   : > { %9504 = vmatpush3.msra.mxu0 %v5213_v2  ;;  %v5191_v31 = vpop.xlane.xlu0 %5190  ;;  %v5185_v51 = vpop.xlane.xlu1 %5184 }
 0xdd5   : > { %v5211_v9 = vmul.f32 %v10176_v17, %v5191_v31  ;;  %9505 = vmatprep.subr.mxu0 %v5212_v28  ;;  %v5208_v42 = vmul.f32 %v10179_v35, %v5185_v51 }
 0xdd6   : > { %9506 = vmatpush3.msra.mxu0 %v5212_v28 }
 0xdd7   : > { %9507 = vmatprep.subr.mxu0 %v5211_v9 }
 0xdd8   : > { %v5187_v60 = vpop.xlane.xlu0 %5186  ;;  %9508 = vmatpush3.msra.mxu0 %v5211_v9  ;;  %v5181_v55 = vpop.xlane.xlu1 %5180 }
 0xdd9   : > { %v5209_v11 = vmul.f32 %v10178_v0, %v5187_v60  ;;  %9509 = vmatprep.subr.mxu0 %v5210_v40  ;;  %v5206_v41 = vmul.f32 %v10181_v45, %v5181_v55 }
 0xdda   : > { %9510 = vmatpush3.msra.mxu0 %v5210_v40 }
 0xddb   : > { %9511 = vmatprep.subr.mxu0 %v5209_v11 }
 0xddc   : > { %v5183_v21 = vpop.xlane.xlu0 %5182  ;;  %9512 = vmatpush3.msra.mxu0 %v5209_v11  ;;  %v5177_v46 = vpop.xlane.xlu1 %5176 }
 0xddd   : > { %v5207_v30 = vmul.f32 %v10180_v56, %v5183_v21  ;;  %9513 = vmatprep.subr.mxu0 %v5208_v42  ;;  %v5204_v8 = vmul.f32 %v10183_v13, %v5177_v46 }
 0xdde   : > { %9514 = vmatpush3.msra.mxu0 %v5208_v42 }
 0xddf   : > { %9515 = vmatprep.subr.mxu0 %v5207_v30 }
 0xde0   : > { %v5179_v62 = vpop.xlane.xlu0 %5178  ;;  %9516 = vmatpush3.msra.mxu0 %v5207_v30  ;;  %v5173_v52 = vpop.xlane.xlu1 %5172 }
 0xde1   : > { %v5205_v24 = vmul.f32 %v10182_v26, %v5179_v62  ;;  %9517 = vmatprep.subr.mxu0 %v5206_v41  ;;  %v5202_v57 = vmul.f32 %v10185_v10, %v5173_v52  ;;  %v10011_v26 = vld [vmem:[%s12046_s0 + $0x8] sm:$0xff]   ;;  %v10016_v10 = vld [vmem:[%s12048_s2] sm:$0xff]  }
 0xde2   : > { %9518 = vmatpush3.msra.mxu0 %v5206_v41  ;;  %v10010_v41 = vld [vmem:[%s12046_s0 + $0x10] sm:$0xff]   ;;  %v10013_v52 = vld [vmem:[%s12047_s1 + $0x8] ss:$0 sps:$4 sm:$0x11]  }
 0xde3   : > { %9519 = vmatprep.subr.mxu0 %v5205_v24  ;;  %v5482_v13 = vsel %vm1949_vm2, %v10013_v52, 0 }
 0xde4   : > { %v5175_v49 = vpop.xlane.xlu0 %5174  ;;  %9520 = vmatpush3.msra.mxu0 %v5205_v24  ;;  %v5169_v50 = vpop.xlane.xlu1 %5168  ;;  %v10012_v24 = vld [vmem:[%s12046_s0] sm:$0xff]   ;;  %s12049_s0 = sld [smem:[#allocation17_spill]] }
 0xde5   : > { %v5203_v3 = vmul.f32 %v10184_v20, %v5175_v49  ;;  %9521 = vmatprep.subr.mxu0 %v5204_v8  ;;  %v5200_v61 = vmul.f32 %v10187_v23, %v5169_v50  ;;  %v10015_v49 = vld [vmem:[%s12048_s2 + $0x8] ss:$0 sps:$4 sm:$0x11]   ;;  %s12051_s2 = sld [smem:[#allocation19_spill]] }
 0xde6   : > { %9522 = vmatpush3.msra.mxu0 %v5204_v8  ;;  %v10014_v8 = vld [vmem:[%s12047_s1] sm:$0xff]   ;;  %v5600_v20 = vsel %vm1949_vm2, %v10015_v49, 0  ;;  %s12050_s1 = sld [smem:[#allocation18_spill]] }
 0xde7   : > { %9523 = vmatprep.subr.mxu0 %v5203_v3 }
 0xde8   : > { %v5171_v47 = vpop.xlane.xlu0 %5170  ;;  %9524 = vmatpush3.msra.mxu0 %v5203_v3  ;;  %v10192_v3 = vld [vmem:[%s10541_s15] sm:$0xff]  }
 0xde9   : > { %v5201_v63 = vmul.f32 %v10186_v22, %v5171_v47  ;;  %9525 = vmatprep.subr.mxu0 %v5202_v57  ;;  %v10193_v47 = vld [vmem:[%s12030_s26] sm:$0xff] }
 0xdea   : > { %9526 = vmatpush3.msra.mxu0 %v5202_v57 }
 0xdeb   : > { %9527 = vmatprep.subr.mxu0 %v5201_v63 }
 0xdec   : > { %9528 = vmatpush3.msra.mxu0 %v5201_v63 }
 0xded   : > { %9529 = vmatprep.subr.mxu0 %v5200_v61 }
 0xdee   : > { %9530 = vmatpush3.msra.mxu0 %v5200_v61 }
 0xdef   : > { %9532 = vmatmul.mubr.f32.vlgmr.msra.gmra.mxu0 %v10188_v34  ;;  %9534 = vmatprep.subr.mxu0 %v10189_v43 }
 0xdf0   : > { %9535 = vmatpush3.msra.mxu0 %v10189_v43 }
 0xdf1   : > { %9539 = vmatprep.subr.bf16.mxu0 %v12043_v7 }
 0xeaf   : > { %v9533_v4 = vpop.f32.mrf.mxu0 }
 0xeb0   : > { %v5292_v59 = vsub.f32 %v9533_v4, %v10190_v32 }
 0xeb1   : > { %v5282_v2 = vpop.f32.mrf.mxu0 }
 0xeb2   : > { %v5291_v28 = vsub.f32 %v5282_v2, %v10191_v48  ;;  %v5296_v31 = vsel %vm1451_vm1, %v5292_v59, -inf }
 0xeb3   : > { %5297 = vmax.xlane.f32.xlu1 %v5296_v31 }
 0xeb4   : > { %v5293_v51 = vsel %vm1451_vm1, %v5291_v28, -inf }
 0xeb5   : > { %5294 = vmax.xlane.f32.xlu0 %v5293_v51 }
 0xf3c   : > { %v5298_v17 = vpop.xlane.xlu1 %5297 }
 0xf3d   : > { %v5300_v9 = vsub.f32 %v5292_v59, %v5298_v17  ;;  %v10194_v17 = vld [vmem:[%s10320_s21] sm:$0xff]  }
 0xf3e   : > { %v5295_v16 = vpop.xlane.xlu0 %5294 }
 0xf3f   : > { %v5303_v40 = vmul.f32 1.442695, %v5300_v9  ;;  %v5299_v60 = vsub.f32 %v5291_v28, %v5295_v16 }
 0xf41   : > { %10136 = vpow2.f32 %v5303_v40  ;;  %v5301_v55 = vmul.f32 1.442695, %v5299_v60  ;;  %v10195_v60 = vld [vmem:[%s12030_s26 + $0x8] sm:$0xff] }
 0xf43   : > { %10138 = vpow2.f32 %v5301_v55 }
 0xf4e   : > { %v10137_v0 = vpop.eup %10136 }
 0xf4f   : > { %v5308_v11 = vsel %vm1451_vm1, %v10137_v0, 0.0 }
 0xf50   : > { %v10139_v35 = vpop.eup %10138  ;;  %5309 = vadd.xlane.f32.xlu1 %v5308_v11 }
 0xf51   : > { %v5305_v42 = vsel %vm1451_vm1, %v10139_v35, 0.0 }
 0xf52   : > { %5306 = vadd.xlane.f32.xlu0 %v5305_v42 }
 0xfd9   : > { %v5310_v21 = vpop.xlane.xlu1 %5309 }
 0xfda   : > { %10140 = vrcp.f32 %v5310_v21 }
 0xfdb   : > { %v5307_v46 = vpop.xlane.xlu0 %5306 }
 0xfdc   : > { %10142 = vrcp.f32 %v5307_v46  ;;  %v5799_v46 = vld [vmem:[%s12049_s0] sm:$0xff] }
 0xfe7   : > { %v10141_v56 = vpop.eup %10140 }
 0xfe8   : > { %v5314_v62 = vmul.f32 %v10141_v56, %v10137_v0  ;;  %v10196_v0 = vld [vmem:[%s10315_s17] sm:$0xff]  }
 0xfe9   : > { %v10143_v30 = vpop.eup %10142 }
 0xfea   : > { %v5313_v45 = vmul.f32 %v10143_v30, %v10139_v35 }
 0xfec   : > { %9536 = vmatprep.mubr.msk.f32.mxu0 %vm1451_vm1, %v5313_v45 }
 0xfed   : > { %9537 = vmatmul.mubr.msk.f32.vlgmr.msra.gmra.mxu0 %vm1451_vm1, %v5314_v62 }
 0xfee   : > { %9540 = vmatpush3.bf16.msra.mxu0 %v10010_v41  ;;  %9545 = vmatprep.mubr.msk.bf16.mxu0 %vm10291_vm4, %v12043_v7 }
 0xfef   : > { %9541 = vmatprep.subr.bf16.mxu0 %v12043_v7 }
 0xff2   : > { %9542 = vmatpush3.bf16.msra.mxu0 %v10011_v26  ;;  %v6046_v26 = vld [vmem:[%s12050_s1 + $0x10] sm:$0x11] }
 0xff3   : > { %9543 = vmatprep.subr.bf16.mxu0 %v12043_v7  ;;  %v8733_v49 = vcombine.high %v6046_v26, %v6046_v26 }
 0xff6   : > { %9544 = vmatpush3.bf16.msra.mxu0 %v10012_v24 }
 0xff7   : > { %9549 = vmatprep.subr.bf16.mxu0 %v12043_v7 }
 0xff9   : > { %9546 = vmatmul.mubr.msk.bf16.vlgmr.msra.gmra.mxu0 %vm4036_vm5, %v10902_v12 }
 0xffa   : > { %9550 = vmatpush3.bf16.msra.mxu0 %v5482_v13  ;;  %9553 = vmatprep.mubr.msk.bf16.mxu0 %vm10291_vm4, %v12043_v7 }
 0xffb   : > { %9551 = vmatprep.subr.bf16.mxu0 %v12043_v7 }
 0xffe   : > { %9552 = vmatpush3.bf16.msra.mxu0 %v10014_v8  ;;  %v10019_v8 = vld [vmem:[%s12051_s2 + $0x24] ss:$8 sps:$4 sm:$0xff]  }
 0xfff   : > { %9567 = vmatprep.subr.bf16.mxu0 %v12043_v7 }
0x1001   : > { %9554 = vmatmul.mubr.msk.bf16.vlgmr.msra.gmra.mxu0 %vm1924_vm3, %v10192_v3 }
0x1002   : > { %9568 = vmatpush3.bf16.msra.mxu0 %v5600_v20  ;;  %9571 = vmatprep.mubr.msk.bf16.mxu0 %vm10291_vm4, %v12043_v7  ;;  %v8732_v20 = vcombine.low %v6046_v26, %v6046_v26 }
0x1003   : > { %9569 = vmatprep.subr.bf16.mxu0 %v12043_v7 }
0x1006   : > { %9570 = vmatpush3.bf16.msra.mxu0 %v10016_v10  ;;  %v10023_v10 = vld [vmem:[%s12051_s2 + $0x14] ss:$8 sps:$4 sm:$0xff]  }
0x1009   : > { %9572 = vmatmul.mubr.msk.bf16.vlgmr.msra.gmra.mxu0 %vm1924_vm3, %v10192_v3  ;;  %v10017_v3 = vld [vmem:[%s12051_s2 + $0x20] ss:$8 sps:$4 sm:$0xff]  }
0x100a   : > { %9586 = vmatprep.mubr.msk.f32.mxu0 %vm1581_vm0, %v10882_v37 }
0x10ad   : > { %v9538_v57 = vpop.f32.mrf.mxu0 }
0x10ae   : > { %v5397_v55 = vmul.f32 %v10195_v60, %v9538_v57  ;;  %v6063_v57 = vsel %vm1949_vm2, %v8732_v20, 0  ;;  %v12054_v60 = vmov 0  }
0x10af   : > { %v5387_v50 = vpop.f32.mrf.mxu0 }
0x10b0   : > { %v5396_v22 = vmul.f32 %v10193_v47, %v5387_v50  ;;  %v10027_v50 = vld [vmem:[%s12050_s1 + $0x4] ss:$8 sps:$4 sm:$0xff]  }
0x10b1   : > { %v10197_v47 = vld [vmem:[%s10315_s17 + $0x8] sm:$0xff]  }
0x10b2   : > { %9579 = vmatprep.mubr.msk.f32.mxu1 %vm1581_vm0, %v5396_v22  ;;  %v10198_v22 = vld [vmem:[%s10320_s21 + $0x8] sm:$0xff]  }
0x10b9   : > { %v5465_v63 = vpop.f32.mrf.mxu0 }
0x10bb   : > { %v9547_v23 = vpop.f32.mrf.mxu0 }
0x10bc   : > { %v10200_v23 = vld [vmem:[%s10320_s21 + $0x10] sm:$0xff]  }
0x10bd   : > { %v5468_v61 = vpop.f32.mrf.mxu0 }
0x10bf   : > { %v9548_v34 = vpop.f32.mrf.mxu0 }
0x10c0   : > { %v10025_v34 = vld [vmem:[%s12050_s1] ss:$8 sps:$4 sm:$0xff]   ;;  %s12055_s1 = sld [smem:[#allocation21_spill]] }
0x10c1   : > { %v5518_v43 = vpop.f32.mrf.mxu0 }
0x10c2   : > { %v5519_v48 = vadd.f32 %v5518_v43, %v5465_v63  ;;  %v10199_v63 = vld [vmem:[%s10315_s17 + $0x10] sm:$0xff]   ;;  %v10030_v43 = vld [vmem:[%s12051_s2 + $0x4] ss:$8 sps:$4 sm:$0xff]  }
0x10c3   : > { %v9555_v4 = vpop.f32.mrf.mxu0 }
0x10c5   : > { %v5521_v32 = vpop.f32.mrf.mxu0 }
0x10c6   : > { %v5522_v59 = vadd.f32 %v5521_v32, %v5468_v61  ;;  %v10021_v61 = vld [vmem:[%s12051_s2 + $0x10] ss:$8 sps:$4 sm:$0xff]   ;;  %v10028_v32 = vld [vmem:[%s12051_s2] ss:$8 sps:$4 sm:$0xff]   ;;  %s12073_s2 = sld [smem:[#allocation23_spill]] }
0x10c7   : > { %v9556_v2 = vpop.f32.mrf.mxu0 }
0x10c8   : > { %9582 = vmatprep.subr.mxu0 %v5522_v59  ;;  %v10202_v2 = vld [vmem:[%s10320_s21 + $0x18] sm:$0xff]  }
0x10c9   : > { %v5636_v28 = vpop.f32.mrf.mxu0  ;;  %9583 = vmatpush3.msra.mxu0 %v5522_v59  ;;  %v10201_v59 = vld [vmem:[%s10315_s17 + $0x18] sm:$0xff]  }
0x10ca   : > { %9584 = vmatprep.subr.mxu0 %v5519_v48  ;;  %v5637_v40 = vadd.f32 %v5636_v28, %v11243_v19  ;;  %v10204_v28 = vld [vmem:[%s10320_s21 + $0x20] sm:$0xff]  }
0x10cb   : > { %v9573_v31 = vpop.f32.mrf.mxu0  ;;  %9585 = vmatpush3.msra.mxu0 %v5519_v48  ;;  %v10203_v48 = vld [vmem:[%s10315_s17 + $0x20] sm:$0xff]  }
0x10cc   : > { %9587 = vmatmul.mubr.msk.f32.vlgmr.msra.gmra.mxu0 %vm1581_vm0, %v10889_v38  ;;  %v10205_v31 = vld [vmem:[%s10315_s17 + $0x28] sm:$0xff]  }
0x10cd   : > { %v5639_v51 = vpop.f32.mrf.mxu0  ;;  %9609 = vmatprep.mubr.msk.bf16.mxu0 %vm1581_vm0, %v10194_v17  ;;  %v10207_v17 = vld [vmem:[%s10315_s17 + $0x30] sm:$0xff]  }
0x10ce   : > { %v5640_v9 = vadd.f32 %v5639_v51, %v11249_v18  ;;  %v5800_v18 = vld [vmem:[%s12049_s0 + $0x8] sm:$0xff]  ;;  %s12053_s0 = sld [smem:[#allocation20_spill]] }
0x10cf   : > { %v9574_v16 = vpop.f32.mrf.mxu0  ;;  %v10206_v51 = vld [vmem:[%s10320_s21 + $0x28] sm:$0xff]  }
0x10d0   : > { %9575 = vmatprep.subr.mxu1 %v5640_v9  ;;  %v10209_v16 = vld [vmem:[%s10315_s17 + $0x38] sm:$0xff]  }
0x10d1   : > { %9576 = vmatpush3.msra.mxu1 %v5640_v9  ;;  %v10208_v9 = vld [vmem:[%s10320_s21 + $0x30] sm:$0xff]  }
0x10d2   : > { %9577 = vmatprep.subr.mxu1 %v5637_v40 }
0x10d3   : > { %9578 = vmatpush3.msra.mxu1 %v5637_v40  ;;  %v10210_v40 = vld [vmem:[%s10320_s21 + $0x38] sm:$0xff]  }
0x10d4   : > { %9580 = vmatmul.mubr.msk.f32.vlgmr.msra.gmra.mxu1 %vm1581_vm0, %v5397_v55  ;;  %v10033_v4 = vld [vmem:[%s12053_s0 + $0x24] ss:$8 sps:$4 sm:$0xff]   ;;  %v10031_v55 = vld [vmem:[%s12053_s0 + $0x20] ss:$8 sps:$4 sm:$0xff]  }
0x10d5   : > { %9591 = vmatprep.mubr.msk.bf16.mxu1 %vm1581_vm0, %v10196_v0  ;;  %v10048_v0 = vld [vmem:[%s12055_s1 + $0x54] ss:$8 sps:$4 sm:$0xff]  }
0x118c   : > { %v9588_v11 = vpop.f32.mrf.mxu0 }
0x118e   : > { %v5790_v21 = vpop.f32.mrf.mxu0 }
0x1194   : > { %v9581_v35 = vpop.f32.mrf.mxu1 }
0x1195   : > { %v5796_v42 = vadd.f32 %v9588_v11, %v9581_v35  ;;  %v10046_v11 = vld [vmem:[%s12055_s1 + $0x50] ss:$8 sps:$4 sm:$0xff]   ;;  %v10051_v35 = vld [vmem:[%s12055_s1 + $0x44] ss:$8 sps:$4 sm:$0xff]  }
0x1196   : > { %v5715_v19 = vpop.f32.mrf.mxu1 }
0x1197   : > { %v5802_v56 = vadd.f32 %v5800_v18, %v5796_v42  ;;  %v5791_v30 = vadd.f32 %v5790_v21, %v5715_v19  ;;  %v10049_v18 = vld [vmem:[%s12055_s1 + $0x40] ss:$8 sps:$4 sm:$0xff]   ;;  %v10054_v42 = vld [vmem:[%s12055_s1 + $0x34] ss:$8 sps:$4 sm:$0xff]   ;;  %v10052_v21 = vld [vmem:[%s12055_s1 + $0x30] ss:$8 sps:$4 sm:$0xff]  }
0x1198   : > { %v10057_v19 = vld [vmem:[%s12055_s1 + $0x24] ss:$8 sps:$4 sm:$0xff]  }
0x1199   : > { %v5804_v45 = vmul.f32 0.01, %v5802_v56  ;;  %v5801_v41 = vadd.f32 %v5799_v46, %v5791_v30  ;;  %v10055_v46 = vld [vmem:[%s12055_s1 + $0x20] ss:$8 sps:$4 sm:$0xff]   ;;  %v10058_v30 = vld [vmem:[%s12055_s1 + $0x10] ss:$8 sps:$4 sm:$0xff]  }
0x119b   : > { %v5803_v62 = vmul.f32 0.01, %v5801_v41  ;;  %v5806_v24 = vmax.f32 %v5802_v56, %v5804_v45  ;;  %v10060_v56 = vld [vmem:[%s12055_s1 + $0x14] ss:$8 sps:$4 sm:$0xff]   ;;  %v10063_v45 = vld [vmem:[%s12055_s1 + $0x4] ss:$8 sps:$4 sm:$0xff]  }
0x119d   : > { %v5805_v52 = vmax.f32 %v5801_v41, %v5803_v62  ;;  %v10061_v41 = vld [vmem:[%s12055_s1] ss:$8 sps:$4 sm:$0xff]   ;;  %v10066_v62 = vld [vmem:[%s12055_s1 + $0xf4] ss:$8 sps:$4 sm:$0xff]  }
0x119f   : > { %v11344_v13 = vpack.c.bf16 %v5806_v24, %v5805_v52  ;;  %v10064_v52 = vld [vmem:[%s12055_s1 + $0xf0] ss:$8 sps:$4 sm:$0xff]  }
0x11a1   : > { %12052 = vst [vmem:[#allocation41_spill] sm:$0xff] %v11344_v13  ;;  %9589 = vmatprep.subr.bf16.mxu1 %v11344_v13  ;;  %9607 = vmatprep.subr.bf16.mxu0 %v11344_v13 }
0x11a2   : > { %9590 = vmatpush3.bf16.msra.mxu1 %v11344_v13  ;;  %9608 = vmatpush3.bf16.msra.mxu0 %v11344_v13 }
0x11a3   : > { %6267 = vmatprep.subr.bf16.mxu0 %v10019_v8  ;;  %8734 = vmatprep.subr.msk.bf16.mxu1 %vm1949_vm2, %v8733_v49  ;;  %v10069_v8 = vld [vmem:[%s12055_s1 + $0xe4] ss:$8 sps:$4 sm:$0xff]  }
0x11a5   : > { %9592 = vmatmul.mubr.msk.bf16.vlgmr.msra.gmra.mxu1 %vm1581_vm0, %v10197_v47  ;;  %9610 = vmatmul.mubr.msk.bf16.vlgmr.msra.gmra.mxu0 %vm1581_vm0, %v10198_v22  ;;  %v10072_v47 = vld [vmem:[%s12055_s1 + $0xd4] ss:$8 sps:$4 sm:$0xff]  }
0x11a6   : > { %9595 = vmatprep.mubr.msk.bf16.mxu1 %vm1581_vm0, %v10199_v63  ;;  %9613 = vmatprep.mubr.msk.bf16.mxu0 %vm1581_vm0, %v10200_v23 }
0x11a7   : > { %6268 = vmatpush1.bf16.msra.mxu0 %v10017_v3  ;;  %6081 = vmatpush1.bf16.msra.mxu1 %v6063_v57  ;;  %v10067_v57 = vld [vmem:[%s12055_s1 + $0xe0] ss:$8 sps:$4 sm:$0xff]  }
0x11a8   : > { %6269 = vmatprep.subr.bf16.mxu0 %v10023_v10  ;;  %6082 = vmatprep.subr.bf16.mxu1 %v10027_v50 }
0x11ab   : > { %6270 = vmatpush1.bf16.msra.mxu0 %v10021_v61  ;;  %6083 = vmatpush1.bf16.msra.mxu1 %v10025_v34 }
0x11ac   : > { %6271 = vmatprep.subr.bf16.mxu0 %v10030_v43  ;;  %6472 = vmatprep.subr.bf16.mxu1 %v10033_v4  ;;  %v10070_v43 = vld [vmem:[%s12055_s1 + $0xd0] ss:$8 sps:$4 sm:$0xff]  }
0x11ad   : > { %9596 = vmatmul.mubr.msk.bf16.gmra.mxu1 %vm1581_vm0, %v10201_v59  ;;  %9614 = vmatmul.mubr.msk.bf16.gmra.mxu0 %vm1581_vm0, %v10202_v2  ;;  %v10075_v59 = vld [vmem:[%s12055_s1 + $0xc4] ss:$8 sps:$4 sm:$0xff]  }
0x11ae   : > { %9599 = vmatprep.mubr.msk.bf16.mxu1 %vm1581_vm0, %v10203_v48  ;;  %9617 = vmatprep.mubr.msk.bf16.mxu0 %vm1581_vm0, %v10204_v28 }
0x11af   : > { %6272 = vmatpush1.bf16.msra.mxu0 %v10028_v32 }
0x11b5   : > { %9600 = vmatmul.mubr.msk.bf16.gmra.mxu1 %vm1581_vm0, %v10205_v31  ;;  %9618 = vmatmul.mubr.msk.bf16.gmra.mxu0 %vm1581_vm0, %v10206_v51  ;;  %v10073_v51 = vld [vmem:[%s12055_s1 + $0xc0] ss:$8 sps:$4 sm:$0xff]  }
0x11b6   : > { %9603 = vmatprep.mubr.msk.bf16.mxu1 %vm1581_vm0, %v10207_v17  ;;  %9621 = vmatprep.mubr.msk.bf16.mxu0 %vm1581_vm0, %v10208_v9 }
0x11bd   : > { %9604 = vmatmul.mubr.msk.bf16.gmra.mxu1 %vm1581_vm0, %v10209_v16  ;;  %9622 = vmatmul.mubr.msk.bf16.gmra.mxu0 %vm1581_vm0, %v10210_v40 }
0x11be   : > { %6100 = vmatprep.mubr.bf16.mxu1 %v12054_v60  ;;  %6289 = vmatprep.mubr.bf16.mxu0 %v12054_v60 }
0x11c5   : > { %8735 = vmatmul.mubr.msk.bf16.vlgmr.msra.gmra.mxu1 %vm1924_vm3, %v10612_v6  ;;  %8749 = vmatmul.mubr.msk.bf16.vlgmr.msra.gmra.mxu0 %vm4036_vm5, %v10995_v36  ;;  %v10036_v6 = vld [vmem:[%s12053_s0 + $0x14] ss:$8 sps:$4 sm:$0xff]   ;;  %v12057_v36 = vld [vmem:[#allocation39_spill] sm:$0xff] }
0x11c6   : > { %6110 = vmatprep.mubr.bf16.mxu1 %v12054_v60  ;;  %6299 = vmatprep.mubr.bf16.mxu0 %v12054_v60 }
0x11c7   : > { %6473 = vmatpush1.bf16.msra.mxu1 %v10031_v55 }
0x11c8   : > { %6474 = vmatprep.subr.bf16.mxu1 %v10036_v6 }
0x11cd   : > { %8736 = vmatmul.mubr.msk.bf16.gmra.mxu1 %vm1924_vm3, %v10617_v14  ;;  %8750 = vmatmul.mubr.msk.bf16.gmra.mxu0 %vm4036_vm5, %v11000_v27  ;;  %v10034_v14 = vld [vmem:[%s12053_s0 + $0x10] ss:$8 sps:$4 sm:$0xff]  }
0x11ce   : > { %6120 = vmatprep.mubr.bf16.mxu1 %v12054_v60  ;;  %6309 = vmatprep.mubr.bf16.mxu0 %v12054_v60  ;;  %v12059_v27 = vld [vmem:[#allocation40_spill] sm:$0xff] }
0x11cf   : > { %6475 = vmatpush1.bf16.msra.mxu1 %v10034_v14 }
0x11d5   : > { %8737 = vmatmul.mubr.msk.bf16.gmra.mxu1 %vm1924_vm3, %v10622_v25  ;;  %8751 = vmatmul.mubr.msk.bf16.gmra.mxu0 %vm4036_vm5, %v11005_v58  ;;  %v10039_v25 = vld [vmem:[%s12053_s0 + $0x4] ss:$8 sps:$4 sm:$0xff]   ;;  %v10040_v58 = vld [vmem:[%s12055_s1 + $0x70] ss:$8 sps:$4 sm:$0xff]  }
0x11d6   : > { %6130 = vmatprep.mubr.bf16.mxu1 %v12054_v60  ;;  %6319 = vmatprep.mubr.bf16.mxu0 %v12054_v60 }
0x11d7   : > { %6476 = vmatprep.subr.bf16.mxu1 %v10039_v25 }
0x11dd   : > { %8738 = vmatmul.mubr.msk.bf16.gmra.mxu1 %vm1924_vm3, %v10627_v33  ;;  %8752 = vmatmul.mubr.msk.bf16.gmra.mxu0 %vm4036_vm5, %v11010_v1  ;;  %v10037_v33 = vld [vmem:[%s12053_s0] ss:$8 sps:$4 sm:$0xff]   ;;  %v10042_v1 = vld [vmem:[%s12055_s1 + $0x74] ss:$8 sps:$4 sm:$0xff]   ;;  %s12060_s0 = sld [smem:[#allocation22_spill]] }
0x11de   : > { %6140 = vmatprep.mubr.bf16.mxu1 %v12054_v60  ;;  %6329 = vmatprep.mubr.bf16.mxu0 %v12054_v60 }
0x11df   : > { %6477 = vmatpush1.bf16.msra.mxu1 %v10037_v33  ;;  %6887 = vmatprep.subr.bf16.mxu0 %v10042_v1 }
0x11e0   : > { %6888 = vmatpush1.bf16.msra.mxu0 %v10040_v58 }
0x11e5   : > { %8739 = vmatmul.mubr.msk.bf16.gmra.mxu1 %vm1924_vm3, %v10632_v44  ;;  %8753 = vmatmul.mubr.msk.bf16.gmra.mxu0 %vm4036_vm5, %v11015_v29  ;;  %v12056_v44 = vld [vmem:[#allocation30_spill] sm:$0xff] }
0x11e6   : > { %6150 = vmatprep.mubr.bf16.mxu1 %v12054_v60  ;;  %6339 = vmatprep.mubr.bf16.mxu0 %v12054_v60  ;;  %v10045_v29 = vld [vmem:[%s12055_s1 + $0x64] ss:$8 sps:$4 sm:$0xff]  }
0x11e7   : > { %6889 = vmatprep.subr.bf16.mxu0 %v10045_v29 }
0x11ed   : > { %8740 = vmatmul.mubr.msk.bf16.gmra.mxu1 %vm1924_vm3, %v10637_v53  ;;  %8754 = vmatmul.mubr.msk.bf16.gmra.mxu0 %vm4036_vm5, %v11020_v5  ;;  %v12058_v53 = vld [vmem:[#allocation31_spill] sm:$0xff] }
0x11ee   : > { %6160 = vmatprep.mubr.bf16.mxu1 %v12054_v60  ;;  %6349 = vmatprep.mubr.bf16.mxu0 %v12054_v60  ;;  %v10043_v5 = vld [vmem:[%s12055_s1 + $0x60] ss:$8 sps:$4 sm:$0xff]  }
0x11ef   : > { %6890 = vmatpush1.bf16.msra.mxu0 %v10043_v5 }
0x11f0   : > { %6891 = vmatprep.subr.bf16.mxu0 %v10048_v0 }
0x11f3   : > { %6892 = vmatpush1.bf16.msra.mxu0 %v10046_v11 }
0x11f4   : > { %6893 = vmatprep.subr.bf16.mxu0 %v10051_v35 }
0x11f5   : > { %8741 = vmatmul.mubr.msk.bf16.gmra.mxu1 %vm1924_vm3, %v12056_v44  ;;  %8755 = vmatmul.mubr.msk.bf16.gmra.mxu0 %vm4036_vm5, %v12057_v36 }
0x11f6   : > { %6170 = vmatprep.mubr.bf16.mxu1 %v12054_v60  ;;  %6359 = vmatprep.mubr.bf16.mxu0 %v12054_v60 }
0x11f7   : > { %6894 = vmatpush1.bf16.msra.mxu0 %v10049_v18 }
0x11f8   : > { %6895 = vmatprep.subr.bf16.mxu0 %v10054_v42 }
0x11fb   : > { %6896 = vmatpush1.bf16.msra.mxu0 %v10052_v21 }
0x11fc   : > { %6897 = vmatprep.subr.bf16.mxu0 %v10057_v19 }
0x11fd   : > { %8742 = vmatmul.mubr.msk.bf16.gmra.mxu1 %vm1924_vm3, %v12058_v53  ;;  %8756 = vmatmul.mubr.msk.bf16.gmra.mxu0 %vm4036_vm5, %v12059_v27 }
0x11fe   : > { %6494 = vmatprep.mubr.bf16.mxu1 %v12054_v60 }
0x11ff   : > { %6898 = vmatpush1.bf16.msra.mxu0 %v10055_v46 }
0x1200   : > { %6899 = vmatprep.subr.bf16.mxu0 %v10060_v56 }
0x1203   : > { %6900 = vmatpush1.bf16.msra.mxu0 %v10058_v30 }
0x1204   : > { %6901 = vmatprep.subr.bf16.mxu0 %v10063_v45 }
0x1207   : > { %6902 = vmatpush1.bf16.msra.mxu0 %v10061_v41 }
0x1208   : > { %6903 = vmatprep.subr.bf16.mxu0 %v10066_v62 }
0x120b   : > { %6904 = vmatpush2.bf16.msra.mxu0 %v10064_v52 }
0x120c   : > { %6905 = vmatprep.subr.bf16.mxu0 %v10069_v8 }
0x120f   : > { %6906 = vmatpush2.bf16.msra.mxu0 %v10067_v57 }
0x1210   : > { %6907 = vmatprep.subr.bf16.mxu0 %v10072_v47 }
0x1213   : > { %6908 = vmatpush2.bf16.msra.mxu0 %v10070_v43 }
0x1214   : > { %6909 = vmatprep.subr.bf16.mxu0 %v10075_v59 }
0x1217   : > { %6910 = vmatpush2.bf16.msra.mxu0 %v10073_v51  ;;  %v10078_v51 = vld [vmem:[%s12055_s1 + $0xb4] ss:$8 sps:$4 sm:$0xff]  }
0x1218   : > { %6911 = vmatprep.subr.bf16.mxu0 %v10078_v51 }
0x1265   : > { %v9593_v26 = vpop.f32.mrf.mxu1  ;;  %v9611_v24 = vpop.f32.mrf.mxu0 }
0x1266   : > { %v6004_v17 = vsub.f32 %v9593_v26, %v9611_v24 }
0x1267   : > { %v5842_v49 = vpop.f32.mrf.mxu1  ;;  %v5939_v20 = vpop.f32.mrf.mxu0 }
0x1268   : > { %v6002_v50 = vsub.f32 %v5842_v49, %v5939_v20  ;;  %v6020_v55 = vand.u32 2147483647, %v6004_v17  ;;  %v10076_v17 = vld [vmem:[%s12055_s1 + $0xb0] ss:$8 sps:$4 sm:$0xff]  }
0x1269   : > { %v9594_v3 = vpop.f32.mrf.mxu1  ;;  %v9612_v10 = vpop.f32.mrf.mxu0  ;;  %6912 = vmatpush2.bf16.msra.mxu0 %v10076_v17 }
0x126a   : > { %v6018_v4 = vand.u32 2147483647, %v6002_v50  ;;  %v6005_v28 = vsub.f32 %v9594_v3, %v9612_v10 }
0x126b   : > { %v5845_v22 = vpop.f32.mrf.mxu1  ;;  %v5942_v63 = vpop.f32.mrf.mxu0 }
0x126c   : > { %v6003_v23 = vsub.f32 %v5845_v22, %v5942_v63  ;;  %v6021_v40 = vand.u32 2147483647, %v6005_v28 }
0x126d   : > { %v9597_v61 = vpop.f32.mrf.mxu1  ;;  %v9615_v34 = vpop.f32.mrf.mxu0 }
0x126e   : > { %v6019_v32 = vand.u32 2147483647, %v6003_v23  ;;  %v6035_v25 = vpack.c.bf16 %v6021_v40, %v6020_v55  ;;  %v6008_v5 = vsub.f32 %v9597_v61, %v9615_v34  ;;  %v10079_v40 = vld [vmem:[%s12055_s1 + $0xa0] ss:$8 sps:$4 sm:$0xff]  }
0x126f   : > { %v5858_v2 = vpop.f32.mrf.mxu1  ;;  %v5955_v48 = vpop.f32.mrf.mxu0 }
0x1270   : > { %v6034_v31 = vpack.c.bf16 %v6019_v32, %v6018_v4  ;;  %v6006_v33 = vsub.f32 %v5858_v2, %v5955_v48  ;;  %v6024_v42 = vand.u32 2147483647, %v6008_v5 }
0x1271   : > { %v9598_v9 = vpop.f32.mrf.mxu1  ;;  %v9616_v16 = vpop.f32.mrf.mxu0 }
0x1272   : > { %8763 = vmatmul.mubr.msk.bf16.vlgmr.msra.gmra.mxu1 %vm4036_vm5, %v6034_v31  ;;  %v6022_v27 = vand.u32 2147483647, %v6006_v33  ;;  %v6009_v0 = vsub.f32 %v9598_v9, %v9616_v16  ;;  %v10081_v16 = vld [vmem:[%s12055_s1 + $0xa4] ss:$8 sps:$4 sm:$0xff]   ;;  %v10085_v33 = vld [vmem:[%s12055_s1 + $0x80] ss:$8 sps:$4 sm:$0xff]  }
0x1273   : > { %6504 = vmatprep.mubr.bf16.mxu1 %v12054_v60  ;;  %v5861_v6 = vpop.f32.mrf.mxu1  ;;  %v5958_v14 = vpop.f32.mrf.mxu0  ;;  %6913 = vmatprep.subr.bf16.mxu0 %v10081_v16 }
0x1274   : > { %v6007_v44 = vsub.f32 %v5861_v6, %v5958_v14  ;;  %v6025_v21 = vand.u32 2147483647, %v6009_v0  ;;  %6914 = vmatpush2.bf16.msra.mxu0 %v10079_v40  ;;  %v10082_v6 = vld [vmem:[%s12055_s1 + $0x90] ss:$8 sps:$4 sm:$0xff]  }
0x1275   : > { %v9601_v36 = vpop.f32.mrf.mxu1  ;;  %v9619_v53 = vpop.f32.mrf.mxu0 }
0x1276   : > { %v6023_v58 = vand.u32 2147483647, %v6007_v44  ;;  %v6037_v56 = vpack.c.bf16 %v6025_v21, %v6024_v42  ;;  %v6012_v49 = vsub.f32 %v9601_v36, %v9619_v53 }
0x1277   : > { %v5874_v1 = vpop.f32.mrf.mxu1  ;;  %v5971_v29 = vpop.f32.mrf.mxu0 }
0x1278   : > { %v6036_v11 = vpack.c.bf16 %v6023_v58, %v6022_v27  ;;  %v6010_v30 = vsub.f32 %v5874_v1, %v5971_v29  ;;  %v6028_v50 = vand.u32 2147483647, %v6012_v49 }
0x1279   : > { %v9602_v35 = vpop.f32.mrf.mxu1  ;;  %v9620_v18 = vpop.f32.mrf.mxu0 }
0x127a   : > { %8764 = vmatmul.mubr.msk.bf16.gmra.mxu1 %vm4036_vm5, %v6035_v25  ;;  %v6026_v26 = vand.u32 2147483647, %v6010_v30  ;;  %v6013_v20 = vsub.f32 %v9602_v35, %v9620_v18  ;;  %v10087_v25 = vld [vmem:[%s12055_s1 + $0x84] ss:$8 sps:$4 sm:$0xff]  }
0x127b   : > { %6514 = vmatprep.mubr.bf16.mxu1 %v12054_v60  ;;  %v5877_v19 = vpop.f32.mrf.mxu1  ;;  %v5974_v46 = vpop.f32.mrf.mxu0 }
0x127c   : > { %v6011_v45 = vsub.f32 %v5877_v19, %v5974_v46  ;;  %v6029_v47 = vand.u32 2147483647, %v6013_v20  ;;  %v10093_v20 = vld [vmem:[%s12060_s0 + $0x28] sm:$0xff]  }
0x127d   : > { %v9605_v41 = vpop.f32.mrf.mxu1  ;;  %v9623_v62 = vpop.f32.mrf.mxu0 }
0x127e   : > { %v6027_v24 = vand.u32 2147483647, %v6011_v45  ;;  %v6039_v23 = vpack.c.bf16 %v6029_v47, %v6028_v50  ;;  %v6016_v32 = vsub.f32 %v9605_v41, %v9623_v62  ;;  %v10088_v45 = vld [vmem:[%s12060_s0 + $0x78] sm:$0xff]   ;;  %v10090_v62 = vld [vmem:[%s12060_s0 + $0x70] sm:$0xff]   ;;  %v10095_v50 = vld [vmem:[%s12060_s0 + $0x20] sm:$0xff]  }
0x127f   : > { %v5890_v52 = vpop.f32.mrf.mxu1  ;;  %v5987_v8 = vpop.f32.mrf.mxu0  ;;  %v10089_v41 = vld [vmem:[%s12060_s0 + $0x38] sm:$0xff]   ;;  %9157 = vmatprep.subr.bf16.mxu1 %v10088_v45 }
0x1280   : > { %v6038_v3 = vpack.c.bf16 %v6027_v24, %v6026_v26  ;;  %v6014_v61 = vsub.f32 %v5890_v52, %v5987_v8  ;;  %v6032_v48 = vand.u32 2147483647, %v6016_v32  ;;  %9158 = vmatpush3.bf16.msra.mxu1 %v10089_v41  ;;  %v10091_v24 = vld [vmem:[%s12060_s0 + $0x30] sm:$0xff]   ;;  %v10092_v8 = vld [vmem:[%s12060_s0 + $0x68] sm:$0xff]  }
0x1281   : > { %v9606_v10 = vpop.f32.mrf.mxu1  ;;  %v9624_v57 = vpop.f32.mrf.mxu0  ;;  %9159 = vmatprep.subr.bf16.mxu1 %v10090_v62 }
0x1282   : > { %8765 = vmatmul.mubr.msk.bf16.gmra.mxu1 %vm4036_vm5, %v6036_v11  ;;  %v6030_v43 = vand.u32 2147483647, %v6014_v61  ;;  %v6017_v59 = vsub.f32 %v9606_v10, %v9624_v57  ;;  %v10094_v10 = vld [vmem:[%s12060_s0 + $0x60] sm:$0xff]  }
0x1283   : > { %6524 = vmatprep.mubr.bf16.mxu1 %v12054_v60  ;;  %v5893_v22 = vpop.f32.mrf.mxu1  ;;  %v5990_v63 = vpop.f32.mrf.mxu0 }
0x1284   : > { %v6015_v34 = vsub.f32 %v5893_v22, %v5990_v63  ;;  %v6033_v28 = vand.u32 2147483647, %v6017_v59  ;;  %9160 = vmatpush3.bf16.msra.mxu1 %v10091_v24 }
0x1285   : > { %v11484_v9 = vpop.f32.mrf.mxu1  ;;  %v6291_v21 = vpop.f32.mrf.mxu0  ;;  %9161 = vmatprep.subr.bf16.mxu1 %v10092_v8 }
0x1286   : > { %v6031_v4 = vand.u32 2147483647, %v6015_v34  ;;  %v6041_v31 = vpack.c.bf16 %v6033_v28, %v6032_v48 }
0x1287   : > { %v11488_v55 = vpop.f32.mrf.mxu1  ;;  %v6293_v46 = vpop.f32.mrf.mxu0 }
0x1288   : > { %v6040_v2 = vpack.c.bf16 %v6031_v4, %v6030_v43  ;;  %9162 = vmatpush3.bf16.msra.mxu1 %v10093_v20 }
0x1289   : > { %v11492_v14 = vpop.f32.mrf.mxu1  ;;  %v6295_v30 = vpop.f32.mrf.mxu0  ;;  %9163 = vmatprep.subr.bf16.mxu1 %v10094_v10 }
0x128a   : > { %8766 = vmatmul.mubr.msk.bf16.gmra.mxu1 %vm4036_vm5, %v6037_v56 }
0x128b   : > { %6534 = vmatprep.mubr.bf16.mxu1 %v12054_v60  ;;  %v11496_v44 = vpop.f32.mrf.mxu1  ;;  %v6297_v52 = vpop.f32.mrf.mxu0 }
0x128c   : > { %9164 = vmatpush3.bf16.msra.mxu1 %v10095_v50 }
0x128d   : > { %v11498_v36 = vpop.f32.mrf.mxu1 }
0x128f   : > { %v11500_v53 = vpop.f32.mrf.mxu1 }
0x1291   : > { %v11502_v27 = vpop.f32.mrf.mxu1 }
0x1292   : > { %8767 = vmatmul.mubr.msk.bf16.gmra.mxu1 %vm4036_vm5, %v6038_v3  ;;  %v11536_v3 = vpop.f32.mrf.mxu0 }
0x1293   : > { %6544 = vmatprep.mubr.bf16.mxu1 %v12054_v60  ;;  %v11504_v58 = vpop.f32.mrf.mxu1 }
0x1294   : > { %v6303_v47 = vpop.f32.mrf.mxu0 }
0x1295   : > { %v11506_v1 = vpop.f32.mrf.mxu1 }
0x1296   : > { %v6305_v63 = vpop.f32.mrf.mxu0 }
0x1297   : > { %v11508_v29 = vpop.f32.mrf.mxu1 }
0x1298   : > { %v6307_v61 = vpop.f32.mrf.mxu0 }
0x1299   : > { %v11510_v5 = vpop.f32.mrf.mxu1 }
0x129a   : > { %8768 = vmatmul.mubr.msk.bf16.gmra.mxu1 %vm4036_vm5, %v6039_v23  ;;  %v11548_v43 = vpop.f32.mrf.mxu0 }
0x129b   : > { %6554 = vmatprep.mubr.bf16.mxu1 %v12054_v60  ;;  %v11512_v0 = vpop.f32.mrf.mxu1 }
0x129c   : > { %v11552_v32 = vpop.f32.mrf.mxu0 }
0x129d   : > { %v11514_v11 = vpop.f32.mrf.mxu1 }
0x129f   : > { %v11516_v35 = vpop.f32.mrf.mxu1 }
0x12a1   : > { %v11518_v18 = vpop.f32.mrf.mxu1 }
0x12a2   : > { %8769 = vmatmul.mubr.msk.bf16.gmra.mxu1 %vm4036_vm5, %v6040_v2  ;;  %v11556_v2 = vpop.f32.mrf.mxu0 }
0x12a3   : > { %6564 = vmatprep.mubr.bf16.mxu1 %v12054_v60  ;;  %v10084_v60 = vld [vmem:[%s12055_s1 + $0x94] ss:$8 sps:$4 sm:$0xff]   ;;  %v11520_v42 = vpop.f32.mrf.mxu1  ;;  %s12061_s1 = sld [smem:[#allocation25_spill]] }
0x12a4   : > { %6915 = vmatprep.subr.bf16.mxu0 %v10084_v60  ;;  %v11560_v28 = vpop.f32.mrf.mxu0 }
0x12a5   : > { %6916 = vmatpush2.bf16.msra.mxu0 %v10082_v6  ;;  %v11522_v19 = vpop.f32.mrf.mxu1 }
0x12a6   : > { %6917 = vmatprep.subr.bf16.mxu0 %v10087_v25  ;;  %v11564_v51 = vpop.f32.mrf.mxu0 }
0x12a7   : > { %v11524_v56 = vpop.f32.mrf.mxu1 }
0x12a8   : > { %v11568_v16 = vpop.f32.mrf.mxu0 }
0x12a9   : > { %6918 = vmatpush2.bf16.msra.mxu0 %v10085_v33  ;;  %v11529_v26 = vpop.f32.mrf.mxu1  ;;  %v11571_v40 = vld [vmem:[%s12061_s1 + $0x8] sm:$0xff]  ;;  %v11576_v6 = vld [vmem:[%s12061_s1] sm:$0xff]  ;;  %v12066_v33 = vld [vmem:[#allocation32_spill] sm:$0xff] }
0x12aa   : > { %8770 = vmatmul.mubr.msk.bf16.gmra.mxu1 %vm4036_vm5, %v6041_v31  ;;  %12063 = vst [vmem:[#allocation39_spill] sm:$0xff] %v11571_v40  ;;  %12065 = vst [vmem:[#allocation40_spill] sm:$0xff] %v11576_v6  ;;  %v11578_v25 = vpop.f32.mrf.mxu0  ;;  %v11582_v45 = vrot.slane %v11571_v40, %v12066_v33  ;;  %v11586_v41 = vrot.slane %v11576_v6, %v12066_v33 }
0x12ab   : > { %v11533_v49 = vpop.f32.mrf.mxu1 }
0x12ac   : > { %v11590_v24 = vpop.f32.mrf.mxu0  ;;  %v6190_v8 = vadd.f32 %v11582_v45, %v11488_v55  ;;  %v6189_v20 = vadd.f32 %v11586_v41, %v11484_v9  ;;  %v6191_v50 = vadd.f32 %v11586_v41, %v11492_v14  ;;  %v6192_v15 = vadd.f32 %v11582_v45, %v11496_v44 }
0x12ad   : > { %v11539_v57 = vpop.f32.mrf.mxu1  ;;  %v6194_v7 = vadd.f32 %v11582_v45, %v11500_v53  ;;  %v6195_v44 = vadd.f32 %v11586_v41, %v11502_v27 }
0x12ae   : > { %v11600_v38 = vpop.f32.mrf.mxu0  ;;  %v6371_v33 = vadd.f32 %v6293_v46, %v6190_v8  ;;  %v6370_v54 = vadd.f32 %v6291_v21, %v6189_v20  ;;  %v6372_v12 = vadd.f32 %v6295_v30, %v6191_v50  ;;  %v6373_v39 = vadd.f32 %v6297_v52, %v6192_v15 }
0x12af   : > { %v11542_v22 = vpop.f32.mrf.mxu1  ;;  %v6196_v15 = vadd.f32 %v11582_v45, %v11504_v58  ;;  %v6376_v50 = vadd.f32 %v6305_v63, %v6195_v44  ;;  %v6199_v63 = vadd.f32 %v11586_v41, %v11510_v5 }
0x12b0   : > { %v11604_v55 = vpop.f32.mrf.mxu0 }
0x12b1   : > { %v11544_v23 = vpop.f32.mrf.mxu1  ;;  %v6380_v5 = vadd.f32 %v11556_v2, %v6199_v63 }
0x12b3   : > { %v11546_v34 = vpop.f32.mrf.mxu1 }
0x12b5   : > { %v11550_v4 = vpop.f32.mrf.mxu1 }
0x12b7   : > { %v11554_v59 = vpop.f32.mrf.mxu1 }
0x12b9   : > { %v11558_v48 = vpop.f32.mrf.mxu1 }
0x12bb   : > { %v11562_v31 = vpop.f32.mrf.mxu1 }
0x12bd   : > { %v11566_v17 = vpop.f32.mrf.mxu1 }
0x12be   : > { %12062 = vst [vmem:[#allocation30_spill] sm:$0xff] %v11566_v17 }
0x12bf   : > { %v11573_v60 = vpop.f32.mrf.mxu1 }
0x12c0   : > { %12064 = vst [vmem:[#allocation31_spill] sm:$0xff] %v11573_v60  ;;  %v6377_v60 = vadd.f32 %v6307_v61, %v6196_v15 }
0x12c1   : > { %v11588_v62 = vpop.f32.mrf.mxu1 }
0x12c2   : > { %12067 = vst [vmem:[#allocation32_spill] sm:$0xff] %v11588_v62 }
0x12c3   : > { %v11596_v10 = vpop.f32.mrf.mxu1 }
0x12c4   : > { %12068 = vst [vmem:[#allocation42_spill] sm:$0xff] %v11596_v10  ;;  %v6193_v10 = vadd.f32 %v11586_v41, %v11498_v36 }
0x1332   : > { %v6496_v37 = vpop.f32.mrf.mxu1 }
0x1333   : > { %v6575_v40 = vadd.f32 %v6496_v37, %v6370_v54  ;;  %v6375_v37 = vadd.f32 %v6303_v47, %v6194_v7  ;;  %v6198_v7 = vadd.f32 %v11582_v45, %v11508_v29 }
0x1334   : > { %v6498_v13 = vpop.f32.mrf.mxu1 }
0x1335   : > { %v6576_v6 = vadd.f32 %v6498_v13, %v6371_v33  ;;  %v11612_v13 = vpop.f32.mrf.mxu0  ;;  %v6607_v20 = vmul.f32 0.01, %v6575_v40  ;;  %v6379_v29 = vadd.f32 %v11552_v32, %v6198_v7 }
0x1336   : > { %v6500_v9 = vpop.f32.mrf.mxu1 }
0x1337   : > { %v6577_v14 = vadd.f32 %v6500_v9, %v6372_v12  ;;  %v6608_v21 = vmul.f32 0.01, %v6576_v6  ;;  %v6374_v12 = vadd.f32 %v11536_v3, %v6193_v10  ;;  %v11617_v62 = vpop.f32.mrf.mxu0  ;;  %v6197_v3 = vadd.f32 %v11586_v41, %v11506_v1 }
0x1338   : > { %v6502_v46 = vpop.f32.mrf.mxu1 }
0x1339   : > { %v6609_v8 = vmul.f32 0.01, %v6577_v14  ;;  %v6578_v30 = vadd.f32 %v6502_v46, %v6373_v39  ;;  %v6640_v33 = vmax.f32 %v6576_v6, %v6608_v21  ;;  %v6639_v39 = vmax.f32 %v6575_v40, %v6607_v20  ;;  %v11625_v40 = vpop.f32.mrf.mxu0 }
0x133a   : > { %v6506_v54 = vpop.f32.mrf.mxu1 }
0x133b   : > { %v6610_v53 = vmul.f32 0.01, %v6578_v30  ;;  %v6641_v52 = vmax.f32 %v6577_v14, %v6609_v8  ;;  %v6579_v46 = vadd.f32 %v6506_v54, %v6374_v12 }
0x133c   : > { %v6508_v36 = vpop.f32.mrf.mxu1 }
0x133d   : > { %v6642_v9 = vmax.f32 %v6578_v30, %v6610_v53  ;;  %v6580_v27 = vadd.f32 %v6508_v36, %v6375_v37  ;;  %v6671_v10 = vpack.c.bf16 %v6641_v52, %v6639_v39  ;;  %v6611_v61 = vmul.f32 0.01, %v6579_v46  ;;  %v11632_v53 = vpop.f32.mrf.mxu0 }
0x133e   : > { %v6510_v17 = vpop.f32.mrf.mxu1  ;;  %v6378_v30 = vadd.f32 %v11548_v43, %v6197_v3  ;;  %v6201_v43 = vadd.f32 %v11586_v41, %v11514_v11  ;;  %v6204_v3 = vadd.f32 %v11582_v45, %v11520_v42  ;;  %v6206_v42 = vadd.f32 %v11582_v45, %v11524_v56 }
0x133f   : > { %v6581_v47 = vadd.f32 %v6510_v17, %v6376_v50  ;;  %v6672_v58 = vpack.c.bf16 %v6642_v9, %v6640_v33  ;;  %v6612_v6 = vmul.f32 0.01, %v6580_v27  ;;  %v6200_v17 = vadd.f32 %v11582_v45, %v11512_v0 }
0x1340   : > { %v6512_v14 = vpop.f32.mrf.mxu1  ;;  %v6643_v12 = vmax.f32 %v6579_v46, %v6611_v61  ;;  %v6202_v0 = vadd.f32 %v11582_v45, %v11516_v35  ;;  %v6387_v56 = vadd.f32 %v11604_v55, %v6206_v42  ;;  %v6210_v55 = vadd.f32 %v11582_v45, %v11542_v22 }
0x1341   : > { %v6613_v44 = vmul.f32 0.01, %v6581_v47  ;;  %v6582_v21 = vadd.f32 %v6512_v14, %v6377_v60  ;;  %6919 = vmatprep.mubr.bf16.mxu0 %v6672_v58  ;;  %v6644_v37 = vmax.f32 %v6580_v27, %v6612_v6  ;;  %v6381_v32 = vadd.f32 %v11560_v28, %v6200_v17 }
0x1342   : > { %v6516_v8 = vpop.f32.mrf.mxu1  ;;  %6920 = vmatmul.mubr.bf16.vlgmr.msra.gmra.mxu0 %v6671_v10  ;;  %v6203_v27 = vadd.f32 %v11586_v41, %v11518_v18  ;;  %v6383_v35 = vadd.f32 %v11568_v16, %v6202_v0  ;;  %v6382_v10 = vadd.f32 %v11564_v51, %v6201_v43  ;;  %v6385_v16 = vadd.f32 %v11590_v24, %v6204_v3 }
0x1343   : > { %v6614_v1 = vmul.f32 0.01, %v6582_v21  ;;  %v6645_v20 = vmax.f32 %v6581_v47, %v6613_v44  ;;  %v6583_v52 = vadd.f32 %v6516_v8, %v6378_v30  ;;  %v11641_v47 = vpop.f32.mrf.mxu0  ;;  %v6205_v51 = vadd.f32 %v11586_v41, %v11522_v19 }
0x1344   : > { %v6518_v54 = vpop.f32.mrf.mxu1  ;;  %v6384_v18 = vadd.f32 %v11578_v25, %v6203_v27  ;;  %v6391_v22 = vadd.f32 %v11632_v53, %v6210_v55  ;;  %v6214_v53 = vadd.f32 %v11582_v45, %v11554_v59  ;;  %v6216_v59 = vadd.f32 %v11582_v45, %v11562_v31  ;;  %v12070_v31 = vld [vmem:[#allocation30_spill] sm:$0xff] }
0x1345   : > { %v6646_v60 = vmax.f32 %v6582_v21, %v6614_v1  ;;  %v6584_v15 = vadd.f32 %v6518_v54, %v6379_v29  ;;  %v6673_v9 = vpack.c.bf16 %v6645_v20, %v6643_v12  ;;  %v6615_v28 = vmul.f32 0.01, %v6583_v52  ;;  %v11648_v61 = vpop.f32.mrf.mxu0 }
0x1346   : > { %v6520_v36 = vpop.f32.mrf.mxu1  ;;  %v6207_v54 = vadd.f32 %v11586_v41, %v11529_v26  ;;  %v6217_v55 = vadd.f32 %v11586_v41, %v12070_v31 }
0x1347   : > { %v6585_v50 = vadd.f32 %v6520_v36, %v6380_v5  ;;  %v6674_v33 = vpack.c.bf16 %v6646_v60, %v6644_v37  ;;  %v6616_v39 = vmul.f32 0.01, %v6584_v15  ;;  %v6647_v8 = vmax.f32 %v6583_v52, %v6615_v28 }
0x1348   : > { %v6522_v2 = vpop.f32.mrf.mxu1  ;;  %v6208_v52 = vadd.f32 %v11582_v45, %v11533_v49  ;;  %v6386_v36 = vadd.f32 %v11600_v38, %v6205_v51  ;;  %v6388_v26 = vadd.f32 %v11612_v13, %v6207_v54  ;;  %v6209_v38 = vadd.f32 %v11586_v41, %v11539_v57 }
0x1349   : > { %v6617_v7 = vmul.f32 0.01, %v6585_v50  ;;  %v6586_v46 = vadd.f32 %v6522_v2, %v6381_v32  ;;  %6929 = vmatprep.mubr.bf16.mxu0 %v6674_v33  ;;  %v6648_v6 = vmax.f32 %v6584_v15, %v6616_v39  ;;  %v11657_v15 = vpop.f32.mrf.mxu0  ;;  %v6211_v13 = vadd.f32 %v11586_v41, %v11544_v23 }
0x134a   : > { %v6526_v58 = vpop.f32.mrf.mxu1  ;;  %6930 = vmatmul.mubr.bf16.gmra.mxu0 %v6673_v9  ;;  %v6390_v57 = vadd.f32 %v11625_v40, %v6209_v38  ;;  %v6213_v40 = vadd.f32 %v11586_v41, %v11550_v4 }
0x134b   : > { %v6618_v11 = vmul.f32 0.01, %v6586_v46  ;;  %v6649_v14 = vmax.f32 %v6585_v50, %v6617_v7  ;;  %v6587_v29 = vadd.f32 %v6526_v58, %v6382_v10  ;;  %v6353_v9 = vpop.f32.mrf.mxu0  ;;  %v6389_v7 = vadd.f32 %v11617_v62, %v6208_v52 }
0x134c   : > { %v6528_v63 = vpop.f32.mrf.mxu1  ;;  %v6392_v23 = vadd.f32 %v11641_v47, %v6211_v13  ;;  %v6215_v47 = vadd.f32 %v11586_v41, %v11558_v48  ;;  %v6394_v4 = vadd.f32 %v11657_v15, %v6213_v40 }
0x134d   : > { %v6650_v44 = vmax.f32 %v6586_v46, %v6618_v11  ;;  %v6588_v21 = vadd.f32 %v6528_v63, %v6383_v35  ;;  %v6675_v20 = vpack.c.bf16 %v6649_v14, %v6647_v8  ;;  %v6619_v24 = vmul.f32 0.01, %v6587_v29  ;;  %v6355_v10 = vpop.f32.mrf.mxu0 }
0x134e   : > { %v6530_v17 = vpop.f32.mrf.mxu1  ;;  %v6212_v63 = vadd.f32 %v11582_v45, %v11546_v34 }
0x134f   : > { %v6589_v1 = vadd.f32 %v6530_v17, %v6384_v18  ;;  %v6676_v30 = vpack.c.bf16 %v6650_v44, %v6648_v6  ;;  %v6620_v5 = vmul.f32 0.01, %v6588_v21  ;;  %v6651_v2 = vmax.f32 %v6587_v29, %v6619_v24  ;;  %v6357_v17 = vpop.f32.mrf.mxu0 }
0x1350   : > { %v6532_v25 = vpop.f32.mrf.mxu1 }
0x1351   : > { %v6621_v37 = vmul.f32 0.01, %v6589_v1  ;;  %v6590_v60 = vadd.f32 %v6532_v25, %v6385_v16  ;;  %6939 = vmatprep.mubr.bf16.mxu0 %v6676_v30  ;;  %v6652_v50 = vmax.f32 %v6588_v21, %v6620_v5  ;;  %v6393_v30 = vadd.f32 %v11648_v61, %v6212_v63 }
0x1352   : > { %v6536_v12 = vpop.f32.mrf.mxu1  ;;  %6940 = vmatmul.mubr.bf16.gmra.mxu0 %v6675_v20 }
0x1353   : > { %v6622_v19 = vmul.f32 0.01, %v6590_v60  ;;  %v6653_v32 = vmax.f32 %v6589_v1, %v6621_v37  ;;  %v6591_v27 = vadd.f32 %v6536_v12, %v6386_v36  ;;  %v6395_v12 = vadd.f32 %v6353_v9, %v6214_v53 }
0x1354   : > { %v6538_v0 = vpop.f32.mrf.mxu1  ;;  %v6396_v36 = vadd.f32 %v6355_v10, %v6215_v47 }
0x1355   : > { %v6654_v33 = vmax.f32 %v6590_v60, %v6622_v19  ;;  %v6592_v43 = vadd.f32 %v6538_v0, %v6387_v56  ;;  %v6677_v28 = vpack.c.bf16 %v6653_v32, %v6651_v2  ;;  %v6623_v14 = vmul.f32 0.01, %v6591_v27  ;;  %v6361_v60 = vpop.f32.mrf.mxu0 }
0x1356   : > { %v6540_v39 = vpop.f32.mrf.mxu1  ;;  %v6397_v2 = vadd.f32 %v6357_v17, %v6216_v59  ;;  %v6398_v63 = vadd.f32 %v6361_v60, %v6217_v55  ;;  %v10099_v59 = vld [vmem:[%s12060_s0 + $0x10] sm:$0xff]  }
0x1357   : > { %v6593_v49 = vadd.f32 %v6540_v39, %v6388_v26  ;;  %v6678_v46 = vpack.c.bf16 %v6654_v33, %v6652_v50  ;;  %v6624_v35 = vmul.f32 0.01, %v6592_v43  ;;  %v6655_v16 = vmax.f32 %v6591_v27, %v6623_v14  ;;  %v6363_v26 = vpop.f32.mrf.mxu0  ;;  %v12069_v27 = vld [vmem:[#allocation31_spill] sm:$0xff]  ;;  %v12072_v14 = vld [vmem:[#allocation42_spill] sm:$0xff] }
0x1358   : > { %v6542_v58 = vpop.f32.mrf.mxu1  ;;  %v6218_v9 = vadd.f32 %v11582_v45, %v12069_v27 }
0x1359   : > { %v6625_v3 = vmul.f32 0.01, %v6593_v49  ;;  %v6594_v11 = vadd.f32 %v6542_v58, %v6389_v7  ;;  %6949 = vmatprep.mubr.bf16.mxu0 %v6678_v46  ;;  %v6656_v21 = vmax.f32 %v6592_v43, %v6624_v35  ;;  %v12071_v46 = vld [vmem:[#allocation32_spill] sm:$0xff]  ;;  %v6365_v35 = vpop.f32.mrf.mxu0 }
0x135a   : > { %v6546_v62 = vpop.f32.mrf.mxu1  ;;  %6950 = vmatmul.mubr.bf16.gmra.mxu0 %v6677_v28  ;;  %v6219_v38 = vadd.f32 %v11586_v41, %v12071_v46  ;;  %v6399_v10 = vadd.f32 %v6363_v26, %v6218_v9  ;;  %v12076_v26 = vld [vmem:[#allocation39_spill] sm:$0xff] }
0x135b   : > { %v6626_v18 = vmul.f32 0.01, %v6594_v11  ;;  %v6657_v6 = vmax.f32 %v6593_v49, %v6625_v3  ;;  %v6595_v42 = vadd.f32 %v6546_v62, %v6390_v57  ;;  %v6220_v62 = vadd.f32 %v11582_v45, %v12072_v14 }
0x135c   : > { %v6548_v44 = vpop.f32.mrf.mxu1 }
0x135d   : > { %v6658_v8 = vmax.f32 %v6594_v11, %v6626_v18  ;;  %v6596_v29 = vadd.f32 %v6548_v44, %v6391_v22  ;;  %v6679_v20 = vpack.c.bf16 %v6657_v6, %v6655_v16  ;;  %v6627_v24 = vmul.f32 0.01, %v6595_v42 }
0x135e   : > { %v6550_v1 = vpop.f32.mrf.mxu1  ;;  %v6400_v6 = vadd.f32 %v6365_v35, %v6219_v38 }
0x135f   : > { %v6597_v34 = vadd.f32 %v6550_v1, %v6392_v23  ;;  %v6680_v51 = vpack.c.bf16 %v6658_v8, %v6656_v21  ;;  %v6628_v54 = vmul.f32 0.01, %v6596_v29  ;;  %v6659_v50 = vmax.f32 %v6595_v42, %v6627_v24  ;;  %v6367_v21 = vpop.f32.mrf.mxu0  ;;  %v10096_v24 = vld [vmem:[%s12060_s0 + $0x58] sm:$0xff]  }
0x1360   : > { %v6552_v25 = vpop.f32.mrf.mxu1  ;;  %v6401_v16 = vadd.f32 %v6367_v21, %v6220_v62  ;;  %9165 = vmatprep.subr.bf16.mxu1 %v10096_v24 }
0x1361   : > { %v6629_v5 = vmul.f32 0.01, %v6597_v34  ;;  %v6598_v37 = vadd.f32 %v6552_v25, %v6393_v30  ;;  %6959 = vmatprep.mubr.bf16.mxu0 %v6680_v51  ;;  %v6660_v32 = vmax.f32 %v6596_v29, %v6628_v54 }
0x1362   : > { %v6556_v61 = vpop.f32.mrf.mxu1  ;;  %6960 = vmatmul.mubr.bf16.gmra.mxu0 %v6679_v20 }
0x1363   : > { %v6630_v56 = vmul.f32 0.01, %v6598_v37  ;;  %v6661_v52 = vmax.f32 %v6597_v34, %v6629_v5  ;;  %v6599_v33 = vadd.f32 %v6556_v61, %v6394_v4  ;;  %v10097_v61 = vld [vmem:[%s12060_s0 + $0x18] sm:$0xff]   ;;  %v10101_v4 = vld [vmem:[%s12060_s0 + $0x8] sm:$0xff]  }
0x1364   : > { %v6558_v19 = vpop.f32.mrf.mxu1  ;;  %9166 = vmatpush3.bf16.msra.mxu1 %v10097_v61 }
0x1365   : > { %v6662_v48 = vmax.f32 %v6598_v37, %v6630_v56  ;;  %v6600_v0 = vadd.f32 %v6558_v19, %v6395_v12  ;;  %v6681_v15 = vpack.c.bf16 %v6661_v52, %v6659_v50  ;;  %v6631_v3 = vmul.f32 0.01, %v6599_v33  ;;  %v10098_v12 = vld [vmem:[%s12060_s0 + $0x50] sm:$0xff]   ;;  %v10100_v56 = vld [vmem:[%s12060_s0 + $0x48] sm:$0xff]   ;;  %v10102_v52 = vld [vmem:[%s12060_s0 + $0x40] sm:$0xff]  }
0x1366   : > { %v6560_v43 = vpop.f32.mrf.mxu1  ;;  %9167 = vmatprep.subr.bf16.mxu1 %v10098_v12  ;;  %v10103_v19 = vld [vmem:[%s12060_s0] sm:$0xff]   ;;  %s12078_s0 = sld [smem:[#allocation28_spill]] }
0x1367   : > { %v6601_v39 = vadd.f32 %v6560_v43, %v6396_v36  ;;  %v6682_v7 = vpack.c.bf16 %v6662_v48, %v6660_v32  ;;  %v6632_v28 = vmul.f32 0.01, %v6600_v0  ;;  %v6663_v8 = vmax.f32 %v6599_v33, %v6631_v3  ;;  %v10110_v32 = vld [vmem:[%s12073_s2 + $0x38] sm:$0xff]   ;;  %v10111_v48 = vld [vmem:[%s12073_s2 + $0x30] sm:$0xff]  }
0x1368   : > { %v6562_v49 = vpop.f32.mrf.mxu1  ;;  %9168 = vmatpush3.bf16.msra.mxu1 %v10099_v59  ;;  %v12074_v36 = vmov 0.0   ;;  %9625 = vmatprep.subr.bf16.mxu0 %v10110_v32  ;;  %v12077_v33 = vld [vmem:[#allocation40_spill] sm:$0xff] }
0x1369   : > { %v6633_v58 = vmul.f32 0.01, %v6601_v39  ;;  %v6602_v13 = vadd.f32 %v6562_v49, %v6397_v2  ;;  %6969 = vmatprep.mubr.bf16.mxu0 %v6682_v7  ;;  %v6664_v44 = vmax.f32 %v6600_v0, %v6632_v28  ;;  %9169 = vmatprep.subr.bf16.mxu1 %v10100_v56  ;;  %v12075_v0 = vld [vmem:[#allocation33_spill] sm:$0xff] }
0x136a   : > { %v6566_v11 = vpop.f32.mrf.mxu1  ;;  %6970 = vmatmul.mubr.bf16.gmra.mxu0 %v6681_v15  ;;  %v11707_v50 = vrot.slane %v12076_v26, %v12075_v0  ;;  %v11711_v43 = vrot.slane %v12077_v33, %v12075_v0 }
0x136b   : > { %v6634_v22 = vmul.f32 0.01, %v6602_v13  ;;  %v6665_v18 = vmax.f32 %v6601_v39, %v6633_v58  ;;  %v6603_v29 = vadd.f32 %v6566_v11, %v6398_v63  ;;  %9626 = vmatpush3.bf16.msra.mxu0 %v10110_v32 }
0x136c   : > { %v6568_v57 = vpop.f32.mrf.mxu1  ;;  %9170 = vmatpush3.bf16.msra.mxu1 %v10101_v4  ;;  %9627 = vmatprep.subr.bf16.mxu0 %v10111_v48 }
0x136d   : > { %v6666_v23 = vmax.f32 %v6602_v13, %v6634_v22  ;;  %v6604_v41 = vadd.f32 %v6568_v57, %v6399_v10  ;;  %v6683_v30 = vpack.c.bf16 %v6665_v18, %v6663_v8  ;;  %v6635_v40 = vmul.f32 0.01, %v6603_v29  ;;  %9171 = vmatprep.subr.bf16.mxu1 %v10102_v52  ;;  %v10104_v57 = vld [vmem:[%s10510_s8 + $0x10] sm:$0xff]  }
0x136e   : > { %v6570_v17 = vpop.f32.mrf.mxu1 }
0x136f   : > { %v6605_v42 = vadd.f32 %v6570_v17, %v6400_v6  ;;  %v6684_v1 = vpack.c.bf16 %v6666_v23, %v6664_v44  ;;  %v6636_v34 = vmul.f32 0.01, %v6604_v41  ;;  %v6667_v5 = vmax.f32 %v6603_v29, %v6635_v40  ;;  %9628 = vmatpush3.bf16.msra.mxu0 %v10111_v48 }
0x1370   : > { %v6572_v53 = vpop.f32.mrf.mxu1  ;;  %9172 = vmatpush3.bf16.msra.mxu1 %v10103_v19 }
0x1371   : > { %v6637_v45 = vmul.f32 0.01, %v6605_v42  ;;  %v6606_v51 = vadd.f32 %v6572_v53, %v6401_v16  ;;  %6979 = vmatprep.mubr.bf16.mxu0 %v6684_v1  ;;  %v6668_v47 = vmax.f32 %v6604_v41, %v6636_v34  ;;  %9715 = vmatprep.subr.bf16.mxu1 %v12074_v36  ;;  %v10105_v16 = vld [vmem:[%s10510_s8 + $0x8] sm:$0xff]  }
0x1372   : > { %6980 = vmatmul.mubr.bf16.gmra.mxu0 %v6683_v30 }
0x1373   : > { %v6638_v20 = vmul.f32 0.01, %v6606_v51  ;;  %v6669_v25 = vmax.f32 %v6605_v42, %v6637_v45 }
0x1375   : > { %v6670_v54 = vmax.f32 %v6606_v51, %v6638_v20  ;;  %v6685_v60 = vpack.c.bf16 %v6669_v25, %v6667_v5 }
0x1377   : > { %v6686_v37 = vpack.c.bf16 %v6670_v54, %v6668_v47  ;;  %v10106_v47 = vld [vmem:[%s10510_s8] sm:$0xff]  }
0x1379   : > { %6989 = vmatprep.mubr.bf16.mxu0 %v6686_v37 }
0x137a   : > { %6990 = vmatmul.mubr.bf16.gmra.mxu0 %v6685_v60 }
0x1402   : > { %v6921_v2 = vpop.f32.mrf.mxu0 }
0x1403   : > { %v6922_v39 = vadd.f32 %v6921_v2, %v11711_v43 }
0x1404   : > { %v6923_v27 = vpop.f32.mrf.mxu0 }
0x1405   : > { %v6924_v9 = vadd.f32 %v6923_v27, %v11707_v50  ;;  %v7000_v38 = vmul.f32 0.01, %v6922_v39 }
0x1406   : > { %v6925_v7 = vpop.f32.mrf.mxu0 }
0x1407   : > { %v6926_v31 = vadd.f32 %v6925_v7, %v11711_v43  ;;  %v7001_v15 = vmul.f32 0.01, %v6924_v9  ;;  %v7032_v14 = vmax.f32 %v6922_v39, %v7000_v38 }
0x1408   : > { %v6927_v55 = vpop.f32.mrf.mxu0 }
0x1409   : > { %v7002_v49 = vmul.f32 0.01, %v6926_v31  ;;  %v6928_v46 = vadd.f32 %v6927_v55, %v11707_v50  ;;  %v7033_v3 = vmax.f32 %v6924_v9, %v7001_v15 }
0x140a   : > { %v6931_v28 = vpop.f32.mrf.mxu0 }
0x140b   : > { %v7003_v58 = vmul.f32 0.01, %v6928_v46  ;;  %v7034_v13 = vmax.f32 %v6926_v31, %v7002_v49  ;;  %v6932_v62 = vadd.f32 %v6931_v28, %v11711_v43 }
0x140c   : > { %v6933_v35 = vpop.f32.mrf.mxu0 }
0x140d   : > { %v7035_v11 = vmax.f32 %v6928_v46, %v7003_v58  ;;  %v6934_v10 = vadd.f32 %v6933_v35, %v11707_v50  ;;  %v7064_v6 = vpack.c.bf16 %v7034_v13, %v7032_v14  ;;  %v7004_v8 = vmul.f32 0.01, %v6932_v62 }
0x140e   : > { %v6935_v22 = vpop.f32.mrf.mxu0 }
0x140f   : > { %v6936_v63 = vadd.f32 %v6935_v22, %v11711_v43  ;;  %v7065_v18 = vpack.c.bf16 %v7035_v11, %v7033_v3  ;;  %v7005_v23 = vmul.f32 0.01, %v6934_v10  ;;  %v7036_v45 = vmax.f32 %v6932_v62, %v7004_v8 }
0x1410   : > { %v6937_v44 = vpop.f32.mrf.mxu0 }
0x1411   : > { %v7006_v41 = vmul.f32 0.01, %v6936_v63  ;;  %v6938_v21 = vadd.f32 %v6937_v44, %v11707_v50  ;;  %7244 = vmatprep.mubr.bf16.mxu1 %v7065_v18  ;;  %v7037_v30 = vmax.f32 %v6934_v10, %v7005_v23 }
0x1412   : > { %v6941_v29 = vpop.f32.mrf.mxu0  ;;  %7245 = vmatmul.mubr.bf16.vlgmr.msra.gmra.mxu1 %v7064_v6 }
0x1413   : > { %v7007_v17 = vmul.f32 0.01, %v6938_v21  ;;  %9716 = vmatpush3.bf16.msra.mxu1 %v10104_v57  ;;  %v7038_v42 = vmax.f32 %v6936_v63, %v7006_v41  ;;  %v6942_v51 = vadd.f32 %v6941_v29, %v11711_v43 }
0x1414   : > { %v6943_v1 = vpop.f32.mrf.mxu0  ;;  %9717 = vmatprep.subr.bf16.mxu1 %v12074_v36 }
0x1415   : > { %v7039_v53 = vmax.f32 %v6938_v21, %v7007_v17  ;;  %v6944_v34 = vadd.f32 %v6943_v1, %v11707_v50  ;;  %v7066_v54 = vpack.c.bf16 %v7038_v42, %v7036_v45  ;;  %v7008_v61 = vmul.f32 0.01, %v6942_v51 }
0x1416   : > { %v6945_v40 = vpop.f32.mrf.mxu0 }
0x1417   : > { %v6946_v20 = vadd.f32 %v6945_v40, %v11711_v43  ;;  %v7067_v25 = vpack.c.bf16 %v7039_v53, %v7037_v30  ;;  %9718 = vmatpush3.bf16.msra.mxu1 %v10105_v16  ;;  %v7009_v37 = vmul.f32 0.01, %v6944_v34  ;;  %v7040_v48 = vmax.f32 %v6942_v51, %v7008_v61 }
0x1418   : > { %v6947_v5 = vpop.f32.mrf.mxu0  ;;  %9719 = vmatprep.subr.bf16.mxu1 %v12074_v36 }
0x1419   : > { %v7010_v60 = vmul.f32 0.01, %v6946_v20  ;;  %v6948_v24 = vadd.f32 %v6947_v5, %v11707_v50  ;;  %7252 = vmatprep.mubr.bf16.mxu1 %v7067_v25  ;;  %v7041_v52 = vmax.f32 %v6944_v34, %v7009_v37 }
0x141a   : > { %v6951_v12 = vpop.f32.mrf.mxu0  ;;  %7253 = vmatmul.mubr.bf16.gmra.mxu1 %v7066_v54 }
0x141b   : > { %v7011_v59 = vmul.f32 0.01, %v6948_v24  ;;  %9720 = vmatpush3.bf16.msra.mxu1 %v10106_v47  ;;  %v7042_v56 = vmax.f32 %v6946_v20, %v7010_v60  ;;  %v6952_v0 = vadd.f32 %v6951_v12, %v11711_v43 }
0x141c   : > { %v6953_v4 = vpop.f32.mrf.mxu0  ;;  %9733 = vmatprep.subr.bf16.mxu1 %v12074_v36 }
0x141d   : > { %v7043_v19 = vmax.f32 %v6948_v24, %v7011_v59  ;;  %v6954_v32 = vadd.f32 %v6953_v4, %v11707_v50  ;;  %v7068_v9 = vpack.c.bf16 %v7042_v56, %v7040_v48  ;;  %v7012_v15 = vmul.f32 0.01, %v6952_v0 }
0x141e   : > { %v6955_v26 = vpop.f32.mrf.mxu0 }
0x141f   : > { %v6956_v2 = vadd.f32 %v6955_v26, %v11711_v43  ;;  %v7069_v27 = vpack.c.bf16 %v7043_v19, %v7041_v52  ;;  %v7013_v7 = vmul.f32 0.01, %v6954_v32  ;;  %v7044_v3 = vmax.f32 %v6952_v0, %v7012_v15 }
0x1420   : > { %v6957_v39 = vpop.f32.mrf.mxu0 }
0x1421   : > { %v7014_v31 = vmul.f32 0.01, %v6956_v2  ;;  %v6958_v55 = vadd.f32 %v6957_v39, %v11707_v50  ;;  %7260 = vmatprep.mubr.bf16.mxu1 %v7069_v27  ;;  %v7045_v58 = vmax.f32 %v6954_v32, %v7013_v7 }
0x1422   : > { %v6961_v49 = vpop.f32.mrf.mxu0  ;;  %7261 = vmatmul.mubr.bf16.gmra.mxu1 %v7068_v9 }
0x1423   : > { %v7015_v46 = vmul.f32 0.01, %v6958_v55  ;;  %v7046_v38 = vmax.f32 %v6956_v2, %v7014_v31  ;;  %v6962_v11 = vadd.f32 %v6961_v49, %v11711_v43 }
0x1424   : > { %v6963_v28 = vpop.f32.mrf.mxu0 }
0x1425   : > { %v7047_v13 = vmax.f32 %v6958_v55, %v7015_v46  ;;  %v6964_v35 = vadd.f32 %v6963_v28, %v11707_v50  ;;  %v7070_v22 = vpack.c.bf16 %v7046_v38, %v7044_v3  ;;  %v7016_v44 = vmul.f32 0.01, %v6962_v11 }
0x1426   : > { %v6965_v10 = vpop.f32.mrf.mxu0 }
0x1427   : > { %v6966_v14 = vadd.f32 %v6965_v10, %v11711_v43  ;;  %v7071_v62 = vpack.c.bf16 %v7047_v13, %v7045_v58  ;;  %v7017_v18 = vmul.f32 0.01, %v6964_v35  ;;  %v7048_v42 = vmax.f32 %v6962_v11, %v7016_v44 }
0x1428   : > { %v6967_v63 = vpop.f32.mrf.mxu0 }
0x1429   : > { %v7018_v57 = vmul.f32 0.01, %v6966_v14  ;;  %v6968_v6 = vadd.f32 %v6967_v63, %v11707_v50  ;;  %7268 = vmatprep.mubr.bf16.mxu1 %v7071_v62  ;;  %v7049_v29 = vmax.f32 %v6964_v35, %v7017_v18 }
0x142a   : > { %v6971_v23 = vpop.f32.mrf.mxu0  ;;  %7269 = vmatmul.mubr.bf16.gmra.mxu1 %v7070_v22 }
0x142b   : > { %v7019_v41 = vmul.f32 0.01, %v6968_v6  ;;  %v7050_v21 = vmax.f32 %v6966_v14, %v7018_v57  ;;  %v6972_v1 = vadd.f32 %v6971_v23, %v11711_v43  ;;  %v12079_v23 = vld [vmem:[#allocation38_spill] sm:$0xff] }
0x142c   : > { %v6973_v8 = vpop.f32.mrf.mxu0 }
0x142d   : > { %v7051_v17 = vmax.f32 %v6968_v6, %v7019_v41  ;;  %v6974_v16 = vadd.f32 %v6973_v8, %v11707_v50  ;;  %v7072_v45 = vpack.c.bf16 %v7050_v21, %v7048_v42  ;;  %v7020_v47 = vmul.f32 0.01, %v6972_v1  ;;  %v10112_v41 = vld [vmem:[%s12073_s2 + $0x28] sm:$0xff]   ;;  %v10113_v8 = vld [vmem:[%s12073_s2 + $0x20] sm:$0xff]   ;;  %v10115_v42 = vld [vmem:[%s12073_s2 + $0x10] sm:$0xff]  }
0x142e   : > { %v6975_v30 = vpop.f32.mrf.mxu0  ;;  %v10108_v21 = vld [vmem:[%s12078_s0 + $0x8] sm:$0xff]   ;;  %9629 = vmatprep.subr.bf16.mxu0 %v10112_v41 }
0x142f   : > { %v6976_v53 = vadd.f32 %v6975_v30, %v11711_v43  ;;  %v7073_v34 = vpack.c.bf16 %v7051_v17, %v7049_v29  ;;  %v7021_v40 = vmul.f32 0.01, %v6974_v16  ;;  %v7052_v59 = vmax.f32 %v6972_v1, %v7020_v47  ;;  %9630 = vmatpush3.bf16.msra.mxu0 %v10112_v41  ;;  %v10109_v29 = vld [vmem:[%s12078_s0] sm:$0xff]   ;;  %v10114_v17 = vld [vmem:[%s12073_s2 + $0x18] sm:$0xff]   ;;  %v10116_v1 = vld [vmem:[%s12073_s2 + $0x8] sm:$0xff]  }
0x1430   : > { %v6977_v51 = vpop.f32.mrf.mxu0  ;;  %9631 = vmatprep.subr.bf16.mxu0 %v10113_v8  ;;  %v10117_v30 = vld [vmem:[%s12073_s2] sm:$0xff]  }
0x1431   : > { %v7022_v20 = vmul.f32 0.01, %v6976_v53  ;;  %v6978_v25 = vadd.f32 %v6977_v51, %v11707_v50  ;;  %7276 = vmatprep.mubr.bf16.mxu1 %v7073_v34  ;;  %v7053_v24 = vmax.f32 %v6974_v16, %v7021_v40  ;;  %v12080_v16 = vld [vmem:[#allocation41_spill] sm:$0xff]  ;;  %v12081_v34 = vld [vmem:[#allocation34_spill] sm:$0xff] }
0x1432   : > { %v6981_v54 = vpop.f32.mrf.mxu0  ;;  %7277 = vmatmul.mubr.bf16.gmra.mxu1 %v7072_v45  ;;  %v11772_v45 = vrot.slane %v12077_v33, %v12081_v34 }
0x1433   : > { %v7023_v5 = vmul.f32 0.01, %v6978_v25  ;;  %v7054_v37 = vmax.f32 %v6976_v53, %v7022_v20  ;;  %v6982_v56 = vadd.f32 %v6981_v54, %v11711_v43  ;;  %9632 = vmatpush3.bf16.msra.mxu0 %v10113_v8 }
0x1434   : > { %v6983_v60 = vpop.f32.mrf.mxu0  ;;  %9633 = vmatprep.subr.bf16.mxu0 %v10114_v17 }
0x1435   : > { %v7055_v61 = vmax.f32 %v6978_v25, %v7023_v5  ;;  %v6984_v12 = vadd.f32 %v6983_v60, %v11707_v50  ;;  %v7074_v32 = vpack.c.bf16 %v7054_v37, %v7052_v59  ;;  %v7024_v27 = vmul.f32 0.01, %v6982_v56 }
0x1436   : > { %v6985_v4 = vpop.f32.mrf.mxu0 }
0x1437   : > { %v6986_v52 = vadd.f32 %v6985_v4, %v11711_v43  ;;  %v7075_v19 = vpack.c.bf16 %v7055_v61, %v7053_v24  ;;  %v7025_v0 = vmul.f32 0.01, %v6984_v12  ;;  %v7056_v46 = vmax.f32 %v6982_v56, %v7024_v27  ;;  %9634 = vmatpush3.bf16.msra.mxu0 %v10114_v17 }
0x1438   : > { %v6987_v48 = vpop.f32.mrf.mxu0  ;;  %9635 = vmatprep.subr.bf16.mxu0 %v10115_v42 }
0x1439   : > { %v7026_v26 = vmul.f32 0.01, %v6986_v52  ;;  %v6988_v2 = vadd.f32 %v6987_v48, %v11707_v50  ;;  %7284 = vmatprep.mubr.bf16.mxu1 %v7075_v19  ;;  %v7057_v55 = vmax.f32 %v6984_v12, %v7025_v0 }
0x143a   : > { %v6991_v9 = vpop.f32.mrf.mxu0  ;;  %7285 = vmatmul.mubr.bf16.gmra.mxu1 %v7074_v32 }
0x143b   : > { %v7027_v39 = vmul.f32 0.01, %v6988_v2  ;;  %v7058_v7 = vmax.f32 %v6986_v52, %v7026_v26  ;;  %v6992_v38 = vadd.f32 %v6991_v9, %v11711_v43  ;;  %9636 = vmatpush3.bf16.msra.mxu0 %v10115_v42 }
0x143c   : > { %v6993_v31 = vpop.f32.mrf.mxu0  ;;  %9637 = vmatprep.subr.bf16.mxu0 %v10116_v1 }
0x143d   : > { %v7059_v15 = vmax.f32 %v6988_v2, %v7027_v39  ;;  %v6994_v49 = vadd.f32 %v6993_v31, %v11707_v50  ;;  %v7076_v35 = vpack.c.bf16 %v7058_v7, %v7056_v46  ;;  %v7028_v62 = vmul.f32 0.01, %v6992_v38 }
0x143e   : > { %v6995_v28 = vpop.f32.mrf.mxu0 }
0x143f   : > { %v6996_v58 = vadd.f32 %v6995_v28, %v11711_v43  ;;  %v7077_v13 = vpack.c.bf16 %v7059_v15, %v7057_v55  ;;  %v7029_v11 = vmul.f32 0.01, %v6994_v49  ;;  %v7060_v6 = vmax.f32 %v6992_v38, %v7028_v62  ;;  %9638 = vmatpush3.bf16.msra.mxu0 %v10116_v1 }
0x1440   : > { %v6997_v3 = vpop.f32.mrf.mxu0  ;;  %9639 = vmatprep.subr.bf16.mxu0 %v10117_v30 }
0x1441   : > { %v7030_v10 = vmul.f32 0.01, %v6996_v58  ;;  %v6998_v14 = vadd.f32 %v6997_v3, %v11707_v50  ;;  %7292 = vmatprep.mubr.bf16.mxu1 %v7077_v13  ;;  %v7061_v18 = vmax.f32 %v6994_v49, %v7029_v11  ;;  %v10107_v50 = vld [vmem:[%s12078_s0 + $0x10] sm:$0xff]   ;;  %s12083_s0 = sld [smem:[#allocation24_spill]] }
0x1442   : > { %7293 = vmatmul.mubr.bf16.gmra.mxu1 %v7076_v35 }
0x1443   : > { %v7031_v22 = vmul.f32 0.01, %v6998_v14  ;;  %v7062_v63 = vmax.f32 %v6996_v58, %v7030_v10  ;;  %9640 = vmatpush3.bf16.msra.mxu0 %v10117_v30 }
0x1445   : > { %v7063_v57 = vmax.f32 %v6998_v14, %v7031_v22  ;;  %v7078_v44 = vpack.c.bf16 %v7062_v63, %v7060_v6 }
0x1447   : > { %v7079_v43 = vpack.c.bf16 %v7063_v57, %v7061_v18 }
0x1449   : > { %7300 = vmatprep.mubr.bf16.mxu1 %v7079_v43 }
0x144a   : > { %7301 = vmatmul.mubr.bf16.gmra.mxu1 %v7078_v44 }
0x144b   : > { %9721 = vmatprep.mubr.msk.bf16.mxu1 %vm10291_vm4, %v12074_v36 }
0x1452   : > { %9722 = vmatmul.mubr.msk.bf16.vlgmr.msra.gmra.mxu1 %vm4036_vm5, %v12079_v23 }
0x1453   : > { %9734 = vmatpush3.bf16.msra.mxu1 %v10107_v50  ;;  %9739 = vmatprep.mubr.msk.bf16.mxu1 %vm10291_vm4, %v12074_v36 }
0x1454   : > { %9735 = vmatprep.subr.bf16.mxu1 %v12074_v36 }
0x1457   : > { %9736 = vmatpush3.bf16.msra.mxu1 %v10108_v21 }
0x1458   : > { %9737 = vmatprep.subr.bf16.mxu1 %v12074_v36 }
0x145b   : > { %9738 = vmatpush3.bf16.msra.mxu1 %v10109_v29 }
0x145e   : > { %9740 = vmatmul.mubr.msk.bf16.vlgmr.msra.gmra.mxu1 %vm4036_vm5, %v12080_v16 }
0x14d2   : > { %v9173_v53 = vpop.f32.mrf.mxu1 }
0x14d4   : > { %v9174_v51 = vpop.f32.mrf.mxu1 }
0x14d5   : > { %v9175_v40 = vadd.f32 %v9174_v51, %v9173_v53 }
0x14d6   : > { %v9176_v20 = vpop.f32.mrf.mxu1 }
0x14d7   : > { %v7247_v25 = vadd.f32 %v9175_v40, %v11772_v45 }
0x14d8   : > { %v9177_v47 = vpop.f32.mrf.mxu1 }
0x14d9   : > { %v9178_v54 = vadd.f32 %v9177_v47, %v9176_v20  ;;  %v7309_v37 = vmul.f32 0.01, %v7247_v25 }
0x14da   : > { %v9179_v5 = vpop.f32.mrf.mxu1 }
0x14db   : > { %v7250_v60 = vadd.f32 %v9178_v54, %v11772_v45  ;;  %v7325_v56 = vmax.f32 %v7247_v25, %v7309_v37 }
0x14dc   : > { %v9180_v24 = vpop.f32.mrf.mxu1 }
0x14dd   : > { %v7310_v61 = vmul.f32 0.01, %v7250_v60  ;;  %v9181_v12 = vadd.f32 %v9180_v24, %v9179_v5 }
0x14de   : > { %v9182_v59 = vpop.f32.mrf.mxu1 }
0x14df   : > { %v7326_v4 = vmax.f32 %v7250_v60, %v7310_v61  ;;  %v7255_v33 = vadd.f32 %v9181_v12, %v11772_v45 }
0x14e0   : > { %v9183_v52 = vpop.f32.mrf.mxu1 }
0x14e1   : > { %v9184_v19 = vadd.f32 %v9183_v52, %v9182_v59  ;;  %v7341_v32 = vpack.c.bf16 %v7326_v4, %v7325_v56  ;;  %v7311_v0 = vmul.f32 0.01, %v7255_v33 }
0x14e2   : > { %v9185_v48 = vpop.f32.mrf.mxu1 }
0x14e3   : > { %v7258_v26 = vadd.f32 %v9184_v19, %v11772_v45  ;;  %9641 = vmatprep.mubr.bf16.mxu0 %v7341_v32  ;;  %v7327_v7 = vmax.f32 %v7255_v33, %v7311_v0 }
0x14e4   : > { %v9186_v2 = vpop.f32.mrf.mxu1 }
0x14e5   : > { %v7312_v27 = vmul.f32 0.01, %v7258_v26  ;;  %v9187_v9 = vadd.f32 %v9186_v2, %v9185_v48 }
0x14e6   : > { %v9188_v39 = vpop.f32.mrf.mxu1 }
0x14e7   : > { %v7328_v31 = vmax.f32 %v7258_v26, %v7312_v27  ;;  %v7263_v55 = vadd.f32 %v9187_v9, %v11772_v45 }
0x14e8   : > { %v9189_v15 = vpop.f32.mrf.mxu1 }
0x14e9   : > { %v7342_v49 = vpack.c.bf16 %v7328_v31, %v7327_v7  ;;  %v9190_v46 = vadd.f32 %v9189_v15, %v9188_v39  ;;  %v7313_v28 = vmul.f32 0.01, %v7263_v55 }
0x14ea   : > { %v9191_v38 = vpop.f32.mrf.mxu1 }
0x14eb   : > { %v7266_v58 = vadd.f32 %v9190_v46, %v11772_v45  ;;  %9642 = vmatmul.mubr.bf16.vlgmr.msra.gmra.mxu0 %v7342_v49  ;;  %v7329_v10 = vmax.f32 %v7263_v55, %v7313_v28 }
0x14ec   : > { %v9192_v13 = vpop.f32.mrf.mxu1 }
0x14ed   : > { %v7314_v35 = vmul.f32 0.01, %v7266_v58  ;;  %v9193_v3 = vadd.f32 %v9192_v13, %v9191_v38 }
0x14ee   : > { %v9194_v11 = vpop.f32.mrf.mxu1 }
0x14ef   : > { %v7330_v14 = vmax.f32 %v7266_v58, %v7314_v35  ;;  %v7271_v62 = vadd.f32 %v9193_v3, %v11772_v45 }
0x14f0   : > { %v9195_v22 = vpop.f32.mrf.mxu1 }
0x14f1   : > { %v9196_v63 = vadd.f32 %v9195_v22, %v9194_v11  ;;  %v7343_v18 = vpack.c.bf16 %v7330_v14, %v7329_v10  ;;  %v7315_v6 = vmul.f32 0.01, %v7271_v62 }
0x14f2   : > { %v9197_v57 = vpop.f32.mrf.mxu1 }
0x14f3   : > { %v7274_v43 = vadd.f32 %v9196_v63, %v11772_v45  ;;  %9645 = vmatprep.mubr.bf16.mxu0 %v7343_v18  ;;  %v7331_v8 = vmax.f32 %v7271_v62, %v7315_v6 }
0x14f4   : > { %v9198_v44 = vpop.f32.mrf.mxu1 }
0x14f5   : > { %v7316_v50 = vmul.f32 0.01, %v7274_v43  ;;  %v9199_v41 = vadd.f32 %v9198_v44, %v9197_v57 }
0x14f6   : > { %v9200_v21 = vpop.f32.mrf.mxu1 }
0x14f7   : > { %v7332_v29 = vmax.f32 %v7274_v43, %v7316_v50  ;;  %v7279_v17 = vadd.f32 %v9199_v41, %v11772_v45  ;;  %v10211_v43 = vld [vmem:[%s10325_s25] sm:$0xff] }
0x14f8   : > { %v9201_v42 = vpop.f32.mrf.mxu1 }
0x14f9   : > { %v7344_v1 = vpack.c.bf16 %v7332_v29, %v7331_v8  ;;  %v9202_v30 = vadd.f32 %v9201_v42, %v9200_v21  ;;  %v7317_v34 = vmul.f32 0.01, %v7279_v17 }
0x14fa   : > { %v9203_v53 = vpop.f32.mrf.mxu1 }
0x14fb   : > { %v7282_v51 = vadd.f32 %v9202_v30, %v11772_v45  ;;  %9646 = vmatmul.mubr.bf16.gmra.mxu0 %v7344_v1  ;;  %v7333_v54 = vmax.f32 %v7279_v17, %v7317_v34 }
0x14fc   : > { %v9204_v40 = vpop.f32.mrf.mxu1 }
0x14fd   : > { %v7318_v20 = vmul.f32 0.01, %v7282_v51  ;;  %v9205_v25 = vadd.f32 %v9204_v40, %v9203_v53 }
0x14fe   : > { %v9206_v47 = vpop.f32.mrf.mxu1 }
0x14ff   : > { %v7334_v5 = vmax.f32 %v7282_v51, %v7318_v20  ;;  %v7287_v37 = vadd.f32 %v9205_v25, %v11772_v45  ;;  %v10212_v25 = vld [vmem:[%s12061_s1] sm:$0xff]  ;;  %s12086_s1 = sld [smem:[#allocation29_spill]] }
0x1500   : > { %v9207_v60 = vpop.f32.mrf.mxu1 }
0x1501   : > { %v9208_v24 = vadd.f32 %v9207_v60, %v9206_v47  ;;  %v7345_v61 = vpack.c.bf16 %v7334_v5, %v7333_v54  ;;  %v7319_v59 = vmul.f32 0.01, %v7287_v37  ;;  %v12082_v47 = vld [vmem:[#allocation35_spill] sm:$0xff] }
0x1502   : > { %v9209_v12 = vpop.f32.mrf.mxu1  ;;  %v11807_v54 = vrot.slane %v10212_v25, %v12082_v47 }
0x1503   : > { %v7290_v56 = vadd.f32 %v9208_v24, %v11772_v45  ;;  %9649 = vmatprep.mubr.bf16.mxu0 %v7345_v61  ;;  %v7335_v32 = vmax.f32 %v7287_v37, %v7319_v59 }
0x1504   : > { %v9210_v4 = vpop.f32.mrf.mxu1 }
0x1505   : > { %v7320_v33 = vmul.f32 0.01, %v7290_v56  ;;  %v9211_v52 = vadd.f32 %v9210_v4, %v9209_v12 }
0x1506   : > { %v9212_v19 = vpop.f32.mrf.mxu1 }
0x1507   : > { %v7336_v48 = vmax.f32 %v7290_v56, %v7320_v33  ;;  %v7295_v0 = vadd.f32 %v9211_v52, %v11772_v45 }
0x1508   : > { %v9213_v26 = vpop.f32.mrf.mxu1 }
0x1509   : > { %v7346_v2 = vpack.c.bf16 %v7336_v48, %v7335_v32  ;;  %v9214_v27 = vadd.f32 %v9213_v26, %v9212_v19  ;;  %v7321_v39 = vmul.f32 0.01, %v7295_v0 }
0x150a   : > { %v9215_v9 = vpop.f32.mrf.mxu1 }
0x150b   : > { %v7298_v7 = vadd.f32 %v9214_v27, %v11772_v45  ;;  %9650 = vmatmul.mubr.bf16.gmra.mxu0 %v7346_v2  ;;  %v7337_v46 = vmax.f32 %v7295_v0, %v7321_v39  ;;  %v11816_v0 = vld [vmem:[%s12083_s0] ss:$0 sm:$0xff]  ;;  %s12084_s0 = sld [smem:[#allocation27_spill]] }
0x150c   : > { %v9216_v31 = vpop.f32.mrf.mxu1 }
0x150d   : > { %v7322_v55 = vmul.f32 0.01, %v7298_v7  ;;  %v9217_v15 = vadd.f32 %v9216_v31, %v9215_v9 }
0x150e   : > { %v9218_v49 = vpop.f32.mrf.mxu1 }
0x150f   : > { %v7338_v38 = vmax.f32 %v7298_v7, %v7322_v55  ;;  %v7303_v28 = vadd.f32 %v9217_v15, %v11772_v45 }
0x1510   : > { %v9219_v58 = vpop.f32.mrf.mxu1 }
0x1511   : > { %v9220_v13 = vadd.f32 %v9219_v58, %v9218_v49  ;;  %v7347_v35 = vpack.c.bf16 %v7338_v38, %v7337_v46  ;;  %v7323_v11 = vmul.f32 0.01, %v7303_v28 }
0x1512   : > { %v11789_v3 = vpop.f32.mrf.mxu1 }
0x1513   : > { %v7306_v10 = vadd.f32 %v9220_v13, %v11772_v45  ;;  %9653 = vmatprep.mubr.bf16.mxu0 %v7347_v35  ;;  %v7339_v63 = vmax.f32 %v7303_v28, %v7323_v11 }
0x1514   : > { %v9723_v14 = vpop.f32.mrf.mxu1 }
0x1515   : > { %v7324_v62 = vmul.f32 0.01, %v7306_v10 }
0x1516   : > { %v11792_v22 = vpop.f32.mrf.mxu1 }
0x1517   : > { %v7340_v18 = vmax.f32 %v7306_v10, %v7324_v62 }
0x1518   : > { %v9724_v57 = vpop.f32.mrf.mxu1 }
0x1519   : > { %v7348_v6 = vpack.c.bf16 %v7340_v18, %v7339_v63 }
0x151b   : > { %9654 = vmatmul.mubr.bf16.gmra.mxu0 %v7348_v6 }
0x151c   : > { %9689 = vmatprep.mubr.f32.mxu0 %v10211_v43 }
0x151e   : > { %v11795_v44 = vpop.f32.mrf.mxu1 }
0x1520   : > { %v9741_v50 = vpop.f32.mrf.mxu1 }
0x1522   : > { %v11797_v41 = vpop.f32.mrf.mxu1 }
0x1524   : > { %v9742_v21 = vpop.f32.mrf.mxu1 }
0x15ab   : > { %v9643_v45 = vpop.f32.mrf.mxu0 }
0x15ac   : > { %v7460_v57 = vadd.f32 %v9643_v45, %v11807_v54 }
0x15ad   : > { %v11799_v8 = vpop.f32.mrf.mxu0 }
0x15af   : > { %v11801_v29 = vpop.f32.mrf.mxu0 }
0x15b1   : > { %v11803_v17 = vpop.f32.mrf.mxu0 }
0x15bb   : > { %v9647_v42 = vpop.f32.mrf.mxu0 }
0x15bc   : > { %v7476_v31 = vadd.f32 %v9647_v42, %v11807_v54 }
0x15bd   : > { %v7467_v1 = vpop.f32.mrf.mxu0 }
0x15be   : > { %v7520_v13 = vmul.f32 0.01, %v7476_v31  ;;  %v7468_v35 = vadd.f32 %v7467_v1, %v11807_v54 }
0x15bf   : > { %v9648_v30 = vpop.f32.mrf.mxu0 }
0x15c0   : > { %v7479_v11 = vadd.f32 %v9648_v30, %v11807_v54  ;;  %v7536_v6 = vmax.f32 %v7476_v31, %v7520_v13  ;;  %v7518_v43 = vmul.f32 0.01, %v7468_v35  ;;  %v10218_v13 = vld [vmem:[%s10330_s29 + $0x50] sm:$0xff] }
0x15c1   : > { %v7470_v53 = vpop.f32.mrf.mxu0 }
0x15c2   : > { %v7521_v50 = vmul.f32 0.01, %v7479_v11  ;;  %v7471_v21 = vadd.f32 %v7470_v53, %v11807_v54  ;;  %v7534_v45 = vmax.f32 %v7468_v35, %v7518_v43  ;;  %v7559_v53 = vmul.f32 %v11816_v0, %v7536_v6  ;;  %v10221_v43 = vld [vmem:[%s10330_s29 + $0x38] sm:$0xff] }
0x15c4   : > { %v7519_v25 = vmul.f32 0.01, %v7471_v21 }
0x15cb   : > { %v9651_v34 = vpop.f32.mrf.mxu0 }
0x15cc   : > { %v7492_v60 = vadd.f32 %v9651_v34, %v11807_v54  ;;  %v7516_v34 = vmul.f32 0.01, %v7460_v57 }
0x15cd   : > { %v7483_v51 = vpop.f32.mrf.mxu0 }
0x15ce   : > { %v7524_v52 = vmul.f32 0.01, %v7492_v60  ;;  %v7484_v19 = vadd.f32 %v7483_v51, %v11807_v54  ;;  %v7452_v51 = vadd.f32 %v11799_v8, %v11807_v54 }
0x15cf   : > { %v9652_v40 = vpop.f32.mrf.mxu0 }
0x15d0   : > { %v7495_v32 = vadd.f32 %v9652_v40, %v11807_v54  ;;  %v7540_v55 = vmax.f32 %v7492_v60, %v7524_v52  ;;  %v7522_v15 = vmul.f32 0.01, %v7484_v19  ;;  %v7463_v40 = vadd.f32 %v11801_v29, %v11807_v54 }
0x15d1   : > { %v7486_v20 = vpop.f32.mrf.mxu0  ;;  %v7557_v29 = vmul.f32 %v11816_v0, %v7534_v45 }
0x15d2   : > { %v7525_v49 = vmul.f32 0.01, %v7495_v32  ;;  %v7487_v46 = vadd.f32 %v7486_v20, %v11807_v54  ;;  %v7538_v10 = vmax.f32 %v7484_v19, %v7522_v15  ;;  %v7563_v18 = vmul.f32 %v11816_v0, %v7540_v55  ;;  %v10215_v55 = vld [vmem:[%s10330_s29 + $0x68] sm:$0xff] }
0x15d3   : > { %v7537_v20 = vmax.f32 %v7479_v11, %v7521_v50  ;;  %v7517_v60 = vmul.f32 0.01, %v7463_v40 }
0x15d4   : > { %v7541_v14 = vmax.f32 %v7495_v32, %v7525_v49  ;;  %v7523_v62 = vmul.f32 0.01, %v7487_v46  ;;  %v7561_v30 = vmul.f32 %v11816_v0, %v7538_v10 }
0x15d5   : > { %v7560_v8 = vmul.f32 %v11816_v0, %v7537_v20 }
0x15d6   : > { %v7539_v42 = vmax.f32 %v7487_v46, %v7523_v62  ;;  %v7564_v1 = vmul.f32 %v11816_v0, %v7541_v14  ;;  %v10219_v14 = vld [vmem:[%s10330_s29 + $0x48] sm:$0xff] }
0x15d8   : > { %v7562_v47 = vmul.f32 %v11816_v0, %v7539_v42 }
0x15db   : > { %v9655_v5 = vpop.f32.mrf.mxu0 }
0x15dc   : > { %v7508_v37 = vadd.f32 %v9655_v5, %v11807_v54  ;;  %v7532_v5 = vmax.f32 %v7460_v57, %v7516_v34 }
0x15dd   : > { %v7499_v24 = vpop.f32.mrf.mxu0 }
0x15de   : > { %v7528_v61 = vmul.f32 0.01, %v7508_v37  ;;  %v7500_v12 = vadd.f32 %v7499_v24, %v11807_v54  ;;  %v7455_v24 = vadd.f32 %v11803_v17, %v11807_v54 }
0x15df   : > { %v9656_v59 = vpop.f32.mrf.mxu0 }
0x15e0   : > { %v7544_v56 = vmax.f32 %v7508_v37, %v7528_v61  ;;  %v7526_v4 = vmul.f32 0.01, %v7500_v12  ;;  %v7511_v33 = vadd.f32 %v9656_v59, %v11807_v54  ;;  %v7514_v37 = vmul.f32 0.01, %v7452_v51 }
0x15e1   : > { %v7502_v48 = vpop.f32.mrf.mxu0  ;;  %v7535_v61 = vmax.f32 %v7471_v21, %v7519_v25  ;;  %v7533_v59 = vmax.f32 %v7463_v40, %v7517_v60  ;;  %v10222_v21 = vld [vmem:[%s10330_s29 + $0x30] sm:$0xff]  ;;  %v10224_v40 = vld [vmem:[%s10330_s29 + $0x20] sm:$0xff]  ;;  %v10225_v25 = vld [vmem:[%s10330_s29 + $0x18] sm:$0xff] }
0x15e2   : > { %v7542_v26 = vmax.f32 %v7500_v12, %v7526_v4  ;;  %v7529_v2 = vmul.f32 0.01, %v7511_v33  ;;  %v7503_v27 = vadd.f32 %v7502_v48, %v11807_v54  ;;  %v7567_v9 = vmul.f32 %v11816_v0, %v7544_v56 }
0x15e3   : > { %v7530_v12 = vmax.f32 %v7452_v51, %v7514_v37  ;;  %v7515_v56 = vmul.f32 0.01, %v7455_v24  ;;  %v7558_v4 = vmul.f32 %v11816_v0, %v7535_v61  ;;  %v7556_v17 = vmul.f32 %v11816_v0, %v7533_v59  ;;  %v10230_v59 = vld [vmem:[%s10335_s3] sm:$0xff] }
0x15e4   : > { %v7545_v39 = vmax.f32 %v7511_v33, %v7529_v2  ;;  %v7527_v7 = vmul.f32 0.01, %v7503_v27  ;;  %7597 = vadd.xlane.f32.xlu1 %v7567_v9  ;;  %v7565_v58 = vmul.f32 %v11816_v0, %v7542_v26  ;;  %v7555_v33 = vmul.f32 %v11816_v0, %v7532_v5  ;;  %v10213_v2 = vld [vmem:[%s10330_s29 + $0x78] sm:$0xff]  ;;  %v10214_v9 = vld [vmem:[%s10330_s29 + $0x70] sm:$0xff] }
0x15e5   : > { %v7531_v52 = vmax.f32 %v7455_v24, %v7515_v56  ;;  %v7553_v54 = vmul.f32 %v11816_v0, %v7530_v12  ;;  %v10227_v24 = vld [vmem:[%s10330_s29 + $0x8] sm:$0xff] }
0x15e6   : > { %v7543_v38 = vmax.f32 %v7503_v27, %v7527_v7  ;;  %v7568_v28 = vmul.f32 %v11816_v0, %v7545_v39  ;;  %v10229_v12 = vld [vmem:[%s10325_s25 + $0x8] sm:$0xff] }
0x15e7   : > { %v7554_v19 = vmul.f32 %v11816_v0, %v7531_v52 }
0x15e8   : > { %7599 = vadd.xlane.f32.xlu0 %v7568_v28  ;;  %7593 = vadd.xlane.f32.xlu1 %v7565_v58  ;;  %v7566_v63 = vmul.f32 %v11816_v0, %v7543_v38  ;;  %v10216_v0 = vld [vmem:[%s10330_s29 + $0x60] sm:$0xff]  ;;  %v10217_v28 = vld [vmem:[%s10330_s29 + $0x58] sm:$0xff] }
0x15ec   : > { %7595 = vadd.xlane.f32.xlu0 %v7566_v63  ;;  %7589 = vadd.xlane.f32.xlu1 %v7563_v18  ;;  %v10220_v63 = vld [vmem:[%s10330_s29 + $0x40] sm:$0xff] }
0x15f0   : > { %7591 = vadd.xlane.f32.xlu0 %v7564_v1  ;;  %7585 = vadd.xlane.f32.xlu1 %v7561_v30  ;;  %v10223_v30 = vld [vmem:[%s10330_s29 + $0x28] sm:$0xff] }
0x15f4   : > { %7587 = vadd.xlane.f32.xlu0 %v7562_v47  ;;  %7581 = vadd.xlane.f32.xlu1 %v7559_v53  ;;  %v10226_v53 = vld [vmem:[%s10330_s29 + $0x10] sm:$0xff] }
0x15f8   : > { %7583 = vadd.xlane.f32.xlu0 %v7560_v8  ;;  %7577 = vadd.xlane.f32.xlu1 %v7557_v29  ;;  %v10228_v8 = vld [vmem:[%s10330_s29] sm:$0xff] }
0x15fc   : > { %7579 = vadd.xlane.f32.xlu0 %v7558_v4  ;;  %7573 = vadd.xlane.f32.xlu1 %v7555_v33  ;;  %v10231_v4 = vld [vmem:[%s10864_s22 + $0x8] sm:$0xff] }
0x1600   : > { %7575 = vadd.xlane.f32.xlu0 %v7556_v17  ;;  %7569 = vadd.xlane.f32.xlu1 %v7553_v54  ;;  %v10232_v17 = vld [vmem:[%s10864_s22] sm:$0xff]  ;;  %s12085_s22 = sld [smem:[#allocation26_spill]] }
0x1604   : > { %7571 = vadd.xlane.f32.xlu0 %v7554_v19 }
0x166d   : > { %v7598_v32 = vpop.xlane.xlu1 %7597 }
0x166e   : > { %v7615_v39 = vmul.f32 %v10214_v9, %v7598_v32 }
0x1671   : > { %v7600_v48 = vpop.xlane.xlu0 %7599  ;;  %v7594_v26 = vpop.xlane.xlu1 %7593 }
0x1672   : > { %v7616_v27 = vmul.f32 %v10213_v2, %v7600_v48  ;;  %v7613_v49 = vmul.f32 %v10216_v0, %v7594_v26 }
0x1674   : > { %9657 = vmatprep.subr.mxu0 %v7616_v27 }
0x1675   : > { %9658 = vmatpush3.msra.mxu0 %v7616_v27  ;;  %v7596_v7 = vpop.xlane.xlu0 %7595  ;;  %v7590_v31 = vpop.xlane.xlu1 %7589 }
0x1676   : > { %v7614_v15 = vmul.f32 %v10215_v55, %v7596_v7  ;;  %9659 = vmatprep.subr.mxu0 %v7615_v39  ;;  %v7611_v35 = vmul.f32 %v10218_v13, %v7590_v31 }
0x1677   : > { %9660 = vmatpush3.msra.mxu0 %v7615_v39 }
0x1678   : > { %9661 = vmatprep.subr.mxu0 %v7614_v15 }
0x1679   : > { %9662 = vmatpush3.msra.mxu0 %v7614_v15  ;;  %v7592_v46 = vpop.xlane.xlu0 %7591  ;;  %v7586_v38 = vpop.xlane.xlu1 %7585 }
0x167a   : > { %v7612_v58 = vmul.f32 %v10217_v28, %v7592_v46  ;;  %9663 = vmatprep.subr.mxu0 %v7613_v49  ;;  %v7609_v18 = vmul.f32 %v10220_v63, %v7586_v38  ;;  %v10123_v63 = vld [vmem:[%s12086_s1 + $0x8] ss:$0 sps:$4 sm:$0x11]  }
0x167b   : > { %9664 = vmatpush3.msra.mxu0 %v7613_v49 }
0x167c   : > { %9665 = vmatprep.subr.mxu0 %v7612_v58 }
0x167d   : > { %v7588_v11 = vpop.xlane.xlu0 %7587  ;;  %9666 = vmatpush3.msra.mxu0 %v7612_v58  ;;  %v7582_v10 = vpop.xlane.xlu1 %7581  ;;  %v10118_v58 = vld [vmem:[%s12084_s0 + $0x10] sm:$0xff]  }
0x167e   : > { %v7610_v62 = vmul.f32 %v10219_v14, %v7588_v11  ;;  %9667 = vmatprep.subr.mxu0 %v7611_v35  ;;  %v7607_v42 = vmul.f32 %v10222_v21, %v7582_v10  ;;  %v10120_v11 = vld [vmem:[%s12084_s0] sm:$0xff]   ;;  %v10121_v10 = vld [vmem:[%s12085_s22 + $0x8] ss:$0 sps:$4 sm:$0x11]   ;;  %v12087_v21 = vld [vmem:[#allocation36_spill] sm:$0xff] }
0x167f   : > { %9668 = vmatpush3.msra.mxu0 %v7611_v35  ;;  %v10119_v35 = vld [vmem:[%s12084_s0 + $0x8] sm:$0xff]   ;;  %v7880_v14 = vsel %vm1949_vm2, %v10121_v10, 0 }
0x1680   : > { %9669 = vmatprep.subr.mxu0 %v7610_v62 }
0x1681   : > { %v7584_v57 = vpop.xlane.xlu0 %7583  ;;  %9670 = vmatpush3.msra.mxu0 %v7610_v62  ;;  %v7578_v6 = vpop.xlane.xlu1 %7577  ;;  %v10122_v62 = vld [vmem:[%s12085_s22] sm:$0xff]  }
0x1682   : > { %v7608_v50 = vmul.f32 %v10221_v43, %v7584_v57  ;;  %9671 = vmatprep.subr.mxu0 %v7609_v18  ;;  %v7605_v45 = vmul.f32 %v10224_v40, %v7578_v6  ;;  %v10233_v57 = vld [vmem:[%s10541_s15] sm:$0xff]   ;;  %v10125_v6 = vld [vmem:[%s10515_s9 + $0x10] sm:$0xff]   ;;  %v10126_v43 = vld [vmem:[%s10515_s9 + $0x8] sm:$0xff]   ;;  %s1390_s15 = scalar_lea.vmem %s10525_s4, %s10538_s11 }
0x1683   : > { %9672 = vmatpush3.msra.mxu0 %v7609_v18  ;;  %v7998_v18 = vsel %vm1949_vm2, %v10123_v63, 0 }
0x1684   : > { %9673 = vmatprep.subr.mxu0 %v7608_v50 }
0x1685   : > { %v7580_v1 = vpop.xlane.xlu0 %7579  ;;  %9674 = vmatpush3.msra.mxu0 %v7608_v50  ;;  %v7574_v51 = vpop.xlane.xlu1 %7573  ;;  %v10127_v50 = vld [vmem:[%s10515_s9] sm:$0xff]  }
0x1686   : > { %v7606_v34 = vmul.f32 %v10223_v30, %v7580_v1  ;;  %9675 = vmatprep.subr.mxu0 %v7607_v42  ;;  %v7603_v5 = vmul.f32 %v10226_v53, %v7574_v51  ;;  %v10234_v30 = vld [vmem:[%s12030_s26] sm:$0xff] }
0x1687   : > { %9676 = vmatpush3.msra.mxu0 %v7607_v42 }
0x1688   : > { %9677 = vmatprep.subr.mxu0 %v7606_v34 }
0x1689   : > { %v7576_v20 = vpop.xlane.xlu0 %7575  ;;  %9678 = vmatpush3.msra.mxu0 %v7606_v34  ;;  %v7570_v37 = vpop.xlane.xlu1 %7569 }
0x168a   : > { %v7604_v47 = vmul.f32 %v10225_v25, %v7576_v20  ;;  %9679 = vmatprep.subr.mxu0 %v7605_v45  ;;  %v7601_v29 = vmul.f32 %v10228_v8, %v7570_v37 }
0x168b   : > { %9680 = vmatpush3.msra.mxu0 %v7605_v45 }
0x168c   : > { %9681 = vmatprep.subr.mxu0 %v7604_v47 }
0x168d   : > { %v7572_v60 = vpop.xlane.xlu0 %7571  ;;  %9682 = vmatpush3.msra.mxu0 %v7604_v47 }
0x168e   : > { %v7602_v61 = vmul.f32 %v10227_v24, %v7572_v60  ;;  %9683 = vmatprep.subr.mxu0 %v7603_v5 }
0x168f   : > { %9684 = vmatpush3.msra.mxu0 %v7603_v5 }
0x1690   : > { %9685 = vmatprep.subr.mxu0 %v7602_v61 }
0x1691   : > { %9686 = vmatpush3.msra.mxu0 %v7602_v61 }
0x1692   : > { %9687 = vmatprep.subr.mxu0 %v7601_v29 }
0x1693   : > { %9688 = vmatpush3.msra.mxu0 %v7601_v29  ;;  %v12088_v29 = vld [vmem:[#allocation37_spill] sm:$0xff] }
0x1694   : > { %9690 = vmatmul.mubr.f32.vlgmr.msra.gmra.mxu0 %v10229_v12  ;;  %9692 = vmatprep.subr.mxu0 %v10230_v59 }
0x1695   : > { %9693 = vmatpush3.msra.mxu0 %v10230_v59 }
0x1696   : > { %9697 = vmatprep.subr.bf16.mxu0 %v12074_v36 }
0x1754   : > { %v9691_v56 = vpop.f32.mrf.mxu0 }
0x1755   : > { %v7693_v33 = vsub.f32 %v9691_v56, %v10231_v4 }
0x1756   : > { %v7683_v52 = vpop.f32.mrf.mxu0 }
0x1757   : > { %v7692_v54 = vsub.f32 %v7683_v52, %v10232_v17  ;;  %v7697_v19 = vsel %vm1451_vm1, %v7693_v33, -inf }
0x1758   : > { %7698 = vmax.xlane.f32.xlu1 %v7697_v19 }
0x1759   : > { %v7694_v32 = vsel %vm1451_vm1, %v7692_v54, -inf }
0x175a   : > { %7695 = vmax.xlane.f32.xlu0 %v7694_v32 }
0x17e1   : > { %v7699_v48 = vpop.xlane.xlu1 %7698 }
0x17e2   : > { %v7701_v26 = vsub.f32 %v7693_v33, %v7699_v48 }
0x17e3   : > { %v7696_v2 = vpop.xlane.xlu0 %7695 }
0x17e4   : > { %v7704_v27 = vmul.f32 1.442695, %v7701_v26  ;;  %v7700_v9 = vsub.f32 %v7692_v54, %v7696_v2  ;;  %v10235_v54 = vld [vmem:[%s12030_s26 + $0x8] sm:$0xff] }
0x17e6   : > { %10144 = vpow2.f32 %v7704_v27  ;;  %v7702_v39 = vmul.f32 1.442695, %v7700_v9  ;;  %v8334_v27 = vld [vmem:[%s10520_s27] sm:$0xff] }
0x17e8   : > { %10146 = vpow2.f32 %v7702_v39 }
0x17f3   : > { %v10145_v7 = vpop.eup %10144 }
0x17f4   : > { %v7709_v31 = vsel %vm1451_vm1, %v10145_v7, 0.0 }
0x17f5   : > { %v10147_v55 = vpop.eup %10146  ;;  %7710 = vadd.xlane.f32.xlu1 %v7709_v31 }
0x17f6   : > { %v7706_v15 = vsel %vm1451_vm1, %v10147_v55, 0.0 }
0x17f7   : > { %7707 = vadd.xlane.f32.xlu0 %v7706_v15 }
0x187e   : > { %v7711_v0 = vpop.xlane.xlu1 %7710 }
0x187f   : > { %10148 = vrcp.f32 %v7711_v0 }
0x1880   : > { %v7708_v49 = vpop.xlane.xlu0 %7707 }
0x1881   : > { %10150 = vrcp.f32 %v7708_v49 }
0x188c   : > { %v10149_v46 = vpop.eup %10148 }
0x188d   : > { %v7715_v13 = vmul.f32 %v10149_v46, %v10145_v7 }
0x188e   : > { %v10151_v38 = vpop.eup %10150 }
0x188f   : > { %v7714_v28 = vmul.f32 %v10151_v38, %v10147_v55 }
0x1891   : > { %9694 = vmatprep.mubr.msk.f32.mxu0 %vm1451_vm1, %v7714_v28 }
0x1892   : > { %9695 = vmatmul.mubr.msk.f32.vlgmr.msra.gmra.mxu0 %vm1451_vm1, %v7715_v13 }
0x1893   : > { %9698 = vmatpush3.bf16.msra.mxu0 %v10118_v58  ;;  %9703 = vmatprep.mubr.msk.bf16.mxu0 %vm10291_vm4, %v12074_v36 }
0x1894   : > { %9699 = vmatprep.subr.bf16.mxu0 %v12074_v36 }
0x1897   : > { %9700 = vmatpush3.bf16.msra.mxu0 %v10119_v35 }
0x1898   : > { %9701 = vmatprep.subr.bf16.mxu0 %v12074_v36 }
0x189b   : > { %9702 = vmatpush3.bf16.msra.mxu0 %v10120_v11 }
0x189c   : > { %9707 = vmatprep.subr.bf16.mxu0 %v12074_v36 }
0x189e   : > { %9704 = vmatmul.mubr.msk.bf16.vlgmr.msra.gmra.mxu0 %vm4036_vm5, %v12079_v23  ;;  %v10124_v23 = vld [vmem:[%s12086_s1] sm:$0xff]  }
0x189f   : > { %9708 = vmatpush3.bf16.msra.mxu0 %v7880_v14  ;;  %9711 = vmatprep.mubr.msk.bf16.mxu0 %vm10291_vm4, %v12074_v36 }
0x18a0   : > { %9709 = vmatprep.subr.bf16.mxu0 %v12074_v36 }
0x18a3   : > { %9710 = vmatpush3.bf16.msra.mxu0 %v10122_v62 }
0x18a4   : > { %9725 = vmatprep.subr.bf16.mxu0 %v12074_v36 }
0x18a6   : > { %9712 = vmatmul.mubr.msk.bf16.vlgmr.msra.gmra.mxu0 %vm1924_vm3, %v10233_v57 }
0x18a7   : > { %9726 = vmatpush3.bf16.msra.mxu0 %v7998_v18  ;;  %9729 = vmatprep.mubr.msk.bf16.mxu0 %vm10291_vm4, %v12074_v36 }
0x18a8   : > { %9727 = vmatprep.subr.bf16.mxu0 %v12074_v36 }
0x18ab   : > { %9728 = vmatpush3.bf16.msra.mxu0 %v10124_v23 }
0x18ac   : > { %9743 = vmatprep.subr.bf16.mxu0 %v12074_v36 }
0x18ae   : > { %9730 = vmatmul.mubr.msk.bf16.vlgmr.msra.gmra.mxu0 %vm1924_vm3, %v10233_v57 }
0x18af   : > { %9744 = vmatpush3.bf16.msra.mxu0 %v10125_v6  ;;  %9749 = vmatprep.mubr.msk.bf16.mxu0 %vm10291_vm4, %v12074_v36 }
0x18b0   : > { %9745 = vmatprep.subr.bf16.mxu0 %v12074_v36 }
0x18b3   : > { %9746 = vmatpush3.bf16.msra.mxu0 %v10126_v43 }
0x18b4   : > { %9747 = vmatprep.subr.bf16.mxu0 %v12074_v36 }
0x18b7   : > { %9748 = vmatpush3.bf16.msra.mxu0 %v10127_v50 }
0x18ba   : > { %9750 = vmatmul.mubr.msk.bf16.vlgmr.msra.gmra.mxu0 %vm4036_vm5, %v12080_v16 }
0x18bb   : > { %9764 = vmatprep.mubr.msk.f32.mxu0 %vm1581_vm0, %v12087_v21 }
0x1952   : > { %v9696_v42 = vpop.f32.mrf.mxu0 }
0x1953   : > { %v7798_v19 = vmul.f32 %v10235_v54, %v9696_v42 }
0x1954   : > { %v7788_v1 = vpop.f32.mrf.mxu0 }
0x1955   : > { %v7797_v34 = vmul.f32 %v10234_v30, %v7788_v1 }
0x1957   : > { %9757 = vmatprep.mubr.msk.f32.mxu1 %vm1581_vm0, %v7797_v34 }
0x195e   : > { %v7863_v51 = vpop.f32.mrf.mxu0 }
0x1960   : > { %v9705_v40 = vpop.f32.mrf.mxu0 }
0x1962   : > { %v7866_v45 = vpop.f32.mrf.mxu0 }
0x1964   : > { %v9706_v20 = vpop.f32.mrf.mxu0 }
0x1966   : > { %v7916_v25 = vpop.f32.mrf.mxu0 }
0x1967   : > { %v7917_v53 = vadd.f32 %v7916_v25, %v7863_v51 }
0x1968   : > { %v9713_v47 = vpop.f32.mrf.mxu0 }
0x1969   : > { %v8109_v24 = vadd.f32 %v11795_v44, %v7917_v53 }
0x196a   : > { %v7919_v36 = vpop.f32.mrf.mxu0 }
0x196b   : > { %v7920_v5 = vadd.f32 %v7919_v36, %v7866_v45 }
0x196c   : > { %v9714_v37 = vpop.f32.mrf.mxu0 }
0x196d   : > { %v8110_v16 = vadd.f32 %v11797_v41, %v7920_v5 }
0x196e   : > { %v8034_v60 = vpop.f32.mrf.mxu0 }
0x196f   : > { %9760 = vmatprep.subr.mxu0 %v8110_v16  ;;  %v8035_v33 = vadd.f32 %v8034_v60, %v11789_v3 }
0x1970   : > { %v9731_v61 = vpop.f32.mrf.mxu0  ;;  %9761 = vmatpush3.msra.mxu0 %v8110_v16 }
0x1971   : > { %9762 = vmatprep.subr.mxu0 %v8109_v24 }
0x1972   : > { %v8037_v8 = vpop.f32.mrf.mxu0  ;;  %9763 = vmatpush3.msra.mxu0 %v8109_v24 }
0x1973   : > { %9765 = vmatmul.mubr.msk.f32.vlgmr.msra.gmra.mxu0 %vm1581_vm0, %v12088_v29  ;;  %v8038_v4 = vadd.f32 %v8037_v8, %v11792_v22  ;;  %v8335_v22 = vld [vmem:[%s10520_s27 + $0x8] sm:$0xff] }
0x1974   : > { %v9732_v12 = vpop.f32.mrf.mxu0 }
0x197a   : > { %v8169_v59 = vpop.f32.mrf.mxu0 }
0x197b   : > { %v8176_v17 = vadd.f32 %v8169_v59, %v8035_v33 }
0x197c   : > { %v9751_v56 = vpop.f32.mrf.mxu0 }
0x197e   : > { %v8172_v41 = vpop.f32.mrf.mxu0 }
0x197f   : > { %v8177_v44 = vadd.f32 %v8172_v41, %v8038_v4 }
0x1980   : > { %v9752_v52 = vpop.f32.mrf.mxu0 }
0x1981   : > { %9753 = vmatprep.subr.mxu1 %v8177_v44 }
0x1982   : > { %9754 = vmatpush3.msra.mxu1 %v8177_v44 }
0x1983   : > { %9755 = vmatprep.subr.mxu1 %v8176_v17 }
0x1984   : > { %9756 = vmatpush3.msra.mxu1 %v8176_v17 }
0x1985   : > { %9758 = vmatmul.mubr.msk.f32.vlgmr.msra.gmra.mxu1 %vm1581_vm0, %v7798_v19 }
0x1a33   : > { %v9766_v32 = vpop.f32.mrf.mxu0 }
0x1a35   : > { %v8325_v2 = vpop.f32.mrf.mxu0 }
0x1a45   : > { %v9759_v48 = vpop.f32.mrf.mxu1 }
0x1a46   : > { %v8331_v26 = vadd.f32 %v9766_v32, %v9759_v48 }
0x1a47   : > { %v8250_v3 = vpop.f32.mrf.mxu1 }
0x1a48   : > { %v8337_v9 = vadd.f32 %v8335_v22, %v8331_v26  ;;  %v8326_v39 = vadd.f32 %v8325_v2, %v8250_v3 }
0x1a4a   : > { %8339 = vst [vmem:[%s1390_s15 + $0x8] sm:$0xff] %v8337_v9  ;;  %v8336_v7 = vadd.f32 %v8334_v27, %v8326_v39 }
0x1a4c   : > { %8338 = vst [vmem:[%s1390_s15] sm:$0xff] %v8336_v7 }
0x1a4d PF: > { %s101_s7 = sadd.s32 1, %s10242_s7  }
0x1a4e   : > { %p98_p4 = scmp.ge.s32.totalorder %s101_s7, 4  }
0x1a50   :  { %100 = sbr.rel (!%p98_p4) target bundleno = 89 (0x59), region = 281 }

</bundles_post_ra>
